<compile_context>
chip_gen: v7x
topology: tpu7x:2x2x1
jax: 0.10.0
libtpu: 0.0.40
codegen_flags: <defaults>
</compile_context>

<pallas_src>
import functools

import jax
import jax.numpy as jnp
from jax.experimental import pallas as pl
from jax.experimental.pallas import tpu as pltpu


# ------------------------------------------------------------------ fused kernel
def _fused_stack_kernel(x_ref, w_ref, b_ref, o_ref, a_pad, h_pad,
                        *, H, W, C, Cin, num_blocks):
    """One batch element: input conv + LeakyReLU(0.1) + num_blocks residual blocks.

    x_ref : (1, H, W, Cin)        network input tile (f32)
    w_ref : (num_convs, 9*C, C)   packed conv weights, bf16, row = (dy*3+dx)*C + cin
    b_ref : (num_convs, 1, C)     packed biases, f32
    o_ref : (1, H*W, C)           output tile (f32)
    a_pad : (H+2, W+2, C) f32     zero-haloed resident activation scratch
    h_pad : (H+2, W+2, C) f32     zero-haloed block-intermediate scratch
    """
    HW = H * W

    # (Re)zero padded scratches; the 1-pixel halo stays zero for every conv.
    a_pad[...] = jnp.zeros_like(a_pad)
    h_pad[...] = jnp.zeros_like(h_pad)

    def conv3x3(src_ref, conv_idx):
        # im2col: 9 shifted windows -> (H*W, 9*C) bf16, then ONE MXU matmul (K = 9*C).
        taps = []
        for k in range(9):
            dy, dx = divmod(k, 3)
            taps.append(
                src_ref[dy:dy + H, dx:dx + W, :].reshape(HW, C).astype(jnp.bfloat16))
        patch = jnp.concatenate(taps, axis=-1)               # (HW, 9*C) bf16
        acc = jnp.dot(patch, w_ref[conv_idx],                # bf16 x bf16 on the MXU
                      preferred_element_type=jnp.float32)    # f32 accumulate
        return acc + b_ref[conv_idx]                         # (HW, C) f32

    # Stage the Cin input channels into the (zeroed) intermediate buffer.  The first
    # conv weight is zero-padded over input channels Cin..C-1, so the math is exact.
    h_pad[1:H + 1, 1:W + 1, 0:Cin] = x_ref[0]

    # ---- input conv + LeakyReLU(0.1) -------------------------------------------
    x_cur = conv3x3(h_pad, 0)
    x_cur = jnp.where(x_cur >= 0.0, x_cur, 0.1 * x_cur)      # (HW, C) f32
    a_pad[1:H + 1, 1:W + 1, :] = x_cur.reshape(H, W, C)

    # ---- num_blocks x ResidualBlockNoBN: x = x + conv2(relu(conv1(x))) ----------
    for blk in range(num_blocks):
        h = jnp.maximum(conv3x3(a_pad, 1 + 2 * blk), 0.0)
        h_pad[1:H + 1, 1:W + 1, :] = h.reshape(H, W, C)
        x_cur = x_cur + conv3x3(h_pad, 2 + 2 * blk)          # fused residual (f32)
        if blk + 1 < num_blocks:                             # next block reads via a_pad
            a_pad[1:H + 1, 1:W + 1, :] = x_cur.reshape(H, W, C)

    o_ref[0] = x_cur.astype(o_ref.dtype)


# ------------------------------------------------------------------ wrapper
def _pack_weights(params):
    """Pack all conv weights into one (num_convs, 9*C, C) bf16 slab + (num_convs,1,C) biases."""
    C = params["w0"].shape[-1]
    Cin = params["w0"].shape[-2]
    w0 = jnp.pad(params["w0"], ((0, 0), (0, 0), (0, C - Cin), (0, 0)))  # (3,3,C,C)
    ws = [w0.reshape(9 * C, C)]
    bs = [params["b0"]]
    for blk in params["blocks"]:
        ws.append(blk["w1"].reshape(9 * C, C)); bs.append(blk["b1"])
        ws.append(blk["w2"].reshape(9 * C, C)); bs.append(blk["b2"])
    w_all = jnp.stack(ws, axis=0).astype(jnp.bfloat16)                  # (num_convs, 9C, C)
    b_all = jnp.stack(bs, axis=0)[:, None, :].astype(jnp.float32)       # (num_convs, 1, C)
    return w_all, b_all


def residual_blocks_with_input_conv(feat_nchw, params):
    """Forward matching PyTorch ResidualBlocksWithInputConv: (N,Cin,H,W) -> (N,C,H,W)."""
    N, Cin, H, W = feat_nchw.shape
    C = params["w0"].shape[-1]
    num_blocks = len(params["blocks"])
    num_convs = 1 + 2 * num_blocks

    x = jnp.transpose(feat_nchw, (0, 2, 3, 1))          # NCHW -> NHWC (channels on lanes)
    w_all, b_all = _pack_weights(params)

    kernel = functools.partial(_fused_stack_kernel, H=H, W=W, C=C, Cin=Cin,
                               num_blocks=num_blocks)

    out = pl.pallas_call(
        kernel,
        out_shape=jax.ShapeDtypeStruct((N, H * W, C), jnp.float32),
        grid_spec=pltpu.PrefetchScalarGridSpec(
            num_scalar_prefetch=0,
            grid=(N,),
            in_specs=[
                pl.BlockSpec((1, H, W, Cin), lambda n: (n, 0, 0, 0)),
                pl.BlockSpec((num_convs, 9 * C, C), lambda n: (0, 0, 0)),  # resident weights
                pl.BlockSpec((num_convs, 1, C), lambda n: (0, 0, 0)),      # resident biases
            ],
            out_specs=pl.BlockSpec((1, H * W, C), lambda n: (n, 0, 0)),
            scratch_shapes=[
                pltpu.VMEM((H + 2, W + 2, C), jnp.float32),   # resident activation
                pltpu.VMEM((H + 2, W + 2, C), jnp.float32),   # block intermediate
            ],
        ),
        compiler_params=pltpu.CompilerParams(dimension_semantics=("parallel",)),
    )(x, w_all, b_all)

    out = out.reshape(N, H, W, C)
    return jnp.transpose(out, (0, 3, 1, 2))             # NHWC -> NCHW


# ----------------------------------------------------------- deterministic parameters
def init_params(key, in_channels, out_channels, num_blocks):
    keys = jax.random.split(key, 2 + 4 * num_blocks)

    def conv_w(k, cin, cout, scale=1.0):
        return scale * jax.random.normal(k, (3, 3, cin, cout), jnp.float32) / jnp.sqrt(9.0 * cin)

    params = {
        "w0": conv_w(keys[0], in_channels, out_channels),
        "b0": 0.01 * jax.random.normal(keys[1], (out_channels,), jnp.float32),
        "blocks": [],
    }
    for i in range(num_blocks):
        k1, k2, k3, k4 = keys[2 + 4 * i: 6 + 4 * i]
        params["blocks"].append(dict(
            w1=conv_w(k1, out_channels, out_channels, 0.1),
            b1=0.01 * jax.random.normal(k2, (out_channels,), jnp.float32),
            w2=conv_w(k3, out_channels, out_channels, 0.1),
            b2=0.01 * jax.random.normal(k4, (out_channels,), jnp.float32),
        ))
    return params


# ------------------------------------------------------------------ pure-JAX reference
def _conv3x3_ref(x_nhwc, w_hwio, b):
    y = jax.lax.conv_general_dilated(
        x_nhwc, w_hwio, window_strides=(1, 1), padding="SAME",
        dimension_numbers=("NHWC", "HWIO", "NHWC"))
    return y + b[None, None, None, :]


def reference_forward(feat_nchw, params):
    x = jnp.transpose(feat_nchw, (0, 2, 3, 1))
    x = _conv3x3_ref(x, params["w0"], params["b0"])
    x = jnp.where(x >= 0.0, x, 0.1 * x)
    for blk in params["blocks"]:
        h = jnp.maximum(_conv3x3_ref(x, blk["w1"], blk["b1"]), 0.0)
        x = x + _conv3x3_ref(h, blk["w2"], blk["b2"])
    return jnp.transpose(x, (0, 3, 1, 2))


# ------------------------------------------------------------------------------- main
if __name__ == "__main__":
    key = jax.random.PRNGKey(0)
    k_in, k_par = jax.random.split(key)

    N, Cin, H, W = 2, 4, 16, 16
    Cout, num_blocks = 32, 2

    feat = jax.random.normal(k_in, (N, Cin, H, W), jnp.float32)      # NCHW like PyTorch
    params = init_params(k_par, Cin, Cout, num_blocks)

    fwd = jax.jit(residual_blocks_with_input_conv)
    out = jax.block_until_ready(fwd(feat, params))

    ref = jax.block_until_ready(reference_forward(feat, params))
    assert out.shape == (N, Cout, H, W), out.shape
    max_err = float(jnp.max(jnp.abs(out - ref)))
    # bf16 MXU inputs with f32 accumulation -> slightly looser tolerance than pure f32.
    assert jnp.allclose(out, ref, rtol=5e-2, atol=5e-2), max_err

    print("KERNEL_OK")
</pallas_src>

<mosaic_0001>
module attributes {stable_mosaic.version = 11 : i64} {
  func.func @_fused_stack_kernel(%arg0: i32, %arg1: memref<1x16x16x4xf32, #tpu.memory_space<vmem>>, %arg2: memref<5x288x32xbf16, #tpu.memory_space<vmem>>, %arg3: memref<5x1x32xf32, #tpu.memory_space<vmem>>, %arg4: memref<1x256x32xf32, #tpu.memory_space<vmem>>, %arg5: memref<18x18x32xf32, #tpu.memory_space<vmem>>, %arg6: memref<18x18x32xf32, #tpu.memory_space<vmem>>) attributes {dimension_semantics = [#tpu.dimension_semantics<parallel>], iteration_bounds = array<i64: 2>, scalar_prefetch = 0 : i64, scratch_operands = 2 : i64, tpu.core_type = #tpu.core_type<tc>, window_params = [{transform_indices = @transform_0, window_bounds = array<i64: 1, 16, 16, 4>}, {pipeline_mode = #tpu.pipeline_mode<synchronous>, transform_indices = @transform_1, window_bounds = array<i64: 5, 288, 32>}, {pipeline_mode = #tpu.pipeline_mode<synchronous>, transform_indices = @transform_2, window_bounds = array<i64: 5, 1, 32>}, {transform_indices = @transform_3, window_bounds = array<i64: 1, 256, 32>}]} {
    %cst = arith.constant 0.000000e+00 : f32
    %0 = vector.broadcast %cst : f32 to vector<18x18x32xf32>
    %c0 = arith.constant 0 : index
    %c0_0 = arith.constant 0 : index
    %c0_1 = arith.constant 0 : index
    %1 = vector.load %arg5[%c0, %c0_0, %c0_1] : memref<18x18x32xf32, #tpu.memory_space<vmem>>, vector<18x18x32xf32>
    tpu.vector_store %arg5[%c0, %c0_0, %c0_1], %0 {strides = array<i32>} : memref<18x18x32xf32, #tpu.memory_space<vmem>>, vector<18x18x32xf32>,
    %cst_2 = arith.constant 0.000000e+00 : f32
    %2 = vector.broadcast %cst_2 : f32 to vector<18x18x32xf32>
    %c0_3 = arith.constant 0 : index
    %c0_4 = arith.constant 0 : index
    %c0_5 = arith.constant 0 : index
    %3 = vector.load %arg6[%c0_3, %c0_4, %c0_5] : memref<18x18x32xf32, #tpu.memory_space<vmem>>, vector<18x18x32xf32>
    tpu.vector_store %arg6[%c0_3, %c0_4, %c0_5], %2 {strides = array<i32>} : memref<18x18x32xf32, #tpu.memory_space<vmem>>, vector<18x18x32xf32>,
    %c0_6 = arith.constant 0 : index
    %c0_7 = arith.constant 0 : index
    %c0_8 = arith.constant 0 : index
    %c0_9 = arith.constant 0 : index
    %4 = vector.load %arg1[%c0_6, %c0_7, %c0_8, %c0_9] : memref<1x16x16x4xf32, #tpu.memory_space<vmem>>, vector<1x16x16x4xf32>
    %5 = vector.shape_cast %4 : vector<1x16x16x4xf32> to vector<16x16x4xf32>
    %c1 = arith.constant 1 : index
    %c1_10 = arith.constant 1 : index
    %c0_11 = arith.constant 0 : index
    %6 = vector.load %arg6[%c1, %c1_10, %c0_11] : memref<18x18x32xf32, #tpu.memory_space<vmem>>, vector<16x16x4xf32>
    tpu.vector_store %arg6[%c1, %c1_10, %c0_11], %5 {strides = array<i32>} : memref<18x18x32xf32, #tpu.memory_space<vmem>>, vector<16x16x4xf32>,
    %c0_12 = arith.constant 0 : index
    %c0_13 = arith.constant 0 : index
    %c0_14 = arith.constant 0 : index
    %7 = vector.load %arg6[%c0_12, %c0_13, %c0_14] : memref<18x18x32xf32, #tpu.memory_space<vmem>>, vector<16x16x32xf32>
    %8 = vector.shape_cast %7 : vector<16x16x32xf32> to vector<256x32xf32>
    %9 = arith.truncf %8 : vector<256x32xf32> to vector<256x32xbf16>
    %c0_15 = arith.constant 0 : index
    %c1_16 = arith.constant 1 : index
    %c0_17 = arith.constant 0 : index
    %10 = vector.load %arg6[%c0_15, %c1_16, %c0_17] : memref<18x18x32xf32, #tpu.memory_space<vmem>>, vector<16x16x32xf32>
    %11 = vector.shape_cast %10 : vector<16x16x32xf32> to vector<256x32xf32>
    %12 = arith.truncf %11 : vector<256x32xf32> to vector<256x32xbf16>
    %c0_18 = arith.constant 0 : index
    %c2 = arith.constant 2 : index
    %c0_19 = arith.constant 0 : index
    %13 = vector.load %arg6[%c0_18, %c2, %c0_19] : memref<18x18x32xf32, #tpu.memory_space<vmem>>, vector<16x16x32xf32>
    %14 = vector.shape_cast %13 : vector<16x16x32xf32> to vector<256x32xf32>
    %15 = arith.truncf %14 : vector<256x32xf32> to vector<256x32xbf16>
    %c1_20 = arith.constant 1 : index
    %c0_21 = arith.constant 0 : index
    %c0_22 = arith.constant 0 : index
    %16 = vector.load %arg6[%c1_20, %c0_21, %c0_22] : memref<18x18x32xf32, #tpu.memory_space<vmem>>, vector<16x16x32xf32>
    %17 = vector.shape_cast %16 : vector<16x16x32xf32> to vector<256x32xf32>
    %18 = arith.truncf %17 : vector<256x32xf32> to vector<256x32xbf16>
    %c1_23 = arith.constant 1 : index
    %c1_24 = arith.constant 1 : index
    %c0_25 = arith.constant 0 : index
    %19 = vector.load %arg6[%c1_23, %c1_24, %c0_25] : memref<18x18x32xf32, #tpu.memory_space<vmem>>, vector<16x16x32xf32>
    %20 = vector.shape_cast %19 : vector<16x16x32xf32> to vector<256x32xf32>
    %21 = arith.truncf %20 : vector<256x32xf32> to vector<256x32xbf16>
    %c1_26 = arith.constant 1 : index
    %c2_27 = arith.constant 2 : index
    %c0_28 = arith.constant 0 : index
    %22 = vector.load %arg6[%c1_26, %c2_27, %c0_28] : memref<18x18x32xf32, #tpu.memory_space<vmem>>, vector<16x16x32xf32>
    %23 = vector.shape_cast %22 : vector<16x16x32xf32> to vector<256x32xf32>
    %24 = arith.truncf %23 : vector<256x32xf32> to vector<256x32xbf16>
    %c2_29 = arith.constant 2 : index
    %c0_30 = arith.constant 0 : index
    %c0_31 = arith.constant 0 : index
    %25 = vector.load %arg6[%c2_29, %c0_30, %c0_31] : memref<18x18x32xf32, #tpu.memory_space<vmem>>, vector<16x16x32xf32>
    %26 = vector.shape_cast %25 : vector<16x16x32xf32> to vector<256x32xf32>
    %27 = arith.truncf %26 : vector<256x32xf32> to vector<256x32xbf16>
    %c2_32 = arith.constant 2 : index
    %c1_33 = arith.constant 1 : index
    %c0_34 = arith.constant 0 : index
    %28 = vector.load %arg6[%c2_32, %c1_33, %c0_34] : memref<18x18x32xf32, #tpu.memory_space<vmem>>, vector<16x16x32xf32>
    %29 = vector.shape_cast %28 : vector<16x16x32xf32> to vector<256x32xf32>
    %30 = arith.truncf %29 : vector<256x32xf32> to vector<256x32xbf16>
    %c2_35 = arith.constant 2 : index
    %c2_36 = arith.constant 2 : index
    %c0_37 = arith.constant 0 : index
    %31 = vector.load %arg6[%c2_35, %c2_36, %c0_37] : memref<18x18x32xf32, #tpu.memory_space<vmem>>, vector<16x16x32xf32>
    %32 = vector.shape_cast %31 : vector<16x16x32xf32> to vector<256x32xf32>
    %33 = arith.truncf %32 : vector<256x32xf32> to vector<256x32xbf16>
    %34 = tpu.concatenate %9, %12, %15, %18, %21, %24, %27, %30, %33 in 1 : vector<256x32xbf16>, vector<256x32xbf16>, vector<256x32xbf16>, vector<256x32xbf16>, vector<256x32xbf16>, vector<256x32xbf16>, vector<256x32xbf16>, vector<256x32xbf16>, vector<256x32xbf16> -> vector<256x288xbf16>
    %c0_38 = arith.constant 0 : index
    %c0_39 = arith.constant 0 : index
    %c0_40 = arith.constant 0 : index
    %35 = vector.load %arg2[%c0_38, %c0_39, %c0_40] : memref<5x288x32xbf16, #tpu.memory_space<vmem>>, vector<1x288x32xbf16>
    %36 = vector.shape_cast %35 : vector<1x288x32xbf16> to vector<288x32xbf16>
    %cst_41 = arith.constant dense<0.000000e+00> : vector<256x32xf32>
    %37 = tpu.matmul %34, %36, %cst_41 {dimension_numbers = #tpu.dot_dimension_numbers<[1], [0], [0], [1], [0, 0, 1, 1], [], []>} : vector<256x288xbf16>, vector<288x32xbf16>, vector<256x32xf32> -> vector<256x32xf32>
    %c0_42 = arith.constant 0 : index
    %c0_43 = arith.constant 0 : index
    %c0_44 = arith.constant 0 : index
    %38 = vector.load %arg3[%c0_42, %c0_43, %c0_44] : memref<5x1x32xf32, #tpu.memory_space<vmem>>, vector<1x1x32xf32>
    %39 = vector.shape_cast %38 : vector<1x1x32xf32> to vector<1x32xf32>
    %40 = vector.broadcast %39 : vector<1x32xf32> to vector<256x32xf32>
    %41 = arith.addf %37, %40 : vector<256x32xf32>
    %cst_45 = arith.constant 0.000000e+00 : f32
    %42 = vector.broadcast %cst_45 : f32 to vector<256x32xf32>
    %43 = arith.cmpf oge, %41, %42 : vector<256x32xf32>
    %cst_46 = arith.constant 1.000000e-01 : f32
    %44 = vector.broadcast %cst_46 : f32 to vector<256x32xf32>
    %45 = arith.mulf %44, %41 : vector<256x32xf32>
    %46 = arith.select %43, %41, %45 : vector<256x32xi1>, vector<256x32xf32>
    %47 = vector.shape_cast %46 : vector<256x32xf32> to vector<16x16x32xf32>
    %c1_47 = arith.constant 1 : index
    %c1_48 = arith.constant 1 : index
    %c0_49 = arith.constant 0 : index
    %48 = vector.load %arg5[%c1_47, %c1_48, %c0_49] : memref<18x18x32xf32, #tpu.memory_space<vmem>>, vector<16x16x32xf32>
    tpu.vector_store %arg5[%c1_47, %c1_48, %c0_49], %47 {strides = array<i32>} : memref<18x18x32xf32, #tpu.memory_space<vmem>>, vector<16x16x32xf32>,
    %c0_50 = arith.constant 0 : index
    %c0_51 = arith.constant 0 : index
    %c0_52 = arith.constant 0 : index
    %49 = vector.load %arg5[%c0_50, %c0_51, %c0_52] : memref<18x18x32xf32, #tpu.memory_space<vmem>>, vector<16x16x32xf32>
    %50 = vector.shape_cast %49 : vector<16x16x32xf32> to vector<256x32xf32>
    %51 = arith.truncf %50 : vector<256x32xf32> to vector<256x32xbf16>
    %c0_53 = arith.constant 0 : index
    %c1_54 = arith.constant 1 : index
    %c0_55 = arith.constant 0 : index
    %52 = vector.load %arg5[%c0_53, %c1_54, %c0_55] : memref<18x18x32xf32, #tpu.memory_space<vmem>>, vector<16x16x32xf32>
    %53 = vector.shape_cast %52 : vector<16x16x32xf32> to vector<256x32xf32>
    %54 = arith.truncf %53 : vector<256x32xf32> to vector<256x32xbf16>
    %c0_56 = arith.constant 0 : index
    %c2_57 = arith.constant 2 : index
    %c0_58 = arith.constant 0 : index
    %55 = vector.load %arg5[%c0_56, %c2_57, %c0_58] : memref<18x18x32xf32, #tpu.memory_space<vmem>>, vector<16x16x32xf32>
    %56 = vector.shape_cast %55 : vector<16x16x32xf32> to vector<256x32xf32>
    %57 = arith.truncf %56 : vector<256x32xf32> to vector<256x32xbf16>
    %c1_59 = arith.constant 1 : index
    %c0_60 = arith.constant 0 : index
    %c0_61 = arith.constant 0 : index
    %58 = vector.load %arg5[%c1_59, %c0_60, %c0_61] : memref<18x18x32xf32, #tpu.memory_space<vmem>>, vector<16x16x32xf32>
    %59 = vector.shape_cast %58 : vector<16x16x32xf32> to vector<256x32xf32>
    %60 = arith.truncf %59 : vector<256x32xf32> to vector<256x32xbf16>
    %c1_62 = arith.constant 1 : index
    %c1_63 = arith.constant 1 : index
    %c0_64 = arith.constant 0 : index
    %61 = vector.load %arg5[%c1_62, %c1_63, %c0_64] : memref<18x18x32xf32, #tpu.memory_space<vmem>>, vector<16x16x32xf32>
    %62 = vector.shape_cast %61 : vector<16x16x32xf32> to vector<256x32xf32>
    %63 = arith.truncf %62 : vector<256x32xf32> to vector<256x32xbf16>
    %c1_65 = arith.constant 1 : index
    %c2_66 = arith.constant 2 : index
    %c0_67 = arith.constant 0 : index
    %64 = vector.load %arg5[%c1_65, %c2_66, %c0_67] : memref<18x18x32xf32, #tpu.memory_space<vmem>>, vector<16x16x32xf32>
    %65 = vector.shape_cast %64 : vector<16x16x32xf32> to vector<256x32xf32>
    %66 = arith.truncf %65 : vector<256x32xf32> to vector<256x32xbf16>
    %c2_68 = arith.constant 2 : index
    %c0_69 = arith.constant 0 : index
    %c0_70 = arith.constant 0 : index
    %67 = vector.load %arg5[%c2_68, %c0_69, %c0_70] : memref<18x18x32xf32, #tpu.memory_space<vmem>>, vector<16x16x32xf32>
    %68 = vector.shape_cast %67 : vector<16x16x32xf32> to vector<256x32xf32>
    %69 = arith.truncf %68 : vector<256x32xf32> to vector<256x32xbf16>
    %c2_71 = arith.constant 2 : index
    %c1_72 = arith.constant 1 : index
    %c0_73 = arith.constant 0 : index
    %70 = vector.load %arg5[%c2_71, %c1_72, %c0_73] : memref<18x18x32xf32, #tpu.memory_space<vmem>>, vector<16x16x32xf32>
    %71 = vector.shape_cast %70 : vector<16x16x32xf32> to vector<256x32xf32>
    %72 = arith.truncf %71 : vector<256x32xf32> to vector<256x32xbf16>
    %c2_74 = arith.constant 2 : index
    %c2_75 = arith.constant 2 : index
    %c0_76 = arith.constant 0 : index
    %73 = vector.load %arg5[%c2_74, %c2_75, %c0_76] : memref<18x18x32xf32, #tpu.memory_space<vmem>>, vector<16x16x32xf32>
    %74 = vector.shape_cast %73 : vector<16x16x32xf32> to vector<256x32xf32>
    %75 = arith.truncf %74 : vector<256x32xf32> to vector<256x32xbf16>
    %76 = tpu.concatenate %51, %54, %57, %60, %63, %66, %69, %72, %75 in 1 : vector<256x32xbf16>, vector<256x32xbf16>, vector<256x32xbf16>, vector<256x32xbf16>, vector<256x32xbf16>, vector<256x32xbf16>, vector<256x32xbf16>, vector<256x32xbf16>, vector<256x32xbf16> -> vector<256x288xbf16>
    %c1_77 = arith.constant 1 : index
    %c0_78 = arith.constant 0 : index
    %c0_79 = arith.constant 0 : index
    %77 = vector.load %arg2[%c1_77, %c0_78, %c0_79] : memref<5x288x32xbf16, #tpu.memory_space<vmem>>, vector<1x288x32xbf16>
    %78 = vector.shape_cast %77 : vector<1x288x32xbf16> to vector<288x32xbf16>
    %cst_80 = arith.constant dense<0.000000e+00> : vector<256x32xf32>
    %79 = tpu.matmul %76, %78, %cst_80 {dimension_numbers = #tpu.dot_dimension_numbers<[1], [0], [0], [1], [0, 0, 1, 1], [], []>} : vector<256x288xbf16>, vector<288x32xbf16>, vector<256x32xf32> -> vector<256x32xf32>
    %c1_81 = arith.constant 1 : index
    %c0_82 = arith.constant 0 : index
    %c0_83 = arith.constant 0 : index
    %80 = vector.load %arg3[%c1_81, %c0_82, %c0_83] : memref<5x1x32xf32, #tpu.memory_space<vmem>>, vector<1x1x32xf32>
    %81 = vector.shape_cast %80 : vector<1x1x32xf32> to vector<1x32xf32>
    %82 = vector.broadcast %81 : vector<1x32xf32> to vector<256x32xf32>
    %83 = arith.addf %79, %82 : vector<256x32xf32>
    %cst_84 = arith.constant 0.000000e+00 : f32
    %84 = vector.broadcast %cst_84 : f32 to vector<256x32xf32>
    %85 = arith.maximumf %83, %84 : vector<256x32xf32>
    %86 = vector.shape_cast %85 : vector<256x32xf32> to vector<16x16x32xf32>
    %c1_85 = arith.constant 1 : index
    %c1_86 = arith.constant 1 : index
    %c0_87 = arith.constant 0 : index
    %87 = vector.load %arg6[%c1_85, %c1_86, %c0_87] : memref<18x18x32xf32, #tpu.memory_space<vmem>>, vector<16x16x32xf32>
    tpu.vector_store %arg6[%c1_85, %c1_86, %c0_87], %86 {strides = array<i32>} : memref<18x18x32xf32, #tpu.memory_space<vmem>>, vector<16x16x32xf32>,
    %c0_88 = arith.constant 0 : index
    %c0_89 = arith.constant 0 : index
    %c0_90 = arith.constant 0 : index
    %88 = vector.load %arg6[%c0_88, %c0_89, %c0_90] : memref<18x18x32xf32, #tpu.memory_space<vmem>>, vector<16x16x32xf32>
    %89 = vector.shape_cast %88 : vector<16x16x32xf32> to vector<256x32xf32>
    %90 = arith.truncf %89 : vector<256x32xf32> to vector<256x32xbf16>
    %c0_91 = arith.constant 0 : index
    %c1_92 = arith.constant 1 : index
    %c0_93 = arith.constant 0 : index
    %91 = vector.load %arg6[%c0_91, %c1_92, %c0_93] : memref<18x18x32xf32, #tpu.memory_space<vmem>>, vector<16x16x32xf32>
    %92 = vector.shape_cast %91 : vector<16x16x32xf32> to vector<256x32xf32>
    %93 = arith.truncf %92 : vector<256x32xf32> to vector<256x32xbf16>
    %c0_94 = arith.constant 0 : index
    %c2_95 = arith.constant 2 : index
    %c0_96 = arith.constant 0 : index
    %94 = vector.load %arg6[%c0_94, %c2_95, %c0_96] : memref<18x18x32xf32, #tpu.memory_space<vmem>>, vector<16x16x32xf32>
    %95 = vector.shape_cast %94 : vector<16x16x32xf32> to vector<256x32xf32>
    %96 = arith.truncf %95 : vector<256x32xf32> to vector<256x32xbf16>
    %c1_97 = arith.constant 1 : index
    %c0_98 = arith.constant 0 : index
    %c0_99 = arith.constant 0 : index
    %97 = vector.load %arg6[%c1_97, %c0_98, %c0_99] : memref<18x18x32xf32, #tpu.memory_space<vmem>>, vector<16x16x32xf32>
    %98 = vector.shape_cast %97 : vector<16x16x32xf32> to vector<256x32xf32>
    %99 = arith.truncf %98 : vector<256x32xf32> to vector<256x32xbf16>
    %c1_100 = arith.constant 1 : index
    %c1_101 = arith.constant 1 : index
    %c0_102 = arith.constant 0 : index
    %100 = vector.load %arg6[%c1_100, %c1_101, %c0_102] : memref<18x18x32xf32, #tpu.memory_space<vmem>>, vector<16x16x32xf32>
    %101 = vector.shape_cast %100 : vector<16x16x32xf32> to vector<256x32xf32>
    %102 = arith.truncf %101 : vector<256x32xf32> to vector<256x32xbf16>
    %c1_103 = arith.constant 1 : index
    %c2_104 = arith.constant 2 : index
    %c0_105 = arith.constant 0 : index
    %103 = vector.load %arg6[%c1_103, %c2_104, %c0_105] : memref<18x18x32xf32, #tpu.memory_space<vmem>>, vector<16x16x32xf32>
    %104 = vector.shape_cast %103 : vector<16x16x32xf32> to vector<256x32xf32>
    %105 = arith.truncf %104 : vector<256x32xf32> to vector<256x32xbf16>
    %c2_106 = arith.constant 2 : index
    %c0_107 = arith.constant 0 : index
    %c0_108 = arith.constant 0 : index
    %106 = vector.load %arg6[%c2_106, %c0_107, %c0_108] : memref<18x18x32xf32, #tpu.memory_space<vmem>>, vector<16x16x32xf32>
    %107 = vector.shape_cast %106 : vector<16x16x32xf32> to vector<256x32xf32>
    %108 = arith.truncf %107 : vector<256x32xf32> to vector<256x32xbf16>
    %c2_109 = arith.constant 2 : index
    %c1_110 = arith.constant 1 : index
    %c0_111 = arith.constant 0 : index
    %109 = vector.load %arg6[%c2_109, %c1_110, %c0_111] : memref<18x18x32xf32, #tpu.memory_space<vmem>>, vector<16x16x32xf32>
    %110 = vector.shape_cast %109 : vector<16x16x32xf32> to vector<256x32xf32>
    %111 = arith.truncf %110 : vector<256x32xf32> to vector<256x32xbf16>
    %c2_112 = arith.constant 2 : index
    %c2_113 = arith.constant 2 : index
    %c0_114 = arith.constant 0 : index
    %112 = vector.load %arg6[%c2_112, %c2_113, %c0_114] : memref<18x18x32xf32, #tpu.memory_space<vmem>>, vector<16x16x32xf32>
    %113 = vector.shape_cast %112 : vector<16x16x32xf32> to vector<256x32xf32>
    %114 = arith.truncf %113 : vector<256x32xf32> to vector<256x32xbf16>
    %115 = tpu.concatenate %90, %93, %96, %99, %102, %105, %108, %111, %114 in 1 : vector<256x32xbf16>, vector<256x32xbf16>, vector<256x32xbf16>, vector<256x32xbf16>, vector<256x32xbf16>, vector<256x32xbf16>, vector<256x32xbf16>, vector<256x32xbf16>, vector<256x32xbf16> -> vector<256x288xbf16>
    %c2_115 = arith.constant 2 : index
    %c0_116 = arith.constant 0 : index
    %c0_117 = arith.constant 0 : index
    %116 = vector.load %arg2[%c2_115, %c0_116, %c0_117] : memref<5x288x32xbf16, #tpu.memory_space<vmem>>, vector<1x288x32xbf16>
    %117 = vector.shape_cast %116 : vector<1x288x32xbf16> to vector<288x32xbf16>
    %cst_118 = arith.constant dense<0.000000e+00> : vector<256x32xf32>
    %118 = tpu.matmul %115, %117, %cst_118 {dimension_numbers = #tpu.dot_dimension_numbers<[1], [0], [0], [1], [0, 0, 1, 1], [], []>} : vector<256x288xbf16>, vector<288x32xbf16>, vector<256x32xf32> -> vector<256x32xf32>
    %c2_119 = arith.constant 2 : index
    %c0_120 = arith.constant 0 : index
    %c0_121 = arith.constant 0 : index
    %119 = vector.load %arg3[%c2_119, %c0_120, %c0_121] : memref<5x1x32xf32, #tpu.memory_space<vmem>>, vector<1x1x32xf32>
    %120 = vector.shape_cast %119 : vector<1x1x32xf32> to vector<1x32xf32>
    %121 = vector.broadcast %120 : vector<1x32xf32> to vector<256x32xf32>
    %122 = arith.addf %118, %121 : vector<256x32xf32>
    %123 = arith.addf %46, %122 : vector<256x32xf32>
    %124 = vector.shape_cast %123 : vector<256x32xf32> to vector<16x16x32xf32>
    %c1_122 = arith.constant 1 : index
    %c1_123 = arith.constant 1 : index
    %c0_124 = arith.constant 0 : index
    %125 = vector.load %arg5[%c1_122, %c1_123, %c0_124] : memref<18x18x32xf32, #tpu.memory_space<vmem>>, vector<16x16x32xf32>
    tpu.vector_store %arg5[%c1_122, %c1_123, %c0_124], %124 {strides = array<i32>} : memref<18x18x32xf32, #tpu.memory_space<vmem>>, vector<16x16x32xf32>,
    %c0_125 = arith.constant 0 : index
    %c0_126 = arith.constant 0 : index
    %c0_127 = arith.constant 0 : index
    %126 = vector.load %arg5[%c0_125, %c0_126, %c0_127] : memref<18x18x32xf32, #tpu.memory_space<vmem>>, vector<16x16x32xf32>
    %127 = vector.shape_cast %126 : vector<16x16x32xf32> to vector<256x32xf32>
    %128 = arith.truncf %127 : vector<256x32xf32> to vector<256x32xbf16>
    %c0_128 = arith.constant 0 : index
    %c1_129 = arith.constant 1 : index
    %c0_130 = arith.constant 0 : index
    %129 = vector.load %arg5[%c0_128, %c1_129, %c0_130] : memref<18x18x32xf32, #tpu.memory_space<vmem>>, vector<16x16x32xf32>
    %130 = vector.shape_cast %129 : vector<16x16x32xf32> to vector<256x32xf32>
    %131 = arith.truncf %130 : vector<256x32xf32> to vector<256x32xbf16>
    %c0_131 = arith.constant 0 : index
    %c2_132 = arith.constant 2 : index
    %c0_133 = arith.constant 0 : index
    %132 = vector.load %arg5[%c0_131, %c2_132, %c0_133] : memref<18x18x32xf32, #tpu.memory_space<vmem>>, vector<16x16x32xf32>
    %133 = vector.shape_cast %132 : vector<16x16x32xf32> to vector<256x32xf32>
    %134 = arith.truncf %133 : vector<256x32xf32> to vector<256x32xbf16>
    %c1_134 = arith.constant 1 : index
    %c0_135 = arith.constant 0 : index
    %c0_136 = arith.constant 0 : index
    %135 = vector.load %arg5[%c1_134, %c0_135, %c0_136] : memref<18x18x32xf32, #tpu.memory_space<vmem>>, vector<16x16x32xf32>
    %136 = vector.shape_cast %135 : vector<16x16x32xf32> to vector<256x32xf32>
    %137 = arith.truncf %136 : vector<256x32xf32> to vector<256x32xbf16>
    %c1_137 = arith.constant 1 : index
    %c1_138 = arith.constant 1 : index
    %c0_139 = arith.constant 0 : index
    %138 = vector.load %arg5[%c1_137, %c1_138, %c0_139] : memref<18x18x32xf32, #tpu.memory_space<vmem>>, vector<16x16x32xf32>
    %139 = vector.shape_cast %138 : vector<16x16x32xf32> to vector<256x32xf32>
    %140 = arith.truncf %139 : vector<256x32xf32> to vector<256x32xbf16>
    %c1_140 = arith.constant 1 : index
    %c2_141 = arith.constant 2 : index
    %c0_142 = arith.constant 0 : index
    %141 = vector.load %arg5[%c1_140, %c2_141, %c0_142] : memref<18x18x32xf32, #tpu.memory_space<vmem>>, vector<16x16x32xf32>
    %142 = vector.shape_cast %141 : vector<16x16x32xf32> to vector<256x32xf32>
    %143 = arith.truncf %142 : vector<256x32xf32> to vector<256x32xbf16>
    %c2_143 = arith.constant 2 : index
    %c0_144 = arith.constant 0 : index
    %c0_145 = arith.constant 0 : index
    %144 = vector.load %arg5[%c2_143, %c0_144, %c0_145] : memref<18x18x32xf32, #tpu.memory_space<vmem>>, vector<16x16x32xf32>
    %145 = vector.shape_cast %144 : vector<16x16x32xf32> to vector<256x32xf32>
    %146 = arith.truncf %145 : vector<256x32xf32> to vector<256x32xbf16>
    %c2_146 = arith.constant 2 : index
    %c1_147 = arith.constant 1 : index
    %c0_148 = arith.constant 0 : index
    %147 = vector.load %arg5[%c2_146, %c1_147, %c0_148] : memref<18x18x32xf32, #tpu.memory_space<vmem>>, vector<16x16x32xf32>
    %148 = vector.shape_cast %147 : vector<16x16x32xf32> to vector<256x32xf32>
    %149 = arith.truncf %148 : vector<256x32xf32> to vector<256x32xbf16>
    %c2_149 = arith.constant 2 : index
    %c2_150 = arith.constant 2 : index
    %c0_151 = arith.constant 0 : index
    %150 = vector.load %arg5[%c2_149, %c2_150, %c0_151] : memref<18x18x32xf32, #tpu.memory_space<vmem>>, vector<16x16x32xf32>
    %151 = vector.shape_cast %150 : vector<16x16x32xf32> to vector<256x32xf32>
    %152 = arith.truncf %151 : vector<256x32xf32> to vector<256x32xbf16>
    %153 = tpu.concatenate %128, %131, %134, %137, %140, %143, %146, %149, %152 in 1 : vector<256x32xbf16>, vector<256x32xbf16>, vector<256x32xbf16>, vector<256x32xbf16>, vector<256x32xbf16>, vector<256x32xbf16>, vector<256x32xbf16>, vector<256x32xbf16>, vector<256x32xbf16> -> vector<256x288xbf16>
    %c3 = arith.constant 3 : index
    %c0_152 = arith.constant 0 : index
    %c0_153 = arith.constant 0 : index
    %154 = vector.load %arg2[%c3, %c0_152, %c0_153] : memref<5x288x32xbf16, #tpu.memory_space<vmem>>, vector<1x288x32xbf16>
    %155 = vector.shape_cast %154 : vector<1x288x32xbf16> to vector<288x32xbf16>
    %cst_154 = arith.constant dense<0.000000e+00> : vector<256x32xf32>
    %156 = tpu.matmul %153, %155, %cst_154 {dimension_numbers = #tpu.dot_dimension_numbers<[1], [0], [0], [1], [0, 0, 1, 1], [], []>} : vector<256x288xbf16>, vector<288x32xbf16>, vector<256x32xf32> -> vector<256x32xf32>
    %c3_155 = arith.constant 3 : index
    %c0_156 = arith.constant 0 : index
    %c0_157 = arith.constant 0 : index
    %157 = vector.load %arg3[%c3_155, %c0_156, %c0_157] : memref<5x1x32xf32, #tpu.memory_space<vmem>>, vector<1x1x32xf32>
    %158 = vector.shape_cast %157 : vector<1x1x32xf32> to vector<1x32xf32>
    %159 = vector.broadcast %158 : vector<1x32xf32> to vector<256x32xf32>
    %160 = arith.addf %156, %159 : vector<256x32xf32>
    %cst_158 = arith.constant 0.000000e+00 : f32
    %161 = vector.broadcast %cst_158 : f32 to vector<256x32xf32>
    %162 = arith.maximumf %160, %161 : vector<256x32xf32>
    %163 = vector.shape_cast %162 : vector<256x32xf32> to vector<16x16x32xf32>
    %c1_159 = arith.constant 1 : index
    %c1_160 = arith.constant 1 : index
    %c0_161 = arith.constant 0 : index
    %164 = vector.load %arg6[%c1_159, %c1_160, %c0_161] : memref<18x18x32xf32, #tpu.memory_space<vmem>>, vector<16x16x32xf32>
    tpu.vector_store %arg6[%c1_159, %c1_160, %c0_161], %163 {strides = array<i32>} : memref<18x18x32xf32, #tpu.memory_space<vmem>>, vector<16x16x32xf32>,
    %c0_162 = arith.constant 0 : index
    %c0_163 = arith.constant 0 : index
    %c0_164 = arith.constant 0 : index
    %165 = vector.load %arg6[%c0_162, %c0_163, %c0_164] : memref<18x18x32xf32, #tpu.memory_space<vmem>>, vector<16x16x32xf32>
    %166 = vector.shape_cast %165 : vector<16x16x32xf32> to vector<256x32xf32>
    %167 = arith.truncf %166 : vector<256x32xf32> to vector<256x32xbf16>
    %c0_165 = arith.constant 0 : index
    %c1_166 = arith.constant 1 : index
    %c0_167 = arith.constant 0 : index
    %168 = vector.load %arg6[%c0_165, %c1_166, %c0_167] : memref<18x18x32xf32, #tpu.memory_space<vmem>>, vector<16x16x32xf32>
    %169 = vector.shape_cast %168 : vector<16x16x32xf32> to vector<256x32xf32>
    %170 = arith.truncf %169 : vector<256x32xf32> to vector<256x32xbf16>
    %c0_168 = arith.constant 0 : index
    %c2_169 = arith.constant 2 : index
    %c0_170 = arith.constant 0 : index
    %171 = vector.load %arg6[%c0_168, %c2_169, %c0_170] : memref<18x18x32xf32, #tpu.memory_space<vmem>>, vector<16x16x32xf32>
    %172 = vector.shape_cast %171 : vector<16x16x32xf32> to vector<256x32xf32>
    %173 = arith.truncf %172 : vector<256x32xf32> to vector<256x32xbf16>
    %c1_171 = arith.constant 1 : index
    %c0_172 = arith.constant 0 : index
    %c0_173 = arith.constant 0 : index
    %174 = vector.load %arg6[%c1_171, %c0_172, %c0_173] : memref<18x18x32xf32, #tpu.memory_space<vmem>>, vector<16x16x32xf32>
    %175 = vector.shape_cast %174 : vector<16x16x32xf32> to vector<256x32xf32>
    %176 = arith.truncf %175 : vector<256x32xf32> to vector<256x32xbf16>
    %c1_174 = arith.constant 1 : index
    %c1_175 = arith.constant 1 : index
    %c0_176 = arith.constant 0 : index
    %177 = vector.load %arg6[%c1_174, %c1_175, %c0_176] : memref<18x18x32xf32, #tpu.memory_space<vmem>>, vector<16x16x32xf32>
    %178 = vector.shape_cast %177 : vector<16x16x32xf32> to vector<256x32xf32>
    %179 = arith.truncf %178 : vector<256x32xf32> to vector<256x32xbf16>
    %c1_177 = arith.constant 1 : index
    %c2_178 = arith.constant 2 : index
    %c0_179 = arith.constant 0 : index
    %180 = vector.load %arg6[%c1_177, %c2_178, %c0_179] : memref<18x18x32xf32, #tpu.memory_space<vmem>>, vector<16x16x32xf32>
    %181 = vector.shape_cast %180 : vector<16x16x32xf32> to vector<256x32xf32>
    %182 = arith.truncf %181 : vector<256x32xf32> to vector<256x32xbf16>
    %c2_180 = arith.constant 2 : index
    %c0_181 = arith.constant 0 : index
    %c0_182 = arith.constant 0 : index
    %183 = vector.load %arg6[%c2_180, %c0_181, %c0_182] : memref<18x18x32xf32, #tpu.memory_space<vmem>>, vector<16x16x32xf32>
    %184 = vector.shape_cast %183 : vector<16x16x32xf32> to vector<256x32xf32>
    %185 = arith.truncf %184 : vector<256x32xf32> to vector<256x32xbf16>
    %c2_183 = arith.constant 2 : index
    %c1_184 = arith.constant 1 : index
    %c0_185 = arith.constant 0 : index
    %186 = vector.load %arg6[%c2_183, %c1_184, %c0_185] : memref<18x18x32xf32, #tpu.memory_space<vmem>>, vector<16x16x32xf32>
    %187 = vector.shape_cast %186 : vector<16x16x32xf32> to vector<256x32xf32>
    %188 = arith.truncf %187 : vector<256x32xf32> to vector<256x32xbf16>
    %c2_186 = arith.constant 2 : index
    %c2_187 = arith.constant 2 : index
    %c0_188 = arith.constant 0 : index
    %189 = vector.load %arg6[%c2_186, %c2_187, %c0_188] : memref<18x18x32xf32, #tpu.memory_space<vmem>>, vector<16x16x32xf32>
    %190 = vector.shape_cast %189 : vector<16x16x32xf32> to vector<256x32xf32>
    %191 = arith.truncf %190 : vector<256x32xf32> to vector<256x32xbf16>
    %192 = tpu.concatenate %167, %170, %173, %176, %179, %182, %185, %188, %191 in 1 : vector<256x32xbf16>, vector<256x32xbf16>, vector<256x32xbf16>, vector<256x32xbf16>, vector<256x32xbf16>, vector<256x32xbf16>, vector<256x32xbf16>, vector<256x32xbf16>, vector<256x32xbf16> -> vector<256x288xbf16>
    %c4 = arith.constant 4 : index
    %c0_189 = arith.constant 0 : index
    %c0_190 = arith.constant 0 : index
    %193 = vector.load %arg2[%c4, %c0_189, %c0_190] : memref<5x288x32xbf16, #tpu.memory_space<vmem>>, vector<1x288x32xbf16>
    %194 = vector.shape_cast %193 : vector<1x288x32xbf16> to vector<288x32xbf16>
    %cst_191 = arith.constant dense<0.000000e+00> : vector<256x32xf32>
    %195 = tpu.matmul %192, %194, %cst_191 {dimension_numbers = #tpu.dot_dimension_numbers<[1], [0], [0], [1], [0, 0, 1, 1], [], []>} : vector<256x288xbf16>, vector<288x32xbf16>, vector<256x32xf32> -> vector<256x32xf32>
    %c4_192 = arith.constant 4 : index
    %c0_193 = arith.constant 0 : index
    %c0_194 = arith.constant 0 : index
    %196 = vector.load %arg3[%c4_192, %c0_193, %c0_194] : memref<5x1x32xf32, #tpu.memory_space<vmem>>, vector<1x1x32xf32>
    %197 = vector.shape_cast %196 : vector<1x1x32xf32> to vector<1x32xf32>
    %198 = vector.broadcast %197 : vector<1x32xf32> to vector<256x32xf32>
    %199 = arith.addf %195, %198 : vector<256x32xf32>
    %200 = arith.addf %123, %199 : vector<256x32xf32>
    %c0_195 = arith.constant 0 : index
    %c0_196 = arith.constant 0 : index
    %c0_197 = arith.constant 0 : index
    %201 = vector.load %arg4[%c0_195, %c0_196, %c0_197] : memref<1x256x32xf32, #tpu.memory_space<vmem>>, vector<1x256x32xf32>
    %202 = vector.shape_cast %201 : vector<1x256x32xf32> to vector<256x32xf32>
    %203 = vector.shape_cast %200 : vector<256x32xf32> to vector<1x256x32xf32>
    tpu.vector_store %arg4[%c0_195, %c0_196, %c0_197], %203 {strides = array<i32>} : memref<1x256x32xf32, #tpu.memory_space<vmem>>, vector<1x256x32xf32>,
    return
  }
  func.func @transform_0(%arg0: i32) -> (i32, i32, i32, i32) {
    %c0_i32 = arith.constant 0 : i32
    %c0_i32_0 = arith.constant 0 : i32
    %c0_i32_1 = arith.constant 0 : i32
    %c0_i32_2 = arith.constant 0 : i32
    return %arg0, %c0_i32, %c0_i32_0, %c0_i32_1 : i32, i32, i32, i32
  }
  func.func @transform_1(%arg0: i32) -> (i32, i32, i32) {
    %c0_i32 = arith.constant 0 : i32
    %c0_i32_0 = arith.constant 0 : i32
    %c0_i32_1 = arith.constant 0 : i32
    %c0_i32_2 = arith.constant 0 : i32
    return %c0_i32, %c0_i32_0, %c0_i32_1 : i32, i32, i32
  }
  func.func @transform_2(%arg0: i32) -> (i32, i32, i32) {
    %c0_i32 = arith.constant 0 : i32
    %c0_i32_0 = arith.constant 0 : i32
    %c0_i32_1 = arith.constant 0 : i32
    %c0_i32_2 = arith.constant 0 : i32
    return %c0_i32, %c0_i32_0, %c0_i32_1 : i32, i32, i32
  }
  func.func @transform_3(%arg0: i32) -> (i32, i32, i32) {
    %c0_i32 = arith.constant 0 : i32
    %c0_i32_0 = arith.constant 0 : i32
    %c0_i32_1 = arith.constant 0 : i32
    return %arg0, %c0_i32, %c0_i32_0 : i32, i32, i32
  }
}

</mosaic_0001>

<bundles_post_ra>
// kernel: residual_blocks_with_input_conv.1
= control target key start
LH: loop header
LB: loop body
LE: loop exit
PB: predicated region body
PF: predicated region fallthrough
CT: control target
= control target key end

     0   :  { %8 = vsyncpa [#allocation5], 0  ;;  %s13440_s0 = inlined_call_operand.vmem [shape: f32[2,16,16,4], index: 0, kind: input, shape index: {}]   ;;  %s13441_s1 = inlined_call_operand.vmem [shape: bf16[5,288,32], index: 1, kind: input, shape index: {}]   ;;  %s13442_s2 = inlined_call_operand.vmem [shape: f32[5,1,32], index: 2, kind: input, shape index: {}]   ;;  %s13443_s3 = inlined_call_operand.hbm [shape: f32[2,256,32], index: 3, kind: output, shape index: {}]  }
   0x1   :  { %10 = vsyncpa [#allocation5 + $0x1], 0  ;;  %s9703_s12 = smov 0   ;;  %s9705_s13 = smov 0  }
   0x2   :  { %s9707_s14 = smov 0   ;;  %s9709_s15 = smov 0  }
   0x3 LB: > { %s9724_s16 = sadd.s32 4294967295, %s9674_s15   ;;  %s8304_s17 = sadd.s32 4294967294, %s9674_s15   ;;  %s9674_s15 = sphi %s9709_s15, %s13590_s15   ;;  %s9670_s14 = sphi %s9707_s14, %s13589_s14   ;;  %s9666_s13 = sphi %s9705_s13, %s13588_s13   ;;  %s9662_s12 = sphi %s9703_s12, %s13587_s12  }
   0x4   : > { %s9728_s18 = sadd.s32 1, %s9674_s15   ;;  %s91_s19 = sadd.s32 1, %s9670_s14 }
   0x5   : > { %s88_s20 = ssub.s32 %s9674_s15, %s9728_s18  ;;  %p101_p0 = scmp.ne.s32.totalorder %s9670_s14, %s9666_s13 }
   0x6   : > { %p89_p1 = scmp.eq.s32.totalorder %s88_s20, 0  ;;  %p102_p2 = scmp.eq.s32.totalorder %s9724_s16, 1 }
   0x7   : > { %p107_p3 = scmp.ne.s32.totalorder %s9666_s13, %s9662_s12  ;;  %p108_p4 = scmp.eq.s32.totalorder %s8304_s17, 1 }
   0x8   : > { %s9739_s21 = scalar_select %p89_p1, %s9670_s14, %s91_s19  }
   0x9   : > { %p9741_p5 = por %p102_p2, %p101_p0  ;;  %p9745_p6 = por %p108_p4, %p107_p3 }
   0xa   : > { %p8307_p7 = scmp.ge.s32.totalorder %s9674_s15, 1  ;;  %p140_p8 = scmp.lt.s32.totalorder %s9674_s15, 3 }
   0xc   : > { %p141_p9 = pnand %p8307_p7, %p140_p8 }
   0xe   : > { %144 = sbr.rel (%p141_p9) target bundleno = 2280 (0x8e8), region = 32 }
  0x15   : > { %vm170_vm0 = vcmask 261120   ;;  %vm173_vm1 = vcmask 254976   ;;  %v9676_v0 = vmov 0.0   ;;  %p164_p10 = scmp.lt.s32.totalorder %s9724_s16, 1  ;;  %v9520_v1 = vld [vmem:[%s13441_s1 + $0x40] sm:$0xff]   ;;  %vm313_vm2 = vcmask 31744  }
  0x16   : > { %226 = vst.msk [vmem:[#allocation3] sm:$0xff] %vm170_vm0, %v9676_v0  ;;  %227 = vst.msk [vmem:[#allocation3 + $0x8] sm:$0xff] %vm170_vm0, %v9676_v0  ;;  %v9521_v2 = vld [vmem:[%s13441_s1] sm:$0xff]   ;;  %8641 = vmatprep.subr.bf16.mxu0 %v9520_v1  ;;  %v9522_v3 = vld [vmem:[%s13441_s1 + $0x48] sm:$0xff]   ;;  %s9677_s17 = smov 64   ;;  %s9678_s19 = smov 32  }
  0x17   : > { %228 = vst.msk [vmem:[#allocation3 + $0x10] sm:$0x3] %vm173_vm1, %v9676_v0  ;;  %174 = vst.msk [vmem:[#allocation2 + $0x10] sm:$0x3] %vm173_vm1, %v9676_v0  ;;  %s165_s26 = scalar_select %p164_p10, %s9724_s16, 1  ;;  %8642 = vmatpush3.bf16.msra.mxu0 %v9521_v2  ;;  %v9523_v4 = vld [vmem:[%s13441_s1 + $0x8] sm:$0xff]  }
  0x18   : > { %171 = vst.msk [vmem:[#allocation2] sm:$0xff] %vm170_vm0, %v9676_v0  ;;  %172 = vst.msk [vmem:[#allocation2 + $0x8] sm:$0xff] %vm170_vm0, %v9676_v0  ;;  %8643 = vmatprep.subr.bf16.mxu0 %v9522_v3  ;;  %v9524_v5 = vld [vmem:[%s13441_s1 + $0x50] sm:$0xff]   ;;  %s9679_s20 = smov 96   ;;  %v9526_v62 = vld [vmem:[%s13441_s1 + $0x58] sm:$0xff]   ;;  %vm1115_vm3 = vcmask 523264  }
  0x19   : > { %175 = vst.msk [vmem:[#allocation2 + $0x18] sm:$0xff] %vm170_vm0, %v9676_v0  ;;  %176 = vst.msk [vmem:[#allocation2 + $0x20] sm:$0xff] %vm170_vm0, %v9676_v0  ;;  %s8639_s4 = sshll.u32 %s165_s26, 8  ;;  %v9525_v61 = vld [vmem:[%s13441_s1 + $0x10] sm:$0xff]   ;;  %v9527_v1 = vld [vmem:[%s13441_s1 + $0x18] sm:$0xff]   ;;  %vm1148_vm4 = vcmask 785408  }
  0x1a   : > { %177 = vst.msk [vmem:[#allocation2 + $0x28] sm:$0x3] %vm173_vm1, %v9676_v0  ;;  %180 = vst.msk [vmem:[#allocation2 + $0x40] sm:$0x3] %vm173_vm1, %v9676_v0  ;;  %s9984_s9 = scalar_lea.vmem %s13440_s0, %s8639_s4  ;;  %v9528_v3 = vld [vmem:[%s13441_s1 + $0x60] sm:$0xff]   ;;  %s8640_s29 = sshll.u32 %s9724_s16, 12 }
  0x1b   : > { %178 = vst.msk [vmem:[#allocation2 + $0x30] sm:$0xff] %vm170_vm0, %v9676_v0  ;;  %179 = vst.msk [vmem:[#allocation2 + $0x38] sm:$0xff] %vm170_vm0, %v9676_v0  ;;  %v282_v6 = vld [vmem:[%s9984_s9 + $0x10] sm:$0xff]  ;;  %v283_v7 = vld [vmem:[%s9984_s9 + $0x18] sm:$0xff]  ;;  %8644 = vmatpush3.bf16.msra.mxu0 %v9523_v4  ;;  %s13388_s6 = scalar_lea.hbm %s13443_s3, %s8640_s29  ;;  %s9680_s7 = smov [#allocation4]  }
  0x1c   : > { %181 = vst.msk [vmem:[#allocation2 + $0x48] sm:$0xff] %vm170_vm0, %v9676_v0  ;;  %182 = vst.msk [vmem:[#allocation2 + $0x50] sm:$0xff] %vm170_vm0, %v9676_v0  ;;  %v280_v8 = vld [vmem:[%s9984_s9] sm:$0xff]  ;;  %v281_v14 = vld [vmem:[%s9984_s9 + $0x8] sm:$0xff]  ;;  %8645 = vmatprep.subr.bf16.mxu0 %v9524_v5  ;;  %s9616_s8 = sshll.u32 %s9680_s7, 4  ;;  %s9617_s8 = int_to_ptr.vmem [resolvable:$false] %s9616_s8 }
  0x1d   : > { %183 = vst.msk [vmem:[#allocation2 + $0x58] sm:$0x3] %vm173_vm1, %v9676_v0  ;;  %186 = vst.msk [vmem:[#allocation2 + $0x70] sm:$0x3] %vm173_vm1, %v9676_v0  ;;  %v442_v9 = vld [vmem:[#allocation3 + $0x2] sm:$0xff]  ;;  %v284_v15 = vld [vmem:[%s9984_s9 + $0x20] sm:$0xff] }
  0x1e   : > { %184 = vst.msk [vmem:[#allocation2 + $0x60] sm:$0xff] %vm170_vm0, %v9676_v0  ;;  %185 = vst.msk [vmem:[#allocation2 + $0x68] sm:$0xff] %vm170_vm0, %v9676_v0  ;;  %v443_v10 = vld [vmem:[#allocation3 + $0xa] sm:$0xff]  ;;  %v394_v11 = vld [vmem:[#allocation3 + $0x1] sm:$0xff]  ;;  %s9618_s10 = scalar_lea.vmem %s9617_s8, 8192 }
  0x1f   : > { %187 = vst.msk [vmem:[#allocation2 + $0x78] sm:$0xff] %vm170_vm0, %v9676_v0  ;;  %188 = vst.msk [vmem:[#allocation2 + $0x80] sm:$0xff] %vm170_vm0, %v9676_v0  ;;  %v474_v12 = vpack.c.bf16 %v443_v10, %v442_v9  ;;  %v395_v13 = vld [vmem:[#allocation3 + $0x9] sm:$0xff]  ;;  %v285_v17 = vld [vmem:[%s9984_s9 + $0x28] sm:$0xff]  ;;  %8646 = vmatpush3.bf16.msra.mxu0 %v9525_v61 }
  0x20   : > { %189 = vst.msk [vmem:[#allocation2 + $0x88] sm:$0x3] %vm173_vm1, %v9676_v0  ;;  %192 = vst.msk [vmem:[#allocation2 + $0xa0] sm:$0x3] %vm173_vm1, %v9676_v0  ;;  %v426_v16 = vpack.c.bf16 %v395_v13, %v394_v11  ;;  %v286_v18 = vld [vmem:[%s9984_s9 + $0x30] sm:$0xff]  ;;  %v287_v19 = vld [vmem:[%s9984_s9 + $0x38] sm:$0xff]  ;;  %8647 = vmatprep.subr.bf16.mxu0 %v9526_v62 }
  0x21   : > { %190 = vst.msk [vmem:[#allocation2 + $0x90] sm:$0xff] %vm170_vm0, %v9676_v0  ;;  %191 = vst.msk [vmem:[#allocation2 + $0x98] sm:$0xff] %vm170_vm0, %v9676_v0  ;;  %843 = vrot.lane.b32.xlu1 %v474_v12, %s9677_s17  ;;  %v288_v20 = vld [vmem:[%s9984_s9 + $0x40] sm:$0xff]  ;;  %v289_v21 = vld [vmem:[%s9984_s9 + $0x48] sm:$0xff] }
  0x22   : > { %193 = vst.msk [vmem:[#allocation2 + $0xa8] sm:$0xff] %vm170_vm0, %v9676_v0  ;;  %194 = vst.msk [vmem:[#allocation2 + $0xb0] sm:$0xff] %vm170_vm0, %v9676_v0  ;;  %v290_v22 = vld [vmem:[%s9984_s9 + $0x50] sm:$0xff]  ;;  %795 = vrot.lane.b32.xlu0 %v426_v16, %s9678_s19  ;;  %v291_v23 = vld [vmem:[%s9984_s9 + $0x58] sm:$0xff] }
  0x23   : > { %195 = vst.msk [vmem:[#allocation2 + $0xb8] sm:$0x3] %vm173_vm1, %v9676_v0  ;;  %198 = vst.msk [vmem:[#allocation2 + $0xd0] sm:$0x3] %vm173_vm1, %v9676_v0  ;;  %v292_v24 = vld [vmem:[%s9984_s9 + $0x60] sm:$0xff]  ;;  %v293_v25 = vld [vmem:[%s9984_s9 + $0x68] sm:$0xff]  ;;  %8648 = vmatpush3.bf16.msra.mxu0 %v9527_v1 }
  0x24   : > { %196 = vst.msk [vmem:[#allocation2 + $0xc0] sm:$0xff] %vm170_vm0, %v9676_v0  ;;  %197 = vst.msk [vmem:[#allocation2 + $0xc8] sm:$0xff] %vm170_vm0, %v9676_v0  ;;  %v294_v26 = vld [vmem:[%s9984_s9 + $0x70] sm:$0xff]  ;;  %v295_v27 = vld [vmem:[%s9984_s9 + $0x78] sm:$0xff]  ;;  %8649 = vmatprep.subr.bf16.mxu0 %v9528_v3 }
  0x25   : > { %199 = vst.msk [vmem:[#allocation2 + $0xd8] sm:$0xff] %vm170_vm0, %v9676_v0  ;;  %200 = vst.msk [vmem:[#allocation2 + $0xe0] sm:$0xff] %vm170_vm0, %v9676_v0  ;;  %v296_v28 = vld [vmem:[%s9984_s9 + $0x80] sm:$0xff]  ;;  %v297_v29 = vld [vmem:[%s9984_s9 + $0x88] sm:$0xff] }
  0x26   : > { %201 = vst.msk [vmem:[#allocation2 + $0xe8] sm:$0x3] %vm173_vm1, %v9676_v0  ;;  %204 = vst.msk [vmem:[#allocation2 + $0x100] sm:$0x3] %vm173_vm1, %v9676_v0  ;;  %v298_v30 = vld [vmem:[%s9984_s9 + $0x90] sm:$0xff]  ;;  %v299_v31 = vld [vmem:[%s9984_s9 + $0x98] sm:$0xff] }
  0x27   : > { %202 = vst.msk [vmem:[#allocation2 + $0xf0] sm:$0xff] %vm170_vm0, %v9676_v0  ;;  %203 = vst.msk [vmem:[#allocation2 + $0xf8] sm:$0xff] %vm170_vm0, %v9676_v0  ;;  %v9529_v5 = vld [vmem:[%s13441_s1 + $0x20] sm:$0xff]   ;;  %v9530_v9 = vld [vmem:[%s13441_s1 + $0x68] sm:$0xff]  }
  0x28   : > { %205 = vst.msk [vmem:[#allocation2 + $0x108] sm:$0xff] %vm170_vm0, %v9676_v0  ;;  %206 = vst.msk [vmem:[#allocation2 + $0x110] sm:$0xff] %vm170_vm0, %v9676_v0  ;;  %8650 = vmatpush3.bf16.msra.mxu0 %v9529_v5  ;;  %v9531_v12 = vld [vmem:[%s13441_s1 + $0x28] sm:$0xff]   ;;  %v302_v16 = vld [vmem:[%s9984_s9 + $0xb0] sm:$0xff] }
  0x29   : > { %207 = vst.msk [vmem:[#allocation2 + $0x118] sm:$0x3] %vm173_vm1, %v9676_v0  ;;  %210 = vst.msk [vmem:[#allocation2 + $0x130] sm:$0x3] %vm173_vm1, %v9676_v0  ;;  %8651 = vmatprep.subr.bf16.mxu0 %v9530_v9 }
  0x2a   : > { %208 = vst.msk [vmem:[#allocation2 + $0x120] sm:$0xff] %vm170_vm0, %v9676_v0  ;;  %209 = vst.msk [vmem:[#allocation2 + $0x128] sm:$0xff] %vm170_vm0, %v9676_v0 }
  0x2b   : > { %211 = vst.msk [vmem:[#allocation2 + $0x138] sm:$0xff] %vm170_vm0, %v9676_v0  ;;  %212 = vst.msk [vmem:[#allocation2 + $0x140] sm:$0xff] %vm170_vm0, %v9676_v0 }
  0x2c   : > { %213 = vst.msk [vmem:[#allocation2 + $0x148] sm:$0x3] %vm173_vm1, %v9676_v0  ;;  %216 = vst.msk [vmem:[#allocation2 + $0x160] sm:$0x3] %vm173_vm1, %v9676_v0  ;;  %8652 = vmatpush3.bf16.msra.mxu0 %v9531_v12 }
  0x2d   : > { %214 = vst.msk [vmem:[#allocation2 + $0x150] sm:$0xff] %vm170_vm0, %v9676_v0  ;;  %215 = vst.msk [vmem:[#allocation2 + $0x158] sm:$0xff] %vm170_vm0, %v9676_v0 }
  0x2e   : > { %217 = vst.msk [vmem:[#allocation2 + $0x168] sm:$0xff] %vm170_vm0, %v9676_v0  ;;  %218 = vst.msk [vmem:[#allocation2 + $0x170] sm:$0xff] %vm170_vm0, %v9676_v0 }
  0x2f   : > { %219 = vst.msk [vmem:[#allocation2 + $0x178] sm:$0x3] %vm173_vm1, %v9676_v0  ;;  %222 = vst.msk [vmem:[#allocation2 + $0x190] sm:$0x3] %vm173_vm1, %v9676_v0 }
  0x30   : > { %220 = vst.msk [vmem:[#allocation2 + $0x180] sm:$0xff] %vm170_vm0, %v9676_v0  ;;  %221 = vst.msk [vmem:[#allocation2 + $0x188] sm:$0xff] %vm170_vm0, %v9676_v0 }
  0x31   : > { %223 = vst.msk [vmem:[#allocation2 + $0x198] sm:$0xff] %vm170_vm0, %v9676_v0  ;;  %224 = vst.msk [vmem:[#allocation2 + $0x1a0] sm:$0xff] %vm170_vm0, %v9676_v0 }
  0x32   : > { %225 = vst.msk [vmem:[#allocation2 + $0x1a8] sm:$0x3] %vm173_vm1, %v9676_v0  ;;  %231 = vst.msk [vmem:[#allocation3 + $0x28] sm:$0x3] %vm173_vm1, %v9676_v0 }
  0x33   : > { %229 = vst.msk [vmem:[#allocation3 + $0x18] sm:$0xff] %vm170_vm0, %v9676_v0  ;;  %230 = vst.msk [vmem:[#allocation3 + $0x20] sm:$0xff] %vm170_vm0, %v9676_v0 }
  0x34   : > { %232 = vst.msk [vmem:[#allocation3 + $0x30] sm:$0xff] %vm170_vm0, %v9676_v0  ;;  %233 = vst.msk [vmem:[#allocation3 + $0x38] sm:$0xff] %vm170_vm0, %v9676_v0 }
  0x35   : > { %234 = vst.msk [vmem:[#allocation3 + $0x40] sm:$0x3] %vm173_vm1, %v9676_v0  ;;  %237 = vst.msk [vmem:[#allocation3 + $0x58] sm:$0x3] %vm173_vm1, %v9676_v0 }
  0x36   : > { %235 = vst.msk [vmem:[#allocation3 + $0x48] sm:$0xff] %vm170_vm0, %v9676_v0  ;;  %236 = vst.msk [vmem:[#allocation3 + $0x50] sm:$0xff] %vm170_vm0, %v9676_v0 }
  0x37   : > { %238 = vst.msk [vmem:[#allocation3 + $0x60] sm:$0xff] %vm170_vm0, %v9676_v0  ;;  %239 = vst.msk [vmem:[#allocation3 + $0x68] sm:$0xff] %vm170_vm0, %v9676_v0 }
  0x38   : > { %240 = vst.msk [vmem:[#allocation3 + $0x70] sm:$0x3] %vm173_vm1, %v9676_v0  ;;  %243 = vst.msk [vmem:[#allocation3 + $0x88] sm:$0x3] %vm173_vm1, %v9676_v0 }
  0x39   : > { %241 = vst.msk [vmem:[#allocation3 + $0x78] sm:$0xff] %vm170_vm0, %v9676_v0  ;;  %242 = vst.msk [vmem:[#allocation3 + $0x80] sm:$0xff] %vm170_vm0, %v9676_v0 }
  0x3a   : > { %244 = vst.msk [vmem:[#allocation3 + $0x90] sm:$0xff] %vm170_vm0, %v9676_v0  ;;  %245 = vst.msk [vmem:[#allocation3 + $0x98] sm:$0xff] %vm170_vm0, %v9676_v0 }
  0x3b   : > { %246 = vst.msk [vmem:[#allocation3 + $0xa0] sm:$0x3] %vm173_vm1, %v9676_v0  ;;  %249 = vst.msk [vmem:[#allocation3 + $0xb8] sm:$0x3] %vm173_vm1, %v9676_v0 }
  0x3c   : > { %247 = vst.msk [vmem:[#allocation3 + $0xa8] sm:$0xff] %vm170_vm0, %v9676_v0  ;;  %248 = vst.msk [vmem:[#allocation3 + $0xb0] sm:$0xff] %vm170_vm0, %v9676_v0 }
  0x3d   : > { %250 = vst.msk [vmem:[#allocation3 + $0xc0] sm:$0xff] %vm170_vm0, %v9676_v0  ;;  %251 = vst.msk [vmem:[#allocation3 + $0xc8] sm:$0xff] %vm170_vm0, %v9676_v0 }
  0x3e   : > { %252 = vst.msk [vmem:[#allocation3 + $0xd0] sm:$0x3] %vm173_vm1, %v9676_v0  ;;  %255 = vst.msk [vmem:[#allocation3 + $0xe8] sm:$0x3] %vm173_vm1, %v9676_v0 }
  0x3f   : > { %253 = vst.msk [vmem:[#allocation3 + $0xd8] sm:$0xff] %vm170_vm0, %v9676_v0  ;;  %254 = vst.msk [vmem:[#allocation3 + $0xe0] sm:$0xff] %vm170_vm0, %v9676_v0 }
  0x40   : > { %256 = vst.msk [vmem:[#allocation3 + $0xf0] sm:$0xff] %vm170_vm0, %v9676_v0  ;;  %257 = vst.msk [vmem:[#allocation3 + $0xf8] sm:$0xff] %vm170_vm0, %v9676_v0 }
  0x41   : > { %258 = vst.msk [vmem:[#allocation3 + $0x100] sm:$0x3] %vm173_vm1, %v9676_v0  ;;  %261 = vst.msk [vmem:[#allocation3 + $0x118] sm:$0x3] %vm173_vm1, %v9676_v0 }
  0x42   : > { %259 = vst.msk [vmem:[#allocation3 + $0x108] sm:$0xff] %vm170_vm0, %v9676_v0  ;;  %260 = vst.msk [vmem:[#allocation3 + $0x110] sm:$0xff] %vm170_vm0, %v9676_v0 }
  0x43   : > { %262 = vst.msk [vmem:[#allocation3 + $0x120] sm:$0xff] %vm170_vm0, %v9676_v0  ;;  %263 = vst.msk [vmem:[#allocation3 + $0x128] sm:$0xff] %vm170_vm0, %v9676_v0 }
  0x44   : > { %264 = vst.msk [vmem:[#allocation3 + $0x130] sm:$0x3] %vm173_vm1, %v9676_v0  ;;  %267 = vst.msk [vmem:[#allocation3 + $0x148] sm:$0x3] %vm173_vm1, %v9676_v0 }
  0x45   : > { %265 = vst.msk [vmem:[#allocation3 + $0x138] sm:$0xff] %vm170_vm0, %v9676_v0  ;;  %266 = vst.msk [vmem:[#allocation3 + $0x140] sm:$0xff] %vm170_vm0, %v9676_v0 }
  0x46   : > { %268 = vst.msk [vmem:[#allocation3 + $0x150] sm:$0xff] %vm170_vm0, %v9676_v0  ;;  %269 = vst.msk [vmem:[#allocation3 + $0x158] sm:$0xff] %vm170_vm0, %v9676_v0 }
  0x47   : > { %270 = vst.msk [vmem:[#allocation3 + $0x160] sm:$0x3] %vm173_vm1, %v9676_v0  ;;  %273 = vst.msk [vmem:[#allocation3 + $0x178] sm:$0x3] %vm173_vm1, %v9676_v0 }
  0x48   : > { %271 = vst.msk [vmem:[#allocation3 + $0x168] sm:$0xff] %vm170_vm0, %v9676_v0  ;;  %272 = vst.msk [vmem:[#allocation3 + $0x170] sm:$0xff] %vm170_vm0, %v9676_v0 }
  0x49   : > { %274 = vst.msk [vmem:[#allocation3 + $0x180] sm:$0xff] %vm170_vm0, %v9676_v0  ;;  %275 = vst.msk [vmem:[#allocation3 + $0x188] sm:$0xff] %vm170_vm0, %v9676_v0 }
  0x4a   : > { %276 = vst.msk [vmem:[#allocation3 + $0x190] sm:$0x3] %vm173_vm1, %v9676_v0  ;;  %279 = vst.msk [vmem:[#allocation3 + $0x1a8] sm:$0x3] %vm173_vm1, %v9676_v0 }
  0x4b   : > { %277 = vst.msk [vmem:[#allocation3 + $0x198] sm:$0xff] %vm170_vm0, %v9676_v0  ;;  %278 = vst.msk [vmem:[#allocation3 + $0x1a0] sm:$0xff] %vm170_vm0, %v9676_v0 }
  0x4c   : > { %316 = vst.msk [vmem:[#allocation3 + $0x31] sm:$0xff] %vm313_vm2, %v282_v6  ;;  %317 = vst.msk [vmem:[#allocation3 + $0x39] sm:$0xff] %vm313_vm2, %v283_v7  ;;  %v300_v6 = vld [vmem:[%s9984_s9 + $0xa0] sm:$0xff]  ;;  %v301_v7 = vld [vmem:[%s9984_s9 + $0xa8] sm:$0xff] }
  0x4d   : > { %314 = vst.msk [vmem:[#allocation3 + $0x19] sm:$0xff] %vm313_vm2, %v280_v8  ;;  %315 = vst.msk [vmem:[#allocation3 + $0x21] sm:$0xff] %vm313_vm2, %v281_v14  ;;  %v9532_v14 = vld [vmem:[%s13441_s1 + $0x70] sm:$0xff]  }
  0x4e   : > { %318 = vst.msk [vmem:[#allocation3 + $0x49] sm:$0xff] %vm313_vm2, %v284_v15  ;;  %319 = vst.msk [vmem:[#allocation3 + $0x51] sm:$0xff] %vm313_vm2, %v285_v17  ;;  %v9533_v17 = vld [vmem:[%s13441_s1 + $0x30] sm:$0xff]   ;;  %8653 = vmatprep.subr.bf16.mxu0 %v9532_v14 }
  0x4f   : > { %320 = vst.msk [vmem:[#allocation3 + $0x61] sm:$0xff] %vm313_vm2, %v286_v18  ;;  %321 = vst.msk [vmem:[#allocation3 + $0x69] sm:$0xff] %vm313_vm2, %v287_v19  ;;  %8654 = vmatpush3.bf16.msra.mxu0 %v9533_v17 }
  0x50   : > { %322 = vst.msk [vmem:[#allocation3 + $0x79] sm:$0xff] %vm313_vm2, %v288_v20  ;;  %323 = vst.msk [vmem:[#allocation3 + $0x81] sm:$0xff] %vm313_vm2, %v289_v21  ;;  %v9534_v21 = vld [vmem:[%s13441_s1 + $0x78] sm:$0xff]  }
  0x51   : > { %324 = vst.msk [vmem:[#allocation3 + $0x91] sm:$0xff] %vm313_vm2, %v290_v22  ;;  %325 = vst.msk [vmem:[#allocation3 + $0x99] sm:$0xff] %vm313_vm2, %v291_v23  ;;  %v9535_v22 = vld [vmem:[%s13441_s1 + $0x38] sm:$0xff]   ;;  %8655 = vmatprep.subr.bf16.mxu0 %v9534_v21 }
  0x52   : > { %326 = vst.msk [vmem:[#allocation3 + $0xa9] sm:$0xff] %vm313_vm2, %v292_v24  ;;  %327 = vst.msk [vmem:[#allocation3 + $0xb1] sm:$0xff] %vm313_vm2, %v293_v25  ;;  %v303_v23 = vld [vmem:[%s9984_s9 + $0xb8] sm:$0xff]  ;;  %v304_v24 = vld [vmem:[%s9984_s9 + $0xc0] sm:$0xff] }
  0x53   : > { %328 = vst.msk [vmem:[#allocation3 + $0xc1] sm:$0xff] %vm313_vm2, %v294_v26  ;;  %329 = vst.msk [vmem:[#allocation3 + $0xc9] sm:$0xff] %vm313_vm2, %v295_v27  ;;  %v635_v32 = vld [vmem:[#allocation3 + $0x30] sm:$0xff]  ;;  %v636_v33 = vld [vmem:[#allocation3 + $0x38] sm:$0xff]  ;;  %8656 = vmatpush3.bf16.msra.mxu0 %v9535_v22 }
  0x54   : > { %330 = vst.msk [vmem:[#allocation3 + $0xd9] sm:$0xff] %vm313_vm2, %v296_v28  ;;  %331 = vst.msk [vmem:[#allocation3 + $0xe1] sm:$0xff] %vm313_vm2, %v297_v29  ;;  %v10031_v34 = vpack.c.bf16 %v636_v33, %v635_v32  ;;  %v683_v35 = vld [vmem:[#allocation3 + $0x31] sm:$0xff]  ;;  %v684_v36 = vld [vmem:[#allocation3 + $0x39] sm:$0xff] }
  0x55   : > { %332 = vst.msk [vmem:[#allocation3 + $0xf1] sm:$0xff] %vm313_vm2, %v298_v30  ;;  %333 = vst.msk [vmem:[#allocation3 + $0xf9] sm:$0xff] %vm313_vm2, %v299_v31  ;;  %v490_v37 = vld [vmem:[#allocation3 + $0x18] sm:$0xff]  ;;  %v587_v39 = vld [vmem:[#allocation3 + $0x22] sm:$0xff]  ;;  %v10038_v45 = vpack.c.bf16 %v684_v36, %v683_v35 }
  0x56   : > { %v586_v38 = vld [vmem:[#allocation3 + $0x1a] sm:$0xff]  ;;  %987 = vrot.lane.b32.xlu1 %v10031_v34, %s9677_s17  ;;  %v588_v46 = vld [vmem:[#allocation3 + $0x32] sm:$0xff]  ;;  %v637_v50 = vld [vmem:[#allocation3 + $0x48] sm:$0xff]  ;;  %334 = vst.msk [vmem:[#allocation3 + $0x109] sm:$0xff] %vm313_vm2, %v300_v6 }
  0x57   : > { %v491_v40 = vld [vmem:[#allocation3 + $0x20] sm:$0xff]  ;;  %v618_v41 = vpack.c.bf16 %v587_v39, %v586_v38  ;;  %v638_v51 = vld [vmem:[#allocation3 + $0x50] sm:$0xff]  ;;  %v640_v2 = vld [vmem:[#allocation3 + $0x68] sm:$0xff]  ;;  %335 = vst.msk [vmem:[#allocation3 + $0x111] sm:$0xff] %vm313_vm2, %v301_v7 }
  0x58   : > { %v10035_v42 = vpack.c.bf16 %v491_v40, %v490_v37  ;;  %v396_v43 = vld [vmem:[#allocation3 + $0x19] sm:$0xff]  ;;  %v397_v44 = vld [vmem:[#allocation3 + $0x21] sm:$0xff]  ;;  %v10051_v55 = vpack.c.bf16 %v638_v51, %v637_v50  ;;  %v685_v56 = vld [vmem:[#allocation3 + $0x49] sm:$0xff]  ;;  %336 = vst.msk [vmem:[#allocation3 + $0x121] sm:$0xff] %vm313_vm2, %v302_v16 }
  0x59   : > { %939 = vrot.lane.b32.xlu0 %v618_v41, %s9678_s19  ;;  %v589_v47 = vld [vmem:[#allocation3 + $0x3a] sm:$0xff]  ;;  %v10042_v48 = vpack.c.bf16 %v397_v44, %v396_v43  ;;  %v596_v52 = vld [vmem:[#allocation3 + $0x92] sm:$0xff]  ;;  %v590_v59 = vld [vmem:[#allocation3 + $0x4a] sm:$0xff]  ;;  %337 = vst.msk [vmem:[#allocation3 + $0x129] sm:$0xff] %vm313_vm2, %v303_v23 }
  0x5a   : > { %891 = vrot.lane.b32.xlu1 %v10035_v42, %s9679_s20  ;;  %v619_v49 = vpack.c.bf16 %v589_v47, %v588_v46  ;;  %v597_v53 = vld [vmem:[#allocation3 + $0x9a] sm:$0xff]  ;;  %v686_v57 = vld [vmem:[#allocation3 + $0x51] sm:$0xff]  ;;  %v688_v10 = vld [vmem:[#allocation3 + $0x69] sm:$0xff]  ;;  %338 = vst.msk [vmem:[#allocation3 + $0x139] sm:$0xff] %vm313_vm2, %v304_v24 }
  0x5b   : > { %v10048_v54 = vpack.c.bf16 %v597_v53, %v596_v52  ;;  %v10058_v58 = vpack.c.bf16 %v686_v57, %v685_v56  ;;  %v591_v60 = vld [vmem:[#allocation3 + $0x52] sm:$0xff]  ;;  %v639_v0 = vld [vmem:[#allocation3 + $0x60] sm:$0xff]  ;;  %v593_v15 = vld [vmem:[#allocation3 + $0x6a] sm:$0xff] }
  0x5c   : > { %v10070_v63 = vpack.c.bf16 %v591_v60, %v590_v59  ;;  %v687_v4 = vld [vmem:[#allocation3 + $0x61] sm:$0xff]  ;;  %v10087_v8 = vpack.c.bf16 %v640_v2, %v639_v0  ;;  %v641_v19 = vld [vmem:[#allocation3 + $0x78] sm:$0xff]  ;;  %v308_v28 = vld [vmem:[%s9984_s9 + $0xe0] sm:$0xff] }
  0x5d   : > { %1035 = vrot.lane.b32.xlu0 %v10038_v45, %s9679_s20  ;;  %9303 = vmatprep.mubr.msk.bf16.mxu1 %vm170_vm0, %v10048_v54  ;;  %v592_v11 = vld [vmem:[#allocation3 + $0x62] sm:$0xff]  ;;  %v10100_v13 = vpack.c.bf16 %v688_v10, %v687_v4  ;;  %v305_v25 = vld [vmem:[%s9984_s9 + $0xc8] sm:$0xff]  ;;  %342 = vst.msk [vmem:[#allocation3 + $0x169] sm:$0xff] %vm313_vm2, %v308_v28  ;;  %v10148_v36 = vld [vmem:[%s13441_s1 + $0x80] sm:$0xff]  }
  0x5e   : > { %797 = vrot.lane.b32.xlu1 %v10042_v48, %s9678_s19  ;;  %v621_v18 = vpack.c.bf16 %v593_v15, %v592_v11  ;;  %v642_v20 = vld [vmem:[#allocation3 + $0x80] sm:$0xff]  ;;  %339 = vst.msk [vmem:[#allocation3 + $0x141] sm:$0xff] %vm313_vm2, %v305_v25  ;;  %v307_v27 = vld [vmem:[%s9984_s9 + $0xd8] sm:$0xff]  ;;  %v309_v31 = vld [vmem:[%s9984_s9 + $0xe8] sm:$0xff]  ;;  %9471 = vmatprep.subr.bf16.mxu1 %v10148_v36 }
  0x5f   : > { %v306_v26 = vld [vmem:[%s9984_s9 + $0xd0] sm:$0xff]  ;;  %341 = vst.msk [vmem:[#allocation3 + $0x159] sm:$0xff] %vm313_vm2, %v307_v27  ;;  %v10136_v32 = vpack.c.bf16 %v642_v20, %v641_v19  ;;  %343 = vst.msk [vmem:[#allocation3 + $0x171] sm:$0xff] %vm313_vm2, %v309_v31  ;;  %v311_v35 = vld [vmem:[%s9984_s9 + $0xf8] sm:$0xff]  ;;  %9291 = vmatprep.subr.bf16.mxu0 %v10148_v36  ;;  %9473 = vmatpush3.bf16.msra.mxu1 %v10148_v36 }
  0x60   : > { %v689_v29 = vld [vmem:[#allocation3 + $0x79] sm:$0xff]  ;;  %v690_v30 = vld [vmem:[#allocation3 + $0x81] sm:$0xff]  ;;  %340 = vst.msk [vmem:[#allocation3 + $0x151] sm:$0xff] %vm313_vm2, %v306_v26  ;;  %345 = vst.msk [vmem:[#allocation3 + $0x189] sm:$0xff] %vm313_vm2, %v311_v35 }
  0x61   : > { %941 = vrot.lane.b32.xlu0 %v619_v49, %s9678_s19  ;;  %v310_v33 = vld [vmem:[%s9984_s9 + $0xf0] sm:$0xff]  ;;  %v10152_v37 = vpack.c.bf16 %v690_v30, %v689_v29  ;;  %v644_v43 = vld [vmem:[#allocation3 + $0x98] sm:$0xff]  ;;  %v601_v53 = vld [vmem:[#allocation3 + $0xca] sm:$0xff] }
  0x62   : > { %845 = vrot.lane.b32.xlu1 %v618_v41, %s9677_s17  ;;  %344 = vst.msk [vmem:[#allocation3 + $0x181] sm:$0xff] %vm313_vm2, %v310_v33  ;;  %v594_v38 = vld [vmem:[#allocation3 + $0x7a] sm:$0xff]  ;;  %v595_v39 = vld [vmem:[#allocation3 + $0x82] sm:$0xff]  ;;  %v643_v41 = vld [vmem:[#allocation3 + $0x90] sm:$0xff] }
  0x63   : > { %v622_v40 = vpack.c.bf16 %v595_v39, %v594_v38  ;;  %v671_v44 = vpack.c.bf16 %v644_v43, %v643_v41  ;;  %v691_v46 = vld [vmem:[#allocation3 + $0x91] sm:$0xff]  ;;  %v692_v47 = vld [vmem:[#allocation3 + $0x99] sm:$0xff]  ;;  %v600_v52 = vld [vmem:[#allocation3 + $0xc2] sm:$0xff] }
  0x64   : > { %v599_v50 = vld [vmem:[#allocation3 + $0xb2] sm:$0xff]  ;;  %v10172_v56 = vpack.c.bf16 %v692_v47, %v691_v46  ;;  %v10179_v59 = vpack.c.bf16 %v601_v53, %v600_v52  ;;  %v645_v60 = vld [vmem:[#allocation3 + $0xa8] sm:$0xff]  ;;  %v602_v62 = vld [vmem:[#allocation3 + $0xda] sm:$0xff] }
  0x65   : > { %989 = vrot.lane.b32.xlu0 %v10051_v55, %s9677_s17  ;;  %v10167_v51 = vld [vmem:[%s13441_s1 + $0x88] sm:$0xff]   ;;  %v646_v61 = vld [vmem:[#allocation3 + $0xb0] sm:$0xff]  ;;  %v608_v11 = vld [vmem:[#allocation3 + $0x122] sm:$0xff] }
  0x66   : > { %893 = vrot.lane.b32.xlu1 %v10031_v34, %s9679_s20  ;;  %9472 = vmatprep.subr.bf16.mxu1 %v10167_v51  ;;  %v604_v0 = vld [vmem:[#allocation3 + $0xf2] sm:$0xff]  ;;  %v605_v1 = vld [vmem:[#allocation3 + $0xfa] sm:$0xff]  ;;  %v693_v2 = vld [vmem:[#allocation3 + $0xa9] sm:$0xff]  ;;  %v672_v4 = vpack.c.bf16 %v646_v61, %v645_v60 }
  0x67   : > { %9474 = vmatpush3.bf16.msra.mxu1 %v10167_v51  ;;  %v694_v3 = vld [vmem:[#allocation3 + $0xb1] sm:$0xff]  ;;  %v10194_v6 = vpack.c.bf16 %v605_v1, %v604_v0  ;;  %v647_v14 = vld [vmem:[#allocation3 + $0xc0] sm:$0xff]  ;;  %v648_v15 = vld [vmem:[#allocation3 + $0xc8] sm:$0xff] }
  0x68   : > { %v10199_v7 = vpack.c.bf16 %v694_v3, %v693_v2  ;;  %v606_v9 = vld [vmem:[#allocation3 + $0x10a] sm:$0xff]  ;;  %v607_v10 = vld [vmem:[#allocation3 + $0x112] sm:$0xff]  ;;  %v673_v20 = vpack.c.bf16 %v648_v15, %v647_v14  ;;  %v610_v21 = vld [vmem:[#allocation3 + $0x13a] sm:$0xff] }
  0x69   : > { %1037 = vrot.lane.b32.xlu0 %v10058_v58, %s9679_s20  ;;  %v609_v12 = vld [vmem:[#allocation3 + $0x12a] sm:$0xff]  ;;  %v10206_v16 = vpack.c.bf16 %v607_v10, %v606_v9  ;;  %v611_v22 = vld [vmem:[#allocation3 + $0x142] sm:$0xff]  ;;  %v612_v23 = vld [vmem:[#allocation3 + $0x152] sm:$0xff] }
  0x6a   : > { %799 = vrot.lane.b32.xlu1 %v10038_v45, %s9678_s19  ;;  %v10210_v17 = vpack.c.bf16 %v609_v12, %v608_v11  ;;  %v696_v19 = vld [vmem:[#allocation3 + $0xc9] sm:$0xff]  ;;  %v613_v24 = vld [vmem:[#allocation3 + $0x15a] sm:$0xff]  ;;  %v10223_v26 = vpack.c.bf16 %v611_v22, %v610_v21  ;;  %v699_v47 = vld [vmem:[#allocation3 + $0xf1] sm:$0xff] }
  0x6b   : > { %v10226_v27 = vpack.c.bf16 %v613_v24, %v612_v23  ;;  %v649_v28 = vld [vmem:[#allocation3 + $0xd8] sm:$0xff]  ;;  %v650_v29 = vld [vmem:[#allocation3 + $0xe0] sm:$0xff]  ;;  %v614_v30 = vld [vmem:[#allocation3 + $0x16a] sm:$0xff] }
  0x6c   : > { %v616_v31 = vld [vmem:[#allocation3 + $0x182] sm:$0xff]  ;;  %v617_v33 = vld [vmem:[#allocation3 + $0x18a] sm:$0xff]  ;;  %v697_v35 = vld [vmem:[#allocation3 + $0xd9] sm:$0xff]  ;;  %v674_v39 = vpack.c.bf16 %v650_v29, %v649_v28 }
  0x6d   : > { %943 = vrot.lane.b32.xlu0 %v10070_v63, %s9678_s19  ;;  %v698_v38 = vld [vmem:[#allocation3 + $0xe1] sm:$0xff]  ;;  %v10242_v41 = vpack.c.bf16 %v617_v33, %v616_v31  ;;  %v652_v46 = vld [vmem:[#allocation3 + $0xf8] sm:$0xff] }
  0x6e   : > { %847 = vrot.lane.b32.xlu1 %v619_v49, %s9677_s17  ;;  %v598_v49 = vld [vmem:[#allocation3 + $0xaa] sm:$0xff]  ;;  %v10247_v43 = vpack.c.bf16 %v698_v38, %v697_v35  ;;  %v346_v0 = vld [vmem:[#allocation3] sm:$0xff] }
  0x6f   : > { %v10175_v57 = vpack.c.bf16 %v599_v50, %v598_v49  ;;  %v700_v49 = vld [vmem:[#allocation3 + $0xf9] sm:$0xff]  ;;  %v653_v53 = vld [vmem:[#allocation3 + $0x108] sm:$0xff]  ;;  %v702_v61 = vld [vmem:[#allocation3 + $0x111] sm:$0xff] }
  0x70   : > { %v10264_v52 = vpack.c.bf16 %v700_v49, %v699_v47  ;;  %v655_v9 = vld [vmem:[#allocation3 + $0x120] sm:$0xff]  ;;  %v656_v10 = vld [vmem:[#allocation3 + $0x128] sm:$0xff] }
  0x71   : > { %991 = vrot.lane.b32.xlu0 %v10087_v8, %s9677_s17  ;;  %9304 = vmatmul.mubr.msk.bf16.vlgmr.msra.gmra.mrb[0].mxu1 %vm170_vm0, %v10175_v57  ;;  %v10292_v15 = vpack.c.bf16 %v656_v10, %v655_v9  ;;  %v707_v9 = vld [vmem:[#allocation3 + $0x151] sm:$0xff]  ;;  %v708_v10 = vld [vmem:[#allocation3 + $0x159] sm:$0xff] }
  0x72   : > { %895 = vrot.lane.b32.xlu1 %v10051_v55, %s9679_s20  ;;  %9307 = vmatprep.mubr.msk.bf16.mxu1 %vm170_vm0, %v10179_v59 }
  0x75   : > { %1039 = vrot.lane.b32.xlu0 %v10100_v13, %s9679_s20 }
  0x76   : > { %801 = vrot.lane.b32.xlu1 %v10058_v58, %s9678_s19 }
  0x79   : > { %945 = vrot.lane.b32.xlu0 %v621_v18, %s9678_s19 }
  0x7a   : > { %849 = vrot.lane.b32.xlu1 %v10070_v63, %s9677_s17  ;;  %v603_v63 = vld [vmem:[#allocation3 + $0xe2] sm:$0xff] }
  0x7b   : > { %v10191_v5 = vpack.c.bf16 %v603_v63, %v602_v62  ;;  %v347_v63 = vld [vmem:[#allocation3 + $0x8] sm:$0xff] }
  0x7c   : > { %v378_v3 = vpack.c.bf16 %v347_v63, %v346_v0 }
  0x7d   : > { %993 = vrot.lane.b32.xlu0 %v10136_v32, %s9677_s17  ;;  %9308 = vmatmul.mubr.msk.bf16.gmra.mrb[4].mxu1 %vm170_vm0, %v10191_v5 }
  0x7e   : > { %897 = vrot.lane.b32.xlu1 %v10087_v8, %s9679_s20  ;;  %9311 = vmatprep.mubr.msk.bf16.mxu1 %vm170_vm0, %v10194_v6 }
  0x81   : > { %1041 = vrot.lane.b32.xlu0 %v10152_v37, %s9679_s20 }
  0x82   : > { %803 = vrot.lane.b32.xlu1 %v10100_v13, %s9678_s19 }
  0x85   : > { %947 = vrot.lane.b32.xlu0 %v622_v40, %s9678_s19  ;;  %9312 = vmatmul.mubr.msk.bf16.gmra.mrb[8].mxu1 %vm170_vm0, %v10206_v16 }
  0x86   : > { %851 = vrot.lane.b32.xlu1 %v621_v18, %s9677_s17  ;;  %v695_v18 = vld [vmem:[#allocation3 + $0xc1] sm:$0xff]  ;;  %9315 = vmatprep.mubr.msk.bf16.mxu1 %vm170_vm0, %v10210_v17 }
  0x87   : > { %v10221_v25 = vpack.c.bf16 %v696_v19, %v695_v18  ;;  %v703_v19 = vld [vmem:[#allocation3 + $0x121] sm:$0xff] }
  0x89   : > { %995 = vrot.lane.b32.xlu0 %v671_v44, %s9677_s17 }
  0x8a   : > { %899 = vrot.lane.b32.xlu1 %v10136_v32, %s9679_s20 }
  0x8d   : > { %1043 = vrot.lane.b32.xlu0 %v10172_v56, %s9679_s20  ;;  %9316 = vmatmul.mubr.msk.bf16.gmra.mrb[12].mxu1 %vm170_vm0, %v10223_v26 }
  0x8e   : > { %805 = vrot.lane.b32.xlu1 %v10152_v37, %s9678_s19  ;;  %9319 = vmatprep.mubr.msk.bf16.mxu1 %vm170_vm0, %v10226_v27 }
  0x91   : > { %949 = vrot.lane.b32.xlu0 %v10048_v54, %s9678_s19 }
  0x92   : > { %853 = vrot.lane.b32.xlu1 %v622_v40, %s9677_s17 }
  0x93   : > { %v844_v62 = vpop.permute.xlu1 %843 }
  0x94   : > { %v796_v1 = vpop.permute.xlu0 %795 }
  0x95   : > { %997 = vrot.lane.b32.xlu0 %v672_v4, %s9677_s17 }
  0x96   : > { %901 = vrot.lane.b32.xlu1 %v671_v44, %s9679_s20  ;;  %v651_v44 = vld [vmem:[#allocation3 + $0xf0] sm:$0xff] }
  0x97   : > { %v10258_v50 = vpack.c.bf16 %v652_v46, %v651_v44  ;;  %v705_v44 = vld [vmem:[#allocation3 + $0x139] sm:$0xff]  ;;  %v706_v46 = vld [vmem:[#allocation3 + $0x141] sm:$0xff] }
  0x99   : > { %1045 = vrot.lane.b32.xlu0 %v10199_v7, %s9679_s20 }
  0x9a   : > { %807 = vrot.lane.b32.xlu1 %v10172_v56, %s9678_s19 }
  0x9d   : > { %951 = vrot.lane.b32.xlu0 %v10175_v57, %s9678_s19 }
  0x9e   : > { %855 = vrot.lane.b32.xlu1 %v10048_v54, %s9677_s17  ;;  %v615_v54 = vld [vmem:[#allocation3 + $0x172] sm:$0xff] }
  0x9f   : > { %v10238_v40 = vpack.c.bf16 %v615_v54, %v614_v30  ;;  %v657_v30 = vld [vmem:[#allocation3 + $0x138] sm:$0xff]  ;;  %v658_v54 = vld [vmem:[#allocation3 + $0x140] sm:$0xff] }
  0xa0   : > { %v10317_v35 = vpack.c.bf16 %v658_v54, %v657_v30  ;;  %v710_v30 = vld [vmem:[#allocation3 + $0x171] sm:$0xff] }
  0xa1   : > { %999 = vrot.lane.b32.xlu0 %v673_v20, %s9677_s17  ;;  %9320 = vmatmul.mubr.msk.bf16.gmra.mrb[16].mxu1 %vm170_vm0, %v10238_v40 }
  0xa2   : > { %903 = vrot.lane.b32.xlu1 %v672_v4, %s9679_s20  ;;  %9323 = vmatprep.mubr.msk.bf16.mxu1 %vm170_vm0, %v10242_v41 }
  0xa5   : > { %1047 = vrot.lane.b32.xlu0 %v10221_v25, %s9679_s20 }
  0xa6   : > { %809 = vrot.lane.b32.xlu1 %v10199_v7, %s9678_s19 }
  0xa9   : > { %953 = vrot.lane.b32.xlu0 %v10179_v59, %s9678_s19 }
  0xaa   : > { %857 = vrot.lane.b32.xlu1 %v10175_v57, %s9677_s17  ;;  %v654_v57 = vld [vmem:[#allocation3 + $0x110] sm:$0xff] }
  0xab   : > { %v10273_v60 = vpack.c.bf16 %v654_v57, %v653_v53 }
  0xad   : > { %1001 = vrot.lane.b32.xlu0 %v674_v39, %s9677_s17 }
  0xae   : > { %905 = vrot.lane.b32.xlu1 %v673_v20, %s9679_s20  ;;  %v704_v20 = vld [vmem:[#allocation3 + $0x129] sm:$0xff] }
  0xaf   : > { %v10302_v28 = vpack.c.bf16 %v704_v20, %v703_v19  ;;  %v661_v19 = vld [vmem:[#allocation3 + $0x168] sm:$0xff]  ;;  %v662_v20 = vld [vmem:[#allocation3 + $0x170] sm:$0xff] }
  0xb1   : > { %1049 = vrot.lane.b32.xlu0 %v10247_v43, %s9679_s20 }
  0xb2   : > { %811 = vrot.lane.b32.xlu1 %v10221_v25, %s9678_s19 }
  0xb5   : > { %955 = vrot.lane.b32.xlu0 %v10191_v5, %s9678_s19 }
  0xb6   : > { %859 = vrot.lane.b32.xlu1 %v10179_v59, %s9677_s17  ;;  %v701_v59 = vld [vmem:[#allocation3 + $0x109] sm:$0xff] }
  0xb7   : > { %v10279_v2 = vpack.c.bf16 %v702_v61, %v701_v59  ;;  %v659_v59 = vld [vmem:[#allocation3 + $0x150] sm:$0xff]  ;;  %v660_v61 = vld [vmem:[#allocation3 + $0x158] sm:$0xff] }
  0xb9   : > { %1003 = vrot.lane.b32.xlu0 %v10258_v50, %s9677_s17 }
  0xba   : > { %907 = vrot.lane.b32.xlu1 %v674_v39, %s9679_s20 }
  0xbd   : > { %1051 = vrot.lane.b32.xlu0 %v10264_v52, %s9679_s20 }
  0xbe   : > { %813 = vrot.lane.b32.xlu1 %v10247_v43, %s9678_s19 }
  0xc1   : > { %957 = vrot.lane.b32.xlu0 %v10194_v6, %s9678_s19 }
  0xc2   : > { %861 = vrot.lane.b32.xlu1 %v10191_v5, %s9677_s17  ;;  %v1069_v5 = vsel %vm170_vm0, %v378_v3, %v796_v1  ;;  %v10341_v1 = vpack.c.bf16 %v660_v61, %v659_v59  ;;  %v711_v61 = vld [vmem:[#allocation3 + $0x181] sm:$0xff] }
  0xc3   : > { %v1117_v18 = vsel %vm1115_vm3, %v1069_v5, %v844_v62 }
  0xc5   : > { %1005 = vrot.lane.b32.xlu0 %v10273_v60, %s9677_s17 }
  0xc6   : > { %909 = vrot.lane.b32.xlu1 %v10258_v50, %s9679_s20 }
  0xc8   : > { %v988_v4 = vpop.permute.xlu1 %987 }
  0xc9   : > { %1053 = vrot.lane.b32.xlu0 %v10279_v2, %s9679_s20 }
  0xca   : > { %815 = vrot.lane.b32.xlu1 %v10264_v52, %s9678_s19 }
  0xcb   : > { %v940_v11 = vpop.permute.xlu0 %939 }
  0xcc   : > { %v1199_v12 = vsel %vm170_vm0, %v10042_v48, %v940_v11  ;;  %v892_v14 = vpop.permute.xlu1 %891 }
  0xcd   : > { %959 = vrot.lane.b32.xlu0 %v10206_v16, %s9678_s19  ;;  %v1246_v22 = vsel %vm1115_vm3, %v1199_v12, %v988_v4  ;;  %v1150_v23 = vsel %vm1148_vm4, %v1117_v18, %v892_v14 }
  0xce   : > { %863 = vrot.lane.b32.xlu1 %v10194_v6, %s9677_s17 }
  0xcf   : > { %v1036_v21 = vpop.permute.xlu0 %1035 }
  0xd0   : > { %v1278_v48 = vsel %vm1148_vm4, %v1246_v22, %v1036_v21  ;;  %v798_v24 = vpop.permute.xlu1 %797 }
  0xd1   : > { %1007 = vrot.lane.b32.xlu0 %v10292_v15, %s9677_s17  ;;  %1556 = vmatprep.mubr.bf16.mxu0 %v1278_v48  ;;  %v1072_v33 = vsel %vm170_vm0, %v10035_v42, %v798_v24  ;;  %v10365_v48 = vpack.c.bf16 %v662_v20, %v661_v19  ;;  %v713_v19 = vld [vmem:[#allocation3 + $0x199] sm:$0xff]  ;;  %v714_v20 = vld [vmem:[#allocation3 + $0x1a1] sm:$0xff] }
  0xd2   : > { %1557 = vmatmul.mubr.bf16.vlgmr.msra.gmra.mrb[0].mxu0 %v1150_v23  ;;  %911 = vrot.lane.b32.xlu1 %v10273_v60, %s9679_s20 }
  0xd3   : > { %v942_v29 = vpop.permute.xlu0 %941  ;;  %9292 = vmatpush3.bf16.msra.mxu0 %v10148_v36 }
  0xd4   : > { %9293 = vmatprep.subr.bf16.mxu0 %v10167_v51  ;;  %v846_v6 = vpop.permute.xlu1 %845  ;;  %v1202_v38 = vsel %vm170_vm0, %v10038_v45, %v942_v29  ;;  %v10329_v45 = vpack.c.bf16 %v706_v46, %v705_v44  ;;  %v664_v44 = vld [vmem:[#allocation3 + $0x188] sm:$0xff] }
  0xd5   : > { %1055 = vrot.lane.b32.xlu0 %v10302_v28, %s9679_s20  ;;  %v1119_v39 = vsel %vm1115_vm3, %v1072_v33, %v846_v6  ;;  %v709_v6 = vld [vmem:[#allocation3 + $0x169] sm:$0xff] }
  0xd6   : > { %817 = vrot.lane.b32.xlu1 %v10279_v2, %s9678_s19 }
  0xd7   : > { %v990_v31 = vpop.permute.xlu0 %989  ;;  %9294 = vmatpush3.bf16.msra.mxu0 %v10167_v51 }
  0xd8   : > { %v894_v36 = vpop.permute.xlu1 %893  ;;  %v1248_v47 = vsel %vm1115_vm3, %v1202_v38, %v990_v31 }
  0xd9   : > { %961 = vrot.lane.b32.xlu0 %v10210_v17, %s9678_s19  ;;  %v1153_v42 = vsel %vm1148_vm4, %v1119_v39, %v894_v36  ;;  %v663_v39 = vld [vmem:[#allocation3 + $0x180] sm:$0xff] }
  0xda   : > { %865 = vrot.lane.b32.xlu1 %v10206_v16, %s9677_s17 }
  0xdb   : > { %v1038_v49 = vpop.permute.xlu0 %1037 }
  0xdc   : > { %v1281_v51 = vsel %vm1148_vm4, %v1248_v47, %v1038_v49  ;;  %v800_v53 = vpop.permute.xlu1 %799  ;;  %v761_v47 = vld [vmem:[#allocation3 + $0x19a] sm:$0xff]  ;;  %v762_v49 = vld [vmem:[#allocation3 + $0x1a2] sm:$0xff] }
  0xdd   : > { %1009 = vrot.lane.b32.xlu0 %v10317_v35, %s9677_s17  ;;  %1564 = vmatprep.mubr.bf16.mxu0 %v1281_v51  ;;  %v1075_v63 = vsel %vm170_vm0, %v10031_v34, %v800_v53 }
  0xde   : > { %1565 = vmatmul.mubr.bf16.gmra.mrb[4].mxu0 %v1153_v42  ;;  %913 = vrot.lane.b32.xlu1 %v10292_v15, %s9679_s20  ;;  %v778_v42 = vpack.c.bf16 %v762_v49, %v761_v47  ;;  %v360_v47 = vld [vmem:[#allocation3 + $0xa8] sm:$0xff]  ;;  %v361_v49 = vld [vmem:[#allocation3 + $0xb0] sm:$0xff] }
  0xdf   : > { %v944_v57 = vpop.permute.xlu0 %943 }
  0xe0   : > { %v848_v16 = vpop.permute.xlu1 %847  ;;  %v1205_v3 = vsel %vm170_vm0, %v10058_v58, %v944_v57  ;;  %v10353_v58 = vpack.c.bf16 %v708_v10, %v707_v9  ;;  %v681_v57 = vpack.c.bf16 %v664_v44, %v663_v39  ;;  %9324 = vmatmul.mubr.msk.bf16.gmra.mrb[20].mxu1 %vm170_vm0, %v778_v42 }
  0xe1   : > { %1057 = vrot.lane.b32.xlu0 %v10329_v45, %s9679_s20  ;;  %v1121_v4 = vsel %vm1115_vm3, %v1075_v63, %v848_v16 }
  0xe2   : > { %819 = vrot.lane.b32.xlu1 %v10302_v28, %s9678_s19 }
  0xe3   : > { %v992_v62 = vpop.permute.xlu0 %991 }
  0xe4   : > { %v896_v0 = vpop.permute.xlu1 %895  ;;  %v1250_v5 = vsel %vm1115_vm3, %v1205_v3, %v992_v62  ;;  %v712_v62 = vld [vmem:[#allocation3 + $0x189] sm:$0xff] }
  0xe5   : > { %963 = vrot.lane.b32.xlu0 %v10223_v26, %s9678_s19  ;;  %v1156_v34 = vsel %vm1148_vm4, %v1121_v4, %v896_v0  ;;  %v10399_v4 = vpack.c.bf16 %v712_v62, %v711_v61 }
  0xe6   : > { %867 = vrot.lane.b32.xlu1 %v10210_v17, %s9677_s17 }
  0xe7   : > { %v1040_v11 = vpop.permute.xlu0 %1039 }
  0xe8   : > { %v1284_v12 = vsel %vm1148_vm4, %v1250_v5, %v1040_v11  ;;  %v802_v14 = vpop.permute.xlu1 %801  ;;  %v666_v5 = vld [vmem:[#allocation3 + $0x1a0] sm:$0xff] }
  0xe9   : > { %1011 = vrot.lane.b32.xlu0 %v10341_v1, %s9677_s17  ;;  %1572 = vmatprep.mubr.bf16.mxu0 %v1284_v12  ;;  %v1078_v22 = vsel %vm170_vm0, %v10051_v55, %v802_v14 }
  0xea   : > { %1573 = vmatmul.mubr.bf16.gmra.mrb[8].mxu0 %v1156_v34  ;;  %915 = vrot.lane.b32.xlu1 %v10317_v35, %s9679_s20 }
  0xeb   : > { %v946_v18 = vpop.permute.xlu0 %945 }
  0xec   : > { %v850_v17 = vpop.permute.xlu1 %849  ;;  %v1208_v24 = vsel %vm170_vm0, %v10100_v13, %v946_v18  ;;  %v10377_v13 = vpack.c.bf16 %v710_v30, %v709_v6 }
  0xed   : > { %1059 = vrot.lane.b32.xlu0 %v10353_v58, %s9679_s20  ;;  %v1123_v29 = vsel %vm1115_vm3, %v1078_v22, %v850_v17 }
  0xee   : > { %821 = vrot.lane.b32.xlu1 %v10329_v45, %s9678_s19 }
  0xef   : > { %v994_v21 = vpop.permute.xlu0 %993 }
  0xf0   : > { %v898_v23 = vpop.permute.xlu1 %897  ;;  %v1252_v54 = vsel %vm1115_vm3, %v1208_v24, %v994_v21  ;;  %v730_v24 = vpack.c.bf16 %v714_v20, %v713_v19 }
  0xf1   : > { %965 = vrot.lane.b32.xlu0 %v10226_v27, %s9678_s19  ;;  %v1159_v55 = vsel %vm1148_vm4, %v1123_v29, %v898_v23  ;;  %v359_v29 = vld [vmem:[#allocation3 + $0x98] sm:$0xff] }
  0xf2   : > { %869 = vrot.lane.b32.xlu1 %v10223_v26, %s9677_s17 }
  0xf3   : > { %v1042_v31 = vpop.permute.xlu0 %1041 }
  0xf4   : > { %v1287_v33 = vsel %vm1148_vm4, %v1252_v54, %v1042_v31  ;;  %v804_v36 = vpop.permute.xlu1 %803 }
  0xf5   : > { %1013 = vrot.lane.b32.xlu0 %v10365_v48, %s9677_s17  ;;  %1580 = vmatprep.mubr.bf16.mxu0 %v1287_v33  ;;  %v1081_v51 = vsel %vm170_vm0, %v10087_v8, %v804_v36 }
  0xf6   : > { %1581 = vmatmul.mubr.bf16.gmra.mrb[12].mxu0 %v1159_v55  ;;  %917 = vrot.lane.b32.xlu1 %v10341_v1, %s9679_s20 }
  0xf7   : > { %v948_v38 = vpop.permute.xlu0 %947 }
  0xf8   : > { %v852_v26 = vpop.permute.xlu1 %851  ;;  %v1211_v16 = vsel %vm170_vm0, %v10152_v37, %v948_v38 }
  0xf9   : > { %1061 = vrot.lane.b32.xlu0 %v10377_v13, %s9679_s20  ;;  %v1125_v59 = vsel %vm1115_vm3, %v1081_v51, %v852_v26  ;;  %v385_v51 = vpack.c.bf16 %v361_v49, %v360_v47 }
  0xfa   : > { %823 = vrot.lane.b32.xlu1 %v10353_v58, %s9678_s19 }
  0xfb   : > { %v996_v46 = vpop.permute.xlu0 %995 }
  0xfc   : > { %v900_v53 = vpop.permute.xlu1 %899  ;;  %v1254_v63 = vsel %vm1115_vm3, %v1211_v16, %v996_v46 }
  0xfd   : > { %967 = vrot.lane.b32.xlu0 %v10238_v40, %s9678_s19  ;;  %v1162_v8 = vsel %vm1148_vm4, %v1125_v59, %v900_v53 }
  0xfe   : > { %871 = vrot.lane.b32.xlu1 %v10226_v27, %s9677_s17  ;;  %v665_v27 = vld [vmem:[#allocation3 + $0x198] sm:$0xff] }
  0xff   : > { %v1044_v0 = vpop.permute.xlu0 %1043  ;;  %v682_v14 = vpack.c.bf16 %v666_v5, %v665_v27 }
 0x100   : > { %v1290_v3 = vsel %vm1148_vm4, %v1254_v63, %v1044_v0  ;;  %v806_v37 = vpop.permute.xlu1 %805 }
 0x101   : > { %1015 = vrot.lane.b32.xlu0 %v681_v57, %s9677_s17  ;;  %1588 = vmatprep.mubr.bf16.mxu0 %v1290_v3  ;;  %v1084_v34 = vsel %vm170_vm0, %v10136_v32, %v806_v37  ;;  %v362_v37 = vld [vmem:[#allocation3 + $0xc0] sm:$0xff] }
 0x102   : > { %1589 = vmatmul.mubr.bf16.gmra.mrb[16].mxu0 %v1162_v8  ;;  %919 = vrot.lane.b32.xlu1 %v10365_v48, %s9679_s20 }
 0x103   : > { %v950_v9 = vpop.permute.xlu0 %949 }
 0x104   : > { %v854_v10 = vpop.permute.xlu1 %853  ;;  %v1214_v18 = vsel %vm170_vm0, %v10172_v56, %v950_v9  ;;  %v358_v56 = vld [vmem:[#allocation3 + $0x90] sm:$0xff]  ;;  %v363_v9 = vld [vmem:[#allocation3 + $0xc8] sm:$0xff] }
 0x105   : > { %1063 = vrot.lane.b32.xlu0 %v10399_v4, %s9679_s20  ;;  %v1127_v17 = vsel %vm1115_vm3, %v1084_v34, %v854_v10  ;;  %v384_v30 = vpack.c.bf16 %v359_v29, %v358_v56  ;;  %v386_v27 = vpack.c.bf16 %v363_v9, %v362_v37 }
 0x106   : > { %825 = vrot.lane.b32.xlu1 %v10377_v13, %s9678_s19 }
 0x107   : > { %v998_v11 = vpop.permute.xlu0 %997 }
 0x108   : > { %v902_v12 = vpop.permute.xlu1 %901  ;;  %v1256_v21 = vsel %vm1115_vm3, %v1214_v18, %v998_v11 }
 0x109   : > { %969 = vrot.lane.b32.xlu0 %v10242_v41, %s9678_s19  ;;  %v1165_v32 = vsel %vm1148_vm4, %v1127_v17, %v902_v12 }
 0x10a   : > { %873 = vrot.lane.b32.xlu1 %v10238_v40, %s9677_s17 }
 0x10b   : > { %v1046_v22 = vpop.permute.xlu0 %1045 }
 0x10c   : > { %v1293_v23 = vsel %vm1148_vm4, %v1256_v21, %v1046_v22  ;;  %v808_v41 = vpop.permute.xlu1 %807  ;;  %v364_v22 = vld [vmem:[#allocation3 + $0xd8] sm:$0xff] }
 0x10d   : > { %1017 = vrot.lane.b32.xlu0 %v682_v14, %s9677_s17  ;;  %1596 = vmatprep.mubr.bf16.mxu0 %v1293_v23  ;;  %v1087_v31 = vsel %vm170_vm0, %v384_v30, %v808_v41 }
 0x10e   : > { %1597 = vmatmul.mubr.bf16.gmra.mrb[20].mxu0 %v1165_v32  ;;  %921 = vrot.lane.b32.xlu1 %v681_v57, %s9679_s20  ;;  %v365_v32 = vld [vmem:[#allocation3 + $0xe0] sm:$0xff] }
 0x10f   : > { %v952_v6 = vpop.permute.xlu0 %951  ;;  %v387_v41 = vpack.c.bf16 %v365_v32, %v364_v22 }
 0x110   : > { %v856_v54 = vpop.permute.xlu1 %855  ;;  %v1217_v33 = vsel %vm170_vm0, %v10199_v7, %v952_v6 }
 0x111   : > { %1065 = vrot.lane.b32.xlu0 %v730_v24, %s9679_s20  ;;  %v1129_v36 = vsel %vm1115_vm3, %v1087_v31, %v856_v54 }
 0x113   : > { %v1000_v40 = vpop.permute.xlu0 %999 }
 0x114   : > { %v904_v55 = vpop.permute.xlu1 %903  ;;  %v1258_v38 = vsel %vm1115_vm3, %v1217_v33, %v1000_v40 }
 0x115   : > { %v1168_v39 = vsel %vm1148_vm4, %v1129_v36, %v904_v55 }
 0x117   : > { %v1048_v26 = vpop.permute.xlu0 %1047 }
 0x118   : > { %v1296_v44 = vsel %vm1148_vm4, %v1258_v38, %v1048_v26  ;;  %v810_v46 = vpop.permute.xlu1 %809 }
 0x119   : > { %1604 = vmatprep.mubr.bf16.mxu0 %v1296_v44  ;;  %v1090_v7 = vsel %vm170_vm0, %v385_v51, %v810_v46 }
 0x11a   : > { %1605 = vmatmul.mubr.bf16.gmra.mrb[24].mxu0 %v1168_v39 }
 0x11b   : > { %v954_v42 = vpop.permute.xlu0 %953 }
 0x11c   : > { %v858_v53 = vpop.permute.xlu1 %857  ;;  %v1220_v59 = vsel %vm170_vm0, %v10221_v25, %v954_v42 }
 0x11d   : > { %v1131_v61 = vsel %vm1115_vm3, %v1090_v7, %v858_v53 }
 0x11f   : > { %v1002_v57 = vpop.permute.xlu0 %1001 }
 0x120   : > { %v906_v16 = vpop.permute.xlu1 %905  ;;  %v1260_v62 = vsel %vm1115_vm3, %v1220_v59, %v1002_v57 }
 0x121   : > { %v1171_v0 = vsel %vm1148_vm4, %v1131_v61, %v906_v16 }
 0x123   : > { %v1050_v63 = vpop.permute.xlu0 %1049 }
 0x124   : > { %v1299_v8 = vsel %vm1148_vm4, %v1260_v62, %v1050_v63  ;;  %v812_v3 = vpop.permute.xlu1 %811 }
 0x125   : > { %1612 = vmatprep.mubr.bf16.mxu0 %v1299_v8  ;;  %v1093_v25 = vsel %vm170_vm0, %v386_v27, %v812_v3 }
 0x126   : > { %1613 = vmatmul.mubr.bf16.gmra.mrb[28].mxu0 %v1171_v0 }
 0x127   : > { %v956_v10 = vpop.permute.xlu0 %955 }
 0x128   : > { %v860_v5 = vpop.permute.xlu1 %859  ;;  %v1223_v12 = vsel %vm170_vm0, %v10247_v43, %v956_v10 }
 0x129   : > { %v1133_v14 = vsel %vm1115_vm3, %v1093_v25, %v860_v5 }
 0x12b   : > { %v1004_v11 = vpop.permute.xlu0 %1003 }
 0x12c   : > { %v908_v34 = vpop.permute.xlu1 %907  ;;  %v1262_v18 = vsel %vm1115_vm3, %v1223_v12, %v1004_v11 }
 0x12d   : > { %v1174_v19 = vsel %vm1148_vm4, %v1133_v14, %v908_v34 }
 0x12f   : > { %v1052_v17 = vpop.permute.xlu0 %1051 }
 0x130   : > { %v1302_v20 = vsel %vm1148_vm4, %v1262_v18, %v1052_v17  ;;  %v814_v21 = vpop.permute.xlu1 %813 }
 0x131   : > { %1620 = vmatprep.mubr.bf16.mxu0 %v1302_v20  ;;  %v1096_v43 = vsel %vm170_vm0, %v387_v41, %v814_v21  ;;  %v2024_v20 = vld [vmem:[#allocation2 + $0x9] sm:$0xff] }
 0x132   : > { %1621 = vmatmul.mubr.bf16.gmra.mrb[32].mxu0 %v1174_v19  ;;  %v2023_v19 = vld [vmem:[#allocation2 + $0x1] sm:$0xff]  ;;  %v2072_v41 = vld [vmem:[#allocation2 + $0xa] sm:$0xff] }
 0x133   : > { %v958_v23 = vpop.permute.xlu0 %957  ;;  %v2055_v21 = vpack.c.bf16 %v2024_v20, %v2023_v19 }
 0x134   : > { %v862_v24 = vpop.permute.xlu1 %861  ;;  %v1226_v6 = vsel %vm170_vm0, %v10264_v52, %v958_v23  ;;  %v2071_v23 = vld [vmem:[#allocation2 + $0x2] sm:$0xff] }
 0x135   : > { %v1135_v30 = vsel %vm1115_vm3, %v1096_v43, %v862_v24  ;;  %2424 = vrot.lane.b32.xlu1 %v2055_v21, %s9678_s19  ;;  %v2103_v24 = vpack.c.bf16 %v2072_v41, %v2071_v23 }
 0x137   : > { %v1006_v56 = vpop.permute.xlu0 %1005 }
 0x138   : > { %v910_v29 = vpop.permute.xlu1 %909  ;;  %v1264_v54 = vsel %vm1115_vm3, %v1226_v6, %v1006_v56 }
 0x139   : > { %v1177_v31 = vsel %vm1148_vm4, %v1135_v30, %v910_v29  ;;  %2472 = vrot.lane.b32.xlu1 %v2103_v24, %s9677_s17 }
 0x13b   : > { %v1054_v40 = vpop.permute.xlu0 %1053 }
 0x13c   : > { %v1305_v55 = vsel %vm1148_vm4, %v1264_v54, %v1054_v40  ;;  %v816_v33 = vpop.permute.xlu1 %815 }
 0x13d   : > { %1628 = vmatprep.mubr.bf16.mxu0 %v1305_v55  ;;  %v1099_v39 = vsel %vm170_vm0, %v10258_v50, %v816_v33 }
 0x13e   : > { %1629 = vmatmul.mubr.bf16.gmra.mrb[36].mxu0 %v1177_v31 }
 0x13f   : > { %v960_v36 = vpop.permute.xlu0 %959 }
 0x140   : > { %v864_v38 = vpop.permute.xlu1 %863  ;;  %v1229_v52 = vsel %vm170_vm0, %v10279_v2, %v960_v36 }
 0x141   : > { %v1137_v46 = vsel %vm1115_vm3, %v1099_v39, %v864_v38 }
 0x143   : > { %v1008_v26 = vpop.permute.xlu0 %1007 }
 0x144   : > { %v912_v44 = vpop.permute.xlu1 %911  ;;  %v1266_v47 = vsel %vm1115_vm3, %v1229_v52, %v1008_v26  ;;  %v10473_v12 = vpop.f32.mrb[0].mxu1 }
 0x145   : > { %v1180_v42 = vsel %vm1148_vm4, %v1137_v46, %v912_v44  ;;  %v10476_v18 = vpop.f32.mrb[1].mxu1 }
 0x147   : > { %v1056_v49 = vpop.permute.xlu0 %1055 }
 0x148   : > { %v1308_v51 = vsel %vm1148_vm4, %v1266_v47, %v1056_v49  ;;  %v818_v53 = vpop.permute.xlu1 %817 }
 0x149   : > { %1636 = vmatprep.mubr.bf16.mxu0 %v1308_v51  ;;  %v1102_v50 = vsel %vm170_vm0, %v10273_v60, %v818_v53 }
 0x14a   : > { %1637 = vmatmul.mubr.bf16.gmra.mrb[40].mxu0 %v1180_v42 }
 0x14b   : > { %v962_v57 = vpop.permute.xlu0 %961 }
 0x14c   : > { %v866_v7 = vpop.permute.xlu1 %865  ;;  %v1232_v2 = vsel %vm170_vm0, %v10302_v28, %v962_v57 }
 0x14d   : > { %v1139_v61 = vsel %vm1115_vm3, %v1102_v50, %v866_v7 }
 0x14f   : > { %v1010_v16 = vpop.permute.xlu0 %1009 }
 0x150   : > { %v914_v59 = vpop.permute.xlu1 %913  ;;  %v1268_v62 = vsel %vm1115_vm3, %v1232_v2, %v1010_v16  ;;  %v732_v2 = vld [vmem:[#allocation3 + $0x3a] sm:$0xff] }
 0x151   : > { %v1183_v0 = vsel %vm1148_vm4, %v1139_v61, %v914_v59 }
 0x153   : > { %v1058_v63 = vpop.permute.xlu0 %1057 }
 0x154   : > { %v1311_v8 = vsel %vm1148_vm4, %v1268_v62, %v1058_v63  ;;  %v820_v3 = vpop.permute.xlu1 %819 }
 0x155   : > { %1644 = vmatprep.mubr.bf16.mxu0 %v1311_v8  ;;  %v1105_v60 = vsel %vm170_vm0, %v10292_v15, %v820_v3  ;;  %v10478_v15 = vpop.f32.mrb[2].mxu1 }
 0x156   : > { %1645 = vmatmul.mubr.bf16.gmra.mrb[44].mxu0 %v1183_v0 }
 0x157   : > { %v964_v37 = vpop.permute.xlu0 %963 }
 0x158   : > { %v868_v9 = vpop.permute.xlu1 %867  ;;  %v1235_v28 = vsel %vm170_vm0, %v10329_v45, %v964_v37  ;;  %v10480_v45 = vpop.f32.mrb[3].mxu1 }
 0x159   : > { %v1141_v5 = vsel %vm1115_vm3, %v1105_v60, %v868_v9  ;;  %v10492_v26 = vpop.f32.mrb[4].mxu1  ;;  %v735_v60 = vld [vmem:[#allocation3 + $0x62] sm:$0xff] }
 0x15b   : > { %v1012_v10 = vpop.permute.xlu0 %1011 }
 0x15c   : > { %v916_v27 = vpop.permute.xlu1 %915  ;;  %v1270_v11 = vsel %vm1115_vm3, %v1235_v28, %v1012_v10  ;;  %v733_v10 = vld [vmem:[#allocation3 + $0x4a] sm:$0xff] }
 0x15d   : > { %v1186_v34 = vsel %vm1148_vm4, %v1141_v5, %v916_v27  ;;  %v736_v27 = vld [vmem:[#allocation3 + $0x6a] sm:$0xff] }
 0x15f   : > { %v1060_v25 = vpop.permute.xlu0 %1059 }
 0x160   : > { %v1314_v14 = vsel %vm1148_vm4, %v1270_v11, %v1060_v25  ;;  %v822_v17 = vpop.permute.xlu1 %821  ;;  %v765_v11 = vpack.c.bf16 %v736_v27, %v735_v60 }
 0x161   : > { %1652 = vmatprep.mubr.bf16.mxu0 %v1314_v14  ;;  %v1108_v43 = vsel %vm170_vm0, %v10317_v35, %v822_v17  ;;  %v10494_v35 = vpop.f32.mrb[5].mxu1  ;;  %v737_v14 = vld [vmem:[#allocation3 + $0x7a] sm:$0xff]  ;;  %v738_v17 = vld [vmem:[#allocation3 + $0x82] sm:$0xff] }
 0x162   : > { %1653 = vmatmul.mubr.bf16.gmra.mrb[48].mxu0 %v1186_v34  ;;  %v766_v19 = vpack.c.bf16 %v738_v17, %v737_v14 }
 0x163   : > { %v966_v22 = vpop.permute.xlu0 %965 }
 0x164   : > { %v870_v32 = vpop.permute.xlu1 %869  ;;  %v1238_v6 = vsel %vm170_vm0, %v10353_v58, %v966_v22  ;;  %v10496_v58 = vpop.f32.mrb[6].mxu1 }
 0x165   : > { %v1143_v30 = vsel %vm1115_vm3, %v1108_v43, %v870_v32  ;;  %v10498_v44 = vpop.f32.mrb[7].mxu1 }
 0x166   : > { %v10517_v28 = vpop.f32.mrb[8].mxu1 }
 0x167   : > { %v1014_v56 = vpop.permute.xlu0 %1013  ;;  %v10519_v5 = vpop.f32.mrb[9].mxu1 }
 0x168   : > { %v918_v29 = vpop.permute.xlu1 %917  ;;  %v1272_v54 = vsel %vm1115_vm3, %v1238_v6, %v1014_v56  ;;  %v10521_v25 = vpop.f32.mrb[10].mxu1 }
 0x169   : > { %v1189_v31 = vsel %vm1148_vm4, %v1143_v30, %v918_v29  ;;  %v10523_v34 = vpop.f32.mrb[11].mxu1 }
 0x16a   : > { %v10528_v20 = vpop.f32.mrb[12].mxu1 }
 0x16b   : > { %v1062_v40 = vpop.permute.xlu0 %1061  ;;  %v10530_v21 = vpop.f32.mrb[13].mxu1 }
 0x16c   : > { %v1317_v55 = vsel %vm1148_vm4, %v1272_v54, %v1062_v40  ;;  %v824_v33 = vpop.permute.xlu1 %823  ;;  %v10532_v22 = vpop.f32.mrb[14].mxu1 }
 0x16d   : > { %1660 = vmatprep.mubr.bf16.mxu0 %v1317_v55  ;;  %v1111_v52 = vsel %vm170_vm0, %v10341_v1, %v824_v33  ;;  %v731_v1 = vld [vmem:[#allocation3 + $0x32] sm:$0xff]  ;;  %v10534_v23 = vpop.f32.mrb[15].mxu1 }
 0x16e   : > { %1661 = vmatmul.mubr.bf16.gmra.mrb[52].mxu0 %v1189_v31  ;;  %v763_v37 = vpack.c.bf16 %v732_v2, %v731_v1 }
 0x16f   : > { %v968_v36 = vpop.permute.xlu0 %967 }
 0x170   : > { %v872_v38 = vpop.permute.xlu1 %871  ;;  %v1241_v47 = vsel %vm170_vm0, %v10377_v13, %v968_v36 }
 0x171   : > { %v1145_v49 = vsel %vm1115_vm3, %v1111_v52, %v872_v38 }
 0x173   : > { %v1016_v39 = vpop.permute.xlu0 %1015 }
 0x174   : > { %v920_v46 = vpop.permute.xlu1 %919  ;;  %v1274_v42 = vsel %vm1115_vm3, %v1241_v47, %v1016_v39  ;;  %v10544_v33 = vpop.f32.mrb[16].mxu1 }
 0x175   : > { %v1192_v53 = vsel %vm1148_vm4, %v1145_v49, %v920_v46  ;;  %v10546_v36 = vpop.f32.mrb[17].mxu1 }
 0x176   : > { %v10548_v38 = vpop.f32.mrb[18].mxu1 }
 0x177   : > { %v1064_v51 = vpop.permute.xlu0 %1063  ;;  %v10550_v52 = vpop.f32.mrb[19].mxu1 }
 0x178   : > { %v1320_v57 = vsel %vm1148_vm4, %v1274_v42, %v1064_v51  ;;  %v826_v7 = vpop.permute.xlu1 %825 }
 0x179   : > { %1668 = vmatprep.mubr.bf16.mxu0 %v1320_v57  ;;  %v1114_v13 = vsel %vm170_vm0, %v10365_v48, %v826_v7  ;;  %v734_v48 = vld [vmem:[#allocation3 + $0x52] sm:$0xff] }
 0x17a   : > { %1669 = vmatmul.mubr.bf16.gmra.mrb[56].mxu0 %v1192_v53 }
 0x17b   : > { %v970_v16 = vpop.permute.xlu0 %969 }
 0x17c   : > { %v874_v50 = vpop.permute.xlu1 %873  ;;  %v1244_v62 = vsel %vm170_vm0, %v10399_v4, %v970_v16  ;;  %v764_v4 = vpack.c.bf16 %v734_v48, %v733_v10 }
 0x17d   : > { %v1147_v63 = vsel %vm1115_vm3, %v1114_v13, %v874_v50 }
 0x17f   : > { %v1018_v59 = vpop.permute.xlu0 %1017 }
 0x180   : > { %v922_v61 = vpop.permute.xlu1 %921  ;;  %v1276_v0 = vsel %vm1115_vm3, %v1244_v62, %v1018_v59 }
 0x181   : > { %v1195_v3 = vsel %vm1148_vm4, %v1147_v63, %v922_v61 }
 0x183   : > { %v1066_v8 = vpop.permute.xlu0 %1065 }
 0x184   : > { %v1323_v9 = vsel %vm1148_vm4, %v1276_v0, %v1066_v8 }
 0x185   : > { %1676 = vmatprep.mubr.bf16.mxu0 %v1323_v9 }
 0x186   : > { %1677 = vmatmul.mubr.bf16.gmra.mrb[60].mxu0 %v1195_v3 }
 0x187   : > { %9295 = vmatprep.mubr.msk.bf16.mxu0 %vm170_vm0, %v763_v37  ;;  %v10571_v37 = vld [vmem:[%s13442_s2] ss:$0 sm:$0xff] }
 0x18e   : > { %9296 = vmatmul.mubr.msk.bf16.vlgmr.msra.gmra.mrb[64].mxu0 %vm170_vm0, %v764_v4 }
 0x18f   : > { %9299 = vmatprep.mubr.msk.bf16.mxu0 %vm170_vm0, %v765_v11 }
 0x196   : > { %9300 = vmatmul.mubr.msk.bf16.gmra.mrb[68].mxu0 %vm170_vm0, %v766_v19 }
 0x1a5   : > { %v8657_v32 = vpop.f32.mrb[0].mxu0 }
 0x1a6   : > { %v8658_v41 = vpop.f32.mrb[1].mxu0 }
 0x1a7   : > { %v10536_v24 = vadd.f32 %v8658_v41, %v8657_v32  ;;  %v8660_v56 = vpop.f32.mrb[2].mxu0 }
 0x1a8   : > { %v8661_v43 = vpop.f32.mrb[3].mxu0 }
 0x1a9   : > { %v10538_v29 = vadd.f32 %v8661_v43, %v8660_v56 }
 0x1b1   : > { %v8663_v6 = vpop.f32.mrb[4].mxu0 }
 0x1b2   : > { %v8664_v30 = vpop.f32.mrb[5].mxu0 }
 0x1b3   : > { %v10540_v54 = vadd.f32 %v8664_v30, %v8663_v6  ;;  %v8666_v40 = vpop.f32.mrb[6].mxu0  ;;  %v10560_v1 = vpop.f32.mrb[20].mxu1 }
 0x1b4   : > { %v8667_v31 = vpop.f32.mrb[7].mxu0  ;;  %v10562_v2 = vpop.f32.mrb[21].mxu1 }
 0x1b5   : > { %v10542_v55 = vadd.f32 %v8667_v31, %v8666_v40  ;;  %v10564_v13 = vpop.f32.mrb[22].mxu1 }
 0x1b6   : > { %v10566_v62 = vpop.f32.mrb[23].mxu1 }
 0x1bd   : > { %v8669_v39 = vpop.f32.mrb[8].mxu0 }
 0x1be   : > { %v8670_v46 = vpop.f32.mrb[9].mxu0 }
 0x1bf   : > { %v10552_v47 = vadd.f32 %v8670_v46, %v8669_v39  ;;  %v8672_v49 = vpop.f32.mrb[10].mxu0 }
 0x1c0   : > { %v8673_v42 = vpop.f32.mrb[11].mxu0 }
 0x1c1   : > { %v10554_v51 = vadd.f32 %v8673_v42, %v8672_v49 }
 0x1c9   : > { %v8675_v53 = vpop.f32.mrb[12].mxu0 }
 0x1ca   : > { %v8676_v57 = vpop.f32.mrb[13].mxu0 }
 0x1cb   : > { %v10556_v7 = vadd.f32 %v8676_v57, %v8675_v53  ;;  %v8678_v16 = vpop.f32.mrb[14].mxu0 }
 0x1cc   : > { %v8679_v50 = vpop.f32.mrb[15].mxu0 }
 0x1cd   : > { %v10558_v59 = vadd.f32 %v8679_v50, %v8678_v16 }
 0x1d5   : > { %v8681_v61 = vpop.f32.mrb[16].mxu0 }
 0x1d6   : > { %v8682_v63 = vpop.f32.mrb[17].mxu0 }
 0x1d7   : > { %v8683_v0 = vadd.f32 %v8682_v63, %v8681_v61  ;;  %v8684_v8 = vpop.f32.mrb[18].mxu0 }
 0x1d8   : > { %v8685_v3 = vpop.f32.mrb[19].mxu0 }
 0x1d9   : > { %v8686_v9 = vadd.f32 %v8685_v3, %v8684_v8  ;;  %v1591_v10 = vadd.f32 %v8683_v0, %v10571_v37 }
 0x1db   : > { %v1752_v48 = vadd.f32 %v10476_v18, %v1591_v10  ;;  %v1594_v60 = vadd.f32 %v8686_v9, %v10571_v37 }
 0x1dd   : > { %vm1854_vm5 = vcmp.ge.f32.partialorder %v1752_v48, 0.0  ;;  %v1886_v27 = vmul.f32 0.1, %v1752_v48  ;;  %v1755_v4 = vadd.f32 %v10480_v45, %v1594_v60 }
 0x1df   : > { %v10577_v11 = vsel %vm1854_vm5, %v1752_v48, %v1886_v27  ;;  %vm1855_vm6 = vcmp.ge.f32.partialorder %v1755_v4, 0.0  ;;  %v1887_v14 = vmul.f32 0.1, %v1755_v4 }
 0x1e0   : > { %13493 = vst [vmem:[#allocation7_spill] sm:$0xff] %v10577_v11  ;;  %1951 = vst.msk [vmem:[#allocation2 + $0x79] sm:$0xff] %vm170_vm0, %v10577_v11 }
 0x1e1   : > { %v10581_v17 = vsel %vm1855_vm6, %v1755_v4, %v1887_v14  ;;  %v8687_v19 = vpop.f32.mrb[20].mxu0  ;;  %v9538_v14 = vld [vmem:[%s13441_s1 + $0x110] sm:$0xff]  }
 0x1e2   : > { %13494 = vst [vmem:[#allocation8_spill] sm:$0xff] %v10581_v17  ;;  %1952 = vst.msk [vmem:[#allocation2 + $0x81] sm:$0xff] %vm170_vm0, %v10581_v17  ;;  %v8688_v18 = vpop.f32.mrb[21].mxu0  ;;  %9327 = vmatprep.subr.bf16.mxu0 %v9538_v14 }
 0x1e3   : > { %v8689_v32 = vadd.f32 %v8688_v18, %v8687_v19  ;;  %v8690_v41 = vpop.f32.mrb[22].mxu0  ;;  %9328 = vmatpush3.bf16.msra.mxu0 %v9538_v14 }
 0x1e4   : > { %v8691_v56 = vpop.f32.mrb[23].mxu0 }
 0x1e5   : > { %v1599_v43 = vadd.f32 %v8689_v32, %v10571_v37  ;;  %v8692_v45 = vadd.f32 %v8691_v56, %v8690_v41 }
 0x1e7   : > { %v1760_v6 = vadd.f32 %v10473_v12, %v1599_v43  ;;  %v1602_v30 = vadd.f32 %v8692_v45, %v10571_v37  ;;  %v2270_v39 = vld [vmem:[#allocation2 + $0x78] sm:$0xff] }
 0x1e8   : > { %v2318_v16 = vld [vmem:[#allocation2 + $0x79] sm:$0xff] }
 0x1e9   : > { %vm1856_vm7 = vcmp.ge.f32.partialorder %v1760_v6, 0.0  ;;  %v1888_v40 = vmul.f32 0.1, %v1760_v6  ;;  %v1763_v31 = vadd.f32 %v10478_v15, %v1602_v30  ;;  %v2271_v46 = vld [vmem:[#allocation2 + $0x80] sm:$0xff] }
 0x1ea   : > { %v10589_v49 = vpack.c.bf16 %v2271_v46, %v2270_v39  ;;  %v2319_v57 = vld [vmem:[#allocation2 + $0x81] sm:$0xff] }
 0x1eb   : > { %v10591_v42 = vsel %vm1856_vm7, %v1760_v6, %v1888_v40  ;;  %vm1857_vm8 = vcmp.ge.f32.partialorder %v1763_v31, 0.0  ;;  %v1889_v53 = vmul.f32 0.1, %v1763_v31  ;;  %v10603_v61 = vpack.c.bf16 %v2319_v57, %v2318_v16  ;;  %v2223_v8 = vld [vmem:[#allocation2 + $0x7a] sm:$0xff]  ;;  %v2224_v3 = vld [vmem:[#allocation2 + $0x82] sm:$0xff] }
 0x1ec   : > { %13495 = vst [vmem:[#allocation9_spill] sm:$0xff] %v10591_v42  ;;  %1953 = vst.msk [vmem:[#allocation2 + $0x91] sm:$0xff] %vm170_vm0, %v10591_v42  ;;  %2622 = vrot.lane.b32.xlu0 %v10589_v49, %s9677_s17  ;;  %2528 = vrot.lane.b32.xlu1 %v10589_v49, %s9679_s20  ;;  %v10610_v60 = vpack.c.bf16 %v2224_v3, %v2223_v8  ;;  %v9539_v6 = vld [vmem:[%s13441_s1 + $0x118] sm:$0xff]  }
 0x1ed   : > { %v10599_v12 = vsel %vm1857_vm8, %v1763_v31, %v1889_v53  ;;  %v8693_v15 = vpop.f32.mrb[24].mxu0  ;;  %9329 = vmatprep.subr.bf16.mxu0 %v9539_v6 }
 0x1ee   : > { %13496 = vst [vmem:[#allocation10_spill] sm:$0xff] %v10599_v12  ;;  %1954 = vst.msk [vmem:[#allocation2 + $0x99] sm:$0xff] %vm170_vm0, %v10599_v12  ;;  %v8694_v50 = vpop.f32.mrb[25].mxu0  ;;  %9330 = vmatpush3.bf16.msra.mxu0 %v9539_v6 }
 0x1ef   : > { %v8695_v63 = vadd.f32 %v8694_v50, %v8693_v15  ;;  %v8696_v0 = vpop.f32.mrb[26].mxu0 }
 0x1f0   : > { %v8697_v9 = vpop.f32.mrb[27].mxu0  ;;  %2670 = vrot.lane.b32.xlu0 %v10603_v61, %s9679_s20  ;;  %2434 = vrot.lane.b32.xlu1 %v10603_v61, %s9678_s19 }
 0x1f1   : > { %v8698_v10 = vadd.f32 %v8697_v9, %v8696_v0  ;;  %v1607_v48 = vadd.f32 %v8695_v63, %v10571_v37 }
 0x1f3   : > { %v1768_v27 = vadd.f32 %v10494_v35, %v1607_v48  ;;  %v1610_v4 = vadd.f32 %v8698_v10, %v10571_v37  ;;  %v2272_v32 = vld [vmem:[#allocation2 + $0x90] sm:$0xff] }
 0x1f4   : > { %2576 = vrot.lane.b32.xlu0 %v10610_v60, %s9678_s19  ;;  %2482 = vrot.lane.b32.xlu1 %v10610_v60, %s9677_s17  ;;  %v2320_v40 = vld [vmem:[#allocation2 + $0x91] sm:$0xff] }
 0x1f5   : > { %vm1858_vm9 = vcmp.ge.f32.partialorder %v1768_v27, 0.0  ;;  %v1890_v19 = vmul.f32 0.1, %v1768_v27  ;;  %v1771_v18 = vadd.f32 %v10498_v44, %v1610_v4  ;;  %v2273_v41 = vld [vmem:[#allocation2 + $0x98] sm:$0xff] }
 0x1f6   : > { %v10622_v35 = vpack.c.bf16 %v2273_v41, %v2272_v32  ;;  %v2321_v45 = vld [vmem:[#allocation2 + $0x99] sm:$0xff] }
 0x1f7   : > { %v10624_v56 = vsel %vm1858_vm9, %v1768_v27, %v1890_v19  ;;  %vm1859_vm10 = vcmp.ge.f32.partialorder %v1771_v18, 0.0  ;;  %v1891_v43 = vmul.f32 0.1, %v1771_v18  ;;  %v10639_v39 = vpack.c.bf16 %v2321_v45, %v2320_v40  ;;  %v2225_v57 = vld [vmem:[#allocation2 + $0x92] sm:$0xff]  ;;  %v2226_v15 = vld [vmem:[#allocation2 + $0x9a] sm:$0xff] }
 0x1f8   : > { %13497 = vst [vmem:[#allocation11_spill] sm:$0xff] %v10624_v56  ;;  %1955 = vst.msk [vmem:[#allocation2 + $0xa9] sm:$0xff] %vm170_vm0, %v10624_v56  ;;  %2624 = vrot.lane.b32.xlu0 %v10622_v35, %s9677_s17  ;;  %2530 = vrot.lane.b32.xlu1 %v10622_v35, %s9679_s20  ;;  %v10646_v0 = vpack.c.bf16 %v2226_v15, %v2225_v57 }
 0x1f9   : > { %v10635_v44 = vsel %vm1859_vm10, %v1771_v18, %v1891_v43  ;;  %v8699_v30 = vpop.f32.mrb[28].mxu0 }
 0x1fa   : > { %13498 = vst [vmem:[#allocation12_spill] sm:$0xff] %v10635_v44  ;;  %1956 = vst.msk [vmem:[#allocation2 + $0xb1] sm:$0xff] %vm170_vm0, %v10635_v44  ;;  %v8700_v31 = vpop.f32.mrb[29].mxu0 }
 0x1fb   : > { %v8701_v46 = vadd.f32 %v8700_v31, %v8699_v30  ;;  %v8702_v53 = vpop.f32.mrb[30].mxu0 }
 0x1fc   : > { %v8703_v16 = vpop.f32.mrb[31].mxu0  ;;  %2672 = vrot.lane.b32.xlu0 %v10639_v39, %s9679_s20  ;;  %2436 = vrot.lane.b32.xlu1 %v10639_v39, %s9678_s19 }
 0x1fd   : > { %v1615_v50 = vadd.f32 %v8701_v46, %v10571_v37  ;;  %v8704_v63 = vadd.f32 %v8703_v16, %v8702_v53 }
 0x1ff   : > { %v1776_v8 = vadd.f32 %v10492_v26, %v1615_v50  ;;  %v1618_v3 = vadd.f32 %v8704_v63, %v10571_v37  ;;  %v2274_v48 = vld [vmem:[#allocation2 + $0xa8] sm:$0xff] }
 0x200   : > { %2578 = vrot.lane.b32.xlu0 %v10646_v0, %s9678_s19  ;;  %2484 = vrot.lane.b32.xlu1 %v10646_v0, %s9677_s17  ;;  %v2322_v41 = vld [vmem:[#allocation2 + $0xa9] sm:$0xff] }
 0x201   : > { %vm1860_vm11 = vcmp.ge.f32.partialorder %v1776_v8, 0.0  ;;  %v1892_v9 = vmul.f32 0.1, %v1776_v8  ;;  %v1779_v10 = vadd.f32 %v10496_v58, %v1618_v3  ;;  %v2275_v27 = vld [vmem:[#allocation2 + $0xb0] sm:$0xff] }
 0x202   : > { %v2301_v4 = vpack.c.bf16 %v2275_v27, %v2274_v48  ;;  %v2323_v26 = vld [vmem:[#allocation2 + $0xb1] sm:$0xff] }
 0x203   : > { %v10655_v14 = vsel %vm1860_vm11, %v1776_v8, %v1892_v9  ;;  %vm1861_vm12 = vcmp.ge.f32.partialorder %v1779_v10, 0.0  ;;  %v1893_v19 = vmul.f32 0.1, %v1779_v10  ;;  %v10665_v43 = vpack.c.bf16 %v2323_v26, %v2322_v41  ;;  %v2227_v30 = vld [vmem:[#allocation2 + $0xaa] sm:$0xff]  ;;  %v2228_v40 = vld [vmem:[#allocation2 + $0xb2] sm:$0xff] }
 0x204   : > { %13499 = vst [vmem:[#allocation13_spill] sm:$0xff] %v10655_v14  ;;  %1957 = vst.msk [vmem:[#allocation2 + $0xc1] sm:$0xff] %vm170_vm0, %v10655_v14  ;;  %2626 = vrot.lane.b32.xlu0 %v2301_v4, %s9677_s17  ;;  %2532 = vrot.lane.b32.xlu1 %v2301_v4, %s9679_s20  ;;  %v10670_v57 = vpack.c.bf16 %v2228_v40, %v2227_v30 }
 0x205   : > { %v10661_v18 = vsel %vm1861_vm12, %v1779_v10, %v1893_v19  ;;  %v8705_v32 = vpop.f32.mrb[32].mxu0 }
 0x206   : > { %13500 = vst [vmem:[#allocation14_spill] sm:$0xff] %v10661_v18  ;;  %1958 = vst.msk [vmem:[#allocation2 + $0xc9] sm:$0xff] %vm170_vm0, %v10661_v18  ;;  %v8706_v58 = vpop.f32.mrb[33].mxu0 }
 0x207   : > { %v8707_v45 = vadd.f32 %v8706_v58, %v8705_v32  ;;  %v8708_v6 = vpop.f32.mrb[34].mxu0 }
 0x208   : > { %v8709_v31 = vpop.f32.mrb[35].mxu0  ;;  %2674 = vrot.lane.b32.xlu0 %v10665_v43, %s9679_s20 }
 0x209   : > { %v8710_v46 = vadd.f32 %v8709_v31, %v8708_v6  ;;  %v1623_v53 = vadd.f32 %v8707_v45, %v10571_v37 }
 0x20b   : > { %v1784_v15 = vadd.f32 %v10519_v5, %v1623_v53  ;;  %v1626_v16 = vadd.f32 %v8710_v46, %v10571_v37  ;;  %v2276_v8 = vld [vmem:[#allocation2 + $0xc0] sm:$0xff] }
 0x20c   : > { %2580 = vrot.lane.b32.xlu0 %v10670_v57, %s9678_s19  ;;  %v2324_v19 = vld [vmem:[#allocation2 + $0xc1] sm:$0xff] }
 0x20d   : > { %vm1862_vm13 = vcmp.ge.f32.partialorder %v1784_v15, 0.0  ;;  %v1894_v50 = vmul.f32 0.1, %v1784_v15  ;;  %v1787_v63 = vadd.f32 %v10523_v34, %v1626_v16  ;;  %v2277_v3 = vld [vmem:[#allocation2 + $0xc8] sm:$0xff] }
 0x20e   : > { %v10677_v9 = vpack.c.bf16 %v2277_v3, %v2276_v8  ;;  %v2325_v27 = vld [vmem:[#allocation2 + $0xc9] sm:$0xff] }
 0x20f   : > { %v10679_v10 = vsel %vm1862_vm13, %v1784_v15, %v1894_v50  ;;  %vm1863_vm14 = vcmp.ge.f32.partialorder %v1787_v63, 0.0  ;;  %v1895_v48 = vmul.f32 0.1, %v1787_v63  ;;  %v10689_v26 = vpack.c.bf16 %v2325_v27, %v2324_v19 }
 0x210   : > { %13501 = vst [vmem:[#allocation15_spill] sm:$0xff] %v10679_v10  ;;  %1959 = vst.msk [vmem:[#allocation2 + $0xd9] sm:$0xff] %vm170_vm0, %v10679_v10  ;;  %2628 = vrot.lane.b32.xlu0 %v10677_v9, %s9677_s17 }
 0x211   : > { %v10685_v5 = vsel %vm1863_vm14, %v1787_v63, %v1895_v48  ;;  %v8711_v4 = vpop.f32.mrb[36].mxu0 }
 0x212   : > { %13502 = vst [vmem:[#allocation16_spill] sm:$0xff] %v10685_v5  ;;  %1960 = vst.msk [vmem:[#allocation2 + $0xe1] sm:$0xff] %vm170_vm0, %v10685_v5  ;;  %v8712_v34 = vpop.f32.mrb[37].mxu0 }
 0x213   : > { %v8713_v32 = vadd.f32 %v8712_v34, %v8711_v4  ;;  %v8714_v41 = vpop.f32.mrb[38].mxu0 }
 0x214   : > { %v8715_v58 = vpop.f32.mrb[39].mxu0  ;;  %2676 = vrot.lane.b32.xlu0 %v10689_v26, %s9679_s20 }
 0x215   : > { %v1631_v45 = vadd.f32 %v8713_v32, %v10571_v37  ;;  %v8716_v6 = vadd.f32 %v8715_v58, %v8714_v41 }
 0x217   : > { %v1792_v30 = vadd.f32 %v10517_v28, %v1631_v45  ;;  %v1634_v40 = vadd.f32 %v8716_v6, %v10571_v37 }
 0x219   : > { %vm1864_vm15 = vcmp.ge.f32.partialorder %v1792_v30, 0.0  ;;  %v1896_v31 = vmul.f32 0.1, %v1792_v30  ;;  %v1795_v46 = vadd.f32 %v10521_v25, %v1634_v40 }
 0x21b   : > { %v10697_v53 = vsel %vm1864_vm15, %v1792_v30, %v1896_v31  ;;  %vm1865_vm1 = vcmp.ge.f32.partialorder %v1795_v46, 0.0  ;;  %v1897_v15 = vmul.f32 0.1, %v1795_v46 }
 0x21c   : > { %13503 = vst [vmem:[#allocation17_spill] sm:$0xff] %v10697_v53  ;;  %1961 = vst.msk [vmem:[#allocation2 + $0xf1] sm:$0xff] %vm170_vm0, %v10697_v53 }
 0x21d   : > { %v10701_v16 = vsel %vm1865_vm1, %v1795_v46, %v1897_v15  ;;  %v8717_v50 = vpop.f32.mrb[40].mxu0 }
 0x21e   : > { %13504 = vst [vmem:[#allocation18_spill] sm:$0xff] %v10701_v16  ;;  %1962 = vst.msk [vmem:[#allocation2 + $0xf9] sm:$0xff] %vm170_vm0, %v10701_v16  ;;  %v8718_v28 = vpop.f32.mrb[41].mxu0 }
 0x21f   : > { %v8719_v63 = vadd.f32 %v8718_v28, %v8717_v50  ;;  %v8720_v8 = vpop.f32.mrb[42].mxu0 }
 0x220   : > { %v8721_v3 = vpop.f32.mrb[43].mxu0 }
 0x221   : > { %v8722_v48 = vadd.f32 %v8721_v3, %v8720_v8  ;;  %v1639_v25 = vadd.f32 %v8719_v63, %v10571_v37 }
 0x223   : > { %v1800_v27 = vadd.f32 %v10530_v21, %v1639_v25  ;;  %v1642_v4 = vadd.f32 %v8722_v48, %v10571_v37 }
 0x225   : > { %vm1866_vm2 = vcmp.ge.f32.partialorder %v1800_v27, 0.0  ;;  %v1898_v19 = vmul.f32 0.1, %v1800_v27  ;;  %v1803_v34 = vadd.f32 %v10534_v23, %v1642_v4 }
 0x227   : > { %v10709_v32 = vsel %vm1866_vm2, %v1800_v27, %v1898_v19  ;;  %vm1867_vm5 = vcmp.ge.f32.partialorder %v1803_v34, 0.0  ;;  %v1899_v41 = vmul.f32 0.1, %v1803_v34 }
 0x228   : > { %13505 = vst [vmem:[#allocation19_spill] sm:$0xff] %v10709_v32  ;;  %1963 = vst.msk [vmem:[#allocation2 + $0x109] sm:$0xff] %vm170_vm0, %v10709_v32 }
 0x229   : > { %v10713_v58 = vsel %vm1867_vm5, %v1803_v34, %v1899_v41  ;;  %v8723_v45 = vpop.f32.mrb[44].mxu0 }
 0x22a   : > { %13506 = vst [vmem:[#allocation20_spill] sm:$0xff] %v10713_v58  ;;  %1964 = vst.msk [vmem:[#allocation2 + $0x111] sm:$0xff] %vm170_vm0, %v10713_v58  ;;  %v8724_v21 = vpop.f32.mrb[45].mxu0 }
 0x22b   : > { %v8725_v6 = vadd.f32 %v8724_v21, %v8723_v45  ;;  %v8726_v30 = vpop.f32.mrb[46].mxu0 }
 0x22c   : > { %v8727_v40 = vpop.f32.mrb[47].mxu0 }
 0x22d   : > { %v1647_v31 = vadd.f32 %v8725_v6, %v10571_v37  ;;  %v8728_v23 = vadd.f32 %v8727_v40, %v8726_v30 }
 0x22f   : > { %v1808_v46 = vadd.f32 %v10528_v20, %v1647_v31  ;;  %v1650_v15 = vadd.f32 %v8728_v23, %v10571_v37 }
 0x231   : > { %vm1868_vm6 = vcmp.ge.f32.partialorder %v1808_v46, 0.0  ;;  %v1900_v50 = vmul.f32 0.1, %v1808_v46  ;;  %v1811_v28 = vadd.f32 %v10532_v22, %v1650_v15 }
 0x233   : > { %v10721_v63 = vsel %vm1868_vm6, %v1808_v46, %v1900_v50  ;;  %vm1869_vm7 = vcmp.ge.f32.partialorder %v1811_v28, 0.0  ;;  %v1901_v8 = vmul.f32 0.1, %v1811_v28 }
 0x234   : > { %13507 = vst [vmem:[#allocation21_spill] sm:$0xff] %v10721_v63  ;;  %1965 = vst.msk [vmem:[#allocation2 + $0x121] sm:$0xff] %vm170_vm0, %v10721_v63 }
 0x235   : > { %v10725_v3 = vsel %vm1869_vm7, %v1811_v28, %v1901_v8  ;;  %v8729_v48 = vpop.f32.mrb[48].mxu0 }
 0x236   : > { %13508 = vst [vmem:[#allocation22_spill] sm:$0xff] %v10725_v3  ;;  %1966 = vst.msk [vmem:[#allocation2 + $0x129] sm:$0xff] %vm170_vm0, %v10725_v3  ;;  %v8730_v20 = vpop.f32.mrb[49].mxu0 }
 0x237   : > { %v8731_v25 = vadd.f32 %v8730_v20, %v8729_v48  ;;  %v8732_v27 = vpop.f32.mrb[50].mxu0 }
 0x238   : > { %v8733_v4 = vpop.f32.mrb[51].mxu0 }
 0x239   : > { %v8734_v19 = vadd.f32 %v8733_v4, %v8732_v27  ;;  %v1655_v22 = vadd.f32 %v8731_v25, %v10571_v37  ;;  %v9540_v4 = vld [vmem:[%s13441_s1 + $0xd0] sm:$0xff]  }
 0x23a   : > { %8771 = vmatprep.subr.bf16.mxu1 %v9540_v4 }
 0x23b   : > { %v1816_v34 = vadd.f32 %v10546_v36, %v1655_v22  ;;  %v1658_v41 = vadd.f32 %v8734_v19, %v10571_v37  ;;  %v2332_v63 = vld [vmem:[#allocation2 + $0x121] sm:$0xff] }
 0x23d   : > { %vm1870_vm8 = vcmp.ge.f32.partialorder %v1816_v34, 0.0  ;;  %v1902_v45 = vmul.f32 0.1, %v1816_v34  ;;  %v1819_v21 = vadd.f32 %v10550_v52, %v1658_v41 }
 0x23f   : > { %v10733_v6 = vsel %vm1870_vm8, %v1816_v34, %v1902_v45  ;;  %vm1871_vm9 = vcmp.ge.f32.partialorder %v1819_v21, 0.0  ;;  %v1903_v30 = vmul.f32 0.1, %v1819_v21  ;;  %v9541_v45 = vld [vmem:[%s13441_s1 + $0x90] sm:$0xff]  }
 0x240   : > { %13509 = vst [vmem:[#allocation23_spill] sm:$0xff] %v10733_v6  ;;  %1967 = vst.msk [vmem:[#allocation2 + $0x139] sm:$0xff] %vm170_vm0, %v10733_v6  ;;  %8772 = vmatpush3.bf16.msra.mxu1 %v9541_v45  ;;  %v1567_v45 = vadd.f32 %v10540_v54, %v10571_v37  ;;  %v1570_v54 = vadd.f32 %v10542_v55, %v10571_v37 }
 0x241   : > { %v10737_v40 = vsel %vm1871_vm9, %v1819_v21, %v1903_v30  ;;  %v8735_v31 = vpop.f32.mrb[52].mxu0 }
 0x242   : > { %13510 = vst [vmem:[#allocation24_spill] sm:$0xff] %v10737_v40  ;;  %1968 = vst.msk [vmem:[#allocation2 + $0x141] sm:$0xff] %vm170_vm0, %v10737_v40  ;;  %v8736_v36 = vpop.f32.mrb[53].mxu0  ;;  %v2284_v40 = vld [vmem:[#allocation2 + $0x120] sm:$0xff] }
 0x243   : > { %v8737_v23 = vadd.f32 %v8736_v36, %v8735_v31  ;;  %v8738_v46 = vpop.f32.mrb[54].mxu0 }
 0x244   : > { %v8739_v15 = vpop.f32.mrb[55].mxu0 }
 0x245   : > { %v1663_v50 = vadd.f32 %v8737_v23, %v10571_v37  ;;  %v8740_v52 = vadd.f32 %v8739_v15, %v8738_v46  ;;  %v9542_v23 = vld [vmem:[%s13441_s1 + $0xd8] sm:$0xff]  }
 0x246   : > { %v9543_v46 = vld [vmem:[%s13441_s1 + $0x98] sm:$0xff]   ;;  %8773 = vmatprep.subr.bf16.mxu1 %v9542_v23 }
 0x247   : > { %v1824_v28 = vadd.f32 %v10544_v33, %v1663_v50  ;;  %v1666_v8 = vadd.f32 %v8740_v52, %v10571_v37  ;;  %8774 = vmatpush3.bf16.msra.mxu1 %v9543_v46  ;;  %v2286_v32 = vld [vmem:[#allocation2 + $0x138] sm:$0xff] }
 0x248   : > { %v2334_v5 = vld [vmem:[#allocation2 + $0x139] sm:$0xff] }
 0x249   : > { %vm1872_vm10 = vcmp.ge.f32.partialorder %v1824_v28, 0.0  ;;  %v1904_v48 = vmul.f32 0.1, %v1824_v28  ;;  %v1827_v20 = vadd.f32 %v10548_v38, %v1666_v8 }
 0x24b   : > { %v10745_v25 = vsel %vm1872_vm10, %v1824_v28, %v1904_v48  ;;  %vm1873_vm11 = vcmp.ge.f32.partialorder %v1827_v20, 0.0  ;;  %v1905_v27 = vmul.f32 0.1, %v1827_v20 }
 0x24c   : > { %13511 = vst [vmem:[#allocation25_spill] sm:$0xff] %v10745_v25  ;;  %1969 = vst.msk [vmem:[#allocation2 + $0x151] sm:$0xff] %vm170_vm0, %v10745_v25 }
 0x24d   : > { %v10752_v19 = vsel %vm1873_vm11, %v1827_v20, %v1905_v27  ;;  %v8741_v33 = vpop.f32.mrb[56].mxu0 }
 0x24e   : > { %13512 = vst [vmem:[#allocation26_spill] sm:$0xff] %v10752_v19  ;;  %1970 = vst.msk [vmem:[#allocation2 + $0x159] sm:$0xff] %vm170_vm0, %v10752_v19  ;;  %v8742_v22 = vpop.f32.mrb[57].mxu0 }
 0x24f   : > { %v8743_v38 = vadd.f32 %v8742_v22, %v8741_v33  ;;  %v8744_v34 = vpop.f32.mrb[58].mxu0  ;;  %v9545_v33 = vld [vmem:[%s13441_s1 + $0xa0] sm:$0xff]  }
 0x250   : > { %v8745_v41 = vpop.f32.mrb[59].mxu0 }
 0x251   : > { %v8746_v21 = vadd.f32 %v8745_v41, %v8744_v34  ;;  %v1671_v30 = vadd.f32 %v8743_v38, %v10571_v37 }
 0x253   : > { %v1832_v31 = vadd.f32 %v10562_v2, %v1671_v30  ;;  %v1674_v36 = vadd.f32 %v8746_v21, %v10571_v37  ;;  %v9544_v2 = vld [vmem:[%s13441_s1 + $0xe0] sm:$0xff]   ;;  %v9546_v21 = vld [vmem:[%s13441_s1 + $0xe8] sm:$0xff]   ;;  %v2288_v18 = vld [vmem:[#allocation2 + $0x150] sm:$0xff] }
 0x254   : > { %8775 = vmatprep.subr.bf16.mxu1 %v9544_v2  ;;  %v9547_v30 = vld [vmem:[%s13441_s1 + $0xa8] sm:$0xff]   ;;  %v2336_v56 = vld [vmem:[#allocation2 + $0x151] sm:$0xff] }
 0x255   : > { %vm1874_vm12 = vcmp.ge.f32.partialorder %v1832_v31, 0.0  ;;  %v1906_v15 = vmul.f32 0.1, %v1832_v31  ;;  %v1835_v50 = vadd.f32 %v10566_v62, %v1674_v36  ;;  %8776 = vmatpush3.bf16.msra.mxu1 %v9545_v33 }
 0x256   : > { %8777 = vmatprep.subr.bf16.mxu1 %v9546_v21  ;;  %v1583_v21 = vadd.f32 %v10556_v7, %v10571_v37 }
 0x257   : > { %v10769_v52 = vsel %vm1874_vm12, %v1832_v31, %v1906_v15  ;;  %vm1875_vm13 = vcmp.ge.f32.partialorder %v1835_v50, 0.0  ;;  %v1907_v28 = vmul.f32 0.1, %v1835_v50 }
 0x258   : > { %13513 = vst [vmem:[#allocation27_spill] sm:$0xff] %v10769_v52  ;;  %1971 = vst.msk [vmem:[#allocation2 + $0x169] sm:$0xff] %vm170_vm0, %v10769_v52 }
 0x259   : > { %v10776_v8 = vsel %vm1875_vm13, %v1835_v50, %v1907_v28  ;;  %v8747_v48 = vpop.f32.mrb[60].mxu0  ;;  %v1562_v50 = vadd.f32 %v10538_v29, %v10571_v37  ;;  %8778 = vmatpush3.bf16.msra.mxu1 %v9547_v30 }
 0x25a   : > { %13514 = vst [vmem:[#allocation28_spill] sm:$0xff] %v10776_v8  ;;  %1972 = vst.msk [vmem:[#allocation2 + $0x171] sm:$0xff] %vm170_vm0, %v10776_v8  ;;  %v8748_v62 = vpop.f32.mrb[61].mxu0  ;;  %v2329_v8 = vld [vmem:[#allocation2 + $0xf9] sm:$0xff] }
 0x25b   : > { %v8749_v20 = vadd.f32 %v8748_v62, %v8747_v48  ;;  %v8750_v27 = vpop.f32.mrb[62].mxu0 }
 0x25c   : > { %v8751_v4 = vpop.f32.mrb[63].mxu0 }
 0x25d   : > { %v1679_v22 = vadd.f32 %v8749_v20, %v10571_v37  ;;  %v8752_v38 = vadd.f32 %v8751_v4, %v8750_v27  ;;  %v9548_v4 = vld [vmem:[%s13441_s1 + $0xf0] sm:$0xff]  }
 0x25e   : > { %8779 = vmatprep.subr.bf16.mxu1 %v9548_v4 }
 0x25f   : > { %v1840_v34 = vadd.f32 %v10560_v1, %v1679_v22  ;;  %v1682_v41 = vadd.f32 %v8752_v38, %v10571_v37  ;;  %v1559_v1 = vadd.f32 %v10536_v24, %v10571_v37  ;;  %v9549_v38 = vld [vmem:[%s13441_s1 + $0xb0] sm:$0xff]   ;;  %v2290_v42 = vld [vmem:[#allocation2 + $0x168] sm:$0xff] }
 0x260   : > { %8780 = vmatpush3.bf16.msra.mxu1 %v9549_v38 }
 0x261   : > { %vm1876_vm14 = vcmp.ge.f32.partialorder %v1840_v34, 0.0  ;;  %v1908_v31 = vmul.f32 0.1, %v1840_v34  ;;  %v1843_v36 = vadd.f32 %v10564_v13, %v1682_v41  ;;  %v9297_v23 = vpop.f32.mrb[64].mxu0  ;;  %v2339_v11 = vld [vmem:[#allocation2 + $0x171] sm:$0xff] }
 0x262   : > { %v1728_v46 = vadd.f32 %v9297_v23, %v1567_v45  ;;  %v1719_v15 = vpop.f32.mrb[65].mxu0 }
 0x263   : > { %v10801_v28 = vsel %vm1876_vm14, %v1840_v34, %v1908_v31  ;;  %vm1877_vm15 = vcmp.ge.f32.partialorder %v1843_v36, 0.0  ;;  %v1909_v2 = vmul.f32 0.1, %v1843_v36  ;;  %v1720_v48 = vadd.f32 %v1719_v15, %v1559_v1  ;;  %v9298_v62 = vpop.f32.mrb[66].mxu0 }
 0x264   : > { %13515 = vst [vmem:[#allocation29_spill] sm:$0xff] %v10801_v28  ;;  %1973 = vst.msk [vmem:[#allocation2 + $0x181] sm:$0xff] %vm170_vm0, %v10801_v28  ;;  %vm1848_vm1 = vcmp.ge.f32.partialorder %v1728_v46, 0.0  ;;  %v1880_v24 = vmul.f32 0.1, %v1728_v46  ;;  %v1731_v13 = vadd.f32 %v9298_v62, %v1570_v54  ;;  %v1722_v20 = vpop.f32.mrb[67].mxu0  ;;  %v1578_v54 = vadd.f32 %v10554_v51, %v10571_v37 }
 0x265   : > { %v10805_v27 = vsel %vm1877_vm15, %v1843_v36, %v1909_v2  ;;  %vm1846_vm2 = vcmp.ge.f32.partialorder %v1720_v48, 0.0  ;;  %v1878_v55 = vmul.f32 0.1, %v1720_v48  ;;  %v1723_v29 = vadd.f32 %v1722_v20, %v1562_v50  ;;  %v9550_v50 = vld [vmem:[%s13441_s1 + $0xf8] sm:$0xff]  }
 0x266   : > { %13516 = vst [vmem:[#allocation30_spill] sm:$0xff] %v10805_v27  ;;  %1974 = vst.msk [vmem:[#allocation2 + $0x189] sm:$0xff] %vm170_vm0, %v10805_v27  ;;  %v10812_v33 = vsel %vm1848_vm1, %v1728_v46, %v1880_v24  ;;  %vm1849_vm5 = vcmp.ge.f32.partialorder %v1731_v13, 0.0  ;;  %v1881_v22 = vmul.f32 0.1, %v1731_v13  ;;  %v1575_v36 = vadd.f32 %v10552_v47, %v10571_v37  ;;  %v9551_v47 = vld [vmem:[%s13441_s1 + $0xb8] sm:$0xff]   ;;  %8781 = vmatprep.subr.bf16.mxu1 %v9550_v50 }
 0x267   : > { %13517 = vst [vmem:[#allocation31_spill] sm:$0xff] %v10812_v33  ;;  %1945 = vst.msk [vmem:[#allocation2 + $0x31] sm:$0xff] %vm170_vm0, %v10812_v33  ;;  %v10819_v34 = vsel %vm1846_vm2, %v1720_v48, %v1878_v55  ;;  %vm1847_vm6 = vcmp.ge.f32.partialorder %v1723_v29, 0.0  ;;  %v1879_v41 = vmul.f32 0.1, %v1723_v29  ;;  %v1586_v46 = vadd.f32 %v10558_v59, %v10571_v37  ;;  %8782 = vmatpush3.bf16.msra.mxu1 %v9551_v47 }
 0x268   : > { %13518 = vst [vmem:[#allocation32_spill] sm:$0xff] %v10819_v34  ;;  %1943 = vst.msk [vmem:[#allocation2 + $0x19] sm:$0xff] %vm170_vm0, %v10819_v34  ;;  %v10823_v45 = vsel %vm1849_vm5, %v1731_v13, %v1881_v22 }
 0x269   : > { %13519 = vst [vmem:[#allocation33_spill] sm:$0xff] %v10823_v45  ;;  %1946 = vst.msk [vmem:[#allocation2 + $0x39] sm:$0xff] %vm170_vm0, %v10823_v45  ;;  %v10829_v30 = vsel %vm1847_vm6, %v1723_v29, %v1879_v41  ;;  %v9301_v31 = vpop.f32.mrb[68].mxu0  ;;  %v9552_v29 = vld [vmem:[%s13441_s1 + $0x100] sm:$0xff]   ;;  %v1976_v45 = vld [vmem:[#allocation2 + $0x8] sm:$0xff] }
 0x26a   : > { %13520 = vst [vmem:[#allocation34_spill] sm:$0xff] %v10829_v30  ;;  %1944 = vst.msk [vmem:[#allocation2 + $0x21] sm:$0xff] %vm170_vm0, %v10829_v30  ;;  %v1744_v23 = vadd.f32 %v9301_v31, %v1583_v21  ;;  %v1735_v1 = vpop.f32.mrb[69].mxu0  ;;  %8783 = vmatprep.subr.bf16.mxu1 %v9552_v29 }
 0x26b   : > { %v1736_v15 = vadd.f32 %v1735_v1, %v1575_v36  ;;  %v9302_v7 = vpop.f32.mrb[70].mxu0  ;;  %v9553_v1 = vld [vmem:[%s13441_s1 + $0xc0] sm:$0xff]  }
 0x26c   : > { %vm1852_vm7 = vcmp.ge.f32.partialorder %v1744_v23, 0.0  ;;  %v1884_v2 = vmul.f32 0.1, %v1744_v23  ;;  %v1747_v48 = vadd.f32 %v9302_v7, %v1586_v46  ;;  %v1738_v62 = vpop.f32.mrb[71].mxu0  ;;  %v9554_v46 = vld [vmem:[%s13441_s1 + $0x108] sm:$0xff]   ;;  %8784 = vmatpush3.bf16.msra.mxu1 %v9553_v1 }
 0x26d   : > { %vm1850_vm8 = vcmp.ge.f32.partialorder %v1736_v15, 0.0  ;;  %v1882_v24 = vmul.f32 0.1, %v1736_v15  ;;  %v1739_v59 = vadd.f32 %v1738_v62, %v1578_v54  ;;  %v9555_v7 = vld [vmem:[%s13441_s1 + $0xc8] sm:$0xff]   ;;  %8785 = vmatprep.subr.bf16.mxu1 %v9554_v46 }
 0x26e   : > { %v10845_v13 = vsel %vm1852_vm7, %v1744_v23, %v1884_v2  ;;  %vm1853_vm9 = vcmp.ge.f32.partialorder %v1747_v48, 0.0  ;;  %v1885_v51 = vmul.f32 0.1, %v1747_v48  ;;  %v2264_v55 = vld [vmem:[#allocation2 + $0x30] sm:$0xff]  ;;  %v2293_v30 = vld [vmem:[#allocation2 + $0x188] sm:$0xff] }
 0x26f   : > { %13521 = vst [vmem:[#allocation35_spill] sm:$0xff] %v10845_v13  ;;  %1949 = vst.msk [vmem:[#allocation2 + $0x61] sm:$0xff] %vm170_vm0, %v10845_v13  ;;  %v10849_v37 = vsel %vm1850_vm8, %v1736_v15, %v1882_v24  ;;  %vm1851_vm10 = vcmp.ge.f32.partialorder %v1739_v59, 0.0  ;;  %v1883_v20 = vmul.f32 0.1, %v1739_v59  ;;  %v2312_v15 = vld [vmem:[#allocation2 + $0x31] sm:$0xff] }
 0x270   : > { %13522 = vst [vmem:[#allocation36_spill] sm:$0xff] %v10849_v37  ;;  %1947 = vst.msk [vmem:[#allocation2 + $0x49] sm:$0xff] %vm170_vm0, %v10849_v37  ;;  %v10856_v4 = vsel %vm1853_vm9, %v1747_v48, %v1885_v51  ;;  %v2360_v22 = vld [vmem:[#allocation2 + $0x32] sm:$0xff]  ;;  %v2361_v38 = vld [vmem:[#allocation2 + $0x3a] sm:$0xff]  ;;  %8786 = vmatpush3.bf16.msra.mxu1 %v9555_v7 }
 0x271   : > { %13523 = vst [vmem:[#allocation37_spill] sm:$0xff] %v10856_v4  ;;  %v2265_v41 = vld [vmem:[#allocation2 + $0x38] sm:$0xff]  ;;  %1950 = vst.msk [vmem:[#allocation2 + $0x69] sm:$0xff] %vm170_vm0, %v10856_v4  ;;  %v10860_v21 = vsel %vm1851_vm10, %v1739_v59, %v1883_v20  ;;  %v2392_v31 = vpack.c.bf16 %v2361_v38, %v2360_v22  ;;  %v2216_v59 = vld [vmem:[#allocation2 + $0x22] sm:$0xff] }
 0x272   : > { %13524 = vst [vmem:[#allocation38_spill] sm:$0xff] %v10860_v21  ;;  %v10862_v36 = vpack.c.bf16 %v2265_v41, %v2264_v55  ;;  %1948 = vst.msk [vmem:[#allocation2 + $0x51] sm:$0xff] %vm170_vm0, %v10860_v21  ;;  %v2313_v23 = vld [vmem:[#allocation2 + $0x39] sm:$0xff]  ;;  %v2026_v41 = vld [vmem:[#allocation2 + $0x21] sm:$0xff] }
 0x273   : > { %9331 = vmatprep.mubr.msk.bf16.mxu0 %vm170_vm0, %v2392_v31  ;;  %v10880_v54 = vpack.c.bf16 %v2313_v23, %v2312_v15  ;;  %v2215_v24 = vld [vmem:[#allocation2 + $0x1a] sm:$0xff]  ;;  %v2338_v4 = vld [vmem:[#allocation2 + $0x169] sm:$0xff] }
 0x274   : > { %2616 = vrot.lane.b32.xlu0 %v10862_v36, %s9677_s17  ;;  %2522 = vrot.lane.b32.xlu1 %v10862_v36, %s9679_s20  ;;  %v2120_v20 = vld [vmem:[#allocation2 + $0x20] sm:$0xff]  ;;  %v2247_v55 = vpack.c.bf16 %v2216_v59, %v2215_v24  ;;  %v2119_v29 = vld [vmem:[#allocation2 + $0x18] sm:$0xff]  ;;  %v11119_v21 = vpack.c.bf16 %v2339_v11, %v2338_v4 }
 0x275   : > { %v10893_v22 = vpack.c.bf16 %v2120_v20, %v2119_v29  ;;  %v2374_v20 = vld [vmem:[#allocation2 + $0xda] sm:$0xff] }
 0x276   : > { %v2268_v23 = vld [vmem:[#allocation2 + $0x60] sm:$0xff] }
 0x277   : > { %v2316_v7 = vld [vmem:[#allocation2 + $0x61] sm:$0xff]  ;;  %v2314_v29 = vld [vmem:[#allocation2 + $0x49] sm:$0xff] }
 0x278   : > { %2664 = vrot.lane.b32.xlu0 %v10880_v54, %s9679_s20  ;;  %2428 = vrot.lane.b32.xlu1 %v10880_v54, %s9678_s19  ;;  %v2364_v50 = vld [vmem:[#allocation2 + $0x62] sm:$0xff]  ;;  %v2365_v47 = vld [vmem:[#allocation2 + $0x6a] sm:$0xff] }
 0x279   : > { %v2362_v2 = vld [vmem:[#allocation2 + $0x4a] sm:$0xff]  ;;  %v2363_v48 = vld [vmem:[#allocation2 + $0x52] sm:$0xff]  ;;  %v2394_v51 = vpack.c.bf16 %v2365_v47, %v2364_v50  ;;  %v2372_v47 = vld [vmem:[#allocation2 + $0xc2] sm:$0xff] }
 0x27a   : > { %v10886_v62 = vpack.c.bf16 %v2363_v48, %v2362_v2  ;;  %v2269_v38 = vld [vmem:[#allocation2 + $0x68] sm:$0xff]  ;;  %v2267_v48 = vld [vmem:[#allocation2 + $0x50] sm:$0xff]  ;;  %v1975_v37 = vld [vmem:[#allocation2] sm:$0xff] }
 0x27b   : > { %v10898_v1 = vpack.c.bf16 %v2269_v38, %v2268_v23  ;;  %v2317_v15 = vld [vmem:[#allocation2 + $0x69] sm:$0xff]  ;;  %v2315_v59 = vld [vmem:[#allocation2 + $0x51] sm:$0xff]  ;;  %v2292_v11 = vld [vmem:[#allocation2 + $0x180] sm:$0xff] }
 0x27c   : > { %2570 = vrot.lane.b32.xlu0 %v2392_v31, %s9678_s19  ;;  %2476 = vrot.lane.b32.xlu1 %v2392_v31, %s9677_s17  ;;  %v2025_v31 = vld [vmem:[#allocation2 + $0x19] sm:$0xff]  ;;  %v10910_v50 = vpack.c.bf16 %v2317_v15, %v2316_v7  ;;  %v2373_v2 = vld [vmem:[#allocation2 + $0xca] sm:$0xff]  ;;  %v10930_v23 = vpack.c.bf16 %v2315_v59, %v2314_v29  ;;  %v2327_v29 = vld [vmem:[#allocation2 + $0xe1] sm:$0xff] }
 0x27d   : > { %9332 = vmatmul.mubr.msk.bf16.vlgmr.msra.gmra.mrb[72].mxu0 %vm170_vm0, %v10886_v62  ;;  %v10900_v46 = vpack.c.bf16 %v2026_v41, %v2025_v31  ;;  %v10916_v24 = vpack.c.bf16 %v2373_v2, %v2372_v47  ;;  %v2376_v38 = vld [vmem:[#allocation2 + $0xf2] sm:$0xff]  ;;  %v2377_v41 = vld [vmem:[#allocation2 + $0xfa] sm:$0xff]  ;;  %v2378_v7 = vld [vmem:[#allocation2 + $0x10a] sm:$0xff] }
 0x27e   : > { %9335 = vmatprep.mubr.msk.bf16.mxu0 %vm170_vm0, %v2394_v51  ;;  %v10936_v15 = vpack.c.bf16 %v2377_v41, %v2376_v38  ;;  %v2379_v47 = vld [vmem:[#allocation2 + $0x112] sm:$0xff]  ;;  %v2380_v2 = vld [vmem:[#allocation2 + $0x122] sm:$0xff]  ;;  %v2382_v38 = vld [vmem:[#allocation2 + $0x13a] sm:$0xff] }
 0x27f   : > { %v2279_v59 = vld [vmem:[#allocation2 + $0xe0] sm:$0xff] }
 0x280   : > { %2568 = vrot.lane.b32.xlu0 %v2247_v55, %s9678_s19  ;;  %2520 = vrot.lane.b32.xlu1 %v10893_v22, %s9679_s20  ;;  %v2383_v41 = vld [vmem:[#allocation2 + $0x142] sm:$0xff] }
 0x284   : > { %2620 = vrot.lane.b32.xlu0 %v10898_v1, %s9677_s17  ;;  %2426 = vrot.lane.b32.xlu1 %v10900_v46, %s9678_s19 }
 0x285   : > { %9336 = vmatmul.mubr.msk.bf16.gmra.mrb[76].mxu0 %vm170_vm0, %v10610_v60  ;;  %v2266_v60 = vld [vmem:[#allocation2 + $0x48] sm:$0xff] }
 0x286   : > { %9339 = vmatprep.mubr.msk.bf16.mxu0 %vm170_vm0, %v10646_v0  ;;  %v10924_v0 = vpack.c.bf16 %v2267_v48, %v2266_v60  ;;  %v2381_v48 = vld [vmem:[#allocation2 + $0x12a] sm:$0xff]  ;;  %v10947_v60 = vpack.c.bf16 %v2379_v47, %v2378_v7  ;;  %v2326_v7 = vld [vmem:[#allocation2 + $0xd9] sm:$0xff] }
 0x287   : > { %v2385_v47 = vld [vmem:[#allocation2 + $0x15a] sm:$0xff] }
 0x288   : > { %2668 = vrot.lane.b32.xlu0 %v10910_v50, %s9679_s20  ;;  %2474 = vrot.lane.b32.xlu1 %v2247_v55, %s9677_s17  ;;  %v2375_v55 = vld [vmem:[#allocation2 + $0xe2] sm:$0xff] }
 0x289   : > { %v10932_v31 = vpack.c.bf16 %v2375_v55, %v2374_v20  ;;  %v2278_v20 = vld [vmem:[#allocation2 + $0xd8] sm:$0xff] }
 0x28a   : > { %v10959_v55 = vpack.c.bf16 %v2279_v59, %v2278_v20  ;;  %v10977_v20 = vpop.permute.xlu0 %2622 }
 0x28c   : > { %2574 = vrot.lane.b32.xlu0 %v2394_v51, %s9678_s19  ;;  %2526 = vrot.lane.b32.xlu1 %v10898_v1, %s9679_s20 }
 0x28d   : > { %9340 = vmatmul.mubr.msk.bf16.gmra.mrb[80].mxu0 %vm170_vm0, %v10670_v57 }
 0x28e   : > { %9343 = vmatprep.mubr.msk.bf16.mxu0 %vm170_vm0, %v10916_v24  ;;  %v10989_v52 = vpop.permute.xlu0 %2670 }
 0x290   : > { %2618 = vrot.lane.b32.xlu0 %v10924_v0, %s9677_s17  ;;  %2432 = vrot.lane.b32.xlu1 %v10910_v50, %s9678_s19 }
 0x294   : > { %2666 = vrot.lane.b32.xlu0 %v10930_v23, %s9679_s20  ;;  %2480 = vrot.lane.b32.xlu1 %v2394_v51, %s9677_s17  ;;  %v10951_v51 = vpack.c.bf16 %v2381_v48, %v2380_v2  ;;  %v10965_v2 = vpack.c.bf16 %v2327_v29, %v2326_v7  ;;  %v10967_v48 = vpack.c.bf16 %v2383_v41, %v2382_v38  ;;  %v2281_v29 = vld [vmem:[#allocation2 + $0xf8] sm:$0xff]  ;;  %v2386_v38 = vld [vmem:[#allocation2 + $0x16a] sm:$0xff] }
 0x295   : > { %9344 = vmatmul.mubr.msk.bf16.gmra.mrb[84].mxu0 %vm170_vm0, %v10932_v31  ;;  %v2387_v41 = vld [vmem:[#allocation2 + $0x172] sm:$0xff] }
 0x296   : > { %9347 = vmatprep.mubr.msk.bf16.mxu0 %vm170_vm0, %v10936_v15  ;;  %v2280_v7 = vld [vmem:[#allocation2 + $0xf0] sm:$0xff]  ;;  %v10987_v28 = vpack.c.bf16 %v2387_v41, %v2386_v38  ;;  %v11007_v38 = vpop.permute.xlu0 %2576  ;;  %v11009_v41 = vpop.permute.xlu1 %2424 }
 0x297   : > { %v10985_v27 = vpack.c.bf16 %v2281_v29, %v2280_v7  ;;  %v2282_v7 = vld [vmem:[#allocation2 + $0x108] sm:$0xff] }
 0x298   : > { %2572 = vrot.lane.b32.xlu0 %v10886_v62, %s9678_s19  ;;  %2438 = vrot.lane.b32.xlu1 %v10665_v43, %s9678_s19 }
 0x29c   : > { %2582 = vrot.lane.b32.xlu0 %v10916_v24, %s9678_s19  ;;  %2486 = vrot.lane.b32.xlu1 %v10670_v57, %s9677_s17  ;;  %v2384_v57 = vld [vmem:[#allocation2 + $0x152] sm:$0xff] }
 0x29d   : > { %9348 = vmatmul.mubr.msk.bf16.gmra.mrb[88].mxu0 %vm170_vm0, %v10947_v60  ;;  %v10971_v59 = vpack.c.bf16 %v2385_v47, %v2384_v57  ;;  %v2388_v57 = vld [vmem:[#allocation2 + $0x182] sm:$0xff]  ;;  %v2389_v47 = vld [vmem:[#allocation2 + $0x18a] sm:$0xff] }
 0x29e   : > { %9351 = vmatprep.mubr.msk.bf16.mxu0 %vm170_vm0, %v10951_v51  ;;  %v10993_v19 = vpack.c.bf16 %v2389_v47, %v2388_v57  ;;  %v2331_v57 = vld [vmem:[#allocation2 + $0x111] sm:$0xff]  ;;  %v11017_v47 = vpop.permute.xlu0 %2624 }
 0x2a0   : > { %2630 = vrot.lane.b32.xlu0 %v10959_v55, %s9677_s17  ;;  %2524 = vrot.lane.b32.xlu1 %v10924_v0, %s9679_s20 }
 0x2a4   : > { %2678 = vrot.lane.b32.xlu0 %v10965_v2, %s9679_s20  ;;  %2430 = vrot.lane.b32.xlu1 %v10930_v23, %s9678_s19 }
 0x2a5   : > { %9352 = vmatmul.mubr.msk.bf16.gmra.mrb[92].mxu0 %vm170_vm0, %v10967_v48 }
 0x2a6   : > { %9355 = vmatprep.mubr.msk.bf16.mxu0 %vm170_vm0, %v10971_v59 }
 0x2a8   : > { %2584 = vrot.lane.b32.xlu0 %v10932_v31, %s9678_s19  ;;  %2478 = vrot.lane.b32.xlu1 %v10886_v62, %s9677_s17  ;;  %v2328_v62 = vld [vmem:[#allocation2 + $0xf1] sm:$0xff] }
 0x2a9   : > { %v11001_v29 = vpack.c.bf16 %v2329_v8, %v2328_v62  ;;  %v2330_v62 = vld [vmem:[#allocation2 + $0x109] sm:$0xff] }
 0x2aa   : > { %v11025_v25 = vpack.c.bf16 %v2331_v57, %v2330_v62  ;;  %v2333_v62 = vld [vmem:[#allocation2 + $0x129] sm:$0xff] }
 0x2ab   : > { %v11049_v58 = vpack.c.bf16 %v2333_v62, %v2332_v63  ;;  %v2335_v62 = vld [vmem:[#allocation2 + $0x141] sm:$0xff] }
 0x2ac   : > { %2632 = vrot.lane.b32.xlu0 %v10985_v27, %s9677_s17  ;;  %2534 = vrot.lane.b32.xlu1 %v10677_v9, %s9679_s20  ;;  %v2283_v9 = vld [vmem:[#allocation2 + $0x110] sm:$0xff]  ;;  %v11073_v10 = vpack.c.bf16 %v2335_v62, %v2334_v5  ;;  %v2337_v62 = vld [vmem:[#allocation2 + $0x159] sm:$0xff] }
 0x2ad   : > { %9356 = vmatmul.mubr.msk.bf16.gmra.mrb[96].mxu0 %vm170_vm0, %v10987_v28  ;;  %v11015_v8 = vpack.c.bf16 %v2283_v9, %v2282_v7  ;;  %v2285_v7 = vld [vmem:[#allocation2 + $0x128] sm:$0xff]  ;;  %v11097_v12 = vpack.c.bf16 %v2337_v62, %v2336_v56 }
 0x2ae   : > { %9359 = vmatprep.mubr.msk.bf16.mxu0 %vm170_vm0, %v10993_v19  ;;  %v11039_v57 = vpack.c.bf16 %v2285_v7, %v2284_v40  ;;  %v2287_v7 = vld [vmem:[#allocation2 + $0x140] sm:$0xff]  ;;  %13528 = vst [vmem:[#allocation42_spill] sm:$0xff] %v11073_v10 }
 0x2af   : > { %13525 = vst [vmem:[#allocation39_spill] sm:$0xff] %v11015_v8  ;;  %v11063_v63 = vpack.c.bf16 %v2287_v7, %v2286_v32  ;;  %v2289_v7 = vld [vmem:[#allocation2 + $0x158] sm:$0xff] }
 0x2b0   : > { %2680 = vrot.lane.b32.xlu0 %v11001_v29, %s9679_s20  ;;  %2440 = vrot.lane.b32.xlu1 %v10689_v26, %s9678_s19  ;;  %v11021_v26 = vpop.permute.xlu1 %2472  ;;  %13526 = vst [vmem:[#allocation40_spill] sm:$0xff] %v11039_v57  ;;  %v11087_v5 = vpack.c.bf16 %v2289_v7, %v2288_v18  ;;  %v2291_v7 = vld [vmem:[#allocation2 + $0x170] sm:$0xff] }
 0x2b1   : > { %13527 = vst [vmem:[#allocation41_spill] sm:$0xff] %v11063_v63  ;;  %v11111_v62 = vpack.c.bf16 %v2291_v7, %v2290_v42  ;;  %v2007_v42 = vpack.c.bf16 %v1976_v45, %v1975_v37  ;;  %v2341_v37 = vld [vmem:[#allocation2 + $0x189] sm:$0xff] }
 0x2b3   : > { %v2698_v4 = vsel %vm170_vm0, %v2007_v42, %v11009_v41  ;;  %v2340_v41 = vld [vmem:[#allocation2 + $0x181] sm:$0xff] }
 0x2b4   : > { %2586 = vrot.lane.b32.xlu0 %v10936_v15, %s9678_s19  ;;  %2488 = vrot.lane.b32.xlu1 %v10916_v24, %s9677_s17  ;;  %v11031_v24 = vpop.permute.xlu0 %2672  ;;  %v11033_v9 = vpop.permute.xlu1 %2528 }
 0x2b8   : > { %2634 = vrot.lane.b32.xlu0 %v11015_v8, %s9677_s17  ;;  %2536 = vrot.lane.b32.xlu1 %v10959_v55, %s9679_s20  ;;  %v11041_v6 = vpop.permute.xlu0 %2578  ;;  %v11045_v3 = vpop.permute.xlu1 %2434 }
 0x2bc   : > { %2682 = vrot.lane.b32.xlu0 %v11025_v25, %s9679_s20  ;;  %2442 = vrot.lane.b32.xlu1 %v10965_v2, %s9678_s19  ;;  %v11055_v40 = vpop.permute.xlu0 %2626 }
 0x2c0   : > { %2588 = vrot.lane.b32.xlu0 %v10947_v60, %s9678_s19  ;;  %2490 = vrot.lane.b32.xlu1 %v10932_v31, %s9677_s17  ;;  %v11057_v31 = vpop.permute.xlu1 %2482  ;;  %v11065_v16 = vpop.permute.xlu0 %2674 }
 0x2c4   : > { %2636 = vrot.lane.b32.xlu0 %v11039_v57, %s9677_s17  ;;  %2538 = vrot.lane.b32.xlu1 %v10985_v27, %s9679_s20  ;;  %v11069_v53 = vpop.permute.xlu1 %2530  ;;  %v11079_v32 = vpop.permute.xlu0 %2580 }
 0x2c8   : > { %2684 = vrot.lane.b32.xlu0 %v11049_v58, %s9679_s20  ;;  %2444 = vrot.lane.b32.xlu1 %v11001_v29, %s9678_s19  ;;  %v11089_v14 = vpop.permute.xlu0 %2628 }
 0x2cc   : > { %2590 = vrot.lane.b32.xlu0 %v10951_v51, %s9678_s19  ;;  %2492 = vrot.lane.b32.xlu1 %v10936_v15, %s9677_s17  ;;  %v11081_v15 = vpop.permute.xlu1 %2436  ;;  %v11103_v18 = vpop.permute.xlu0 %2676 }
 0x2d0   : > { %2638 = vrot.lane.b32.xlu0 %v11063_v63, %s9677_s17  ;;  %2540 = vrot.lane.b32.xlu1 %v11015_v8, %s9679_s20  ;;  %v11093_v44 = vpop.permute.xlu1 %2484  ;;  %v2745_v8 = vsel %vm1115_vm3, %v2698_v4, %v11021_v26  ;;  %v2295_v26 = vld [vmem:[#allocation2 + $0x1a0] sm:$0xff] }
 0x2d4   : > { %2686 = vrot.lane.b32.xlu0 %v11073_v10, %s9679_s20  ;;  %2446 = vrot.lane.b32.xlu1 %v11025_v25, %s9678_s19 }
 0x2d8   : > { %2592 = vrot.lane.b32.xlu0 %v10967_v48, %s9678_s19  ;;  %2494 = vrot.lane.b32.xlu1 %v10947_v60, %s9677_s17  ;;  %v11105_v60 = vpop.permute.xlu1 %2532 }
 0x2dc   : > { %2640 = vrot.lane.b32.xlu0 %v11087_v5, %s9677_s17  ;;  %2542 = vrot.lane.b32.xlu1 %v11039_v57, %s9679_s20 }
 0x2e0   : > { %2688 = vrot.lane.b32.xlu0 %v11097_v12, %s9679_s20  ;;  %2448 = vrot.lane.b32.xlu1 %v11049_v58, %s9678_s19 }
 0x2e4   : > { %2594 = vrot.lane.b32.xlu0 %v10971_v59, %s9678_s19  ;;  %2496 = vrot.lane.b32.xlu1 %v10951_v51, %s9677_s17 }
 0x2e6   : > { %v2617_v56 = vpop.permute.xlu0 %2616  ;;  %v11113_v17 = vpop.permute.xlu1 %2522 }
 0x2e8   : > { %2642 = vrot.lane.b32.xlu0 %v11111_v62, %s9677_s17  ;;  %2544 = vrot.lane.b32.xlu1 %v11063_v63, %s9679_s20  ;;  %v2310_v63 = vpack.c.bf16 %v2293_v30, %v2292_v11  ;;  %v2391_v11 = vld [vmem:[#allocation2 + $0x1a2] sm:$0xff] }
 0x2ea   : > { %v2665_v13 = vpop.permute.xlu0 %2664  ;;  %v11121_v51 = vpop.permute.xlu1 %2428 }
 0x2ec   : > { %2690 = vrot.lane.b32.xlu0 %v11119_v21, %s9679_s20  ;;  %2450 = vrot.lane.b32.xlu1 %v11073_v10, %s9678_s19 }
 0x2ee   : > { %v2571_v7 = vpop.permute.xlu0 %2570  ;;  %v11127_v33 = vpop.permute.xlu1 %2476 }
 0x2f0   : > { %2596 = vrot.lane.b32.xlu0 %v10987_v28, %s9678_s19  ;;  %2498 = vrot.lane.b32.xlu1 %v10967_v48, %s9677_s17 }
 0x2f2   : > { %v2569_v34 = vpop.permute.xlu0 %2568  ;;  %v2521_v45 = vpop.permute.xlu1 %2520 }
 0x2f3   : > { %v2826_v57 = vsel %vm170_vm0, %v10900_v46, %v2569_v34  ;;  %v2777_v30 = vsel %vm1148_vm4, %v2745_v8, %v2521_v45  ;;  %v11145_v34 = vpack.c.bf16 %v2341_v37, %v2340_v41  ;;  %v2342_v45 = vld [vmem:[#allocation2 + $0x199] sm:$0xff]  ;;  %v2343_v37 = vld [vmem:[#allocation2 + $0x1a1] sm:$0xff] }
 0x2f4   : > { %2644 = vrot.lane.b32.xlu0 %v2310_v63, %s9677_s17  ;;  %v2873_v10 = vsel %vm1115_vm3, %v2826_v57, %v2617_v56  ;;  %2546 = vrot.lane.b32.xlu1 %v11087_v5, %s9679_s20  ;;  %v2294_v57 = vld [vmem:[#allocation2 + $0x198] sm:$0xff] }
 0x2f5   : > { %v2905_v48 = vsel %vm1148_vm4, %v2873_v10, %v2665_v13  ;;  %v2390_v56 = vld [vmem:[#allocation2 + $0x19a] sm:$0xff]  ;;  %v2311_v8 = vpack.c.bf16 %v2295_v26, %v2294_v57 }
 0x2f6   : > { %3185 = vmatprep.mubr.bf16.mxu1 %v2905_v48  ;;  %v2621_v42 = vpop.permute.xlu0 %2620  ;;  %v2427_v46 = vpop.permute.xlu1 %2426  ;;  %v2407_v13 = vpack.c.bf16 %v2391_v11, %v2390_v56 }
 0x2f7   : > { %3186 = vmatmul.mubr.bf16.vlgmr.msra.gmra.mrb[24].mxu1 %v2777_v30  ;;  %v2359_v30 = vpack.c.bf16 %v2343_v37, %v2342_v45 }
 0x2f8   : > { %2692 = vrot.lane.b32.xlu0 %v11145_v34, %s9679_s20  ;;  %2452 = vrot.lane.b32.xlu1 %v11097_v12, %s9678_s19 }
 0x2f9   : > { %9360 = vmatmul.mubr.msk.bf16.gmra.mrb[100].mxu0 %vm170_vm0, %v2407_v13 }
 0x2fa   : > { %v2669_v10 = vpop.permute.xlu0 %2668  ;;  %v2475_v4 = vpop.permute.xlu1 %2474 }
 0x2fc   : > { %2598 = vrot.lane.b32.xlu0 %v10993_v19, %s9678_s19  ;;  %2500 = vrot.lane.b32.xlu1 %v10971_v59, %s9677_s17  ;;  %v2701_v19 = vsel %vm170_vm0, %v10893_v22, %v2427_v46  ;;  %v2829_v59 = vsel %vm170_vm0, %v10880_v54, %v2571_v7 }
 0x2fd   : > { %v2747_v57 = vsel %vm1115_vm3, %v2701_v19, %v2475_v4 }
 0x2fe   : > { %v2575_v48 = vpop.permute.xlu0 %2574  ;;  %v2527_v41 = vpop.permute.xlu1 %2526  ;;  %v2780_v22 = vsel %vm1148_vm4, %v2747_v57, %v11113_v17 }
 0x2ff   : > { %v2835_v17 = vsel %vm170_vm0, %v10910_v50, %v2575_v48 }
 0x300   : > { %2646 = vrot.lane.b32.xlu0 %v2311_v8, %s9677_s17  ;;  %2548 = vrot.lane.b32.xlu1 %v11111_v62, %s9679_s20  ;;  %v2879_v19 = vsel %vm1115_vm3, %v2835_v17, %v10977_v20  ;;  %v2838_v20 = vsel %vm170_vm0, %v10603_v61, %v11007_v38 }
 0x301   : > { %v2914_v50 = vsel %vm1148_vm4, %v2879_v19, %v10989_v52 }
 0x302   : > { %v2619_v56 = vpop.permute.xlu0 %2618  ;;  %v2433_v11 = vpop.permute.xlu1 %2432 }
 0x303   : > { %v2875_v26 = vsel %vm1115_vm3, %v2829_v59, %v2619_v56 }
 0x304   : > { %2694 = vrot.lane.b32.xlu0 %v2359_v30, %s9679_s20  ;;  %2454 = vrot.lane.b32.xlu1 %v11119_v21, %s9678_s19 }
 0x306   : > { %v2667_v13 = vpop.permute.xlu0 %2666  ;;  %v2481_v8 = vpop.permute.xlu1 %2480 }
 0x307   : > { %v2908_v45 = vsel %vm1148_vm4, %v2875_v26, %v2667_v13  ;;  %v2881_v26 = vsel %vm1115_vm3, %v2838_v20, %v11017_v47  ;;  %v2841_v47 = vsel %vm170_vm0, %v10639_v39, %v11041_v6  ;;  %v2844_v6 = vsel %vm170_vm0, %v10665_v43, %v11079_v32 }
 0x308   : > { %3193 = vmatprep.mubr.bf16.mxu1 %v2908_v45  ;;  %2502 = vrot.lane.b32.xlu1 %v10987_v28, %s9677_s17  ;;  %v2704_v28 = vsel %vm170_vm0, %v10862_v36, %v11121_v51  ;;  %v2917_v45 = vsel %vm1148_vm4, %v2881_v26, %v11031_v24  ;;  %v2716_v43 = vsel %vm170_vm0, %v10622_v35, %v11081_v15 }
 0x309   : > { %3194 = vmatmul.mubr.bf16.gmra.mrb[28].mxu1 %v2780_v22 }
 0x30a   : > { %v2573_v54 = vpop.permute.xlu0 %2572  ;;  %v11175_v46 = vpop.permute.xlu1 %2438 }
 0x30b   : > { %v2832_v7 = vsel %vm170_vm0, %v10930_v23, %v2573_v54 }
 0x30c   : > { %v2877_v4 = vsel %vm1115_vm3, %v2832_v7, %v2621_v42  ;;  %2550 = vrot.lane.b32.xlu1 %v2310_v63, %s9679_s20  ;;  %v2749_v63 = vsel %vm1115_vm3, %v2704_v28, %v11127_v33  ;;  %v2181_v28 = vld [vmem:[#allocation2 + $0xc1] sm:$0xff] }
 0x30d   : > { %v2911_v37 = vsel %vm1148_vm4, %v2877_v4, %v2669_v10 }
 0x30e   : > { %v2583_v30 = vpop.permute.xlu0 %2582  ;;  %3201 = vmatprep.mubr.bf16.mxu1 %v2911_v37  ;;  %v11182_v56 = vpop.permute.xlu1 %2486 }
 0x312   : > { %v2631_v23 = vpop.permute.xlu0 %2630  ;;  %v2525_v42 = vpop.permute.xlu1 %2524 }
 0x313   : > { %v2783_v10 = vsel %vm1148_vm4, %v2749_v63, %v2525_v42  ;;  %v1990_v42 = vld [vmem:[#allocation2 + $0xb0] sm:$0xff] }
 0x314   : > { %3202 = vmatmul.mubr.bf16.gmra.mrb[32].mxu1 %v2783_v10 }
 0x315   : > { %3209 = vmatprep.mubr.bf16.mxu1 %v2914_v50 }
 0x316   : > { %v2679_v48 = vpop.permute.xlu0 %2678  ;;  %v2431_v59 = vpop.permute.xlu1 %2430 }
 0x317   : > { %v2707_v36 = vsel %vm170_vm0, %v10924_v0, %v2431_v59  ;;  %v2710_v0 = vsel %vm170_vm0, %v10898_v1, %v2433_v11 }
 0x318   : > { %v2753_v54 = vsel %vm1115_vm3, %v2710_v0, %v2481_v8  ;;  %v2713_v8 = vsel %vm170_vm0, %v10589_v49, %v11045_v3  ;;  %v2182_v49 = vld [vmem:[#allocation2 + $0xc9] sm:$0xff] }
 0x319   : > { %v2789_v7 = vsel %vm1148_vm4, %v2753_v54, %v11033_v9  ;;  %v2755_v39 = vsel %vm1115_vm3, %v2713_v8, %v11057_v31  ;;  %v2885_v9 = vsel %vm1115_vm3, %v2844_v6, %v11089_v14  ;;  %v2206_v31 = vpack.c.bf16 %v2182_v49, %v2181_v28 }
 0x31a   : > { %v2585_v57 = vpop.permute.xlu0 %2584  ;;  %v2479_v51 = vpop.permute.xlu1 %2478  ;;  %v2923_v17 = vsel %vm1148_vm4, %v2885_v9, %v11103_v18  ;;  %v2757_v14 = vsel %vm1115_vm3, %v2716_v43, %v11093_v44 }
 0x31b   : > { %v2751_v33 = vsel %vm1115_vm3, %v2707_v36, %v2479_v51  ;;  %v2795_v18 = vsel %vm1148_vm4, %v2757_v14, %v11105_v60  ;;  %v1989_v36 = vld [vmem:[#allocation2 + $0xa8] sm:$0xff]  ;;  %v2850_v60 = vsel %vm170_vm0, %v10965_v2, %v2585_v57  ;;  %v3588_v14 = vld [vmem:[#allocation3 + $0x9] sm:$0xff] }
 0x31c   : > { %v2786_v13 = vsel %vm1148_vm4, %v2751_v33, %v2527_v41  ;;  %v2883_v41 = vsel %vm1115_vm3, %v2841_v47, %v11055_v40  ;;  %v2014_v35 = vpack.c.bf16 %v1990_v42, %v1989_v36  ;;  %v3635_v42 = vld [vmem:[#allocation3 + $0x2] sm:$0xff] }
 0x31d   : > { %3210 = vmatmul.mubr.bf16.gmra.mrb[36].mxu1 %v2786_v13  ;;  %v2920_v4 = vsel %vm1148_vm4, %v2883_v41, %v11065_v16  ;;  %v2792_v16 = vsel %vm1148_vm4, %v2755_v39, %v11069_v53  ;;  %v2847_v53 = vsel %vm170_vm0, %v2206_v31, %v2583_v30 }
 0x31e   : > { %v2633_v52 = vpop.permute.xlu0 %2632  ;;  %v2535_v22 = vpop.permute.xlu1 %2534  ;;  %3217 = vmatprep.mubr.bf16.mxu1 %v2917_v45  ;;  %v2887_v63 = vsel %vm1115_vm3, %v2847_v53, %v2631_v23  ;;  %v2719_v44 = vsel %vm170_vm0, %v2014_v35, %v11175_v46  ;;  %v1991_v45 = vld [vmem:[#allocation2 + $0xc0] sm:$0xff]  ;;  %v3857_v53 = vld [vmem:[#allocation3 + $0x198] sm:$0xff] }
 0x31f   : > { %v2926_v50 = vsel %vm1148_vm4, %v2887_v63, %v2679_v48  ;;  %v2759_v30 = vsel %vm1115_vm3, %v2719_v44, %v11182_v56  ;;  %v2889_v23 = vsel %vm1115_vm3, %v2850_v60, %v2633_v52  ;;  %v1992_v48 = vld [vmem:[#allocation2 + $0xc8] sm:$0xff]  ;;  %v13529_v44 = vld [vmem:[#allocation39_spill] sm:$0xff] }
 0x320   : > { %v2798_v20 = vsel %vm1148_vm4, %v2759_v30, %v2535_v22  ;;  %v2015_v46 = vpack.c.bf16 %v1992_v48, %v1991_v45 }
 0x322   : > { %v2681_v61 = vpop.permute.xlu0 %2680  ;;  %v2441_v38 = vpop.permute.xlu1 %2440 }
 0x323   : > { %v2929_v26 = vsel %vm1148_vm4, %v2889_v23, %v2681_v61  ;;  %v2722_v54 = vsel %vm170_vm0, %v2015_v46, %v2441_v38  ;;  %v13530_v23 = vld [vmem:[#allocation42_spill] sm:$0xff] }
 0x325   : > { %3218 = vmatmul.mubr.bf16.gmra.mrb[40].mxu1 %v2789_v7 }
 0x326   : > { %v2587_v24 = vpop.permute.xlu0 %2586  ;;  %v2489_v1 = vpop.permute.xlu1 %2488  ;;  %3225 = vmatprep.mubr.bf16.mxu1 %v2920_v4 }
 0x327   : > { %v2853_v2 = vsel %vm170_vm0, %v11001_v29, %v2587_v24  ;;  %v2761_v57 = vsel %vm1115_vm3, %v2722_v54, %v2489_v1 }
 0x32a   : > { %v2635_v11 = vpop.permute.xlu0 %2634  ;;  %v2537_v37 = vpop.permute.xlu1 %2536 }
 0x32b   : > { %v2891_v52 = vsel %vm1115_vm3, %v2853_v2, %v2635_v11  ;;  %v2801_v22 = vsel %vm1148_vm4, %v2761_v57, %v2537_v37  ;;  %v13531_v57 = vld [vmem:[#allocation40_spill] sm:$0xff] }
 0x32d   : > { %3226 = vmatmul.mubr.bf16.gmra.mrb[44].mxu1 %v2792_v16 }
 0x32e   : > { %v2683_v40 = vpop.permute.xlu0 %2682  ;;  %v2443_v3 = vpop.permute.xlu1 %2442  ;;  %3233 = vmatprep.mubr.bf16.mxu1 %v2923_v17 }
 0x32f   : > { %v2932_v61 = vsel %vm1148_vm4, %v2891_v52, %v2683_v40  ;;  %v2725_v38 = vsel %vm170_vm0, %v10959_v55, %v2443_v3 }
 0x332   : > { %v2589_v19 = vpop.permute.xlu0 %2588  ;;  %v2491_v32 = vpop.permute.xlu1 %2490 }
 0x333   : > { %v2856_v29 = vsel %vm170_vm0, %v11025_v25, %v2589_v19  ;;  %v2763_v24 = vsel %vm1115_vm3, %v2725_v38, %v2491_v32  ;;  %v3587_v32 = vld [vmem:[#allocation3 + $0x1] sm:$0xff] }
 0x334   : > { %v3619_v63 = vpack.c.bf16 %v3588_v14, %v3587_v32 }
 0x335   : > { %3234 = vmatmul.mubr.bf16.gmra.mrb[48].mxu1 %v2795_v18  ;;  %v3858_v18 = vld [vmem:[#allocation3 + $0x1a0] sm:$0xff] }
 0x336   : > { %v2637_v10 = vpop.permute.xlu0 %2636  ;;  %v2539_v59 = vpop.permute.xlu1 %2538  ;;  %3241 = vmatprep.mubr.bf16.mxu1 %v2926_v50  ;;  %v3874_v50 = vpack.c.bf16 %v3858_v18, %v3857_v53  ;;  %3987 = vrot.lane.b32.xlu1 %v3619_v63, %s9678_s19 }
 0x337   : > { %v2893_v1 = vsel %vm1115_vm3, %v2856_v29, %v2637_v10  ;;  %v2804_v11 = vsel %vm1148_vm4, %v2763_v24, %v2539_v59  ;;  %v3636_v10 = vld [vmem:[#allocation3 + $0xa] sm:$0xff] }
 0x338   : > { %v3667_v36 = vpack.c.bf16 %v3636_v10, %v3635_v42  ;;  %4209 = vrot.lane.b32.xlu0 %v3874_v50, %s9677_s17  ;;  %v9556_v50 = vld [vmem:[%s13441_s1 + $0x160] sm:$0xff]  }
 0x339   : > { %8901 = vmatprep.subr.bf16.mxu1 %v9556_v50 }
 0x33a   : > { %v2685_v15 = vpop.permute.xlu0 %2684  ;;  %v2445_v51 = vpop.permute.xlu1 %2444  ;;  %4035 = vrot.lane.b32.xlu1 %v3667_v36, %s9677_s17  ;;  %v9557_v36 = vld [vmem:[%s13441_s1 + $0x120] sm:$0xff]  }
 0x33b   : > { %v2935_v37 = vsel %vm1148_vm4, %v2893_v1, %v2685_v15  ;;  %v2728_v25 = vsel %vm170_vm0, %v10985_v27, %v2445_v51  ;;  %8902 = vmatpush3.bf16.msra.mxu1 %v9557_v36 }
 0x33d   : > { %3242 = vmatmul.mubr.bf16.gmra.mrb[52].mxu1 %v2798_v20 }
 0x33e   : > { %v2591_v33 = vpop.permute.xlu0 %2590  ;;  %v2493_v13 = vpop.permute.xlu1 %2492  ;;  %3249 = vmatprep.mubr.bf16.mxu1 %v2929_v26 }
 0x33f   : > { %v2859_v49 = vsel %vm170_vm0, %v11049_v58, %v2591_v33  ;;  %v2765_v3 = vsel %vm1115_vm3, %v2728_v25, %v2493_v13 }
 0x342   : > { %v2639_v0 = vpop.permute.xlu0 %2638  ;;  %v2541_v56 = vpop.permute.xlu1 %2540 }
 0x343   : > { %v2895_v28 = vsel %vm1115_vm3, %v2859_v49, %v2639_v0  ;;  %v2807_v31 = vsel %vm1148_vm4, %v2765_v3, %v2541_v56 }
 0x345   : > { %3250 = vmatmul.mubr.bf16.gmra.mrb[56].mxu1 %v2801_v22 }
 0x346   : > { %v2687_v47 = vpop.permute.xlu0 %2686  ;;  %v2447_v41 = vpop.permute.xlu1 %2446  ;;  %3257 = vmatprep.mubr.bf16.mxu1 %v2932_v61 }
 0x347   : > { %v2938_v43 = vsel %vm1148_vm4, %v2895_v28, %v2687_v47  ;;  %v2731_v51 = vsel %vm170_vm0, %v13529_v44, %v2447_v41 }
 0x34a   : > { %v2593_v7 = vpop.permute.xlu0 %2592  ;;  %v2495_v4 = vpop.permute.xlu1 %2494 }
 0x34b   : > { %v2862_v20 = vsel %vm170_vm0, %v13530_v23, %v2593_v7  ;;  %v2767_v48 = vsel %vm1115_vm3, %v2731_v51, %v2495_v4 }
 0x34d   : > { %3258 = vmatmul.mubr.bf16.gmra.mrb[60].mxu1 %v2804_v11 }
 0x34e   : > { %v2641_v8 = vpop.permute.xlu0 %2640  ;;  %v2543_v39 = vpop.permute.xlu1 %2542  ;;  %3265 = vmatprep.mubr.bf16.mxu1 %v2935_v37 }
 0x34f   : > { %v2897_v33 = vsel %vm1115_vm3, %v2862_v20, %v2641_v8  ;;  %v2810_v26 = vsel %vm1148_vm4, %v2767_v48, %v2543_v39  ;;  %v9558_v48 = vld [vmem:[%s13441_s1 + $0x1a0] sm:$0xff]  }
 0x350   : > { %v11265_v6 = vpop.f32.mrb[72].mxu0  ;;  %9363 = vmatprep.subr.bf16.mxu0 %v9558_v48 }
 0x351   : > { %v11267_v9 = vpop.f32.mrb[73].mxu0  ;;  %9364 = vmatpush3.bf16.msra.mxu0 %v9558_v48 }
 0x352   : > { %v11269_v55 = vpop.f32.mrb[74].mxu0  ;;  %v2689_v16 = vpop.permute.xlu0 %2688 }
 0x353   : > { %v2449_v40 = vpop.permute.xlu1 %2448  ;;  %v11273_v17 = vpop.f32.mrb[75].mxu0  ;;  %v2941_v45 = vsel %vm1148_vm4, %v2897_v33, %v2689_v16 }
 0x354   : > { %v2734_v52 = vsel %vm170_vm0, %v13531_v57, %v2449_v40 }
 0x355   : > { %3266 = vmatmul.mubr.bf16.gmra.mrb[64].mxu1 %v2807_v31 }
 0x356   : > { %v2595_v19 = vpop.permute.xlu0 %2594  ;;  %3273 = vmatprep.mubr.bf16.mxu1 %v2938_v43 }
 0x357   : > { %v2497_v27 = vpop.permute.xlu1 %2496  ;;  %v2865_v61 = vsel %vm170_vm0, %v11097_v12, %v2595_v19  ;;  %v13532_v12 = vld [vmem:[#allocation41_spill] sm:$0xff] }
 0x358   : > { %v11281_v58 = vpop.f32.mrb[76].mxu0  ;;  %v2769_v41 = vsel %vm1115_vm3, %v2734_v52, %v2497_v27 }
 0x359   : > { %v11283_v59 = vpop.f32.mrb[77].mxu0 }
 0x35a   : > { %v11286_v35 = vpop.f32.mrb[78].mxu0  ;;  %v2643_v15 = vpop.permute.xlu0 %2642 }
 0x35b   : > { %v2545_v30 = vpop.permute.xlu1 %2544  ;;  %v11291_v60 = vpop.f32.mrb[79].mxu0  ;;  %v2899_v7 = vsel %vm1115_vm3, %v2865_v61, %v2643_v15 }
 0x35c   : > { %v2813_v38 = vsel %vm1148_vm4, %v2769_v41, %v2545_v30 }
 0x35d   : > { %3274 = vmatmul.mubr.bf16.gmra.mrb[68].mxu1 %v2810_v26 }
 0x35e   : > { %v2691_v13 = vpop.permute.xlu0 %2690  ;;  %3281 = vmatprep.mubr.bf16.mxu1 %v2941_v45 }
 0x35f   : > { %v2451_v46 = vpop.permute.xlu1 %2450  ;;  %v2944_v29 = vsel %vm1148_vm4, %v2899_v7, %v2691_v13  ;;  %v9559_v13 = vld [vmem:[%s13441_s1 + $0x1a8] sm:$0xff]  }
 0x360   : > { %v11300_v0 = vpop.f32.mrb[80].mxu0  ;;  %v2737_v39 = vsel %vm170_vm0, %v13532_v12, %v2451_v46  ;;  %9365 = vmatprep.subr.bf16.mxu0 %v9559_v13  ;;  %v9561_v7 = vld [vmem:[%s13441_s1 + $0x128] sm:$0xff]   ;;  %v9567_v12 = vld [vmem:[%s13441_s1 + $0x140] sm:$0xff]  }
 0x361   : > { %v11302_v54 = vpop.f32.mrb[81].mxu0  ;;  %9366 = vmatpush3.bf16.msra.mxu0 %v9559_v13 }
 0x362   : > { %v11304_v56 = vpop.f32.mrb[82].mxu0  ;;  %v2597_v2 = vpop.permute.xlu0 %2596 }
 0x363   : > { %v2499_v22 = vpop.permute.xlu1 %2498  ;;  %v11308_v47 = vpop.f32.mrb[83].mxu0  ;;  %v2868_v40 = vsel %vm170_vm0, %v11119_v21, %v2597_v2 }
 0x364   : > { %v2771_v49 = vsel %vm1115_vm3, %v2737_v39, %v2499_v22  ;;  %v9568_v39 = vld [vmem:[%s13441_s1 + $0x188] sm:$0xff]  }
 0x365   : > { %3282 = vmatmul.mubr.bf16.gmra.mrb[72].mxu1 %v2813_v38  ;;  %v9562_v38 = vld [vmem:[%s13441_s1 + $0x170] sm:$0xff]  }
 0x366   : > { %v2645_v4 = vpop.permute.xlu0 %2644  ;;  %3289 = vmatprep.mubr.bf16.mxu1 %v2944_v29  ;;  %v9564_v29 = vld [vmem:[%s13441_s1 + $0x178] sm:$0xff]  }
 0x367   : > { %v2547_v24 = vpop.permute.xlu1 %2546  ;;  %v2901_v3 = vsel %vm1115_vm3, %v2868_v40, %v2645_v4  ;;  %v9563_v4 = vld [vmem:[%s13441_s1 + $0x130] sm:$0xff]  }
 0x368   : > { %v11316_v1 = vpop.f32.mrb[84].mxu0  ;;  %v2816_v28 = vsel %vm1148_vm4, %v2771_v49, %v2547_v24  ;;  %v9565_v24 = vld [vmem:[%s13441_s1 + $0x138] sm:$0xff]   ;;  %v11413_v49 = vld [vmem:[%s13442_s2 + $0x1] ss:$0 sm:$0xff] }
 0x369   : > { %v11318_v11 = vpop.f32.mrb[85].mxu0 }
 0x36a   : > { %v11320_v8 = vpop.f32.mrb[86].mxu0  ;;  %v2693_v37 = vpop.permute.xlu0 %2692 }
 0x36b   : > { %v2453_v16 = vpop.permute.xlu1 %2452  ;;  %v11324_v25 = vpop.f32.mrb[87].mxu0  ;;  %v2947_v19 = vsel %vm1148_vm4, %v2901_v3, %v2693_v37  ;;  %v9566_v37 = vld [vmem:[%s13441_s1 + $0x180] sm:$0xff]  }
 0x36c   : > { %v2740_v53 = vsel %vm170_vm0, %v11087_v5, %v2453_v16  ;;  %v9569_v16 = vld [vmem:[%s13441_s1 + $0x148] sm:$0xff]  }
 0x36d   : > { %3290 = vmatmul.mubr.bf16.gmra.mrb[76].mxu1 %v2816_v28 }
 0x36e   : > { %v2599_v31 = vpop.permute.xlu0 %2598  ;;  %3297 = vmatprep.mubr.bf16.mxu1 %v2947_v19 }
 0x36f   : > { %v2501_v43 = vpop.permute.xlu1 %2500  ;;  %v2871_v5 = vsel %vm170_vm0, %v11145_v34, %v2599_v31 }
 0x370   : > { %v11332_v32 = vpop.f32.mrb[88].mxu0  ;;  %v2773_v63 = vsel %vm1115_vm3, %v2740_v53, %v2501_v43 }
 0x371   : > { %v11334_v14 = vpop.f32.mrb[89].mxu0 }
 0x372   : > { %v11338_v21 = vpop.f32.mrb[90].mxu0  ;;  %v2647_v27 = vpop.permute.xlu0 %2646 }
 0x373   : > { %v2549_v18 = vpop.permute.xlu1 %2548  ;;  %v11341_v42 = vpop.f32.mrb[91].mxu0  ;;  %v2903_v15 = vsel %vm1115_vm3, %v2871_v5, %v2647_v27 }
 0x374   : > { %v2819_v10 = vsel %vm1148_vm4, %v2773_v63, %v2549_v18 }
 0x375   : > { %3298 = vmatmul.mubr.bf16.gmra.mrb[80].mxu1 %v2819_v10 }
 0x376   : > { %v2695_v44 = vpop.permute.xlu0 %2694 }
 0x377   : > { %v2455_v51 = vpop.permute.xlu1 %2454  ;;  %v2950_v30 = vsel %vm1148_vm4, %v2903_v15, %v2695_v44  ;;  %v9570_v15 = vld [vmem:[%s13441_s1 + $0x190] sm:$0xff]  }
 0x378   : > { %3305 = vmatprep.mubr.bf16.mxu1 %v2950_v30  ;;  %v11354_v23 = vpop.f32.mrb[92].mxu0  ;;  %v2743_v45 = vsel %vm170_vm0, %v11111_v62, %v2455_v51  ;;  %v9560_v62 = vld [vmem:[%s13441_s1 + $0x168] sm:$0xff]  }
 0x379   : > { %v11356_v20 = vpop.f32.mrb[93].mxu0  ;;  %8903 = vmatprep.subr.bf16.mxu1 %v9560_v62 }
 0x37a   : > { %v11361_v33 = vpop.f32.mrb[94].mxu0  ;;  %8904 = vmatpush3.bf16.msra.mxu1 %v9561_v7 }
 0x37b   : > { %v2503_v34 = vpop.permute.xlu1 %2502  ;;  %v11363_v26 = vpop.f32.mrb[95].mxu0  ;;  %8905 = vmatprep.subr.bf16.mxu1 %v9562_v38 }
 0x37c   : > { %v2775_v46 = vsel %vm1115_vm3, %v2743_v45, %v2503_v34 }
 0x37e   : > { %8906 = vmatpush3.bf16.msra.mxu1 %v9563_v4 }
 0x37f   : > { %v2551_v2 = vpop.permute.xlu1 %2550  ;;  %8907 = vmatprep.subr.bf16.mxu1 %v9564_v29 }
 0x380   : > { %v2822_v57 = vsel %vm1148_vm4, %v2775_v46, %v2551_v2  ;;  %v11372_v52 = vpop.f32.mrb[96].mxu0 }
 0x381   : > { %3306 = vmatmul.mubr.bf16.gmra.mrb[84].mxu1 %v2822_v57  ;;  %v11374_v22 = vpop.f32.mrb[97].mxu0 }
 0x382   : > { %v11376_v61 = vpop.f32.mrb[98].mxu0  ;;  %8908 = vmatpush3.bf16.msra.mxu1 %v9565_v24  ;;  %v9572_v24 = vld [vmem:[%s13441_s1 + $0x198] sm:$0xff]  }
 0x383   : > { %v11378_v41 = vpop.f32.mrb[99].mxu0  ;;  %8909 = vmatprep.subr.bf16.mxu1 %v9566_v37  ;;  %v9573_v37 = vld [vmem:[%s13441_s1 + $0x158] sm:$0xff]  }
 0x386   : > { %8910 = vmatpush3.bf16.msra.mxu1 %v9567_v12 }
 0x387   : > { %8911 = vmatprep.subr.bf16.mxu1 %v9568_v39 }
 0x38a   : > { %8912 = vmatpush3.bf16.msra.mxu1 %v9569_v16 }
 0x38b   : > { %8913 = vmatprep.subr.bf16.mxu1 %v9570_v15 }
 0x3ca   : > { %v8787_v40 = vpop.f32.mrb[24].mxu1 }
 0x3cb   : > { %v8788_v3 = vpop.f32.mrb[25].mxu1 }
 0x3cc   : > { %v8789_v28 = vadd.f32 %v8788_v3, %v8787_v40  ;;  %v8790_v31 = vpop.f32.mrb[26].mxu1  ;;  %v11416_v27 = vpop.f32.mrb[100].mxu0 }
 0x3cd   : > { %v8791_v19 = vpop.f32.mrb[27].mxu1  ;;  %v11420_v10 = vpop.f32.mrb[101].mxu0 }
 0x3ce   : > { %v3188_v43 = vadd.f32 %v8789_v28, %v11413_v49  ;;  %v8792_v53 = vadd.f32 %v8791_v19, %v8790_v31  ;;  %v11423_v5 = vpop.f32.mrb[102].mxu0 }
 0x3cf   : > { %v11429_v51 = vpop.f32.mrb[103].mxu0 }
 0x3d0   : > { %v3349_v63 = vadd.f32 %v11267_v9, %v3188_v43  ;;  %v3191_v18 = vadd.f32 %v8792_v53, %v11413_v49  ;;  %v9571_v9 = vld [vmem:[%s13441_s1 + $0x150] sm:$0xff]  }
 0x3d1   : > { %8914 = vmatpush3.bf16.msra.mxu1 %v9571_v9 }
 0x3d2   : > { %v3475_v50 = vmax.f32 %v3349_v63, 0.0  ;;  %v3352_v36 = vadd.f32 %v11273_v17, %v3191_v18  ;;  %8915 = vmatprep.subr.bf16.mxu1 %v9572_v24 }
 0x3d4   : > { %3507 = vst.msk [vmem:[#allocation3 + $0x19] sm:$0xff] %vm170_vm0, %v3475_v50  ;;  %v3476_v44 = vmax.f32 %v3352_v36, 0.0 }
 0x3d5   : > { %8916 = vmatpush3.bf16.msra.mxu1 %v9573_v37 }
 0x3d6   : > { %3508 = vst.msk [vmem:[#allocation3 + $0x21] sm:$0xff] %vm170_vm0, %v3476_v44 }
 0x3db   : > { %v3683_v30 = vld [vmem:[#allocation3 + $0x18] sm:$0xff] }
 0x3dc   : > { %v8793_v17 = vpop.f32.mrb[28].mxu1  ;;  %v3589_v12 = vld [vmem:[#allocation3 + $0x19] sm:$0xff] }
 0x3dd   : > { %v8794_v48 = vpop.f32.mrb[29].mxu1  ;;  %v3779_v34 = vld [vmem:[#allocation3 + $0x1a] sm:$0xff]  ;;  %v3780_v13 = vld [vmem:[#allocation3 + $0x22] sm:$0xff] }
 0x3de   : > { %v3684_v45 = vld [vmem:[#allocation3 + $0x20] sm:$0xff]  ;;  %v8795_v46 = vadd.f32 %v8794_v48, %v8793_v17  ;;  %v8796_v2 = vpop.f32.mrb[30].mxu1  ;;  %v3811_v57 = vpack.c.bf16 %v3780_v13, %v3779_v34 }
 0x3df   : > { %v3715_v62 = vpack.c.bf16 %v3684_v45, %v3683_v30  ;;  %v8797_v7 = vpop.f32.mrb[31].mxu1  ;;  %v3590_v38 = vld [vmem:[#allocation3 + $0x21] sm:$0xff] }
 0x3e0   : > { %v3196_v4 = vadd.f32 %v8795_v46, %v11413_v49  ;;  %v8798_v29 = vadd.f32 %v8797_v7, %v8796_v2  ;;  %4131 = vrot.lane.b32.xlu0 %v3811_v57, %s9678_s19  ;;  %v11446_v40 = vpack.c.bf16 %v3590_v38, %v3589_v12 }
 0x3e1   : > { %4083 = vrot.lane.b32.xlu1 %v3715_v62, %s9679_s20 }
 0x3e2   : > { %v3357_v39 = vadd.f32 %v11265_v6, %v3196_v4  ;;  %v3199_v16 = vadd.f32 %v8798_v29, %v11413_v49 }
 0x3e4   : > { %v3477_v3 = vmax.f32 %v3357_v39, 0.0  ;;  %v3360_v28 = vadd.f32 %v11269_v55, %v3199_v16 }
 0x3e5   : > { %3989 = vrot.lane.b32.xlu1 %v11446_v40, %s9678_s19 }
 0x3e6   : > { %3509 = vst.msk [vmem:[#allocation3 + $0x31] sm:$0xff] %vm170_vm0, %v3477_v3  ;;  %v3478_v31 = vmax.f32 %v3360_v28, 0.0 }
 0x3e7   : > { %v8799_v19 = vpop.f32.mrb[32].mxu1 }
 0x3e8   : > { %3510 = vst.msk [vmem:[#allocation3 + $0x39] sm:$0xff] %vm170_vm0, %v3478_v31  ;;  %v8800_v6 = vpop.f32.mrb[33].mxu1 }
 0x3e9   : > { %4037 = vrot.lane.b32.xlu1 %v3811_v57, %s9677_s17  ;;  %v8801_v43 = vadd.f32 %v8800_v6, %v8799_v19  ;;  %v8802_v53 = vpop.f32.mrb[34].mxu1 }
 0x3ea   : > { %v8803_v63 = vpop.f32.mrb[35].mxu1 }
 0x3eb   : > { %v3204_v18 = vadd.f32 %v8801_v43, %v11413_v49  ;;  %v8804_v50 = vadd.f32 %v8803_v63, %v8802_v53 }
 0x3ed   : > { %v3365_v55 = vadd.f32 %v11283_v59, %v3204_v18  ;;  %v3207_v36 = vadd.f32 %v8804_v50, %v11413_v49  ;;  %v3827_v15 = vld [vmem:[#allocation3 + $0x30] sm:$0xff] }
 0x3ee   : > { %v3875_v7 = vld [vmem:[#allocation3 + $0x31] sm:$0xff] }
 0x3ef   : > { %v3923_v44 = vld [vmem:[#allocation3 + $0x32] sm:$0xff]  ;;  %v3924_v9 = vld [vmem:[#allocation3 + $0x3a] sm:$0xff]  ;;  %v3479_v30 = vmax.f32 %v3365_v55, 0.0  ;;  %v3368_v48 = vadd.f32 %v11291_v60, %v3207_v36 }
 0x3f0   : > { %v3828_v17 = vld [vmem:[#allocation3 + $0x38] sm:$0xff]  ;;  %v3955_v34 = vpack.c.bf16 %v3924_v9, %v3923_v44  ;;  %v8805_v45 = vpop.f32.mrb[36].mxu1 }
 0x3f1   : > { %v3859_v13 = vpack.c.bf16 %v3828_v17, %v3827_v15  ;;  %v3876_v46 = vld [vmem:[#allocation3 + $0x39] sm:$0xff]  ;;  %3511 = vst.msk [vmem:[#allocation3 + $0x49] sm:$0xff] %vm170_vm0, %v3479_v30  ;;  %v3480_v2 = vmax.f32 %v3368_v48, 0.0  ;;  %v8806_v57 = vpop.f32.mrb[37].mxu1 }
 0x3f2   : > { %9367 = vmatprep.mubr.msk.bf16.mxu0 %vm170_vm0, %v3955_v34  ;;  %v8807_v59 = vadd.f32 %v8806_v57, %v8805_v45  ;;  %v8808_v62 = vpop.f32.mrb[38].mxu1  ;;  %v3907_v38 = vpack.c.bf16 %v3876_v46, %v3875_v7 }
 0x3f3   : > { %4179 = vrot.lane.b32.xlu0 %v3859_v13, %s9677_s17  ;;  %4085 = vrot.lane.b32.xlu1 %v3859_v13, %s9679_s20  ;;  %3512 = vst.msk [vmem:[#allocation3 + $0x51] sm:$0xff] %vm170_vm0, %v3480_v2  ;;  %v8809_v60 = vpop.f32.mrb[39].mxu1 }
 0x3f4   : > { %v3212_v4 = vadd.f32 %v8807_v59, %v11413_v49  ;;  %v8810_v29 = vadd.f32 %v8809_v60, %v8808_v62 }
 0x3f6   : > { %v3373_v24 = vadd.f32 %v11281_v58, %v3212_v4  ;;  %v3215_v37 = vadd.f32 %v8810_v29, %v11413_v49 }
 0x3f7   : > { %4227 = vrot.lane.b32.xlu0 %v3907_v38, %s9679_s20  ;;  %3991 = vrot.lane.b32.xlu1 %v3907_v38, %s9678_s19 }
 0x3f8   : > { %v3481_v12 = vmax.f32 %v3373_v24, 0.0  ;;  %v3376_v39 = vadd.f32 %v11286_v35, %v3215_v37  ;;  %v8811_v16 = vpop.f32.mrb[40].mxu1  ;;  %v3829_v28 = vld [vmem:[#allocation3 + $0x48] sm:$0xff] }
 0x3f9   : > { %v8812_v3 = vpop.f32.mrb[41].mxu1  ;;  %v3877_v9 = vld [vmem:[#allocation3 + $0x49] sm:$0xff] }
 0x3fa   : > { %3513 = vst.msk [vmem:[#allocation3 + $0x61] sm:$0xff] %vm170_vm0, %v3481_v12  ;;  %v3482_v31 = vmax.f32 %v3376_v39, 0.0  ;;  %v8813_v19 = vadd.f32 %v8812_v3, %v8811_v16  ;;  %v8814_v6 = vpop.f32.mrb[42].mxu1  ;;  %v3925_v58 = vld [vmem:[#allocation3 + $0x4a] sm:$0xff]  ;;  %v3926_v43 = vld [vmem:[#allocation3 + $0x52] sm:$0xff] }
 0x3fb   : > { %4133 = vrot.lane.b32.xlu0 %v3955_v34, %s9678_s19  ;;  %4039 = vrot.lane.b32.xlu1 %v3955_v34, %s9677_s17  ;;  %v3830_v53 = vld [vmem:[#allocation3 + $0x50] sm:$0xff]  ;;  %v8815_v63 = vpop.f32.mrb[43].mxu1  ;;  %v3956_v18 = vpack.c.bf16 %v3926_v43, %v3925_v58 }
 0x3fc   : > { %v3860_v50 = vpack.c.bf16 %v3830_v53, %v3829_v28  ;;  %3514 = vst.msk [vmem:[#allocation3 + $0x69] sm:$0xff] %vm170_vm0, %v3482_v31  ;;  %v3220_v35 = vadd.f32 %v8813_v19, %v11413_v49  ;;  %v8816_v55 = vadd.f32 %v8815_v63, %v8814_v6  ;;  %v3878_v36 = vld [vmem:[#allocation3 + $0x51] sm:$0xff] }
 0x3fd   : > { %9368 = vmatmul.mubr.msk.bf16.vlgmr.msra.gmra.mrb[104].mxu0 %vm170_vm0, %v3956_v18  ;;  %v3908_v17 = vpack.c.bf16 %v3878_v36, %v3877_v9 }
 0x3fe   : > { %v3381_v15 = vadd.f32 %v11302_v54, %v3220_v35  ;;  %v3223_v44 = vadd.f32 %v8816_v55, %v11413_v49 }
 0x3ff   : > { %4181 = vrot.lane.b32.xlu0 %v3860_v50, %s9677_s17  ;;  %4087 = vrot.lane.b32.xlu1 %v3860_v50, %s9679_s20 }
 0x400   : > { %v3483_v30 = vmax.f32 %v3381_v15, 0.0  ;;  %v3384_v48 = vadd.f32 %v11308_v47, %v3223_v44  ;;  %v8817_v34 = vpop.f32.mrb[44].mxu1 }
 0x401   : > { %v8818_v13 = vpop.f32.mrb[45].mxu1  ;;  %v3831_v29 = vld [vmem:[#allocation3 + $0x60] sm:$0xff] }
 0x402   : > { %3515 = vst.msk [vmem:[#allocation3 + $0x79] sm:$0xff] %vm170_vm0, %v3483_v30  ;;  %v3484_v45 = vmax.f32 %v3384_v48, 0.0  ;;  %v8819_v46 = vadd.f32 %v8818_v13, %v8817_v34  ;;  %v8820_v2 = vpop.f32.mrb[46].mxu1  ;;  %v3879_v19 = vld [vmem:[#allocation3 + $0x61] sm:$0xff] }
 0x403   : > { %4229 = vrot.lane.b32.xlu0 %v3908_v17, %s9679_s20  ;;  %3993 = vrot.lane.b32.xlu1 %v3908_v17, %s9678_s19  ;;  %v8821_v54 = vpop.f32.mrb[47].mxu1  ;;  %v3927_v57 = vld [vmem:[#allocation3 + $0x62] sm:$0xff]  ;;  %v3928_v59 = vld [vmem:[#allocation3 + $0x6a] sm:$0xff] }
 0x404   : > { %3516 = vst.msk [vmem:[#allocation3 + $0x81] sm:$0xff] %vm170_vm0, %v3484_v45  ;;  %v3228_v62 = vadd.f32 %v8819_v46, %v11413_v49  ;;  %v8822_v7 = vadd.f32 %v8821_v54, %v8820_v2  ;;  %v3957_v47 = vpack.c.bf16 %v3928_v59, %v3927_v57  ;;  %v3832_v60 = vld [vmem:[#allocation3 + $0x68] sm:$0xff] }
 0x405   : > { %v3861_v24 = vpack.c.bf16 %v3832_v60, %v3831_v29  ;;  %v3880_v16 = vld [vmem:[#allocation3 + $0x69] sm:$0xff] }
 0x406   : > { %v3389_v38 = vadd.f32 %v11300_v0, %v3228_v62  ;;  %v3231_v4 = vadd.f32 %v8822_v7, %v11413_v49  ;;  %9371 = vmatprep.mubr.msk.bf16.mxu0 %vm170_vm0, %v3957_v47  ;;  %v3909_v53 = vpack.c.bf16 %v3880_v16, %v3879_v19 }
 0x407   : > { %4135 = vrot.lane.b32.xlu0 %v3956_v18, %s9678_s19  ;;  %4041 = vrot.lane.b32.xlu1 %v3956_v18, %s9677_s17 }
 0x408   : > { %v3485_v37 = vmax.f32 %v3389_v38, 0.0  ;;  %v3392_v12 = vadd.f32 %v11304_v56, %v3231_v4  ;;  %v8823_v39 = vpop.f32.mrb[48].mxu1 }
 0x409   : > { %v8824_v3 = vpop.f32.mrb[49].mxu1  ;;  %v3881_v7 = vld [vmem:[#allocation3 + $0x79] sm:$0xff] }
 0x40a   : > { %3517 = vst.msk [vmem:[#allocation3 + $0x91] sm:$0xff] %vm170_vm0, %v3485_v37  ;;  %v3486_v28 = vmax.f32 %v3392_v12, 0.0  ;;  %v8825_v0 = vadd.f32 %v8824_v3, %v8823_v39  ;;  %v8826_v31 = vpop.f32.mrb[50].mxu1 }
 0x40b   : > { %4183 = vrot.lane.b32.xlu0 %v3861_v24, %s9677_s17  ;;  %4089 = vrot.lane.b32.xlu1 %v3861_v24, %s9679_s20  ;;  %v8827_v6 = vpop.f32.mrb[51].mxu1  ;;  %v3929_v58 = vld [vmem:[#allocation3 + $0x7a] sm:$0xff]  ;;  %v3930_v43 = vld [vmem:[#allocation3 + $0x82] sm:$0xff] }
 0x40c   : > { %3518 = vst.msk [vmem:[#allocation3 + $0x99] sm:$0xff] %vm170_vm0, %v3486_v28  ;;  %v3236_v56 = vadd.f32 %v8825_v0, %v11413_v49  ;;  %v8828_v63 = vadd.f32 %v8827_v6, %v8826_v31  ;;  %v3958_v18 = vpack.c.bf16 %v3930_v43, %v3929_v58  ;;  %v3834_v44 = vld [vmem:[#allocation3 + $0x80] sm:$0xff] }
 0x40d   : > { %v3882_v57 = vld [vmem:[#allocation3 + $0x81] sm:$0xff] }
 0x40e   : > { %v3397_v50 = vadd.f32 %v11318_v11, %v3236_v56  ;;  %v3239_v35 = vadd.f32 %v8828_v63, %v11413_v49  ;;  %9372 = vmatmul.mubr.msk.bf16.gmra.mrb[108].mxu0 %vm170_vm0, %v3958_v18  ;;  %v3833_v11 = vld [vmem:[#allocation3 + $0x78] sm:$0xff] }
 0x40f   : > { %4231 = vrot.lane.b32.xlu0 %v3909_v53, %s9679_s20  ;;  %3995 = vrot.lane.b32.xlu1 %v3909_v53, %s9678_s19  ;;  %v3862_v46 = vpack.c.bf16 %v3834_v44, %v3833_v11 }
 0x410   : > { %v3487_v55 = vmax.f32 %v3397_v50, 0.0  ;;  %v3400_v36 = vadd.f32 %v11324_v25, %v3239_v35  ;;  %v8829_v15 = vpop.f32.mrb[52].mxu1 }
 0x411   : > { %v8830_v9 = vpop.f32.mrb[53].mxu1  ;;  %v3835_v6 = vld [vmem:[#allocation3 + $0x90] sm:$0xff] }
 0x412   : > { %3519 = vst.msk [vmem:[#allocation3 + $0xa9] sm:$0xff] %vm170_vm0, %v3487_v55  ;;  %v3488_v17 = vmax.f32 %v3400_v36, 0.0  ;;  %v8831_v30 = vadd.f32 %v8830_v9, %v8829_v15  ;;  %v8832_v48 = vpop.f32.mrb[54].mxu1 }
 0x413   : > { %4137 = vrot.lane.b32.xlu0 %v3957_v47, %s9678_s19  ;;  %4043 = vrot.lane.b32.xlu1 %v3957_v47, %s9677_s17  ;;  %v8833_v34 = vpop.f32.mrb[55].mxu1  ;;  %v3931_v13 = vld [vmem:[#allocation3 + $0x92] sm:$0xff]  ;;  %v3932_v45 = vld [vmem:[#allocation3 + $0x9a] sm:$0xff]  ;;  %v3910_v47 = vpack.c.bf16 %v3882_v57, %v3881_v7 }
 0x414   : > { %3520 = vst.msk [vmem:[#allocation3 + $0xb1] sm:$0xff] %vm170_vm0, %v3488_v17  ;;  %v3244_v25 = vadd.f32 %v8831_v30, %v11413_v49  ;;  %v8834_v2 = vadd.f32 %v8833_v34, %v8832_v48  ;;  %v11507_v54 = vpack.c.bf16 %v3932_v45, %v3931_v13  ;;  %v3836_v0 = vld [vmem:[#allocation3 + $0x98] sm:$0xff] }
 0x415   : > { %v11529_v58 = vpack.c.bf16 %v3836_v0, %v3835_v6  ;;  %v3884_v63 = vld [vmem:[#allocation3 + $0x99] sm:$0xff] }
 0x416   : > { %v3405_v59 = vadd.f32 %v11316_v1, %v3244_v25  ;;  %v3247_v62 = vadd.f32 %v8834_v2, %v11413_v49  ;;  %9375 = vmatprep.mubr.msk.bf16.mxu0 %vm170_vm0, %v11507_v54 }
 0x417   : > { %4185 = vrot.lane.b32.xlu0 %v3862_v46, %s9677_s17  ;;  %4091 = vrot.lane.b32.xlu1 %v3862_v46, %s9679_s20 }
 0x418   : > { %v3489_v60 = vmax.f32 %v3405_v59, 0.0  ;;  %v3408_v38 = vadd.f32 %v11320_v8, %v3247_v62  ;;  %v8835_v4 = vpop.f32.mrb[56].mxu1 }
 0x419   : > { %v8836_v29 = vpop.f32.mrb[57].mxu1  ;;  %v3837_v59 = vld [vmem:[#allocation3 + $0xa8] sm:$0xff] }
 0x41a   : > { %3521 = vst.msk [vmem:[#allocation3 + $0xc1] sm:$0xff] %vm170_vm0, %v3489_v60  ;;  %v3490_v24 = vmax.f32 %v3408_v38, 0.0  ;;  %v8837_v1 = vadd.f32 %v8836_v29, %v8835_v4  ;;  %v8838_v37 = vpop.f32.mrb[58].mxu1 }
 0x41b   : > { %4233 = vrot.lane.b32.xlu0 %v3910_v47, %s9679_s20  ;;  %3997 = vrot.lane.b32.xlu1 %v3910_v47, %s9678_s19  ;;  %v8839_v12 = vpop.f32.mrb[59].mxu1  ;;  %v3933_v39 = vld [vmem:[#allocation3 + $0xaa] sm:$0xff]  ;;  %v3934_v16 = vld [vmem:[#allocation3 + $0xb2] sm:$0xff] }
 0x41c   : > { %3522 = vst.msk [vmem:[#allocation3 + $0xc9] sm:$0xff] %vm170_vm0, %v3490_v24  ;;  %v3252_v3 = vadd.f32 %v8837_v1, %v11413_v49  ;;  %v8840_v28 = vadd.f32 %v8839_v12, %v8838_v37  ;;  %v11521_v8 = vpack.c.bf16 %v3934_v16, %v3933_v39  ;;  %v3838_v46 = vld [vmem:[#allocation3 + $0xb0] sm:$0xff] }
 0x41d   : > { %v11557_v60 = vpack.c.bf16 %v3838_v46, %v3837_v59  ;;  %v3886_v29 = vld [vmem:[#allocation3 + $0xb1] sm:$0xff]  ;;  %v3885_v1 = vld [vmem:[#allocation3 + $0xa9] sm:$0xff] }
 0x41e   : > { %v3413_v31 = vadd.f32 %v11334_v14, %v3252_v3  ;;  %v3255_v19 = vadd.f32 %v8840_v28, %v11413_v49  ;;  %9376 = vmatmul.mubr.msk.bf16.gmra.mrb[112].mxu0 %vm170_vm0, %v11521_v8  ;;  %v11571_v37 = vpack.c.bf16 %v3886_v29, %v3885_v1 }
 0x41f   : > { %4139 = vrot.lane.b32.xlu0 %v3958_v18, %s9678_s19  ;;  %4045 = vrot.lane.b32.xlu1 %v3958_v18, %s9677_s17  ;;  %v3883_v18 = vld [vmem:[#allocation3 + $0x91] sm:$0xff] }
 0x420   : > { %v3491_v43 = vmax.f32 %v3413_v31, 0.0  ;;  %v3416_v53 = vadd.f32 %v11341_v42, %v3255_v19  ;;  %v8841_v56 = vpop.f32.mrb[60].mxu1  ;;  %v11537_v9 = vpack.c.bf16 %v3884_v63, %v3883_v18 }
 0x421   : > { %v8842_v50 = vpop.f32.mrb[61].mxu1 }
 0x422   : > { %3523 = vst.msk [vmem:[#allocation3 + $0xd9] sm:$0xff] %vm170_vm0, %v3491_v43  ;;  %v3492_v14 = vmax.f32 %v3416_v53, 0.0  ;;  %v8843_v35 = vadd.f32 %v8842_v50, %v8841_v56  ;;  %v8844_v55 = vpop.f32.mrb[62].mxu1 }
 0x423   : > { %4187 = vrot.lane.b32.xlu0 %v11529_v58, %s9677_s17  ;;  %4093 = vrot.lane.b32.xlu1 %v11529_v58, %s9679_s20  ;;  %v8845_v36 = vpop.f32.mrb[63].mxu1  ;;  %v3935_v15 = vld [vmem:[#allocation3 + $0xc2] sm:$0xff]  ;;  %v3936_v44 = vld [vmem:[#allocation3 + $0xca] sm:$0xff] }
 0x424   : > { %3524 = vst.msk [vmem:[#allocation3 + $0xe1] sm:$0xff] %vm170_vm0, %v3492_v14  ;;  %v3260_v42 = vadd.f32 %v8843_v35, %v11413_v49  ;;  %v8846_v17 = vadd.f32 %v8845_v36, %v8844_v55  ;;  %v11541_v30 = vpack.c.bf16 %v3936_v44, %v3935_v15  ;;  %v3840_v56 = vld [vmem:[#allocation3 + $0xc8] sm:$0xff]  ;;  %v3839_v14 = vld [vmem:[#allocation3 + $0xc0] sm:$0xff] }
 0x425   : > { %v11591_v35 = vpack.c.bf16 %v3840_v56, %v3839_v14  ;;  %v3888_v15 = vld [vmem:[#allocation3 + $0xc9] sm:$0xff] }
 0x426   : > { %v3421_v48 = vadd.f32 %v11332_v32, %v3260_v42  ;;  %v3263_v11 = vadd.f32 %v8846_v17, %v11413_v49  ;;  %9379 = vmatprep.mubr.msk.bf16.mxu0 %vm170_vm0, %v11541_v30 }
 0x427   : > { %4235 = vrot.lane.b32.xlu0 %v11537_v9, %s9679_s20  ;;  %3999 = vrot.lane.b32.xlu1 %v11537_v9, %s9678_s19 }
 0x428   : > { %v3493_v34 = vmax.f32 %v3421_v48, 0.0  ;;  %v3424_v13 = vadd.f32 %v11338_v21, %v3263_v11  ;;  %v8847_v45 = vpop.f32.mrb[64].mxu1 }
 0x429   : > { %v8848_v25 = vpop.f32.mrb[65].mxu1 }
 0x42a   : > { %3525 = vst.msk [vmem:[#allocation3 + $0xf1] sm:$0xff] %vm170_vm0, %v3493_v34  ;;  %v3494_v32 = vmax.f32 %v3424_v13, 0.0  ;;  %v8849_v2 = vadd.f32 %v8848_v25, %v8847_v45  ;;  %v8850_v57 = vpop.f32.mrb[66].mxu1 }
 0x42b   : > { %4141 = vrot.lane.b32.xlu0 %v11507_v54, %s9678_s19  ;;  %4047 = vrot.lane.b32.xlu1 %v11507_v54, %s9677_s17  ;;  %v8851_v62 = vpop.f32.mrb[67].mxu1  ;;  %v3937_v7 = vld [vmem:[#allocation3 + $0xda] sm:$0xff]  ;;  %v3938_v47 = vld [vmem:[#allocation3 + $0xe2] sm:$0xff] }
 0x42c   : > { %3526 = vst.msk [vmem:[#allocation3 + $0xf9] sm:$0xff] %vm170_vm0, %v3494_v32  ;;  %v3268_v21 = vadd.f32 %v8849_v2, %v11413_v49  ;;  %v8852_v38 = vadd.f32 %v8851_v62, %v8850_v57  ;;  %v11561_v4 = vpack.c.bf16 %v3938_v47, %v3937_v7  ;;  %v3842_v62 = vld [vmem:[#allocation3 + $0xe0] sm:$0xff] }
 0x42e   : > { %v3429_v24 = vadd.f32 %v11356_v20, %v3268_v21  ;;  %v3271_v54 = vadd.f32 %v8852_v38, %v11413_v49  ;;  %9380 = vmatmul.mubr.msk.bf16.gmra.mrb[116].mxu0 %vm170_vm0, %v11561_v4  ;;  %v3841_v38 = vld [vmem:[#allocation3 + $0xd8] sm:$0xff] }
 0x42f   : > { %4189 = vrot.lane.b32.xlu0 %v11557_v60, %s9677_s17  ;;  %4095 = vrot.lane.b32.xlu1 %v11557_v60, %s9679_s20  ;;  %v11619_v1 = vpack.c.bf16 %v3842_v62, %v3841_v38 }
 0x430   : > { %v3495_v12 = vmax.f32 %v3429_v24, 0.0  ;;  %v3432_v39 = vadd.f32 %v11363_v26, %v3271_v54  ;;  %v8853_v16 = vpop.f32.mrb[68].mxu1 }
 0x431   : > { %v8854_v3 = vpop.f32.mrb[69].mxu1 }
 0x432   : > { %3527 = vst.msk [vmem:[#allocation3 + $0x109] sm:$0xff] %vm170_vm0, %v3495_v12  ;;  %v3496_v20 = vmax.f32 %v3432_v39, 0.0  ;;  %v8855_v28 = vadd.f32 %v8854_v3, %v8853_v16  ;;  %v8856_v0 = vpop.f32.mrb[70].mxu1  ;;  %v3890_v16 = vld [vmem:[#allocation3 + $0xe1] sm:$0xff] }
 0x433   : > { %4237 = vrot.lane.b32.xlu0 %v11571_v37, %s9679_s20  ;;  %4001 = vrot.lane.b32.xlu1 %v11571_v37, %s9678_s19  ;;  %v8857_v31 = vpop.f32.mrb[71].mxu1  ;;  %v3939_v19 = vld [vmem:[#allocation3 + $0xf2] sm:$0xff]  ;;  %v3940_v6 = vld [vmem:[#allocation3 + $0xfa] sm:$0xff] }
 0x434   : > { %3528 = vst.msk [vmem:[#allocation3 + $0x111] sm:$0xff] %vm170_vm0, %v3496_v20  ;;  %v3276_v26 = vadd.f32 %v8855_v28, %v11413_v49  ;;  %v8858_v43 = vadd.f32 %v8857_v31, %v8856_v0  ;;  %v11581_v53 = vpack.c.bf16 %v3940_v6, %v3939_v19  ;;  %v3889_v20 = vld [vmem:[#allocation3 + $0xd9] sm:$0xff]  ;;  %v11636_v6 = vpop.permute.xlu1 %3987 }
 0x435   : > { %v11633_v28 = vpack.c.bf16 %v3890_v16, %v3889_v20 }
 0x436   : > { %v3437_v63 = vadd.f32 %v11354_v23, %v3276_v26  ;;  %v3279_v50 = vadd.f32 %v8858_v43, %v11413_v49  ;;  %9383 = vmatprep.mubr.msk.bf16.mxu0 %vm170_vm0, %v11581_v53 }
 0x437   : > { %4143 = vrot.lane.b32.xlu0 %v11521_v8, %s9678_s19  ;;  %4049 = vrot.lane.b32.xlu1 %v11521_v8, %s9677_s17  ;;  %v3887_v8 = vld [vmem:[#allocation3 + $0xc1] sm:$0xff] }
 0x438   : > { %v3497_v55 = vmax.f32 %v3437_v63, 0.0  ;;  %v3440_v18 = vadd.f32 %v11361_v33, %v3279_v50  ;;  %v8859_v36 = vpop.f32.mrb[72].mxu1  ;;  %v11599_v13 = vpack.c.bf16 %v3888_v15, %v3887_v8 }
 0x439   : > { %v8860_v44 = vpop.f32.mrb[73].mxu1 }
 0x43a   : > { %3529 = vst.msk [vmem:[#allocation3 + $0x121] sm:$0xff] %vm170_vm0, %v3497_v55  ;;  %v3498_v23 = vmax.f32 %v3440_v18, 0.0  ;;  %v8861_v42 = vadd.f32 %v8860_v44, %v8859_v36  ;;  %v8862_v17 = vpop.f32.mrb[74].mxu1  ;;  %v3844_v36 = vld [vmem:[#allocation3 + $0xf8] sm:$0xff]  ;;  %v11650_v44 = vpop.permute.xlu1 %4035 }
 0x43b   : > { %4191 = vrot.lane.b32.xlu0 %v11591_v35, %s9677_s17  ;;  %4097 = vrot.lane.b32.xlu1 %v11591_v35, %s9679_s20  ;;  %v8863_v48 = vpop.f32.mrb[75].mxu1  ;;  %v3941_v11 = vld [vmem:[#allocation3 + $0x10a] sm:$0xff]  ;;  %v3942_v34 = vld [vmem:[#allocation3 + $0x112] sm:$0xff] }
 0x43c   : > { %3530 = vst.msk [vmem:[#allocation3 + $0x129] sm:$0xff] %vm170_vm0, %v3498_v23  ;;  %v3284_v33 = vadd.f32 %v8861_v42, %v11413_v49  ;;  %v8864_v45 = vadd.f32 %v8863_v48, %v8862_v17  ;;  %v11603_v46 = vpack.c.bf16 %v3942_v34, %v3941_v11  ;;  %v3843_v42 = vld [vmem:[#allocation3 + $0xf0] sm:$0xff]  ;;  %v3892_v11 = vld [vmem:[#allocation3 + $0xf9] sm:$0xff] }
 0x43d   : > { %v11657_v17 = vpack.c.bf16 %v3844_v36, %v3843_v42  ;;  %v3891_v34 = vld [vmem:[#allocation3 + $0xf1] sm:$0xff] }
 0x43e   : > { %v3445_v25 = vadd.f32 %v11374_v22, %v3284_v33  ;;  %v3287_v32 = vadd.f32 %v8864_v45, %v11413_v49  ;;  %9384 = vmatmul.mubr.msk.bf16.gmra.mrb[120].mxu0 %vm170_vm0, %v11603_v46 }
 0x43f   : > { %4239 = vrot.lane.b32.xlu0 %v11599_v13, %s9679_s20  ;;  %4003 = vrot.lane.b32.xlu1 %v11599_v13, %s9678_s19 }
 0x440   : > { %v3499_v2 = vmax.f32 %v3445_v25, 0.0  ;;  %v3448_v57 = vadd.f32 %v11378_v41, %v3287_v32  ;;  %v8865_v59 = vpop.f32.mrb[76].mxu1  ;;  %v11665_v25 = vpack.c.bf16 %v3892_v11, %v3891_v34 }
 0x441   : > { %v8866_v7 = vpop.f32.mrb[77].mxu1  ;;  %v3847_v42 = vld [vmem:[#allocation3 + $0x120] sm:$0xff] }
 0x442   : > { %3531 = vst.msk [vmem:[#allocation3 + $0x139] sm:$0xff] %vm170_vm0, %v3499_v2  ;;  %v3500_v22 = vmax.f32 %v3448_v57, 0.0  ;;  %v8867_v47 = vadd.f32 %v8866_v7, %v8865_v59  ;;  %v8868_v21 = vpop.f32.mrb[78].mxu1 }
 0x443   : > { %4145 = vrot.lane.b32.xlu0 %v11541_v30, %s9678_s19  ;;  %4051 = vrot.lane.b32.xlu1 %v11541_v30, %s9677_s17  ;;  %v8869_v29 = vpop.f32.mrb[79].mxu1  ;;  %v3943_v24 = vld [vmem:[#allocation3 + $0x122] sm:$0xff]  ;;  %v3944_v54 = vld [vmem:[#allocation3 + $0x12a] sm:$0xff] }
 0x444   : > { %3532 = vst.msk [vmem:[#allocation3 + $0x141] sm:$0xff] %vm170_vm0, %v3500_v22  ;;  %v3292_v41 = vadd.f32 %v8867_v47, %v11413_v49  ;;  %v8870_v12 = vadd.f32 %v8869_v29, %v8868_v21  ;;  %v11623_v39 = vpack.c.bf16 %v3944_v54, %v3943_v24  ;;  %v3846_v47 = vld [vmem:[#allocation3 + $0x110] sm:$0xff]  ;;  %v11677_v21 = vpop.permute.xlu0 %4209  ;;  %v3845_v54 = vld [vmem:[#allocation3 + $0x108] sm:$0xff] }
 0x446   : > { %v3453_v3 = vadd.f32 %v11372_v52, %v3292_v41  ;;  %v3295_v30 = vadd.f32 %v8870_v12, %v11413_v49  ;;  %9387 = vmatprep.mubr.msk.bf16.mxu0 %vm170_vm0, %v11623_v39 }
 0x447   : > { %4193 = vrot.lane.b32.xlu0 %v11619_v1, %s9677_s17  ;;  %4099 = vrot.lane.b32.xlu1 %v11619_v1, %s9679_s20 }
 0x448   : > { %v3501_v0 = vmax.f32 %v3453_v3, 0.0  ;;  %v3456_v31 = vadd.f32 %v11376_v61, %v3295_v30  ;;  %v8871_v19 = vpop.f32.mrb[80].mxu1  ;;  %v11688_v30 = vpack.c.bf16 %v3846_v47, %v3845_v54 }
 0x449   : > { %v8872_v26 = vpop.f32.mrb[81].mxu1  ;;  %v3849_v54 = vld [vmem:[#allocation3 + $0x138] sm:$0xff] }
 0x44a   : > { %3533 = vst.msk [vmem:[#allocation3 + $0x151] sm:$0xff] %vm170_vm0, %v3501_v0  ;;  %v3502_v52 = vmax.f32 %v3456_v31, 0.0  ;;  %v8873_v43 = vadd.f32 %v8872_v26, %v8871_v19  ;;  %v8874_v56 = vpop.f32.mrb[82].mxu1  ;;  %v3540_v0 = vld [vmem:[#allocation3 + $0x8] sm:$0xff] }
 0x44b   : > { %4241 = vrot.lane.b32.xlu0 %v11633_v28, %s9679_s20  ;;  %4005 = vrot.lane.b32.xlu1 %v11633_v28, %s9678_s19  ;;  %v8875_v63 = vpop.f32.mrb[83].mxu1  ;;  %v3945_v50 = vld [vmem:[#allocation3 + $0x13a] sm:$0xff]  ;;  %v3946_v14 = vld [vmem:[#allocation3 + $0x142] sm:$0xff] }
 0x44c   : > { %3534 = vst.msk [vmem:[#allocation3 + $0x159] sm:$0xff] %vm170_vm0, %v3502_v52  ;;  %v8876_v61 = vadd.f32 %v8875_v63, %v8874_v56  ;;  %v3300_v55 = vadd.f32 %v8873_v43, %v11413_v49  ;;  %v11645_v18 = vpack.c.bf16 %v3946_v14, %v3945_v50  ;;  %v3848_v50 = vld [vmem:[#allocation3 + $0x128] sm:$0xff] }
 0x44d   : > { %v11722_v11 = vpack.c.bf16 %v3848_v50, %v3847_v42 }
 0x44e   : > { %v3461_v15 = vadd.f32 %v11420_v10, %v3300_v55  ;;  %9388 = vmatmul.mubr.msk.bf16.gmra.mrb[124].mxu0 %vm170_vm0, %v11645_v18  ;;  %v3303_v23 = vadd.f32 %v8876_v61, %v11413_v49 }
 0x44f   : > { %4147 = vrot.lane.b32.xlu0 %v11561_v4, %s9678_s19  ;;  %4053 = vrot.lane.b32.xlu1 %v11561_v4, %s9677_s17 }
 0x450   : > { %v3503_v8 = vmax.f32 %v3461_v15, 0.0  ;;  %v3464_v48 = vadd.f32 %v11429_v51, %v3303_v23 }
 0x452   : > { %3535 = vst.msk [vmem:[#allocation3 + $0x169] sm:$0xff] %vm170_vm0, %v3503_v8  ;;  %v3504_v10 = vmax.f32 %v3464_v48, 0.0 }
 0x453   : > { %4195 = vrot.lane.b32.xlu0 %v11657_v17, %s9677_s17  ;;  %4101 = vrot.lane.b32.xlu1 %v11657_v17, %s9679_s20  ;;  %v3947_v33 = vld [vmem:[#allocation3 + $0x152] sm:$0xff]  ;;  %v3948_v45 = vld [vmem:[#allocation3 + $0x15a] sm:$0xff]  ;;  %v4084_v32 = vpop.permute.xlu1 %4083 }
 0x454   : > { %v8877_v4 = vpop.f32.mrb[84].mxu1  ;;  %3536 = vst.msk [vmem:[#allocation3 + $0x171] sm:$0xff] %vm170_vm0, %v3504_v10  ;;  %v11668_v2 = vpack.c.bf16 %v3948_v45, %v3947_v33  ;;  %v3895_v10 = vld [vmem:[#allocation3 + $0x121] sm:$0xff]  ;;  %v3734_v33 = vld [vmem:[#allocation3 + $0x39] sm:$0xff] }
 0x455   : > { %v8878_v51 = vpop.f32.mrb[85].mxu1  ;;  %v3542_v45 = vld [vmem:[#allocation3 + $0x20] sm:$0xff] }
 0x456   : > { %v8879_v57 = vadd.f32 %v8878_v51, %v8877_v4  ;;  %v8880_v59 = vpop.f32.mrb[86].mxu1  ;;  %9391 = vmatprep.mubr.msk.bf16.mxu0 %vm170_vm0, %v11668_v2 }
 0x457   : > { %4243 = vrot.lane.b32.xlu0 %v11665_v25, %s9679_s20  ;;  %v8881_v62 = vpop.f32.mrb[87].mxu1  ;;  %4007 = vrot.lane.b32.xlu1 %v11665_v25, %s9678_s19  ;;  %v11683_v24 = vpop.permute.xlu1 %3989 }
 0x458   : > { %v3308_v7 = vadd.f32 %v8879_v57, %v11413_v49  ;;  %v8882_v22 = vadd.f32 %v8881_v62, %v8880_v59  ;;  %v3541_v62 = vld [vmem:[#allocation3 + $0x18] sm:$0xff] }
 0x45a   : > { %v3469_v38 = vadd.f32 %v11416_v27, %v3308_v7  ;;  %v3311_v29 = vadd.f32 %v8882_v22, %v11413_v49  ;;  %v3894_v27 = vld [vmem:[#allocation3 + $0x111] sm:$0xff]  ;;  %v3539_v49 = vld [vmem:[#allocation3] sm:$0xff]  ;;  %v3572_v22 = vpack.c.bf16 %v3542_v45, %v3541_v62 }
 0x45b   : > { %4149 = vrot.lane.b32.xlu0 %v11581_v53, %s9678_s19  ;;  %4055 = vrot.lane.b32.xlu1 %v11581_v53, %s9677_s17  ;;  %v3949_v16 = vld [vmem:[#allocation3 + $0x16a] sm:$0xff]  ;;  %v3950_v3 = vld [vmem:[#allocation3 + $0x172] sm:$0xff]  ;;  %v4132_v53 = vpop.permute.xlu0 %4131  ;;  %v3571_v26 = vpack.c.bf16 %v3540_v0, %v3539_v49  ;;  %v4038_v52 = vpop.permute.xlu1 %4037  ;;  %v3850_v7 = vld [vmem:[#allocation3 + $0x140] sm:$0xff] }
 0x45c   : > { %v3505_v41 = vmax.f32 %v3469_v38, 0.0  ;;  %v3472_v12 = vadd.f32 %v11423_v5, %v3311_v29  ;;  %v11690_v20 = vpack.c.bf16 %v3950_v3, %v3949_v16  ;;  %v3893_v5 = vld [vmem:[#allocation3 + $0x109] sm:$0xff]  ;;  %v4389_v14 = vsel %vm170_vm0, %v11446_v40, %v4132_v53  ;;  %v3898_v49 = vld [vmem:[#allocation3 + $0x141] sm:$0xff]  ;;  %v3897_v0 = vld [vmem:[#allocation3 + $0x139] sm:$0xff] }
 0x45d   : > { %v11700_v19 = vpack.c.bf16 %v3894_v27, %v3893_v5  ;;  %v4261_v56 = vsel %vm170_vm0, %v3571_v26, %v11636_v6  ;;  %v3896_v40 = vld [vmem:[#allocation3 + $0x129] sm:$0xff]  ;;  %v11748_v3 = vpack.c.bf16 %v3850_v7, %v3849_v54  ;;  %v11756_v5 = vpack.c.bf16 %v3898_v49, %v3897_v0  ;;  %v3736_v53 = vld [vmem:[#allocation3 + $0x51] sm:$0xff] }
 0x45e   : > { %3537 = vst.msk [vmem:[#allocation3 + $0x181] sm:$0xff] %vm170_vm0, %v3505_v41  ;;  %v3506_v31 = vmax.f32 %v3472_v12, 0.0  ;;  %9392 = vmatmul.mubr.msk.bf16.gmra.mrb[128].mxu0 %vm170_vm0, %v11690_v20  ;;  %v4308_v36 = vsel %vm1115_vm3, %v4261_v56, %v11650_v44  ;;  %v11731_v4 = vpack.c.bf16 %v3896_v40, %v3895_v10  ;;  %v4264_v41 = vsel %vm170_vm0, %v3572_v22, %v11683_v24  ;;  %v3544_v26 = vld [vmem:[#allocation3 + $0x38] sm:$0xff] }
 0x45f   : > { %4197 = vrot.lane.b32.xlu0 %v11688_v30, %s9677_s17  ;;  %4103 = vrot.lane.b32.xlu1 %v11688_v30, %s9679_s20  ;;  %v4310_v27 = vsel %vm1115_vm3, %v4264_v41, %v4038_v52  ;;  %v3735_v52 = vld [vmem:[#allocation3 + $0x49] sm:$0xff]  ;;  %v3900_v10 = vld [vmem:[#allocation3 + $0x159] sm:$0xff] }
 0x460   : > { %3538 = vst.msk [vmem:[#allocation3 + $0x189] sm:$0xff] %vm170_vm0, %v3506_v31  ;;  %v3765_v56 = vpack.c.bf16 %v3736_v53, %v3735_v52  ;;  %v3902_v53 = vld [vmem:[#allocation3 + $0x171] sm:$0xff] }
 0x463   : > { %4245 = vrot.lane.b32.xlu0 %v11700_v19, %s9679_s20  ;;  %4009 = vrot.lane.b32.xlu1 %v11700_v19, %s9678_s19 }
 0x465   : > { %v4180_v43 = vpop.permute.xlu0 %4179  ;;  %v4086_v63 = vpop.permute.xlu1 %4085 }
 0x466   : > { %v4436_v15 = vsel %vm1115_vm3, %v4389_v14, %v4180_v43  ;;  %v3543_v14 = vld [vmem:[#allocation3 + $0x30] sm:$0xff] }
 0x467   : > { %4151 = vrot.lane.b32.xlu0 %v11603_v46, %s9678_s19  ;;  %4057 = vrot.lane.b32.xlu1 %v11603_v46, %s9677_s17  ;;  %v3951_v61 = vld [vmem:[#allocation3 + $0x182] sm:$0xff]  ;;  %v3952_v55 = vld [vmem:[#allocation3 + $0x18a] sm:$0xff]  ;;  %v4340_v46 = vsel %vm1148_vm4, %v4308_v36, %v4084_v32 }
 0x468   : > { %v11717_v6 = vpack.c.bf16 %v3952_v55, %v3951_v61  ;;  %v3733_v32 = vld [vmem:[#allocation3 + $0x31] sm:$0xff]  ;;  %v3573_v61 = vpack.c.bf16 %v3544_v26, %v3543_v14  ;;  %v3739_v14 = vld [vmem:[#allocation3 + $0x79] sm:$0xff] }
 0x469   : > { %v4228_v23 = vpop.permute.xlu0 %4227  ;;  %v11719_v8 = vpop.permute.xlu1 %3991  ;;  %v3764_v57 = vpack.c.bf16 %v3734_v33, %v3733_v32  ;;  %v3899_v33 = vld [vmem:[#allocation3 + $0x151] sm:$0xff] }
 0x46a   : > { %v4468_v48 = vsel %vm1148_vm4, %v4436_v15, %v4228_v23  ;;  %9395 = vmatprep.mubr.msk.bf16.mxu0 %vm170_vm0, %v11717_v6  ;;  %v3851_v23 = vld [vmem:[#allocation3 + $0x150] sm:$0xff]  ;;  %v4267_v42 = vsel %vm170_vm0, %v3573_v61, %v11719_v8  ;;  %v11781_v32 = vpack.c.bf16 %v3900_v10, %v3899_v33 }
 0x46b   : > { %4748 = vmatprep.mubr.bf16.mxu1 %v4468_v48  ;;  %4199 = vrot.lane.b32.xlu0 %v11722_v11, %s9677_s17 }
 0x46c   : > { %4105 = vrot.lane.b32.xlu1 %v11722_v11, %s9679_s20  ;;  %4749 = vmatmul.mubr.bf16.vlgmr.msra.gmra.mrb[88].mxu1 %v4340_v46 }
 0x46d   : > { %v4134_v44 = vpop.permute.xlu0 %4133  ;;  %v4040_v34 = vpop.permute.xlu1 %4039 }
 0x46e   : > { %v4392_v47 = vsel %vm170_vm0, %v3764_v57, %v4134_v44  ;;  %v4312_v44 = vsel %vm1115_vm3, %v4267_v42, %v4040_v34  ;;  %v3546_v34 = vld [vmem:[#allocation3 + $0x50] sm:$0xff]  ;;  %v3737_v57 = vld [vmem:[#allocation3 + $0x61] sm:$0xff] }
 0x46f   : > { %4247 = vrot.lane.b32.xlu0 %v11731_v4, %s9679_s20 }
 0x470   : > { %4011 = vrot.lane.b32.xlu1 %v11731_v4, %s9678_s19 }
 0x471   : > { %v4182_v51 = vpop.permute.xlu0 %4181  ;;  %v4088_v59 = vpop.permute.xlu1 %4087 }
 0x472   : > { %v4438_v38 = vsel %vm1115_vm3, %v4392_v47, %v4182_v51  ;;  %v3738_v51 = vld [vmem:[#allocation3 + $0x69] sm:$0xff] }
 0x473   : > { %4153 = vrot.lane.b32.xlu0 %v11623_v39, %s9678_s19  ;;  %v3766_v7 = vpack.c.bf16 %v3738_v51, %v3737_v57  ;;  %v3545_v47 = vld [vmem:[#allocation3 + $0x48] sm:$0xff] }
 0x474   : > { %4059 = vrot.lane.b32.xlu1 %v11623_v39, %s9677_s17  ;;  %v4343_v39 = vsel %vm1148_vm4, %v4310_v27, %v4086_v63  ;;  %v3852_v63 = vld [vmem:[#allocation3 + $0x158] sm:$0xff] }
 0x475   : > { %v4230_v29 = vpop.permute.xlu0 %4229  ;;  %v11745_v12 = vpop.permute.xlu1 %3993  ;;  %v11772_v40 = vpack.c.bf16 %v3852_v63, %v3851_v23  ;;  %v3856_v23 = vld [vmem:[#allocation3 + $0x188] sm:$0xff] }
 0x476   : > { %v4471_v16 = vsel %vm1148_vm4, %v4438_v38, %v4230_v29  ;;  %v3574_v38 = vpack.c.bf16 %v3546_v34, %v3545_v47 }
 0x477   : > { %4756 = vmatprep.mubr.bf16.mxu1 %v4471_v16  ;;  %4201 = vrot.lane.b32.xlu0 %v11748_v3, %s9677_s17  ;;  %v3853_v16 = vld [vmem:[#allocation3 + $0x168] sm:$0xff] }
 0x478   : > { %4107 = vrot.lane.b32.xlu1 %v11748_v3, %s9679_s20  ;;  %4757 = vmatmul.mubr.bf16.gmra.mrb[92].mxu1 %v4343_v39  ;;  %v4270_v27 = vsel %vm170_vm0, %v3574_v38, %v11745_v12  ;;  %v3901_v12 = vld [vmem:[#allocation3 + $0x169] sm:$0xff] }
 0x479   : > { %v4136_v24 = vpop.permute.xlu0 %4135  ;;  %v4042_v31 = vpop.permute.xlu1 %4041 }
 0x47a   : > { %v4395_v55 = vsel %vm170_vm0, %v3765_v56, %v4136_v24  ;;  %v4314_v0 = vsel %vm1115_vm3, %v4270_v27, %v4042_v31  ;;  %v3740_v56 = vld [vmem:[#allocation3 + $0x81] sm:$0xff] }
 0x47b   : > { %4249 = vrot.lane.b32.xlu0 %v11756_v5, %s9679_s20  ;;  %v3548_v31 = vld [vmem:[#allocation3 + $0x68] sm:$0xff]  ;;  %v3767_v61 = vpack.c.bf16 %v3740_v56, %v3739_v14 }
 0x47c   : > { %4013 = vrot.lane.b32.xlu1 %v11756_v5, %s9678_s19 }
 0x47d   : > { %v4184_v43 = vpop.permute.xlu0 %4183  ;;  %v4090_v50 = vpop.permute.xlu1 %4089 }
 0x47e   : > { %v4440_v36 = vsel %vm1115_vm3, %v4395_v55, %v4184_v43  ;;  %v11804_v43 = vpack.c.bf16 %v3902_v53, %v3901_v12 }
 0x47f   : > { %4155 = vrot.lane.b32.xlu0 %v11645_v18, %s9678_s19 }
 0x480   : > { %4061 = vrot.lane.b32.xlu1 %v11645_v18, %s9677_s17  ;;  %v4346_v18 = vsel %vm1148_vm4, %v4312_v44, %v4088_v59  ;;  %v3854_v59 = vld [vmem:[#allocation3 + $0x170] sm:$0xff] }
 0x481   : > { %v4232_v15 = vpop.permute.xlu0 %4231  ;;  %v11770_v48 = vpop.permute.xlu1 %3995  ;;  %v11795_v39 = vpack.c.bf16 %v3854_v59, %v3853_v16  ;;  %v3903_v59 = vld [vmem:[#allocation3 + $0x181] sm:$0xff]  ;;  %v3549_v16 = vld [vmem:[#allocation3 + $0x78] sm:$0xff] }
 0x482   : > { %v4474_v46 = vsel %vm1148_vm4, %v4440_v36, %v4232_v15  ;;  %v3953_v36 = vld [vmem:[#allocation3 + $0x19a] sm:$0xff] }
 0x483   : > { %4764 = vmatprep.mubr.bf16.mxu1 %v4474_v46  ;;  %4203 = vrot.lane.b32.xlu0 %v11772_v40, %s9677_s17  ;;  %v3547_v15 = vld [vmem:[#allocation3 + $0x60] sm:$0xff] }
 0x484   : > { %4109 = vrot.lane.b32.xlu1 %v11772_v40, %s9679_s20  ;;  %4765 = vmatmul.mubr.bf16.gmra.mrb[96].mxu1 %v4346_v18  ;;  %v3575_v46 = vpack.c.bf16 %v3548_v31, %v3547_v15 }
 0x485   : > { %v4138_v8 = vpop.permute.xlu0 %4137  ;;  %v4044_v45 = vpop.permute.xlu1 %4043 }
 0x486   : > { %v4398_v29 = vsel %vm170_vm0, %v3766_v7, %v4138_v8  ;;  %v3855_v8 = vld [vmem:[#allocation3 + $0x180] sm:$0xff]  ;;  %v4273_v33 = vsel %vm170_vm0, %v3575_v46, %v11770_v48  ;;  %v3904_v7 = vld [vmem:[#allocation3 + $0x189] sm:$0xff] }
 0x487   : > { %4251 = vrot.lane.b32.xlu0 %v11781_v32, %s9679_s20  ;;  %v3873_v34 = vpack.c.bf16 %v3856_v23, %v3855_v8  ;;  %v3550_v48 = vld [vmem:[#allocation3 + $0x80] sm:$0xff] }
 0x488   : > { %4015 = vrot.lane.b32.xlu1 %v11781_v32, %s9678_s19 }
 0x489   : > { %v4186_v62 = vpop.permute.xlu0 %4185  ;;  %v4092_v22 = vpop.permute.xlu1 %4091 }
 0x48a   : > { %v4442_v54 = vsel %vm1115_vm3, %v4398_v29, %v4186_v62  ;;  %v4316_v62 = vsel %vm1115_vm3, %v4273_v33, %v4044_v45  ;;  %v11824_v29 = vpack.c.bf16 %v3904_v7, %v3903_v59  ;;  %v3905_v45 = vld [vmem:[#allocation3 + $0x199] sm:$0xff] }
 0x48b   : > { %4157 = vrot.lane.b32.xlu0 %v11668_v2, %s9678_s19 }
 0x48c   : > { %4063 = vrot.lane.b32.xlu1 %v11668_v2, %s9677_s17  ;;  %v4349_v2 = vsel %vm1148_vm4, %v4314_v0, %v4090_v50  ;;  %v3954_v50 = vld [vmem:[#allocation3 + $0x1a2] sm:$0xff] }
 0x48d   : > { %v4234_v41 = vpop.permute.xlu0 %4233  ;;  %v3998_v49 = vpop.permute.xlu1 %3997  ;;  %v3970_v42 = vpack.c.bf16 %v3954_v50, %v3953_v36 }
 0x48e   : > { %v4477_v24 = vsel %vm1148_vm4, %v4442_v54, %v4234_v41  ;;  %v3906_v41 = vld [vmem:[#allocation3 + $0x1a1] sm:$0xff] }
 0x48f   : > { %4772 = vmatprep.mubr.bf16.mxu1 %v4477_v24  ;;  %4205 = vrot.lane.b32.xlu0 %v11795_v39, %s9677_s17  ;;  %v3576_v24 = vpack.c.bf16 %v3550_v48, %v3549_v16 }
 0x490   : > { %4111 = vrot.lane.b32.xlu1 %v11795_v39, %s9679_s20  ;;  %4773 = vmatmul.mubr.bf16.gmra.mrb[100].mxu1 %v4349_v2 }
 0x491   : > { %v4140_v26 = vpop.permute.xlu0 %4139  ;;  %v4046_v52 = vpop.permute.xlu1 %4045  ;;  %9396 = vmatmul.mubr.msk.bf16.gmra.mrb[132].mxu0 %vm170_vm0, %v3970_v42  ;;  %v4276_v53 = vsel %vm170_vm0, %v3576_v24, %v3998_v49 }
 0x492   : > { %v4401_v44 = vsel %vm170_vm0, %v3767_v61, %v4140_v26  ;;  %v4318_v12 = vsel %vm1115_vm3, %v4276_v53, %v4046_v52 }
 0x493   : > { %4253 = vrot.lane.b32.xlu0 %v11804_v43, %s9679_s20 }
 0x494   : > { %4017 = vrot.lane.b32.xlu1 %v11804_v43, %s9678_s19 }
 0x495   : > { %v4188_v63 = vpop.permute.xlu0 %4187  ;;  %v4094_v55 = vpop.permute.xlu1 %4093 }
 0x496   : > { %v4444_v10 = vsel %vm1115_vm3, %v4401_v44, %v4188_v63  ;;  %v4355_v14 = vsel %vm1148_vm4, %v4318_v12, %v4094_v55 }
 0x497   : > { %4159 = vrot.lane.b32.xlu0 %v11690_v20, %s9678_s19 }
 0x498   : > { %4065 = vrot.lane.b32.xlu1 %v11690_v20, %s9677_s17  ;;  %v4352_v20 = vsel %vm1148_vm4, %v4316_v62, %v4092_v22  ;;  %v3922_v22 = vpack.c.bf16 %v3906_v41, %v3905_v45 }
 0x499   : > { %v4236_v18 = vpop.permute.xlu0 %4235  ;;  %v4000_v51 = vpop.permute.xlu1 %3999 }
 0x49a   : > { %v4480_v57 = vsel %vm1148_vm4, %v4444_v10, %v4236_v18  ;;  %v4279_v36 = vsel %vm170_vm0, %v11529_v58, %v4000_v51 }
 0x49b   : > { %4780 = vmatprep.mubr.bf16.mxu1 %v4480_v57  ;;  %4207 = vrot.lane.b32.xlu0 %v3873_v34, %s9677_s17 }
 0x49c   : > { %4113 = vrot.lane.b32.xlu1 %v3873_v34, %s9679_s20  ;;  %4781 = vmatmul.mubr.bf16.gmra.mrb[104].mxu1 %v4352_v20 }
 0x49d   : > { %v4142_v47 = vpop.permute.xlu0 %4141  ;;  %v4048_v38 = vpop.permute.xlu1 %4047 }
 0x49e   : > { %v4404_v0 = vsel %vm170_vm0, %v11537_v9, %v4142_v47  ;;  %v4320_v15 = vsel %vm1115_vm3, %v4279_v36, %v4048_v38 }
 0x49f   : > { %4255 = vrot.lane.b32.xlu0 %v11824_v29, %s9679_s20 }
 0x4a1   : > { %v4190_v54 = vpop.permute.xlu0 %4189  ;;  %v4096_v27 = vpop.permute.xlu1 %4095 }
 0x4a2   : > { %v4446_v2 = vsel %vm1115_vm3, %v4404_v0, %v4190_v54  ;;  %v4358_v42 = vsel %vm1148_vm4, %v4320_v15, %v4096_v27  ;;  %v5150_v0 = vld [vmem:[#allocation2 + $0x1] sm:$0xff] }
 0x4a3   : > { %4161 = vrot.lane.b32.xlu0 %v11717_v6, %s9678_s19 }
 0x4a5   : > { %v4238_v26 = vpop.permute.xlu0 %4237  ;;  %v4002_v56 = vpop.permute.xlu1 %4001 }
 0x4a6   : > { %v4483_v31 = vsel %vm1148_vm4, %v4446_v2, %v4238_v26  ;;  %v4282_v58 = vsel %vm170_vm0, %v11557_v60, %v4002_v56 }
 0x4a7   : > { %4788 = vmatprep.mubr.bf16.mxu1 %v4483_v31  ;;  %4257 = vrot.lane.b32.xlu0 %v3922_v22, %s9679_s20  ;;  %v5151_v22 = vld [vmem:[#allocation2 + $0x9] sm:$0xff]  ;;  %v5420_v31 = vld [vmem:[#allocation2 + $0x198] sm:$0xff] }
 0x4a8   : > { %4789 = vmatmul.mubr.bf16.gmra.mrb[108].mxu1 %v4355_v14  ;;  %v5182_v53 = vpack.c.bf16 %v5151_v22, %v5150_v0  ;;  %v5421_v14 = vld [vmem:[#allocation2 + $0x1a0] sm:$0xff] }
 0x4a9   : > { %v4144_v9 = vpop.permute.xlu0 %4143  ;;  %v4050_v63 = vpop.permute.xlu1 %4049  ;;  %v5437_v36 = vpack.c.bf16 %v5421_v14, %v5420_v31 }
 0x4aa   : > { %v4407_v49 = vsel %vm170_vm0, %v11571_v37, %v4144_v9  ;;  %v4322_v51 = vsel %vm1115_vm3, %v4282_v58, %v4050_v63  ;;  %5550 = vrot.lane.b32.xlu1 %v5182_v53, %s9678_s19  ;;  %v5198_v9 = vld [vmem:[#allocation2 + $0x2] sm:$0xff] }
 0x4ab   : > { %5772 = vrot.lane.b32.xlu0 %v5437_v36, %s9677_s17 }
 0x4ad   : > { %v4192_v6 = vpop.permute.xlu0 %4191  ;;  %v4098_v61 = vpop.permute.xlu1 %4097 }
 0x4ae   : > { %v4448_v52 = vsel %vm1115_vm3, %v4407_v49, %v4192_v6  ;;  %v4361_v62 = vsel %vm1148_vm4, %v4322_v51, %v4098_v61 }
 0x4b1   : > { %v4240_v50 = vpop.permute.xlu0 %4239  ;;  %v4004_v23 = vpop.permute.xlu1 %4003 }
 0x4b2   : > { %v4486_v55 = vsel %vm1148_vm4, %v4448_v52, %v4240_v50  ;;  %v4285_v60 = vsel %vm170_vm0, %v11591_v35, %v4004_v23  ;;  %v5199_v52 = vld [vmem:[#allocation2 + $0xa] sm:$0xff] }
 0x4b3   : > { %4796 = vmatprep.mubr.bf16.mxu1 %v4486_v55  ;;  %v5230_v23 = vpack.c.bf16 %v5199_v52, %v5198_v9 }
 0x4b4   : > { %4797 = vmatmul.mubr.bf16.gmra.mrb[112].mxu1 %v4358_v42 }
 0x4b5   : > { %v4146_v46 = vpop.permute.xlu0 %4145  ;;  %v4052_v44 = vpop.permute.xlu1 %4051  ;;  %5598 = vrot.lane.b32.xlu1 %v5230_v23, %s9677_s17 }
 0x4b6   : > { %v4410_v37 = vsel %vm170_vm0, %v11599_v13, %v4146_v46  ;;  %v4324_v54 = vsel %vm1115_vm3, %v4285_v60, %v4052_v44 }
 0x4b9   : > { %v4194_v10 = vpop.permute.xlu0 %4193  ;;  %v4100_v18 = vpop.permute.xlu1 %4099 }
 0x4ba   : > { %v4450_v8 = vsel %vm1115_vm3, %v4410_v37, %v4194_v10  ;;  %v4364_v16 = vsel %vm1148_vm4, %v4324_v54, %v4100_v18 }
 0x4bd   : > { %v4242_v33 = vpop.permute.xlu0 %4241  ;;  %v4006_v34 = vpop.permute.xlu1 %4005 }
 0x4be   : > { %v4489_v57 = vsel %vm1148_vm4, %v4450_v8, %v4242_v33  ;;  %v4288_v63 = vsel %vm170_vm0, %v11619_v1, %v4006_v34 }
 0x4bf   : > { %4804 = vmatprep.mubr.bf16.mxu1 %v4489_v57 }
 0x4c0   : > { %4805 = vmatmul.mubr.bf16.gmra.mrb[116].mxu1 %v4361_v62 }
 0x4c1   : > { %v4148_v7 = vpop.permute.xlu0 %4147  ;;  %v4054_v20 = vpop.permute.xlu1 %4053 }
 0x4c2   : > { %v4413_v13 = vsel %vm170_vm0, %v11633_v28, %v4148_v7  ;;  %v4326_v50 = vsel %vm1115_vm3, %v4288_v63, %v4054_v20 }
 0x4c5   : > { %v4196_v47 = vpop.permute.xlu0 %4195  ;;  %v4102_v59 = vpop.permute.xlu1 %4101 }
 0x4c6   : > { %v4452_v38 = vsel %vm1115_vm3, %v4413_v13, %v4196_v47  ;;  %v4367_v55 = vsel %vm1148_vm4, %v4326_v50, %v4102_v59  ;;  %v9574_v47 = vld [vmem:[%s13441_s1 + $0x230] sm:$0xff]  }
 0x4c7   : > { %9399 = vmatprep.subr.bf16.mxu1 %v9574_v47 }
 0x4c8   : > { %9400 = vmatpush3.bf16.msra.mxu1 %v9574_v47 }
 0x4c9   : > { %v4244_v48 = vpop.permute.xlu0 %4243  ;;  %v4008_v45 = vpop.permute.xlu1 %4007 }
 0x4ca   : > { %v4492_v41 = vsel %vm1148_vm4, %v4452_v38, %v4244_v48  ;;  %v4291_v18 = vsel %vm170_vm0, %v11657_v17, %v4008_v45  ;;  %v9575_v38 = vld [vmem:[%s13441_s1 + $0x238] sm:$0xff]  }
 0x4cb   : > { %4812 = vmatprep.mubr.bf16.mxu1 %v4492_v41  ;;  %9401 = vmatprep.subr.bf16.mxu1 %v9575_v38 }
 0x4cc   : > { %4813 = vmatmul.mubr.bf16.gmra.mrb[120].mxu1 %v4364_v16 }
 0x4cd   : > { %v4150_v27 = vpop.permute.xlu0 %4149  ;;  %v4056_v24 = vpop.permute.xlu1 %4055  ;;  %9402 = vmatpush3.bf16.msra.mxu1 %v9575_v38 }
 0x4ce   : > { %v4416_v12 = vsel %vm170_vm0, %v11665_v25, %v4150_v27  ;;  %v4328_v33 = vsel %vm1115_vm3, %v4291_v18, %v4056_v24 }
 0x4d0   : > { %v11862_v2 = vpop.f32.mrb[104].mxu0 }
 0x4d1   : > { %v4198_v28 = vpop.permute.xlu0 %4197  ;;  %v4104_v35 = vpop.permute.xlu1 %4103 }
 0x4d2   : > { %v11864_v26 = vpop.f32.mrb[105].mxu0  ;;  %v4454_v6 = vsel %vm1115_vm3, %v4416_v12, %v4198_v28  ;;  %v4370_v62 = vsel %vm1148_vm4, %v4328_v33, %v4104_v35 }
 0x4d3   : > { %v11869_v56 = vpop.f32.mrb[106].mxu0 }
 0x4d4   : > { %v11874_v61 = vpop.f32.mrb[107].mxu0 }
 0x4d5   : > { %v4246_v49 = vpop.permute.xlu0 %4245  ;;  %v4010_v15 = vpop.permute.xlu1 %4009 }
 0x4d6   : > { %v4495_v25 = vsel %vm1148_vm4, %v4454_v6, %v4246_v49  ;;  %v4294_v48 = vsel %vm170_vm0, %v11688_v30, %v4010_v15 }
 0x4d7   : > { %4820 = vmatprep.mubr.bf16.mxu1 %v4495_v25 }
 0x4d8   : > { %4821 = vmatmul.mubr.bf16.gmra.mrb[124].mxu1 %v4367_v55 }
 0x4d9   : > { %v4152_v1 = vpop.permute.xlu0 %4151  ;;  %v4058_v42 = vpop.permute.xlu1 %4057 }
 0x4da   : > { %v4419_v10 = vsel %vm170_vm0, %v11700_v19, %v4152_v1  ;;  %v4330_v41 = vsel %vm1115_vm3, %v4294_v48, %v4058_v42 }
 0x4dd   : > { %v4200_v46 = vpop.permute.xlu0 %4199 }
 0x4de   : > { %v4106_v44 = vpop.permute.xlu1 %4105  ;;  %v4456_v37 = vsel %vm1115_vm3, %v4419_v10, %v4200_v46 }
 0x4df   : > { %v4373_v24 = vsel %vm1148_vm4, %v4330_v41, %v4106_v44 }
 0x4e1   : > { %v4248_v58 = vpop.permute.xlu0 %4247  ;;  %v11887_v51 = vpop.f32.mrb[108].mxu0 }
 0x4e2   : > { %v4012_v8 = vpop.permute.xlu1 %4011  ;;  %v4498_v34 = vsel %vm1148_vm4, %v4456_v37, %v4248_v58  ;;  %v11890_v57 = vpop.f32.mrb[109].mxu0 }
 0x4e3   : > { %4828 = vmatprep.mubr.bf16.mxu1 %v4498_v34  ;;  %v11893_v19 = vpop.f32.mrb[110].mxu0  ;;  %v4297_v14 = vsel %vm170_vm0, %v11722_v11, %v4012_v8 }
 0x4e4   : > { %4829 = vmatmul.mubr.bf16.gmra.mrb[128].mxu1 %v4370_v62  ;;  %v11895_v7 = vpop.f32.mrb[111].mxu0 }
 0x4e5   : > { %v4154_v17 = vpop.permute.xlu0 %4153 }
 0x4e6   : > { %v4060_v20 = vpop.permute.xlu1 %4059  ;;  %v4422_v60 = vsel %vm170_vm0, %v11731_v4, %v4154_v17 }
 0x4e7   : > { %v4332_v6 = vsel %vm1115_vm3, %v4297_v14, %v4060_v20  ;;  %v9578_v14 = vld [vmem:[%s13441_s1 + $0x1f8] sm:$0xff]  }
 0x4e9   : > { %v4202_v59 = vpop.permute.xlu0 %4201 }
 0x4ea   : > { %v4108_v13 = vpop.permute.xlu1 %4107  ;;  %v4458_v54 = vsel %vm1115_vm3, %v4422_v60, %v4202_v59 }
 0x4eb   : > { %v4376_v52 = vsel %vm1148_vm4, %v4332_v6, %v4108_v13 }
 0x4ed   : > { %v4250_v45 = vpop.permute.xlu0 %4249 }
 0x4ee   : > { %v4014_v16 = vpop.permute.xlu1 %4013  ;;  %v4501_v27 = vsel %vm1148_vm4, %v4458_v54, %v4250_v45 }
 0x4ef   : > { %4836 = vmatprep.mubr.bf16.mxu1 %v4501_v27  ;;  %v4300_v1 = vsel %vm170_vm0, %v11748_v3, %v4014_v16 }
 0x4f0   : > { %4837 = vmatmul.mubr.bf16.gmra.mrb[132].mxu1 %v4373_v24 }
 0x4f1   : > { %v4156_v4 = vpop.permute.xlu0 %4155  ;;  %v11911_v22 = vpop.f32.mrb[112].mxu0 }
 0x4f2   : > { %v4062_v0 = vpop.permute.xlu1 %4061  ;;  %v11913_v28 = vpop.f32.mrb[113].mxu0  ;;  %v4425_v31 = vsel %vm170_vm0, %v11756_v5, %v4156_v4 }
 0x4f3   : > { %v11915_v30 = vpop.f32.mrb[114].mxu0  ;;  %v4334_v10 = vsel %vm1115_vm3, %v4300_v1, %v4062_v0  ;;  %v12011_v1 = vld [vmem:[%s13442_s2 + $0x2] ss:$0 sm:$0xff] }
 0x4f4   : > { %v11917_v53 = vpop.f32.mrb[115].mxu0 }
 0x4f5   : > { %v4204_v35 = vpop.permute.xlu0 %4203 }
 0x4f6   : > { %v4110_v12 = vpop.permute.xlu1 %4109  ;;  %v4460_v9 = vsel %vm1115_vm3, %v4425_v31, %v4204_v35 }
 0x4f7   : > { %v4379_v58 = vsel %vm1148_vm4, %v4334_v10, %v4110_v12 }
 0x4f9   : > { %v4252_v63 = vpop.permute.xlu0 %4251 }
 0x4fa   : > { %v4016_v49 = vpop.permute.xlu1 %4015  ;;  %v4504_v36 = vsel %vm1148_vm4, %v4460_v9, %v4252_v63  ;;  %v9579_v9 = vld [vmem:[%s13441_s1 + $0x1b8] sm:$0xff]  }
 0x4fb   : > { %4844 = vmatprep.mubr.bf16.mxu1 %v4504_v36  ;;  %v4303_v34 = vsel %vm170_vm0, %v11772_v40, %v4016_v49  ;;  %v9580_v36 = vld [vmem:[%s13441_s1 + $0x200] sm:$0xff]  }
 0x4fc   : > { %4845 = vmatmul.mubr.bf16.gmra.mrb[136].mxu1 %v4376_v52 }
 0x4fd   : > { %v4158_v50 = vpop.permute.xlu0 %4157 }
 0x4fe   : > { %v4064_v15 = vpop.permute.xlu1 %4063  ;;  %v4428_v11 = vsel %vm170_vm0, %v11781_v32, %v4158_v50  ;;  %v9581_v50 = vld [vmem:[%s13441_s1 + $0x1c0] sm:$0xff]  }
 0x4ff   : > { %v4336_v20 = vsel %vm1115_vm3, %v4303_v34, %v4064_v15  ;;  %v9582_v15 = vld [vmem:[%s13441_s1 + $0x208] sm:$0xff]  }
 0x500   : > { %v13533_v34 = vld [vmem:[#allocation32_spill] sm:$0xff] }
 0x501   : > { %v4206_v25 = vpop.permute.xlu0 %4205  ;;  %v11927_v23 = vpop.f32.mrb[116].mxu0 }
 0x502   : > { %v11929_v5 = vpop.f32.mrb[117].mxu0  ;;  %v4462_v42 = vsel %vm1115_vm3, %v4428_v11, %v4206_v25  ;;  %v4112_v18 = vpop.permute.xlu1 %4111  ;;  %v9583_v25 = vld [vmem:[%s13441_s1 + $0x1c8] sm:$0xff]  }
 0x503   : > { %v11933_v55 = vpop.f32.mrb[118].mxu0  ;;  %v4382_v38 = vsel %vm1148_vm4, %v4336_v20, %v4112_v18  ;;  %v13534_v20 = vld [vmem:[#allocation34_spill] sm:$0xff] }
 0x504   : > { %v11938_v46 = vpop.f32.mrb[119].mxu0 }
 0x505   : > { %v4254_v44 = vpop.permute.xlu0 %4253 }
 0x506   : > { %v4507_v37 = vsel %vm1148_vm4, %v4462_v42, %v4254_v44  ;;  %v4018_v8 = vpop.permute.xlu1 %4017 }
 0x507   : > { %4852 = vmatprep.mubr.bf16.mxu1 %v4507_v37  ;;  %v4306_v41 = vsel %vm170_vm0, %v11795_v39, %v4018_v8  ;;  %v9577_v39 = vld [vmem:[%s13441_s1 + $0x1b0] sm:$0xff]  }
 0x508   : > { %4853 = vmatmul.mubr.bf16.gmra.mrb[140].mxu1 %v4379_v58  ;;  %v9585_v8 = vld [vmem:[%s13441_s1 + $0x1d0] sm:$0xff]  }
 0x509   : > { %v4160_v32 = vpop.permute.xlu0 %4159 }
 0x50a   : > { %v4431_v3 = vsel %vm170_vm0, %v11804_v43, %v4160_v32  ;;  %v4066_v47 = vpop.permute.xlu1 %4065  ;;  %v9584_v32 = vld [vmem:[%s13441_s1 + $0x210] sm:$0xff]  }
 0x50b   : > { %v4338_v24 = vsel %vm1115_vm3, %v4306_v41, %v4066_v47 }
 0x50d   : > { %v4208_v33 = vpop.permute.xlu0 %4207 }
 0x50e   : > { %v4464_v62 = vsel %vm1115_vm3, %v4431_v3, %v4208_v33  ;;  %v4114_v45 = vpop.permute.xlu1 %4113 }
 0x50f   : > { %v4385_v0 = vsel %vm1148_vm4, %v4338_v24, %v4114_v45 }
 0x511   : > { %v4256_v17 = vpop.permute.xlu0 %4255  ;;  %v11949_v59 = vpop.f32.mrb[120].mxu0 }
 0x512   : > { %v4510_v13 = vsel %vm1148_vm4, %v4464_v62, %v4256_v17  ;;  %v11952_v60 = vpop.f32.mrb[121].mxu0 }
 0x513   : > { %4860 = vmatprep.mubr.bf16.mxu1 %v4510_v13  ;;  %v11955_v43 = vpop.f32.mrb[122].mxu0 }
 0x514   : > { %4861 = vmatmul.mubr.bf16.gmra.mrb[144].mxu1 %v4382_v38  ;;  %v11957_v48 = vpop.f32.mrb[123].mxu0 }
 0x515   : > { %v4162_v40 = vpop.permute.xlu0 %4161 }
 0x516   : > { %v4434_v54 = vsel %vm170_vm0, %v11824_v29, %v4162_v40  ;;  %v9576_v29 = vld [vmem:[%s13441_s1 + $0x1f0] sm:$0xff]  }
 0x517   : > { %v4466_v27 = vsel %vm1115_vm3, %v4434_v54, %v11677_v21  ;;  %9031 = vmatprep.subr.bf16.mxu0 %v9576_v29  ;;  %v9586_v54 = vld [vmem:[%s13441_s1 + $0x218] sm:$0xff]   ;;  %v9589_v29 = vld [vmem:[%s13441_s1 + $0x1e0] sm:$0xff]  }
 0x518   : > { %9032 = vmatpush3.bf16.msra.mxu0 %v9577_v39 }
 0x519   : > { %v4258_v16 = vpop.permute.xlu0 %4257  ;;  %9033 = vmatprep.subr.bf16.mxu0 %v9578_v14 }
 0x51a   : > { %v4513_v4 = vsel %vm1148_vm4, %v4466_v27, %v4258_v16  ;;  %v9587_v16 = vld [vmem:[%s13441_s1 + $0x1d8] sm:$0xff]   ;;  %v9588_v27 = vld [vmem:[%s13441_s1 + $0x220] sm:$0xff]  }
 0x51b   : > { %4868 = vmatprep.mubr.bf16.mxu1 %v4513_v4 }
 0x51c   : > { %4869 = vmatmul.mubr.bf16.gmra.mrb[148].mxu1 %v4385_v0  ;;  %9034 = vmatpush3.bf16.msra.mxu0 %v9579_v9 }
 0x51d   : > { %9035 = vmatprep.subr.bf16.mxu0 %v9580_v36  ;;  %v13535_v36 = vld [vmem:[#allocation31_spill] sm:$0xff] }
 0x520   : > { %9036 = vmatpush3.bf16.msra.mxu0 %v9581_v50 }
 0x521   : > { %v11974_v35 = vpop.f32.mrb[124].mxu0  ;;  %9037 = vmatprep.subr.bf16.mxu0 %v9582_v15 }
 0x522   : > { %v11976_v21 = vpop.f32.mrb[125].mxu0 }
 0x523   : > { %v11978_v12 = vpop.f32.mrb[126].mxu0 }
 0x524   : > { %v11980_v31 = vpop.f32.mrb[127].mxu0  ;;  %9038 = vmatpush3.bf16.msra.mxu0 %v9583_v25 }
 0x525   : > { %9039 = vmatprep.subr.bf16.mxu0 %v9584_v32 }
 0x528   : > { %9040 = vmatpush3.bf16.msra.mxu0 %v9585_v8  ;;  %v9590_v8 = vld [vmem:[%s13441_s1 + $0x228] sm:$0xff]  }
 0x529   : > { %9041 = vmatprep.subr.bf16.mxu0 %v9586_v54 }
 0x52c   : > { %9042 = vmatpush3.bf16.msra.mxu0 %v9587_v16 }
 0x52d   : > { %9043 = vmatprep.subr.bf16.mxu0 %v9588_v27 }
 0x530   : > { %9044 = vmatpush3.bf16.msra.mxu0 %v9589_v29 }
 0x531   : > { %v11988_v63 = vpop.f32.mrb[128].mxu0  ;;  %9045 = vmatprep.subr.bf16.mxu0 %v9590_v8 }
 0x532   : > { %v11990_v6 = vpop.f32.mrb[129].mxu0 }
 0x533   : > { %v11992_v49 = vpop.f32.mrb[130].mxu0 }
 0x534   : > { %v11997_v52 = vpop.f32.mrb[131].mxu0 }
 0x53f   : > { %v8917_v11 = vpop.f32.mrb[88].mxu1 }
 0x540   : > { %v8918_v42 = vpop.f32.mrb[89].mxu1 }
 0x541   : > { %v8919_v44 = vadd.f32 %v8918_v42, %v8917_v11  ;;  %v8920_v10 = vpop.f32.mrb[90].mxu1  ;;  %v13536_v42 = vld [vmem:[#allocation33_spill] sm:$0xff] }
 0x542   : > { %v8921_v18 = vpop.f32.mrb[91].mxu1 }
 0x543   : > { %v4751_v37 = vadd.f32 %v8919_v44, %v12011_v1  ;;  %v8922_v58 = vadd.f32 %v8921_v18, %v8920_v10 }
 0x545   : > { %v4912_v33 = vadd.f32 %v11864_v26, %v4751_v37  ;;  %v4754_v3 = vadd.f32 %v8922_v58, %v12011_v1 }
 0x547   : > { %v12023_v62 = vadd.f32 %v4912_v33, %v13533_v34  ;;  %v4915_v17 = vadd.f32 %v11874_v61, %v4754_v3  ;;  %v9591_v3 = vld [vmem:[%s13441_s1 + $0x1e8] sm:$0xff]  }
 0x548   : > { %9046 = vmatpush3.bf16.msra.mxu0 %v9591_v3 }
 0x549   : > { %5070 = vst.msk [vmem:[#allocation2 + $0x19] sm:$0xff] %vm170_vm0, %v12023_v62  ;;  %v12029_v47 = vadd.f32 %v4915_v17, %v13534_v20 }
 0x54b   : > { %5071 = vst.msk [vmem:[#allocation2 + $0x21] sm:$0xff] %vm170_vm0, %v12029_v47  ;;  %v8923_v13 = vpop.f32.mrb[92].mxu1 }
 0x54c   : > { %v8924_v26 = vpop.f32.mrb[93].mxu1 }
 0x54d   : > { %v8925_v38 = vadd.f32 %v8924_v26, %v8923_v13  ;;  %v8926_v40 = vpop.f32.mrb[94].mxu1 }
 0x54e   : > { %v8927_v45 = vpop.f32.mrb[95].mxu1 }
 0x54f   : > { %v4759_v61 = vadd.f32 %v8925_v38, %v12011_v1  ;;  %v8928_v41 = vadd.f32 %v8927_v45, %v8926_v40  ;;  %v13537_v45 = vld [vmem:[#allocation36_spill] sm:$0xff] }
 0x550   : > { %v5246_v0 = vld [vmem:[#allocation2 + $0x18] sm:$0xff] }
 0x551   : > { %v4920_v24 = vadd.f32 %v11862_v2, %v4759_v61  ;;  %v4762_v4 = vadd.f32 %v8928_v41, %v12011_v1  ;;  %v5152_v10 = vld [vmem:[#allocation2 + $0x19] sm:$0xff] }
 0x552   : > { %v5342_v39 = vld [vmem:[#allocation2 + $0x1a] sm:$0xff]  ;;  %v5343_v14 = vld [vmem:[#allocation2 + $0x22] sm:$0xff] }
 0x553   : > { %v5247_v9 = vld [vmem:[#allocation2 + $0x20] sm:$0xff]  ;;  %v12049_v50 = vadd.f32 %v4920_v24, %v13535_v36  ;;  %v4923_v15 = vadd.f32 %v11869_v56, %v4762_v4  ;;  %v5374_v25 = vpack.c.bf16 %v5343_v14, %v5342_v39 }
 0x554   : > { %v12052_v11 = vpack.c.bf16 %v5247_v9, %v5246_v0  ;;  %v5153_v2 = vld [vmem:[#allocation2 + $0x21] sm:$0xff] }
 0x555   : > { %5072 = vst.msk [vmem:[#allocation2 + $0x31] sm:$0xff] %vm170_vm0, %v12049_v50  ;;  %v12057_v44 = vadd.f32 %v4923_v15, %v13536_v42  ;;  %5694 = vrot.lane.b32.xlu0 %v5374_v25, %s9678_s19  ;;  %v12064_v18 = vpack.c.bf16 %v5153_v2, %v5152_v10 }
 0x556   : > { %5646 = vrot.lane.b32.xlu1 %v12052_v11, %s9679_s20 }
 0x557   : > { %5073 = vst.msk [vmem:[#allocation2 + $0x39] sm:$0xff] %vm170_vm0, %v12057_v44  ;;  %v8929_v56 = vpop.f32.mrb[96].mxu1 }
 0x558   : > { %v8930_v37 = vpop.f32.mrb[97].mxu1 }
 0x559   : > { %v8931_v58 = vadd.f32 %v8930_v37, %v8929_v56  ;;  %v8932_v32 = vpop.f32.mrb[98].mxu1 }
 0x55a   : > { %5552 = vrot.lane.b32.xlu1 %v12064_v18, %s9678_s19  ;;  %v8933_v33 = vpop.f32.mrb[99].mxu1 }
 0x55b   : > { %v4767_v34 = vadd.f32 %v8931_v58, %v12011_v1  ;;  %v8934_v17 = vadd.f32 %v8933_v33, %v8932_v32  ;;  %v13539_v32 = vld [vmem:[#allocation35_spill] sm:$0xff] }
 0x55c   : > { %v5390_v26 = vld [vmem:[#allocation2 + $0x30] sm:$0xff] }
 0x55d   : > { %v4928_v20 = vadd.f32 %v11890_v57, %v4767_v34  ;;  %v4770_v13 = vadd.f32 %v8934_v17, %v12011_v1  ;;  %v13538_v57 = vld [vmem:[#allocation38_spill] sm:$0xff] }
 0x55e   : > { %5600 = vrot.lane.b32.xlu1 %v5374_v25, %s9677_s17  ;;  %v5391_v38 = vld [vmem:[#allocation2 + $0x38] sm:$0xff] }
 0x55f   : > { %v5486_v40 = vld [vmem:[#allocation2 + $0x32] sm:$0xff]  ;;  %v5487_v54 = vld [vmem:[#allocation2 + $0x3a] sm:$0xff]  ;;  %v12079_v61 = vadd.f32 %v4928_v20, %v13537_v45  ;;  %v4931_v41 = vadd.f32 %v11895_v7, %v4770_v13  ;;  %v5422_v16 = vpack.c.bf16 %v5391_v38, %v5390_v26 }
 0x560   : > { %v5518_v27 = vpack.c.bf16 %v5487_v54, %v5486_v40  ;;  %v5439_v24 = vld [vmem:[#allocation2 + $0x39] sm:$0xff]  ;;  %v5438_v0 = vld [vmem:[#allocation2 + $0x31] sm:$0xff] }
 0x561   : > { %5074 = vst.msk [vmem:[#allocation2 + $0x49] sm:$0xff] %vm170_vm0, %v12079_v61  ;;  %v12085_v4 = vadd.f32 %v4931_v41, %v13538_v57  ;;  %5742 = vrot.lane.b32.xlu0 %v5422_v16, %s9677_s17  ;;  %v5470_v29 = vpack.c.bf16 %v5439_v24, %v5438_v0  ;;  %v13540_v13 = vld [vmem:[#allocation37_spill] sm:$0xff] }
 0x562   : > { %5648 = vrot.lane.b32.xlu1 %v5422_v16, %s9679_s20  ;;  %9403 = vmatprep.mubr.msk.bf16.mxu1 %vm170_vm0, %v5518_v27 }
 0x563   : > { %5075 = vst.msk [vmem:[#allocation2 + $0x51] sm:$0xff] %vm170_vm0, %v12085_v4  ;;  %v8935_v7 = vpop.f32.mrb[100].mxu1 }
 0x564   : > { %v8936_v39 = vpop.f32.mrb[101].mxu1  ;;  %v12103_v17 = vpop.f32.mrb[132].mxu0 }
 0x565   : > { %v8937_v14 = vadd.f32 %v8936_v39, %v8935_v7  ;;  %5790 = vrot.lane.b32.xlu0 %v5470_v29, %s9679_s20  ;;  %v8938_v9 = vpop.f32.mrb[102].mxu1  ;;  %v12105_v20 = vpop.f32.mrb[133].mxu0 }
 0x566   : > { %5554 = vrot.lane.b32.xlu1 %v5470_v29, %s9678_s19  ;;  %v8939_v36 = vpop.f32.mrb[103].mxu1  ;;  %v12117_v54 = vpop.f32.mrb[134].mxu0 }
 0x567   : > { %v4775_v15 = vadd.f32 %v8937_v14, %v12011_v1  ;;  %v8940_v25 = vadd.f32 %v8939_v36, %v8938_v9  ;;  %v12119_v41 = vpop.f32.mrb[135].mxu0 }
 0x568   : > { %v5392_v10 = vld [vmem:[#allocation2 + $0x48] sm:$0xff] }
 0x569   : > { %v4936_v2 = vadd.f32 %v11887_v51, %v4775_v15  ;;  %v4778_v42 = vadd.f32 %v8940_v25, %v12011_v1  ;;  %5696 = vrot.lane.b32.xlu0 %v5518_v27, %s9678_s19  ;;  %v13541_v15 = vld [vmem:[#allocation7_spill] sm:$0xff] }
 0x56a   : > { %5602 = vrot.lane.b32.xlu1 %v5518_v27, %s9677_s17  ;;  %v5393_v56 = vld [vmem:[#allocation2 + $0x50] sm:$0xff] }
 0x56b   : > { %v5488_v37 = vld [vmem:[#allocation2 + $0x4a] sm:$0xff]  ;;  %v5489_v58 = vld [vmem:[#allocation2 + $0x52] sm:$0xff]  ;;  %v12100_v8 = vadd.f32 %v4936_v2, %v13539_v32  ;;  %v4939_v33 = vadd.f32 %v11893_v19, %v4778_v42  ;;  %v5423_v3 = vpack.c.bf16 %v5393_v56, %v5392_v10 }
 0x56c   : > { %v5519_v34 = vpack.c.bf16 %v5489_v58, %v5488_v37  ;;  %v5441_v51 = vld [vmem:[#allocation2 + $0x51] sm:$0xff]  ;;  %v5440_v19 = vld [vmem:[#allocation2 + $0x49] sm:$0xff] }
 0x56d   : > { %5076 = vst.msk [vmem:[#allocation2 + $0x61] sm:$0xff] %vm170_vm0, %v12100_v8  ;;  %v12110_v26 = vadd.f32 %v4939_v33, %v13540_v13  ;;  %5744 = vrot.lane.b32.xlu0 %v5423_v3, %s9677_s17  ;;  %v5471_v40 = vpack.c.bf16 %v5441_v51, %v5440_v19 }
 0x56e   : > { %5650 = vrot.lane.b32.xlu1 %v5423_v3, %s9679_s20  ;;  %9404 = vmatmul.mubr.msk.bf16.vlgmr.msra.gmra.mrb[152].mxu1 %vm170_vm0, %v5519_v34 }
 0x56f   : > { %5077 = vst.msk [vmem:[#allocation2 + $0x69] sm:$0xff] %vm170_vm0, %v12110_v26  ;;  %v8941_v38 = vpop.f32.mrb[104].mxu1 }
 0x570   : > { %v8942_v45 = vpop.f32.mrb[105].mxu1 }
 0x571   : > { %v8943_v16 = vadd.f32 %v8942_v45, %v8941_v38  ;;  %5792 = vrot.lane.b32.xlu0 %v5471_v40, %s9679_s20  ;;  %v8944_v27 = vpop.f32.mrb[106].mxu1 }
 0x572   : > { %5556 = vrot.lane.b32.xlu1 %v5471_v40, %s9678_s19  ;;  %v8945_v24 = vpop.f32.mrb[107].mxu1 }
 0x573   : > { %v4783_v57 = vadd.f32 %v8943_v16, %v12011_v1  ;;  %v8946_v0 = vadd.f32 %v8945_v24, %v8944_v27  ;;  %v13543_v16 = vld [vmem:[#allocation9_spill] sm:$0xff] }
 0x574   : > { %v5394_v39 = vld [vmem:[#allocation2 + $0x60] sm:$0xff] }
 0x575   : > { %v4944_v7 = vadd.f32 %v11913_v28, %v4783_v57  ;;  %v4786_v29 = vadd.f32 %v8946_v0, %v12011_v1  ;;  %5698 = vrot.lane.b32.xlu0 %v5519_v34, %s9678_s19  ;;  %v13542_v28 = vld [vmem:[#allocation8_spill] sm:$0xff] }
 0x576   : > { %5604 = vrot.lane.b32.xlu1 %v5519_v34, %s9677_s17  ;;  %v5490_v14 = vld [vmem:[#allocation2 + $0x62] sm:$0xff]  ;;  %v5491_v9 = vld [vmem:[#allocation2 + $0x6a] sm:$0xff] }
 0x577   : > { %v5395_v36 = vld [vmem:[#allocation2 + $0x68] sm:$0xff]  ;;  %v12129_v25 = vadd.f32 %v4944_v7, %v13541_v15  ;;  %v4947_v2 = vadd.f32 %v11917_v53, %v4786_v29  ;;  %v5520_v42 = vpack.c.bf16 %v5491_v9, %v5490_v14 }
 0x578   : > { %v5424_v10 = vpack.c.bf16 %v5395_v36, %v5394_v39  ;;  %v5443_v56 = vld [vmem:[#allocation2 + $0x69] sm:$0xff]  ;;  %v5442_v32 = vld [vmem:[#allocation2 + $0x61] sm:$0xff] }
 0x579   : > { %5078 = vst.msk [vmem:[#allocation2 + $0x79] sm:$0xff] %vm170_vm0, %v12129_v25  ;;  %v12135_v37 = vadd.f32 %v4947_v2, %v13542_v28  ;;  %9407 = vmatprep.mubr.msk.bf16.mxu1 %vm170_vm0, %v5520_v42  ;;  %v5472_v33 = vpack.c.bf16 %v5443_v56, %v5442_v32 }
 0x57a   : > { %5746 = vrot.lane.b32.xlu0 %v5424_v10, %s9677_s17  ;;  %5652 = vrot.lane.b32.xlu1 %v5424_v10, %s9679_s20 }
 0x57b   : > { %v8947_v58 = vpop.f32.mrb[108].mxu1  ;;  %5079 = vst.msk [vmem:[#allocation2 + $0x81] sm:$0xff] %vm170_vm0, %v12135_v37 }
 0x57c   : > { %v8948_v53 = vpop.f32.mrb[109].mxu1 }
 0x57d   : > { %v8949_v3 = vadd.f32 %v8948_v53, %v8947_v58  ;;  %v8950_v34 = vpop.f32.mrb[110].mxu1 }
 0x57e   : > { %5794 = vrot.lane.b32.xlu0 %v5472_v33, %s9679_s20  ;;  %v8951_v51 = vpop.f32.mrb[111].mxu1  ;;  %5558 = vrot.lane.b32.xlu1 %v5472_v33, %s9678_s19 }
 0x57f   : > { %v4791_v13 = vadd.f32 %v8949_v3, %v12011_v1  ;;  %v8952_v19 = vadd.f32 %v8951_v51, %v8950_v34 }
 0x580   : > { %v5396_v45 = vld [vmem:[#allocation2 + $0x78] sm:$0xff] }
 0x581   : > { %v4952_v38 = vadd.f32 %v11911_v22, %v4791_v13  ;;  %v4794_v40 = vadd.f32 %v8952_v19, %v12011_v1  ;;  %v13544_v22 = vld [vmem:[#allocation10_spill] sm:$0xff]  ;;  %v13545_v13 = vld [vmem:[#allocation11_spill] sm:$0xff] }
 0x582   : > { %5700 = vrot.lane.b32.xlu0 %v5520_v42, %s9678_s19  ;;  %5606 = vrot.lane.b32.xlu1 %v5520_v42, %s9677_s17  ;;  %v5492_v57 = vld [vmem:[#allocation2 + $0x7a] sm:$0xff]  ;;  %v5493_v0 = vld [vmem:[#allocation2 + $0x82] sm:$0xff] }
 0x583   : > { %v12149_v27 = vadd.f32 %v4952_v38, %v13543_v16  ;;  %v4955_v24 = vadd.f32 %v11915_v30, %v4794_v40  ;;  %v5397_v7 = vld [vmem:[#allocation2 + $0x80] sm:$0xff]  ;;  %v5521_v29 = vpack.c.bf16 %v5493_v0, %v5492_v57 }
 0x584   : > { %v5425_v39 = vpack.c.bf16 %v5397_v7, %v5396_v45  ;;  %v5445_v9 = vld [vmem:[#allocation2 + $0x81] sm:$0xff]  ;;  %v5444_v36 = vld [vmem:[#allocation2 + $0x79] sm:$0xff] }
 0x585   : > { %5080 = vst.msk [vmem:[#allocation2 + $0x91] sm:$0xff] %vm170_vm0, %v12149_v27  ;;  %v12156_v14 = vadd.f32 %v4955_v24, %v13544_v22  ;;  %9408 = vmatmul.mubr.msk.bf16.gmra.mrb[156].mxu1 %vm170_vm0, %v5521_v29  ;;  %v5473_v2 = vpack.c.bf16 %v5445_v9, %v5444_v36 }
 0x586   : > { %5748 = vrot.lane.b32.xlu0 %v5425_v39, %s9677_s17  ;;  %5654 = vrot.lane.b32.xlu1 %v5425_v39, %s9679_s20 }
 0x587   : > { %5081 = vst.msk [vmem:[#allocation2 + $0x99] sm:$0xff] %vm170_vm0, %v12156_v14  ;;  %v8953_v30 = vpop.f32.mrb[112].mxu1 }
 0x588   : > { %v8954_v15 = vpop.f32.mrb[113].mxu1 }
 0x589   : > { %v8955_v42 = vadd.f32 %v8954_v15, %v8953_v30  ;;  %v8956_v10 = vpop.f32.mrb[114].mxu1 }
 0x58a   : > { %5796 = vrot.lane.b32.xlu0 %v5473_v2, %s9679_s20  ;;  %v8957_v56 = vpop.f32.mrb[115].mxu1  ;;  %5560 = vrot.lane.b32.xlu1 %v5473_v2, %s9678_s19 }
 0x58b   : > { %v4799_v28 = vadd.f32 %v8955_v42, %v12011_v1  ;;  %v8958_v58 = vadd.f32 %v8957_v56, %v8956_v10 }
 0x58c   : > { %v5398_v33 = vld [vmem:[#allocation2 + $0x90] sm:$0xff] }
 0x58d   : > { %v4960_v32 = vadd.f32 %v11929_v5, %v4799_v28  ;;  %v4802_v53 = vadd.f32 %v8958_v58, %v12011_v1  ;;  %v13546_v5 = vld [vmem:[#allocation12_spill] sm:$0xff]  ;;  %v5446_v57 = vld [vmem:[#allocation2 + $0x91] sm:$0xff] }
 0x58e   : > { %5702 = vrot.lane.b32.xlu0 %v5521_v29, %s9678_s19  ;;  %v5494_v3 = vld [vmem:[#allocation2 + $0x92] sm:$0xff]  ;;  %v5495_v34 = vld [vmem:[#allocation2 + $0x9a] sm:$0xff]  ;;  %5608 = vrot.lane.b32.xlu1 %v5521_v29, %s9677_s17 }
 0x58f   : > { %v5399_v51 = vld [vmem:[#allocation2 + $0x98] sm:$0xff]  ;;  %v12170_v19 = vadd.f32 %v4960_v32, %v13545_v13  ;;  %v4963_v38 = vadd.f32 %v11938_v46, %v4802_v53  ;;  %v5522_v40 = vpack.c.bf16 %v5495_v34, %v5494_v3  ;;  %v13547_v28 = vld [vmem:[#allocation13_spill] sm:$0xff] }
 0x590   : > { %v5426_v45 = vpack.c.bf16 %v5399_v51, %v5398_v33  ;;  %v5447_v24 = vld [vmem:[#allocation2 + $0x99] sm:$0xff] }
 0x591   : > { %5082 = vst.msk [vmem:[#allocation2 + $0xa9] sm:$0xff] %vm170_vm0, %v12170_v19  ;;  %v12177_v16 = vadd.f32 %v4963_v38, %v13546_v5  ;;  %9411 = vmatprep.mubr.msk.bf16.mxu1 %vm170_vm0, %v5522_v40  ;;  %v5474_v7 = vpack.c.bf16 %v5447_v24, %v5446_v57 }
 0x592   : > { %5750 = vrot.lane.b32.xlu0 %v5426_v45, %s9677_s17  ;;  %5656 = vrot.lane.b32.xlu1 %v5426_v45, %s9679_s20 }
 0x593   : > { %5083 = vst.msk [vmem:[#allocation2 + $0xb1] sm:$0xff] %vm170_vm0, %v12177_v16  ;;  %v8959_v46 = vpop.f32.mrb[116].mxu1 }
 0x594   : > { %v8960_v0 = vpop.f32.mrb[117].mxu1 }
 0x595   : > { %v8961_v29 = vadd.f32 %v8960_v0, %v8959_v46  ;;  %v8962_v39 = vpop.f32.mrb[118].mxu1 }
 0x596   : > { %5798 = vrot.lane.b32.xlu0 %v5474_v7, %s9679_s20  ;;  %v8963_v22 = vpop.f32.mrb[119].mxu1  ;;  %5562 = vrot.lane.b32.xlu1 %v5474_v7, %s9678_s19 }
 0x597   : > { %v4807_v9 = vadd.f32 %v8961_v29, %v12011_v1  ;;  %v8964_v30 = vadd.f32 %v8963_v22, %v8962_v39 }
 0x598   : > { %v5400_v2 = vld [vmem:[#allocation2 + $0xa8] sm:$0xff] }
 0x599   : > { %v4968_v36 = vadd.f32 %v11927_v23, %v4807_v9  ;;  %v4810_v15 = vadd.f32 %v8964_v30, %v12011_v1  ;;  %v13548_v23 = vld [vmem:[#allocation14_spill] sm:$0xff]  ;;  %v5448_v51 = vld [vmem:[#allocation2 + $0xa9] sm:$0xff]  ;;  %v13549_v9 = vld [vmem:[#allocation15_spill] sm:$0xff] }
 0x59a   : > { %5704 = vrot.lane.b32.xlu0 %v5522_v40, %s9678_s19  ;;  %v5496_v42 = vld [vmem:[#allocation2 + $0xaa] sm:$0xff]  ;;  %v5497_v10 = vld [vmem:[#allocation2 + $0xb2] sm:$0xff]  ;;  %5610 = vrot.lane.b32.xlu1 %v5522_v40, %s9677_s17 }
 0x59b   : > { %v5401_v56 = vld [vmem:[#allocation2 + $0xb0] sm:$0xff]  ;;  %v12191_v58 = vadd.f32 %v4968_v36, %v13547_v28  ;;  %v4971_v32 = vadd.f32 %v11933_v55, %v4810_v15  ;;  %v5523_v53 = vpack.c.bf16 %v5497_v10, %v5496_v42 }
 0x59c   : > { %v5427_v33 = vpack.c.bf16 %v5401_v56, %v5400_v2  ;;  %v5449_v34 = vld [vmem:[#allocation2 + $0xb1] sm:$0xff] }
 0x59d   : > { %5084 = vst.msk [vmem:[#allocation2 + $0xc1] sm:$0xff] %vm170_vm0, %v12191_v58  ;;  %v12198_v3 = vadd.f32 %v4971_v32, %v13548_v23  ;;  %9412 = vmatmul.mubr.msk.bf16.gmra.mrb[160].mxu1 %vm170_vm0, %v5523_v53  ;;  %v5475_v38 = vpack.c.bf16 %v5449_v34, %v5448_v51 }
 0x59e   : > { %5752 = vrot.lane.b32.xlu0 %v5427_v33, %s9677_s17  ;;  %5658 = vrot.lane.b32.xlu1 %v5427_v33, %s9679_s20 }
 0x59f   : > { %5085 = vst.msk [vmem:[#allocation2 + $0xc9] sm:$0xff] %vm170_vm0, %v12198_v3  ;;  %v8965_v55 = vpop.f32.mrb[120].mxu1 }
 0x5a0   : > { %v8966_v13 = vpop.f32.mrb[121].mxu1 }
 0x5a1   : > { %v8967_v40 = vadd.f32 %v8966_v13, %v8965_v55  ;;  %v8968_v45 = vpop.f32.mrb[122].mxu1 }
 0x5a2   : > { %5800 = vrot.lane.b32.xlu0 %v5475_v38, %s9679_s20  ;;  %v8969_v5 = vpop.f32.mrb[123].mxu1  ;;  %5564 = vrot.lane.b32.xlu1 %v5475_v38, %s9678_s19 }
 0x5a3   : > { %v4815_v24 = vadd.f32 %v8967_v40, %v12011_v1  ;;  %v8970_v46 = vadd.f32 %v8969_v5, %v8968_v45 }
 0x5a4   : > { %v5402_v7 = vld [vmem:[#allocation2 + $0xc0] sm:$0xff] }
 0x5a5   : > { %v4976_v57 = vadd.f32 %v11952_v60, %v4815_v24  ;;  %v4818_v0 = vadd.f32 %v8970_v46, %v12011_v1  ;;  %v13550_v60 = vld [vmem:[#allocation16_spill] sm:$0xff]  ;;  %v13551_v24 = vld [vmem:[#allocation17_spill] sm:$0xff] }
 0x5a6   : > { %5706 = vrot.lane.b32.xlu0 %v5523_v53, %s9678_s19  ;;  %v5498_v29 = vld [vmem:[#allocation2 + $0xc2] sm:$0xff]  ;;  %v5499_v39 = vld [vmem:[#allocation2 + $0xca] sm:$0xff]  ;;  %5612 = vrot.lane.b32.xlu1 %v5523_v53, %s9677_s17 }
 0x5a7   : > { %v5403_v22 = vld [vmem:[#allocation2 + $0xc8] sm:$0xff]  ;;  %v12212_v30 = vadd.f32 %v4976_v57, %v13549_v9  ;;  %v4979_v36 = vadd.f32 %v11957_v48, %v4818_v0  ;;  %v5524_v15 = vpack.c.bf16 %v5499_v39, %v5498_v29 }
 0x5a8   : > { %v5428_v2 = vpack.c.bf16 %v5403_v22, %v5402_v7  ;;  %v5451_v10 = vld [vmem:[#allocation2 + $0xc9] sm:$0xff]  ;;  %v5450_v56 = vld [vmem:[#allocation2 + $0xc1] sm:$0xff] }
 0x5a9   : > { %5086 = vst.msk [vmem:[#allocation2 + $0xd9] sm:$0xff] %vm170_vm0, %v12212_v30  ;;  %v12219_v42 = vadd.f32 %v4979_v36, %v13550_v60  ;;  %9415 = vmatprep.mubr.msk.bf16.mxu1 %vm170_vm0, %v5524_v15  ;;  %v5476_v32 = vpack.c.bf16 %v5451_v10, %v5450_v56  ;;  %v12258_v56 = vpop.permute.xlu1 %5550 }
 0x5aa   : > { %5754 = vrot.lane.b32.xlu0 %v5428_v2, %s9677_s17  ;;  %5660 = vrot.lane.b32.xlu1 %v5428_v2, %s9679_s20 }
 0x5ab   : > { %5087 = vst.msk [vmem:[#allocation2 + $0xe1] sm:$0xff] %vm170_vm0, %v12219_v42  ;;  %v8971_v48 = vpop.f32.mrb[124].mxu1 }
 0x5ac   : > { %v8972_v28 = vpop.f32.mrb[125].mxu1 }
 0x5ad   : > { %v8973_v53 = vadd.f32 %v8972_v28, %v8971_v48  ;;  %v8974_v33 = vpop.f32.mrb[126].mxu1 }
 0x5ae   : > { %5802 = vrot.lane.b32.xlu0 %v5476_v32, %s9679_s20  ;;  %v8975_v23 = vpop.f32.mrb[127].mxu1  ;;  %5566 = vrot.lane.b32.xlu1 %v5476_v32, %s9678_s19 }
 0x5af   : > { %v4823_v34 = vadd.f32 %v8973_v53, %v12011_v1  ;;  %v8976_v55 = vadd.f32 %v8975_v23, %v8974_v33 }
 0x5b0   : > { %v5404_v38 = vld [vmem:[#allocation2 + $0xd8] sm:$0xff] }
 0x5b1   : > { %v4984_v51 = vadd.f32 %v11949_v59, %v4823_v34  ;;  %v4826_v13 = vadd.f32 %v8976_v55, %v12011_v1  ;;  %v13552_v59 = vld [vmem:[#allocation18_spill] sm:$0xff] }
 0x5b2   : > { %5708 = vrot.lane.b32.xlu0 %v5524_v15, %s9678_s19  ;;  %v5500_v40 = vld [vmem:[#allocation2 + $0xda] sm:$0xff]  ;;  %v5501_v45 = vld [vmem:[#allocation2 + $0xe2] sm:$0xff]  ;;  %5614 = vrot.lane.b32.xlu1 %v5524_v15, %s9677_s17 }
 0x5b3   : > { %v5405_v5 = vld [vmem:[#allocation2 + $0xe0] sm:$0xff]  ;;  %v12233_v46 = vadd.f32 %v4984_v51, %v13551_v24  ;;  %v4987_v57 = vadd.f32 %v11955_v43, %v4826_v13  ;;  %v5525_v0 = vpack.c.bf16 %v5501_v45, %v5500_v40  ;;  %v13554_v45 = vld [vmem:[#allocation20_spill] sm:$0xff]  ;;  %v5599_v24 = vpop.permute.xlu1 %5598 }
 0x5b4   : > { %v12237_v7 = vpack.c.bf16 %v5405_v5, %v5404_v38  ;;  %v5453_v39 = vld [vmem:[#allocation2 + $0xe1] sm:$0xff]  ;;  %v5452_v43 = vld [vmem:[#allocation2 + $0xd9] sm:$0xff] }
 0x5b5   : > { %5088 = vst.msk [vmem:[#allocation2 + $0xf1] sm:$0xff] %vm170_vm0, %v12233_v46  ;;  %v12242_v29 = vadd.f32 %v4987_v57, %v13552_v59  ;;  %9416 = vmatmul.mubr.msk.bf16.gmra.mrb[164].mxu1 %vm170_vm0, %v5525_v0  ;;  %v12251_v9 = vpack.c.bf16 %v5453_v39, %v5452_v43  ;;  %v13553_v13 = vld [vmem:[#allocation19_spill] sm:$0xff] }
 0x5b6   : > { %5756 = vrot.lane.b32.xlu0 %v12237_v7, %s9677_s17  ;;  %5662 = vrot.lane.b32.xlu1 %v12237_v7, %s9679_s20 }
 0x5b7   : > { %5089 = vst.msk [vmem:[#allocation2 + $0xf9] sm:$0xff] %vm170_vm0, %v12242_v29  ;;  %v8977_v22 = vpop.f32.mrb[128].mxu1 }
 0x5b8   : > { %v8978_v36 = vpop.f32.mrb[129].mxu1 }
 0x5b9   : > { %v8979_v15 = vadd.f32 %v8978_v36, %v8977_v22  ;;  %v8980_v2 = vpop.f32.mrb[130].mxu1 }
 0x5ba   : > { %5804 = vrot.lane.b32.xlu0 %v12251_v9, %s9679_s20  ;;  %5568 = vrot.lane.b32.xlu1 %v12251_v9, %s9678_s19  ;;  %v8981_v60 = vpop.f32.mrb[131].mxu1 }
 0x5bb   : > { %v4831_v10 = vadd.f32 %v8979_v15, %v12011_v1  ;;  %v8982_v48 = vadd.f32 %v8981_v60, %v8980_v2  ;;  %v12291_v60 = vpop.permute.xlu0 %5772 }
 0x5bc   : > { %v5406_v28 = vld [vmem:[#allocation2 + $0xf0] sm:$0xff] }
 0x5bd   : > { %v4992_v32 = vadd.f32 %v11976_v21, %v4831_v10  ;;  %v4834_v53 = vadd.f32 %v8982_v48, %v12011_v1  ;;  %v5454_v57 = vld [vmem:[#allocation2 + $0xf1] sm:$0xff] }
 0x5be   : > { %5710 = vrot.lane.b32.xlu0 %v5525_v0, %s9678_s19  ;;  %v5502_v33 = vld [vmem:[#allocation2 + $0xf2] sm:$0xff]  ;;  %v5503_v23 = vld [vmem:[#allocation2 + $0xfa] sm:$0xff]  ;;  %5616 = vrot.lane.b32.xlu1 %v5525_v0, %s9677_s17 }
 0x5bf   : > { %v5407_v34 = vld [vmem:[#allocation2 + $0xf8] sm:$0xff]  ;;  %v5526_v55 = vpack.c.bf16 %v5503_v23, %v5502_v33  ;;  %v12267_v38 = vadd.f32 %v4992_v32, %v13553_v13  ;;  %v4995_v40 = vadd.f32 %v11980_v31, %v4834_v53  ;;  %v13556_v23 = vld [vmem:[#allocation21_spill] sm:$0xff] }
 0x5c0   : > { %v12264_v51 = vpack.c.bf16 %v5407_v34, %v5406_v28  ;;  %v5455_v21 = vld [vmem:[#allocation2 + $0xf9] sm:$0xff] }
 0x5c1   : > { %9419 = vmatprep.mubr.msk.bf16.mxu1 %vm170_vm0, %v5526_v55  ;;  %5090 = vst.msk [vmem:[#allocation2 + $0x109] sm:$0xff] %vm170_vm0, %v12267_v38  ;;  %v12274_v5 = vadd.f32 %v4995_v40, %v13554_v45  ;;  %v12282_v0 = vpack.c.bf16 %v5455_v21, %v5454_v57  ;;  %v5103_v57 = vld [vmem:[#allocation2 + $0x8] sm:$0xff] }
 0x5c2   : > { %5758 = vrot.lane.b32.xlu0 %v12264_v51, %s9677_s17  ;;  %5664 = vrot.lane.b32.xlu1 %v12264_v51, %s9679_s20 }
 0x5c3   : > { %13555 = vst [vmem:[#allocation39_spill] sm:$0xff] %v12274_v5  ;;  %5091 = vst.msk [vmem:[#allocation2 + $0x111] sm:$0xff] %vm170_vm0, %v12274_v5  ;;  %v8983_v31 = vpop.f32.mrb[132].mxu1 }
 0x5c4   : > { %v8984_v59 = vpop.f32.mrb[133].mxu1 }
 0x5c5   : > { %v8985_v39 = vadd.f32 %v8984_v59, %v8983_v31  ;;  %v8986_v43 = vpop.f32.mrb[134].mxu1 }
 0x5c6   : > { %5806 = vrot.lane.b32.xlu0 %v12282_v0, %s9679_s20  ;;  %5570 = vrot.lane.b32.xlu1 %v12282_v0, %s9678_s19  ;;  %v8987_v22 = vpop.f32.mrb[135].mxu1 }
 0x5c7   : > { %v4839_v36 = vadd.f32 %v8985_v39, %v12011_v1  ;;  %v8988_v15 = vadd.f32 %v8987_v22, %v8986_v43 }
 0x5c8   : > { %v12289_v2 = vpop.permute.xlu1 %5646  ;;  %v5408_v28 = vld [vmem:[#allocation2 + $0x108] sm:$0xff] }
 0x5c9   : > { %v5000_v10 = vadd.f32 %v11974_v35, %v4839_v36  ;;  %v4842_v48 = vadd.f32 %v8988_v15, %v12011_v1  ;;  %v5102_v35 = vld [vmem:[#allocation2] sm:$0xff]  ;;  %v5456_v39 = vld [vmem:[#allocation2 + $0x109] sm:$0xff] }
 0x5ca   : > { %5712 = vrot.lane.b32.xlu0 %v5526_v55, %s9678_s19  ;;  %5618 = vrot.lane.b32.xlu1 %v5526_v55, %s9677_s17  ;;  %v5504_v32 = vld [vmem:[#allocation2 + $0x10a] sm:$0xff]  ;;  %v5505_v53 = vld [vmem:[#allocation2 + $0x112] sm:$0xff]  ;;  %v5134_v43 = vpack.c.bf16 %v5103_v57, %v5102_v35 }
 0x5cb   : > { %v5409_v33 = vld [vmem:[#allocation2 + $0x110] sm:$0xff]  ;;  %v12298_v34 = vadd.f32 %v5000_v10, %v13556_v23  ;;  %v5003_v13 = vadd.f32 %v11978_v12, %v4842_v48  ;;  %v5527_v21 = vpack.c.bf16 %v5505_v53, %v5504_v32  ;;  %v13558_v55 = vld [vmem:[#allocation22_spill] sm:$0xff]  ;;  %v5695_v12 = vpop.permute.xlu0 %5694 }
 0x5cc   : > { %v12301_v40 = vpop.permute.xlu1 %5552  ;;  %v12303_v45 = vpack.c.bf16 %v5409_v33, %v5408_v28  ;;  %v5457_v31 = vld [vmem:[#allocation2 + $0x111] sm:$0xff]  ;;  %v5824_v53 = vsel %vm170_vm0, %v5134_v43, %v12258_v56  ;;  %v5952_v57 = vsel %vm170_vm0, %v12064_v18, %v5695_v12 }
 0x5cd   : > { %13557 = vst [vmem:[#allocation42_spill] sm:$0xff] %v12298_v34  ;;  %5092 = vst.msk [vmem:[#allocation2 + $0x121] sm:$0xff] %vm170_vm0, %v12298_v34  ;;  %v12308_v59 = vadd.f32 %v5003_v13, %v13558_v55  ;;  %9420 = vmatmul.mubr.msk.bf16.gmra.mrb[168].mxu1 %vm170_vm0, %v5527_v21  ;;  %v12319_v15 = vpack.c.bf16 %v5457_v31, %v5456_v39 }
 0x5ce   : > { %5760 = vrot.lane.b32.xlu0 %v12303_v45, %s9677_s17  ;;  %5666 = vrot.lane.b32.xlu1 %v12303_v45, %s9679_s20 }
 0x5cf   : > { %13559 = vst [vmem:[#allocation40_spill] sm:$0xff] %v12308_v59  ;;  %5093 = vst.msk [vmem:[#allocation2 + $0x129] sm:$0xff] %vm170_vm0, %v12308_v59  ;;  %v8989_v36 = vpop.f32.mrb[136].mxu1 }
 0x5d0   : > { %v12317_v22 = vpop.permute.xlu1 %5600  ;;  %v8990_v10 = vpop.f32.mrb[137].mxu1 }
 0x5d1   : > { %v8991_v48 = vadd.f32 %v8990_v10, %v8989_v36  ;;  %v8992_v28 = vpop.f32.mrb[138].mxu1  ;;  %v5871_v36 = vsel %vm1115_vm3, %v5824_v53, %v5599_v24 }
 0x5d2   : > { %5808 = vrot.lane.b32.xlu0 %v12319_v15, %s9679_s20  ;;  %5572 = vrot.lane.b32.xlu1 %v12319_v15, %s9678_s19  ;;  %v8993_v32 = vpop.f32.mrb[139].mxu1 }
 0x5d3   : > { %v4847_v33 = vadd.f32 %v8991_v48, %v12011_v1  ;;  %v8994_v23 = vadd.f32 %v8993_v32, %v8992_v28  ;;  %v5743_v13 = vpop.permute.xlu0 %5742  ;;  %v13560_v28 = vld [vmem:[#allocation23_spill] sm:$0xff] }
 0x5d4   : > { %v12328_v35 = vpop.permute.xlu1 %5648  ;;  %v5410_v39 = vld [vmem:[#allocation2 + $0x120] sm:$0xff]  ;;  %v5999_v56 = vsel %vm1115_vm3, %v5952_v57, %v5743_v13 }
 0x5d5   : > { %v5008_v31 = vadd.f32 %v11990_v6, %v4847_v33  ;;  %v4850_v55 = vadd.f32 %v8994_v23, %v12011_v1 }
 0x5d6   : > { %5714 = vrot.lane.b32.xlu0 %v5527_v21, %s9678_s19  ;;  %5620 = vrot.lane.b32.xlu1 %v5527_v21, %s9677_s17  ;;  %v5506_v43 = vld [vmem:[#allocation2 + $0x122] sm:$0xff]  ;;  %v5507_v10 = vld [vmem:[#allocation2 + $0x12a] sm:$0xff] }
 0x5d7   : > { %v5411_v48 = vld [vmem:[#allocation2 + $0x128] sm:$0xff]  ;;  %v12339_v32 = vadd.f32 %v5008_v31, %v13560_v28  ;;  %v5011_v18 = vadd.f32 %v11997_v52, %v4850_v55  ;;  %v5791_v6 = vpop.permute.xlu0 %5790  ;;  %v5528_v33 = vpack.c.bf16 %v5507_v10, %v5506_v43  ;;  %v5903_v52 = vsel %vm1148_vm4, %v5871_v36, %v12289_v2  ;;  %v5297_v43 = vld [vmem:[#allocation2 + $0x39] sm:$0xff] }
 0x5d8   : > { %v12342_v12 = vpop.permute.xlu1 %5554  ;;  %v12344_v23 = vpack.c.bf16 %v5411_v48, %v5410_v39  ;;  %v6031_v24 = vsel %vm1148_vm4, %v5999_v56, %v5791_v6  ;;  %v13562_v21 = vld [vmem:[#allocation24_spill] sm:$0xff]  ;;  %v5296_v48 = vld [vmem:[#allocation2 + $0x31] sm:$0xff] }
 0x5d9   : > { %13561 = vst [vmem:[#allocation41_spill] sm:$0xff] %v12339_v32  ;;  %5094 = vst.msk [vmem:[#allocation2 + $0x139] sm:$0xff] %vm170_vm0, %v12339_v32  ;;  %v12350_v53 = vadd.f32 %v5011_v18, %v13562_v21  ;;  %6311 = vmatprep.mubr.bf16.mxu0 %v6031_v24  ;;  %9423 = vmatprep.mubr.msk.bf16.mxu1 %vm170_vm0, %v5528_v33  ;;  %v5459_v13 = vld [vmem:[#allocation2 + $0x129] sm:$0xff]  ;;  %v5458_v55 = vld [vmem:[#allocation2 + $0x121] sm:$0xff]  ;;  %v5327_v6 = vpack.c.bf16 %v5297_v43, %v5296_v48 }
 0x5da   : > { %5762 = vrot.lane.b32.xlu0 %v12344_v23, %s9677_s17  ;;  %5668 = vrot.lane.b32.xlu1 %v12344_v23, %s9679_s20  ;;  %v12363_v56 = vpack.c.bf16 %v5459_v13, %v5458_v55 }
 0x5db   : > { %13563 = vst [vmem:[#allocation32_spill] sm:$0xff] %v12350_v53  ;;  %5095 = vst.msk [vmem:[#allocation2 + $0x141] sm:$0xff] %vm170_vm0, %v12350_v53  ;;  %6312 = vmatmul.mubr.bf16.vlgmr.msra.gmra.mrb[136].mxu0 %v5903_v52  ;;  %v5697_v57 = vpop.permute.xlu0 %5696  ;;  %v8995_v39 = vpop.f32.mrb[140].mxu1 }
 0x5dc   : > { %v12361_v31 = vpop.permute.xlu1 %5602  ;;  %v8996_v10 = vpop.f32.mrb[141].mxu1  ;;  %v5955_v55 = vsel %vm170_vm0, %v5327_v6, %v5697_v57  ;;  %v5827_v57 = vsel %vm170_vm0, %v12052_v11, %v12301_v40  ;;  %v13566_v11 = vld [vmem:[#allocation26_spill] sm:$0xff] }
 0x5dd   : > { %v8997_v2 = vadd.f32 %v8996_v10, %v8995_v39  ;;  %v8998_v36 = vpop.f32.mrb[142].mxu1 }
 0x5de   : > { %5810 = vrot.lane.b32.xlu0 %v12363_v56, %s9679_s20  ;;  %5574 = vrot.lane.b32.xlu1 %v12363_v56, %s9678_s19  ;;  %v8999_v28 = vpop.f32.mrb[143].mxu1 }
 0x5df   : > { %v5745_v18 = vpop.permute.xlu0 %5744  ;;  %v4855_v24 = vadd.f32 %v8997_v2, %v12011_v1  ;;  %v9000_v21 = vadd.f32 %v8999_v28, %v8998_v36 }
 0x5e0   : > { %v12370_v52 = vpop.permute.xlu1 %5650  ;;  %v5412_v13 = vld [vmem:[#allocation2 + $0x138] sm:$0xff]  ;;  %v6001_v43 = vsel %vm1115_vm3, %v5955_v55, %v5745_v18  ;;  %v5873_v18 = vsel %vm1115_vm3, %v5827_v57, %v12317_v22  ;;  %v5298_v57 = vld [vmem:[#allocation2 + $0x49] sm:$0xff] }
 0x5e1   : > { %v5016_v39 = vadd.f32 %v11988_v63, %v4855_v24  ;;  %v4858_v10 = vadd.f32 %v9000_v21, %v12011_v1  ;;  %v13564_v63 = vld [vmem:[#allocation25_spill] sm:$0xff] }
 0x5e2   : > { %5716 = vrot.lane.b32.xlu0 %v5528_v33, %s9678_s19  ;;  %5622 = vrot.lane.b32.xlu1 %v5528_v33, %s9677_s17  ;;  %v5508_v53 = vld [vmem:[#allocation2 + $0x13a] sm:$0xff]  ;;  %v5509_v32 = vld [vmem:[#allocation2 + $0x142] sm:$0xff] }
 0x5e3   : > { %v5413_v59 = vld [vmem:[#allocation2 + $0x140] sm:$0xff]  ;;  %v5793_v2 = vpop.permute.xlu0 %5792  ;;  %v5529_v36 = vpack.c.bf16 %v5509_v32, %v5508_v53  ;;  %v12384_v28 = vadd.f32 %v5016_v39, %v13564_v63  ;;  %v5019_v6 = vadd.f32 %v11992_v49, %v4858_v10  ;;  %v5906_v49 = vsel %vm1148_vm4, %v5873_v18, %v12328_v35  ;;  %v5299_v39 = vld [vmem:[#allocation2 + $0x51] sm:$0xff] }
 0x5e4   : > { %v12378_v48 = vpack.c.bf16 %v5413_v59, %v5412_v13  ;;  %v12387_v24 = vpop.permute.xlu1 %5556  ;;  %v6034_v33 = vsel %vm1148_vm4, %v6001_v43, %v5793_v2  ;;  %v5461_v59 = vld [vmem:[#allocation2 + $0x141] sm:$0xff]  ;;  %v5460_v53 = vld [vmem:[#allocation2 + $0x139] sm:$0xff]  ;;  %v5328_v18 = vpack.c.bf16 %v5299_v39, %v5298_v57 }
 0x5e5   : > { %13565 = vst [vmem:[#allocation34_spill] sm:$0xff] %v12384_v28  ;;  %6319 = vmatprep.mubr.bf16.mxu0 %v6034_v33  ;;  %9424 = vmatmul.mubr.msk.bf16.gmra.mrb[172].mxu1 %vm170_vm0, %v5529_v36  ;;  %5096 = vst.msk [vmem:[#allocation2 + $0x151] sm:$0xff] %vm170_vm0, %v12384_v28  ;;  %v12396_v40 = vadd.f32 %v5019_v6, %v13566_v11  ;;  %v12408_v55 = vpack.c.bf16 %v5461_v59, %v5460_v53  ;;  %v5107_v2 = vld [vmem:[#allocation2 + $0x38] sm:$0xff]  ;;  %v5106_v59 = vld [vmem:[#allocation2 + $0x30] sm:$0xff] }
 0x5e6   : > { %5764 = vrot.lane.b32.xlu0 %v12378_v48, %s9677_s17  ;;  %5670 = vrot.lane.b32.xlu1 %v12378_v48, %s9679_s20  ;;  %v5136_v53 = vpack.c.bf16 %v5107_v2, %v5106_v59  ;;  %v13568_v28 = vld [vmem:[#allocation27_spill] sm:$0xff] }
 0x5e7   : > { %13567 = vst [vmem:[#allocation31_spill] sm:$0xff] %v12396_v40  ;;  %6320 = vmatmul.mubr.bf16.gmra.mrb[140].mxu0 %v5906_v49  ;;  %v5699_v22 = vpop.permute.xlu0 %5698  ;;  %v9001_v32 = vpop.f32.mrb[144].mxu1  ;;  %5097 = vst.msk [vmem:[#allocation2 + $0x159] sm:$0xff] %vm170_vm0, %v12396_v40 }
 0x5e8   : > { %v12406_v21 = vpop.permute.xlu1 %5604  ;;  %v9002_v13 = vpop.f32.mrb[145].mxu1 }
 0x5e9   : > { %v9003_v10 = vadd.f32 %v9002_v13, %v9001_v32  ;;  %v9004_v43 = vpop.f32.mrb[146].mxu1  ;;  %v5958_v13 = vsel %vm170_vm0, %v5328_v18, %v5699_v22  ;;  %v5830_v22 = vsel %vm170_vm0, %v5136_v53, %v12342_v12 }
 0x5ea   : > { %5812 = vrot.lane.b32.xlu0 %v12408_v55, %s9679_s20  ;;  %5576 = vrot.lane.b32.xlu1 %v12408_v55, %s9678_s19  ;;  %v9005_v35 = vpop.f32.mrb[147].mxu1 }
 0x5eb   : > { %v4863_v63 = vadd.f32 %v9003_v10, %v12011_v1  ;;  %v9006_v6 = vadd.f32 %v9005_v35, %v9004_v43 }
 0x5ec   : > { %v5747_v33 = vpop.permute.xlu0 %5746  ;;  %v12415_v11 = vpop.permute.xlu1 %5652  ;;  %v5414_v40 = vld [vmem:[#allocation2 + $0x150] sm:$0xff] }
 0x5ed   : > { %v5024_v49 = vadd.f32 %v12105_v20, %v4863_v63  ;;  %v4866_v32 = vadd.f32 %v9006_v6, %v12011_v1  ;;  %v6003_v43 = vsel %vm1115_vm3, %v5958_v13, %v5747_v33  ;;  %v13570_v33 = vld [vmem:[#allocation28_spill] sm:$0xff] }
 0x5ee   : > { %5718 = vrot.lane.b32.xlu0 %v5529_v36, %s9678_s19  ;;  %5624 = vrot.lane.b32.xlu1 %v5529_v36, %s9677_s17  ;;  %v5510_v20 = vld [vmem:[#allocation2 + $0x152] sm:$0xff]  ;;  %v5511_v63 = vld [vmem:[#allocation2 + $0x15a] sm:$0xff] }
 0x5ef   : > { %v12423_v10 = vadd.f32 %v5024_v49, %v13568_v28  ;;  %v5027_v39 = vadd.f32 %v12119_v41, %v4866_v32  ;;  %v9007_v35 = vpop.f32.mrb[148].mxu1  ;;  %v5415_v6 = vld [vmem:[#allocation2 + $0x158] sm:$0xff]  ;;  %v5530_v59 = vpack.c.bf16 %v5511_v63, %v5510_v20  ;;  %v5875_v41 = vsel %vm1115_vm3, %v5830_v22, %v12361_v31  ;;  %v5301_v22 = vld [vmem:[#allocation2 + $0x69] sm:$0xff] }
 0x5f0   : > { %v5795_v57 = vpop.permute.xlu0 %5794  ;;  %v12429_v2 = vpop.permute.xlu1 %5558  ;;  %v12432_v28 = vpack.c.bf16 %v5415_v6, %v5414_v40  ;;  %v5463_v12 = vld [vmem:[#allocation2 + $0x159] sm:$0xff]  ;;  %v5909_v53 = vsel %vm1148_vm4, %v5875_v41, %v12370_v52  ;;  %v9610_v52 = vld [vmem:[%s13442_s2 + $0x2] ss:$0 sm:$0xff] }
 0x5f1   : > { %13569 = vst [vmem:[#allocation33_spill] sm:$0xff] %v12423_v10  ;;  %v9008_v18 = vpop.f32.mrb[149].mxu1  ;;  %v6037_v36 = vsel %vm1148_vm4, %v6003_v43, %v5795_v57  ;;  %5098 = vst.msk [vmem:[#allocation2 + $0x169] sm:$0xff] %vm170_vm0, %v12423_v10  ;;  %v12439_v49 = vadd.f32 %v5027_v39, %v13570_v33  ;;  %9427 = vmatprep.mubr.msk.bf16.mxu1 %vm170_vm0, %v5530_v59  ;;  %v5300_v33 = vld [vmem:[#allocation2 + $0x61] sm:$0xff] }
 0x5f2   : > { %v9009_v32 = vadd.f32 %v9008_v18, %v9007_v35  ;;  %v9010_v13 = vpop.f32.mrb[150].mxu1  ;;  %6327 = vmatprep.mubr.bf16.mxu0 %v6037_v36  ;;  %5766 = vrot.lane.b32.xlu0 %v12432_v28, %s9677_s17  ;;  %v5462_v35 = vld [vmem:[#allocation2 + $0x151] sm:$0xff] }
 0x5f3   : > { %13571 = vst [vmem:[#allocation36_spill] sm:$0xff] %v12439_v49  ;;  %v9011_v40 = vpop.f32.mrb[151].mxu1  ;;  %5099 = vst.msk [vmem:[#allocation2 + $0x171] sm:$0xff] %vm170_vm0, %v12439_v49  ;;  %5672 = vrot.lane.b32.xlu1 %v12432_v28, %s9679_s20  ;;  %6328 = vmatmul.mubr.bf16.gmra.mrb[144].mxu0 %v5909_v53  ;;  %v12453_v20 = vpack.c.bf16 %v5463_v12, %v5462_v35  ;;  %v13572_v18 = vld [vmem:[#allocation29_spill] sm:$0xff]  ;;  %v13574_v53 = vld [vmem:[#allocation30_spill] sm:$0xff] }
 0x5f4   : > { %v4871_v31 = vadd.f32 %v9009_v32, %v12011_v1  ;;  %v9012_v39 = vadd.f32 %v9011_v40, %v9010_v13  ;;  %v5701_v43 = vpop.permute.xlu0 %5700  ;;  %v12451_v57 = vpop.permute.xlu1 %5606  ;;  %v5109_v1 = vld [vmem:[#allocation2 + $0x50] sm:$0xff]  ;;  %v5108_v32 = vld [vmem:[#allocation2 + $0x48] sm:$0xff]  ;;  %v5329_v13 = vpack.c.bf16 %v5301_v22, %v5300_v33 }
 0x5f5   : > { %v5137_v40 = vpack.c.bf16 %v5109_v1, %v5108_v32 }
 0x5f6   : > { %v5032_v63 = vadd.f32 %v12103_v17, %v4871_v31  ;;  %v4874_v6 = vadd.f32 %v9610_v52, %v9012_v39  ;;  %5814 = vrot.lane.b32.xlu0 %v12453_v20, %s9679_s20  ;;  %v5961_v35 = vsel %vm170_vm0, %v5329_v13, %v5701_v43 }
 0x5f7   : > { %5578 = vrot.lane.b32.xlu1 %v12453_v20, %s9678_s19 }
 0x5f8   : > { %v12462_v36 = vadd.f32 %v5032_v63, %v13572_v18  ;;  %v5035_v41 = vadd.f32 %v12117_v54, %v4874_v6  ;;  %v5749_v17 = vpop.permute.xlu0 %5748  ;;  %v12467_v12 = vpop.permute.xlu1 %5654  ;;  %v5416_v39 = vld [vmem:[#allocation2 + $0x168] sm:$0xff]  ;;  %v5833_v6 = vsel %vm170_vm0, %v5137_v40, %v12387_v24 }
 0x5f9   : > { %v6005_v22 = vsel %vm1115_vm3, %v5961_v35, %v5749_v17  ;;  %v5877_v43 = vsel %vm1115_vm3, %v5833_v6, %v12406_v21  ;;  %v5464_v21 = vld [vmem:[#allocation2 + $0x169] sm:$0xff]  ;;  %v5516_v6 = vld [vmem:[#allocation2 + $0x19a] sm:$0xff] }
 0x5fa   : > { %13573 = vst [vmem:[#allocation38_spill] sm:$0xff] %v12462_v36  ;;  %5100 = vst.msk [vmem:[#allocation2 + $0x181] sm:$0xff] %vm170_vm0, %v12462_v36  ;;  %v12472_v31 = vadd.f32 %v5035_v41, %v13574_v53  ;;  %5720 = vrot.lane.b32.xlu0 %v5530_v59, %s9678_s19  ;;  %v5512_v54 = vld [vmem:[#allocation2 + $0x16a] sm:$0xff]  ;;  %v5513_v63 = vld [vmem:[#allocation2 + $0x172] sm:$0xff]  ;;  %v5912_v24 = vsel %vm1148_vm4, %v5877_v43, %v12415_v11 }
 0x5fb   : > { %v5417_v52 = vld [vmem:[#allocation2 + $0x170] sm:$0xff]  ;;  %5626 = vrot.lane.b32.xlu1 %v5530_v59, %s9677_s17  ;;  %v5531_v18 = vpack.c.bf16 %v5513_v63, %v5512_v54  ;;  %v5303_v53 = vld [vmem:[#allocation2 + $0x81] sm:$0xff]  ;;  %v5302_v54 = vld [vmem:[#allocation2 + $0x79] sm:$0xff] }
 0x5fc   : > { %13575 = vst [vmem:[#allocation35_spill] sm:$0xff] %v12472_v31  ;;  %5101 = vst.msk [vmem:[#allocation2 + $0x189] sm:$0xff] %vm170_vm0, %v12472_v31  ;;  %v5797_v1 = vpop.permute.xlu0 %5796  ;;  %v12482_v41 = vpack.c.bf16 %v5417_v52, %v5416_v39  ;;  %v12486_v33 = vpop.permute.xlu1 %5560  ;;  %v5465_v17 = vld [vmem:[#allocation2 + $0x171] sm:$0xff]  ;;  %v5111_v39 = vld [vmem:[#allocation2 + $0x68] sm:$0xff]  ;;  %v5330_v43 = vpack.c.bf16 %v5303_v53, %v5302_v54 }
 0x5fd   : > { %v6040_v32 = vsel %vm1148_vm4, %v6005_v22, %v5797_v1  ;;  %9428 = vmatmul.mubr.msk.bf16.gmra.mrb[176].mxu1 %vm170_vm0, %v5531_v18  ;;  %v12496_v40 = vpack.c.bf16 %v5465_v17, %v5464_v21  ;;  %v5517_v22 = vld [vmem:[#allocation2 + $0x1a2] sm:$0xff] }
 0x5fe   : > { %6335 = vmatprep.mubr.bf16.mxu0 %v6040_v32  ;;  %5768 = vrot.lane.b32.xlu0 %v12482_v41, %s9677_s17  ;;  %v5110_v1 = vld [vmem:[#allocation2 + $0x60] sm:$0xff] }
 0x5ff   : > { %6336 = vmatmul.mubr.bf16.gmra.mrb[148].mxu0 %v5912_v24  ;;  %5674 = vrot.lane.b32.xlu1 %v12482_v41, %s9679_s20  ;;  %v5533_v24 = vpack.c.bf16 %v5517_v22, %v5516_v6  ;;  %v5138_v17 = vpack.c.bf16 %v5111_v39, %v5110_v1 }
 0x600   : > { %v5703_v59 = vpop.permute.xlu0 %5702  ;;  %v5609_v13 = vpop.permute.xlu1 %5608 }
 0x601   : > { %v5964_v31 = vsel %vm170_vm0, %v5330_v43, %v5703_v59  ;;  %v5836_v36 = vsel %vm170_vm0, %v5138_v17, %v12429_v2  ;;  %v5304_v43 = vld [vmem:[#allocation2 + $0x91] sm:$0xff]  ;;  %v5468_v17 = vld [vmem:[#allocation2 + $0x199] sm:$0xff] }
 0x602   : > { %5816 = vrot.lane.b32.xlu0 %v12496_v40, %s9679_s20  ;;  %v5879_v39 = vsel %vm1115_vm3, %v5836_v36, %v12451_v57  ;;  %v5305_v57 = vld [vmem:[#allocation2 + $0x99] sm:$0xff] }
 0x603   : > { %v5514_v35 = vld [vmem:[#allocation2 + $0x182] sm:$0xff]  ;;  %v5515_v11 = vld [vmem:[#allocation2 + $0x18a] sm:$0xff]  ;;  %5580 = vrot.lane.b32.xlu1 %v12496_v40, %s9678_s19  ;;  %v5915_v22 = vsel %vm1148_vm4, %v5879_v39, %v12467_v12 }
 0x604   : > { %v5751_v63 = vpop.permute.xlu0 %5750  ;;  %v5532_v52 = vpack.c.bf16 %v5515_v11, %v5514_v35  ;;  %v5657_v32 = vpop.permute.xlu1 %5656  ;;  %v5419_v21 = vld [vmem:[#allocation2 + $0x188] sm:$0xff]  ;;  %v5418_v11 = vld [vmem:[#allocation2 + $0x180] sm:$0xff] }
 0x605   : > { %v6007_v35 = vsel %vm1115_vm3, %v5964_v31, %v5751_v63  ;;  %v5436_v6 = vpack.c.bf16 %v5419_v21, %v5418_v11  ;;  %v5467_v1 = vld [vmem:[#allocation2 + $0x189] sm:$0xff]  ;;  %v5466_v31 = vld [vmem:[#allocation2 + $0x181] sm:$0xff]  ;;  %v5112_v21 = vld [vmem:[#allocation2 + $0x78] sm:$0xff] }
 0x606   : > { %9431 = vmatprep.mubr.msk.bf16.mxu1 %vm170_vm0, %v5532_v52  ;;  %5722 = vrot.lane.b32.xlu0 %v5531_v18, %s9678_s19  ;;  %v12517_v63 = vpack.c.bf16 %v5467_v1, %v5466_v31  ;;  %v5113_v36 = vld [vmem:[#allocation2 + $0x80] sm:$0xff] }
 0x607   : > { %9432 = vmatmul.mubr.msk.bf16.gmra.mrb[180].mxu1 %vm170_vm0, %v5533_v24  ;;  %5628 = vrot.lane.b32.xlu1 %v5531_v18, %s9677_s17  ;;  %v5469_v12 = vld [vmem:[#allocation2 + $0x1a1] sm:$0xff]  ;;  %v5139_v11 = vpack.c.bf16 %v5113_v36, %v5112_v21  ;;  %v5307_v36 = vld [vmem:[#allocation2 + $0xb1] sm:$0xff] }
 0x608   : > { %v5799_v53 = vpop.permute.xlu0 %5798  ;;  %v5563_v54 = vpop.permute.xlu1 %5562 }
 0x609   : > { %v6043_v59 = vsel %vm1148_vm4, %v6007_v35, %v5799_v53  ;;  %v5331_v35 = vpack.c.bf16 %v5305_v57, %v5304_v43  ;;  %v5115_v43 = vld [vmem:[#allocation2 + $0x98] sm:$0xff] }
 0x60a   : > { %6343 = vmatprep.mubr.bf16.mxu0 %v6043_v59  ;;  %5770 = vrot.lane.b32.xlu0 %v5436_v6, %s9677_s17  ;;  %v5839_v59 = vsel %vm170_vm0, %v5139_v11, %v12486_v33 }
 0x60b   : > { %6344 = vmatmul.mubr.bf16.gmra.mrb[152].mxu0 %v5915_v22  ;;  %5676 = vrot.lane.b32.xlu1 %v5436_v6, %s9679_s20  ;;  %v5485_v6 = vpack.c.bf16 %v5469_v12, %v5468_v17  ;;  %v5881_v31 = vsel %vm1115_vm3, %v5839_v59, %v5609_v13  ;;  %v5306_v17 = vld [vmem:[#allocation2 + $0xa9] sm:$0xff] }
 0x60c   : > { %v5705_v2 = vpop.permute.xlu0 %5704  ;;  %v5611_v18 = vpop.permute.xlu1 %5610  ;;  %v5918_v57 = vsel %vm1148_vm4, %v5881_v31, %v5657_v32  ;;  %v5114_v12 = vld [vmem:[#allocation2 + $0x90] sm:$0xff] }
 0x60d   : > { %v5967_v39 = vsel %vm170_vm0, %v5331_v35, %v5705_v2  ;;  %v5140_v35 = vpack.c.bf16 %v5115_v43, %v5114_v12  ;;  %v5308_v43 = vld [vmem:[#allocation2 + $0xc1] sm:$0xff] }
 0x60e   : > { %5818 = vrot.lane.b32.xlu0 %v12517_v63, %s9679_s20 }
 0x60f   : > { %v5842_v11 = vsel %vm170_vm0, %v5140_v35, %v5563_v54 }
 0x610   : > { %v5753_v24 = vpop.permute.xlu0 %5752  ;;  %v5659_v53 = vpop.permute.xlu1 %5658 }
 0x611   : > { %v6009_v22 = vsel %vm1115_vm3, %v5967_v39, %v5753_v24  ;;  %v5332_v24 = vpack.c.bf16 %v5307_v36, %v5306_v17  ;;  %v5883_v39 = vsel %vm1115_vm3, %v5842_v11, %v5611_v18  ;;  %v5117_v36 = vld [vmem:[#allocation2 + $0xb0] sm:$0xff]  ;;  %v5116_v17 = vld [vmem:[#allocation2 + $0xa8] sm:$0xff] }
 0x612   : > { %5724 = vrot.lane.b32.xlu0 %v5532_v52, %s9678_s19 }
 0x614   : > { %v5801_v1 = vpop.permute.xlu0 %5800  ;;  %v5565_v49 = vpop.permute.xlu1 %5564 }
 0x615   : > { %v6046_v10 = vsel %vm1148_vm4, %v6009_v22, %v5801_v1  ;;  %v5921_v22 = vsel %vm1148_vm4, %v5883_v39, %v5659_v53 }
 0x616   : > { %6351 = vmatprep.mubr.bf16.mxu0 %v6046_v10  ;;  %5820 = vrot.lane.b32.xlu0 %v5485_v6, %s9679_s20 }
 0x617   : > { %6352 = vmatmul.mubr.bf16.gmra.mrb[156].mxu0 %v5918_v57  ;;  %v5309_v57 = vld [vmem:[#allocation2 + $0xc9] sm:$0xff] }
 0x618   : > { %v5707_v2 = vpop.permute.xlu0 %5706  ;;  %v5613_v52 = vpop.permute.xlu1 %5612  ;;  %v5333_v54 = vpack.c.bf16 %v5309_v57, %v5308_v43 }
 0x619   : > { %v5970_v13 = vsel %vm170_vm0, %v5332_v24, %v5707_v2 }
 0x61c   : > { %v5755_v33 = vpop.permute.xlu0 %5754  ;;  %v5661_v21 = vpop.permute.xlu1 %5660 }
 0x61d   : > { %v6011_v10 = vsel %vm1115_vm3, %v5970_v13, %v5755_v33  ;;  %v5141_v33 = vpack.c.bf16 %v5117_v36, %v5116_v17  ;;  %v5118_v36 = vld [vmem:[#allocation2 + $0xc0] sm:$0xff] }
 0x61f   : > { %v5845_v18 = vsel %vm170_vm0, %v5141_v33, %v5565_v49 }
 0x620   : > { %v5803_v32 = vpop.permute.xlu0 %5802  ;;  %v5567_v6 = vpop.permute.xlu1 %5566  ;;  %v5885_v53 = vsel %vm1115_vm3, %v5845_v18, %v5613_v52 }
 0x621   : > { %v6049_v59 = vsel %vm1148_vm4, %v6011_v10, %v5803_v32  ;;  %v5924_v32 = vsel %vm1148_vm4, %v5885_v53, %v5661_v21  ;;  %v6714_v53 = vld [vmem:[#allocation3 + $0x9] sm:$0xff] }
 0x622   : > { %6359 = vmatprep.mubr.bf16.mxu0 %v6049_v59 }
 0x623   : > { %6360 = vmatmul.mubr.bf16.gmra.mrb[160].mxu0 %v5921_v22  ;;  %v5119_v22 = vld [vmem:[#allocation2 + $0xc8] sm:$0xff] }
 0x624   : > { %v5709_v1 = vpop.permute.xlu0 %5708  ;;  %v5615_v31 = vpop.permute.xlu1 %5614  ;;  %v5142_v43 = vpack.c.bf16 %v5119_v22, %v5118_v36  ;;  %v6761_v22 = vld [vmem:[#allocation3 + $0x2] sm:$0xff] }
 0x625   : > { %v5973_v24 = vsel %vm170_vm0, %v5333_v54, %v5709_v1 }
 0x628   : > { %v5757_v2 = vpop.permute.xlu0 %5756  ;;  %v5663_v12 = vpop.permute.xlu1 %5662 }
 0x629   : > { %v6013_v35 = vsel %vm1115_vm3, %v5973_v24, %v5757_v2  ;;  %v5848_v2 = vsel %vm170_vm0, %v5142_v43, %v5567_v6  ;;  %v6762_v43 = vld [vmem:[#allocation3 + $0xa] sm:$0xff] }
 0x62a   : > { %v5887_v54 = vsel %vm1115_vm3, %v5848_v2, %v5615_v31  ;;  %v6984_v31 = vld [vmem:[#allocation3 + $0x1a0] sm:$0xff] }
 0x62b   : > { %v5927_v24 = vsel %vm1148_vm4, %v5887_v54, %v5663_v12  ;;  %v6793_v54 = vpack.c.bf16 %v6762_v43, %v6761_v22 }
 0x62c   : > { %v5805_v13 = vpop.permute.xlu0 %5804  ;;  %v5569_v11 = vpop.permute.xlu1 %5568 }
 0x62d   : > { %v6052_v10 = vsel %vm1148_vm4, %v6013_v35, %v5805_v13  ;;  %v6713_v13 = vld [vmem:[#allocation3 + $0x1] sm:$0xff] }
 0x62e   : > { %6367 = vmatprep.mubr.bf16.mxu0 %v6052_v10  ;;  %v6745_v10 = vpack.c.bf16 %v6714_v53, %v6713_v13 }
 0x62f   : > { %6368 = vmatmul.mubr.bf16.gmra.mrb[164].mxu0 %v5924_v32 }
 0x630   : > { %v5711_v39 = vpop.permute.xlu0 %5710  ;;  %v5617_v59 = vpop.permute.xlu1 %5616  ;;  %7113 = vrot.lane.b32.xlu1 %v6745_v10, %s9678_s19 }
 0x631   : > { %v5976_v49 = vsel %vm170_vm0, %v12251_v9, %v5711_v39  ;;  %v6983_v39 = vld [vmem:[#allocation3 + $0x198] sm:$0xff] }
 0x632   : > { %v7000_v12 = vpack.c.bf16 %v6984_v31, %v6983_v39 }
 0x634   : > { %v5759_v57 = vpop.permute.xlu0 %5758  ;;  %v5665_v1 = vpop.permute.xlu1 %5664  ;;  %7335 = vrot.lane.b32.xlu0 %v7000_v12, %s9677_s17  ;;  %7161 = vrot.lane.b32.xlu1 %v6793_v54, %s9677_s17 }
 0x635   : > { %v6015_v52 = vsel %vm1115_vm3, %v5976_v49, %v5759_v57  ;;  %v5851_v49 = vsel %vm170_vm0, %v12237_v7, %v5569_v11 }
 0x638   : > { %v5807_v17 = vpop.permute.xlu0 %5806  ;;  %v5571_v33 = vpop.permute.xlu1 %5570 }
 0x639   : > { %v6055_v21 = vsel %vm1148_vm4, %v6015_v52, %v5807_v17 }
 0x63a   : > { %6375 = vmatprep.mubr.bf16.mxu0 %v6055_v21  ;;  %v5889_v21 = vsel %vm1115_vm3, %v5851_v49, %v5617_v59 }
 0x63b   : > { %6376 = vmatmul.mubr.bf16.gmra.mrb[168].mxu0 %v5927_v24 }
 0x63c   : > { %v5713_v18 = vpop.permute.xlu0 %5712  ;;  %v5619_v35 = vpop.permute.xlu1 %5618 }
 0x63d   : > { %v5979_v57 = vsel %vm170_vm0, %v12282_v0, %v5713_v18  ;;  %v5930_v18 = vsel %vm1148_vm4, %v5889_v21, %v5665_v1 }
 0x640   : > { %v5761_v9 = vpop.permute.xlu0 %5760  ;;  %v5667_v32 = vpop.permute.xlu1 %5666 }
 0x641   : > { %v12550_v6 = vpop.f32.mrb[152].mxu1  ;;  %v6017_v2 = vsel %vm1115_vm3, %v5979_v57, %v5761_v9  ;;  %v5854_v9 = vsel %vm170_vm0, %v12264_v51, %v5571_v33 }
 0x642   : > { %v12554_v36 = vpop.f32.mrb[153].mxu1  ;;  %v5891_v57 = vsel %vm1115_vm3, %v5854_v9, %v5619_v35  ;;  %v9593_v35 = vld [vmem:[%s13441_s1 + $0x2c8] sm:$0xff]  }
 0x643   : > { %v12559_v52 = vpop.f32.mrb[154].mxu1  ;;  %v5933_v12 = vsel %vm1148_vm4, %v5891_v57, %v5667_v32 }
 0x644   : > { %v5809_v17 = vpop.permute.xlu0 %5808  ;;  %v12562_v24 = vpop.f32.mrb[155].mxu1 }
 0x645   : > { %v5573_v13 = vpop.permute.xlu1 %5572  ;;  %v6058_v0 = vsel %vm1148_vm4, %v6017_v2, %v5809_v17 }
 0x646   : > { %6383 = vmatprep.mubr.bf16.mxu0 %v6058_v0  ;;  %v5857_v21 = vsel %vm170_vm0, %v12303_v45, %v5573_v13 }
 0x647   : > { %6384 = vmatmul.mubr.bf16.gmra.mrb[172].mxu0 %v5930_v18 }
 0x648   : > { %v5715_v7 = vpop.permute.xlu0 %5714 }
 0x649   : > { %v5621_v11 = vpop.permute.xlu1 %5620  ;;  %v5982_v59 = vsel %vm170_vm0, %v12319_v15, %v5715_v7  ;;  %v9592_v15 = vld [vmem:[%s13441_s1 + $0x2c0] sm:$0xff]  }
 0x64a   : > { %9435 = vmatprep.subr.bf16.mxu0 %v9592_v15 }
 0x64b   : > { %9436 = vmatpush3.bf16.msra.mxu0 %v9592_v15 }
 0x64c   : > { %v5763_v53 = vpop.permute.xlu0 %5762  ;;  %9437 = vmatprep.subr.bf16.mxu0 %v9593_v35 }
 0x64d   : > { %v5669_v10 = vpop.permute.xlu1 %5668  ;;  %v6019_v39 = vsel %vm1115_vm3, %v5982_v59, %v5763_v53  ;;  %v5893_v53 = vsel %vm1115_vm3, %v5857_v21, %v5621_v11 }
 0x64f   : > { %9438 = vmatpush3.bf16.msra.mxu0 %v9593_v35 }
 0x650   : > { %v5811_v31 = vpop.permute.xlu0 %5810 }
 0x651   : > { %v5575_v22 = vpop.permute.xlu1 %5574  ;;  %v6061_v1 = vsel %vm1148_vm4, %v6019_v39, %v5811_v31 }
 0x652   : > { %6391 = vmatprep.mubr.bf16.mxu0 %v6061_v1  ;;  %v5860_v1 = vsel %vm170_vm0, %v12344_v23, %v5575_v22 }
 0x653   : > { %6392 = vmatmul.mubr.bf16.gmra.mrb[176].mxu0 %v5933_v12 }
 0x654   : > { %v5717_v43 = vpop.permute.xlu0 %5716 }
 0x655   : > { %v5623_v49 = vpop.permute.xlu1 %5622  ;;  %v5985_v32 = vsel %vm170_vm0, %v12363_v56, %v5717_v43  ;;  %v5936_v56 = vsel %vm1148_vm4, %v5893_v53, %v5669_v10 }
 0x656   : > { %v5895_v43 = vsel %vm1115_vm3, %v5860_v1, %v5623_v49 }
 0x658   : > { %v5765_v2 = vpop.permute.xlu0 %5764  ;;  %v12579_v33 = vpop.f32.mrb[156].mxu1 }
 0x659   : > { %v5671_v51 = vpop.permute.xlu1 %5670  ;;  %v12581_v17 = vpop.f32.mrb[157].mxu1  ;;  %v6021_v0 = vsel %vm1115_vm3, %v5985_v32, %v5765_v2 }
 0x65a   : > { %v12588_v54 = vpop.f32.mrb[158].mxu1  ;;  %v5939_v10 = vsel %vm1148_vm4, %v5895_v43, %v5671_v51 }
 0x65b   : > { %v12593_v18 = vpop.f32.mrb[159].mxu1 }
 0x65c   : > { %v5813_v7 = vpop.permute.xlu0 %5812 }
 0x65d   : > { %v5577_v59 = vpop.permute.xlu1 %5576  ;;  %v6064_v9 = vsel %vm1148_vm4, %v6021_v0, %v5813_v7 }
 0x65e   : > { %6399 = vmatprep.mubr.bf16.mxu0 %v6064_v9  ;;  %v5863_v7 = vsel %vm170_vm0, %v12378_v48, %v5577_v59 }
 0x65f   : > { %6400 = vmatmul.mubr.bf16.gmra.mrb[180].mxu0 %v5936_v56 }
 0x660   : > { %v5719_v39 = vpop.permute.xlu0 %5718 }
 0x661   : > { %v5625_v31 = vpop.permute.xlu1 %5624  ;;  %v5988_v13 = vsel %vm170_vm0, %v12408_v55, %v5719_v39 }
 0x662   : > { %v5897_v9 = vsel %vm1115_vm3, %v5863_v7, %v5625_v31 }
 0x664   : > { %v5767_v57 = vpop.permute.xlu0 %5766 }
 0x665   : > { %v5673_v45 = vpop.permute.xlu1 %5672  ;;  %v6023_v11 = vsel %vm1115_vm3, %v5988_v13, %v5767_v57 }
 0x666   : > { %v5942_v57 = vsel %vm1148_vm4, %v5897_v9, %v5673_v45 }
 0x668   : > { %v5815_v12 = vpop.permute.xlu0 %5814 }
 0x669   : > { %v5579_v15 = vpop.permute.xlu1 %5578  ;;  %v6067_v2 = vsel %vm1148_vm4, %v6023_v11, %v5815_v12 }
 0x66a   : > { %6407 = vmatprep.mubr.bf16.mxu0 %v6067_v2  ;;  %v5866_v48 = vsel %vm170_vm0, %v12432_v28, %v5579_v15 }
 0x66b   : > { %6408 = vmatmul.mubr.bf16.gmra.mrb[184].mxu0 %v5939_v10 }
 0x66c   : > { %v5721_v35 = vpop.permute.xlu0 %5720 }
 0x66d   : > { %v5627_v32 = vpop.permute.xlu1 %5626  ;;  %v5991_v49 = vsel %vm170_vm0, %v12453_v20, %v5721_v35 }
 0x66e   : > { %v5899_v31 = vsel %vm1115_vm3, %v5866_v48, %v5627_v32  ;;  %v9596_v48 = vld [vmem:[%s13441_s1 + $0x288] sm:$0xff]  }
 0x670   : > { %v12606_v21 = vpop.f32.mrb[160].mxu1  ;;  %v5769_v55 = vpop.permute.xlu0 %5768 }
 0x671   : > { %v12608_v0 = vpop.f32.mrb[161].mxu1  ;;  %v6025_v51 = vsel %vm1115_vm3, %v5991_v49, %v5769_v55  ;;  %v5675_v56 = vpop.permute.xlu1 %5674 }
 0x672   : > { %v12610_v23 = vpop.f32.mrb[162].mxu1  ;;  %v5945_v45 = vsel %vm1148_vm4, %v5899_v31, %v5675_v56  ;;  %v9597_v31 = vld [vmem:[%s13441_s1 + $0x248] sm:$0xff]  }
 0x673   : > { %v12612_v22 = vpop.f32.mrb[163].mxu1 }
 0x674   : > { %v5817_v53 = vpop.permute.xlu0 %5816 }
 0x675   : > { %v6070_v39 = vsel %vm1148_vm4, %v6025_v51, %v5817_v53  ;;  %v5581_v1 = vpop.permute.xlu1 %5580 }
 0x676   : > { %6415 = vmatprep.mubr.bf16.mxu0 %v6070_v39  ;;  %v5869_v28 = vsel %vm170_vm0, %v12482_v41, %v5581_v1 }
 0x677   : > { %6416 = vmatmul.mubr.bf16.gmra.mrb[188].mxu0 %v5942_v57  ;;  %v9594_v57 = vld [vmem:[%s13441_s1 + $0x280] sm:$0xff]  }
 0x678   : > { %v5723_v13 = vpop.permute.xlu0 %5722  ;;  %9161 = vmatprep.subr.bf16.mxu1 %v9594_v57 }
 0x679   : > { %v5994_v20 = vsel %vm170_vm0, %v12496_v40, %v5723_v13  ;;  %v5629_v43 = vpop.permute.xlu1 %5628  ;;  %v9595_v13 = vld [vmem:[%s13441_s1 + $0x240] sm:$0xff]  }
 0x67a   : > { %v5901_v7 = vsel %vm1115_vm3, %v5869_v28, %v5629_v43  ;;  %9162 = vmatpush3.bf16.msra.mxu1 %v9595_v13 }
 0x67b   : > { %9163 = vmatprep.subr.bf16.mxu1 %v9596_v48  ;;  %v9602_v48 = vld [vmem:[%s13441_s1 + $0x2a0] sm:$0xff]  }
 0x67c   : > { %v5771_v11 = vpop.permute.xlu0 %5770 }
 0x67d   : > { %v6027_v59 = vsel %vm1115_vm3, %v5994_v20, %v5771_v11  ;;  %v5677_v40 = vpop.permute.xlu1 %5676  ;;  %v12664_v11 = vld [vmem:[%s13442_s2 + $0x3] ss:$0 sm:$0xff] }
 0x67e   : > { %9164 = vmatpush3.bf16.msra.mxu1 %v9597_v31  ;;  %v9603_v31 = vld [vmem:[%s13441_s1 + $0x260] sm:$0xff]  }
 0x680   : > { %v5819_v12 = vpop.permute.xlu0 %5818 }
 0x681   : > { %v6073_v2 = vsel %vm1148_vm4, %v6027_v59, %v5819_v12 }
 0x682   : > { %6423 = vmatprep.mubr.bf16.mxu0 %v6073_v2 }
 0x683   : > { %6424 = vmatmul.mubr.bf16.gmra.mrb[192].mxu0 %v5945_v45 }
 0x684   : > { %v5725_v10 = vpop.permute.xlu0 %5724 }
 0x685   : > { %v5997_v35 = vsel %vm170_vm0, %v12517_v63, %v5725_v10  ;;  %v5948_v63 = vsel %vm1148_vm4, %v5901_v7, %v5677_v40  ;;  %v9598_v10 = vld [vmem:[%s13441_s1 + $0x290] sm:$0xff]   ;;  %v9600_v7 = vld [vmem:[%s13441_s1 + $0x298] sm:$0xff]  }
 0x686   : > { %v6029_v32 = vsel %vm1115_vm3, %v5997_v35, %v12291_v60  ;;  %v9599_v35 = vld [vmem:[%s13441_s1 + $0x250] sm:$0xff]   ;;  %9165 = vmatprep.subr.bf16.mxu1 %v9598_v10  ;;  %v9604_v10 = vld [vmem:[%s13441_s1 + $0x2a8] sm:$0xff]  }
 0x687   : > { %9166 = vmatpush3.bf16.msra.mxu1 %v9599_v35  ;;  %v9605_v35 = vld [vmem:[%s13441_s1 + $0x268] sm:$0xff]  }
 0x688   : > { %v12632_v55 = vpop.f32.mrb[164].mxu1  ;;  %v5821_v15 = vpop.permute.xlu0 %5820  ;;  %9167 = vmatprep.subr.bf16.mxu1 %v9600_v7 }
 0x689   : > { %v12638_v49 = vpop.f32.mrb[165].mxu1  ;;  %v6076_v51 = vsel %vm1148_vm4, %v6029_v32, %v5821_v15 }
 0x68a   : > { %v12642_v53 = vpop.f32.mrb[166].mxu1  ;;  %6431 = vmatprep.mubr.bf16.mxu0 %v6076_v51 }
 0x68b   : > { %v12645_v9 = vpop.f32.mrb[167].mxu1  ;;  %6432 = vmatmul.mubr.bf16.gmra.mrb[196].mxu0 %v5948_v63 }
 0x6a0   : > { %v12647_v56 = vpop.f32.mrb[168].mxu1 }
 0x6a1   : > { %v12649_v41 = vpop.f32.mrb[169].mxu1 }
 0x6a2   : > { %v12651_v39 = vpop.f32.mrb[170].mxu1 }
 0x6a3   : > { %v12653_v60 = vpop.f32.mrb[171].mxu1 }
 0x6ae   : > { %v9047_v1 = vpop.f32.mrb[136].mxu0 }
 0x6af   : > { %v9048_v20 = vpop.f32.mrb[137].mxu0 }
 0x6b0   : > { %v9049_v59 = vadd.f32 %v9048_v20, %v9047_v1  ;;  %v9050_v12 = vpop.f32.mrb[138].mxu0 }
 0x6b1   : > { %v9051_v43 = vpop.f32.mrb[139].mxu0 }
 0x6b2   : > { %v6314_v2 = vadd.f32 %v9049_v59, %v12664_v11  ;;  %v9052_v45 = vadd.f32 %v9051_v43, %v9050_v12 }
 0x6b4   : > { %v6475_v40 = vadd.f32 %v12554_v36, %v6314_v2  ;;  %v6317_v28 = vadd.f32 %v9052_v45, %v12664_v11  ;;  %v9601_v36 = vld [vmem:[%s13441_s1 + $0x258] sm:$0xff]  }
 0x6b5   : > { %9168 = vmatpush3.bf16.msra.mxu1 %v9601_v36 }
 0x6b6   : > { %v6601_v15 = vmax.f32 %v6475_v40, 0.0  ;;  %v6478_v32 = vadd.f32 %v12562_v24, %v6317_v28  ;;  %9169 = vmatprep.subr.bf16.mxu1 %v9602_v48 }
 0x6b8   : > { %6633 = vst.msk [vmem:[#allocation3 + $0x19] sm:$0xff] %vm170_vm0, %v6601_v15  ;;  %v6602_v51 = vmax.f32 %v6478_v32, 0.0  ;;  %v12686_v63 = vpop.f32.mrb[172].mxu1 }
 0x6b9   : > { %v12691_v57 = vpop.f32.mrb[173].mxu1  ;;  %9170 = vmatpush3.bf16.msra.mxu1 %v9603_v31 }
 0x6ba   : > { %6634 = vst.msk [vmem:[#allocation3 + $0x21] sm:$0xff] %vm170_vm0, %v6602_v51  ;;  %v9053_v24 = vpop.f32.mrb[140].mxu0  ;;  %v12694_v13 = vpop.f32.mrb[174].mxu1  ;;  %9171 = vmatprep.subr.bf16.mxu1 %v9604_v10  ;;  %v9608_v10 = vld [vmem:[%s13441_s1 + $0x2b8] sm:$0xff]  }
 0x6bb   : > { %v9054_v1 = vpop.f32.mrb[141].mxu0  ;;  %v12696_v20 = vpop.f32.mrb[175].mxu1 }
 0x6bc   : > { %v9055_v59 = vadd.f32 %v9054_v1, %v9053_v24  ;;  %v9056_v12 = vpop.f32.mrb[142].mxu0 }
 0x6bd   : > { %v9057_v43 = vpop.f32.mrb[143].mxu0  ;;  %9172 = vmatpush3.bf16.msra.mxu1 %v9605_v35 }
 0x6be   : > { %v6322_v2 = vadd.f32 %v9055_v59, %v12664_v11  ;;  %v9058_v45 = vadd.f32 %v9057_v43, %v9056_v12  ;;  %v9606_v12 = vld [vmem:[%s13441_s1 + $0x2b0] sm:$0xff]  }
 0x6bf   : > { %v6809_v15 = vld [vmem:[#allocation3 + $0x18] sm:$0xff]  ;;  %9173 = vmatprep.subr.bf16.mxu1 %v9606_v12 }
 0x6c0   : > { %v6483_v40 = vadd.f32 %v12550_v6, %v6322_v2  ;;  %v6325_v28 = vadd.f32 %v9058_v45, %v12664_v11  ;;  %v6715_v31 = vld [vmem:[#allocation3 + $0x19] sm:$0xff] }
 0x6c1   : > { %v6905_v32 = vld [vmem:[#allocation3 + $0x1a] sm:$0xff]  ;;  %v6906_v7 = vld [vmem:[#allocation3 + $0x22] sm:$0xff] }
 0x6c2   : > { %v6810_v51 = vld [vmem:[#allocation3 + $0x20] sm:$0xff]  ;;  %v6603_v36 = vmax.f32 %v6483_v40, 0.0  ;;  %v6486_v24 = vadd.f32 %v12559_v52, %v6325_v28  ;;  %v6937_v1 = vpack.c.bf16 %v6906_v7, %v6905_v32  ;;  %v9609_v28 = vld [vmem:[%s13441_s1 + $0x278] sm:$0xff]  }
 0x6c3   : > { %v12714_v48 = vpack.c.bf16 %v6810_v51, %v6809_v15  ;;  %v6716_v59 = vld [vmem:[#allocation3 + $0x21] sm:$0xff] }
 0x6c4   : > { %6635 = vst.msk [vmem:[#allocation3 + $0x31] sm:$0xff] %vm170_vm0, %v6603_v36  ;;  %v6604_v6 = vmax.f32 %v6486_v24, 0.0  ;;  %7257 = vrot.lane.b32.xlu0 %v6937_v1, %s9678_s19  ;;  %v9607_v52 = vld [vmem:[%s13441_s1 + $0x270] sm:$0xff]   ;;  %v12727_v2 = vpack.c.bf16 %v6716_v59, %v6715_v31 }
 0x6c5   : > { %7209 = vrot.lane.b32.xlu1 %v12714_v48, %s9679_s20  ;;  %9174 = vmatpush3.bf16.msra.mxu1 %v9607_v52 }
 0x6c6   : > { %6636 = vst.msk [vmem:[#allocation3 + $0x39] sm:$0xff] %vm170_vm0, %v6604_v6  ;;  %v9059_v43 = vpop.f32.mrb[144].mxu0  ;;  %9175 = vmatprep.subr.bf16.mxu1 %v9608_v10 }
 0x6c7   : > { %v9060_v45 = vpop.f32.mrb[145].mxu0 }
 0x6c8   : > { %v9061_v35 = vadd.f32 %v9060_v45, %v9059_v43  ;;  %v9062_v40 = vpop.f32.mrb[146].mxu0 }
 0x6c9   : > { %7115 = vrot.lane.b32.xlu1 %v12727_v2, %s9678_s19  ;;  %v9063_v15 = vpop.f32.mrb[147].mxu0  ;;  %9176 = vmatpush3.bf16.msra.mxu1 %v9609_v28 }
 0x6ca   : > { %v6330_v32 = vadd.f32 %v9061_v35, %v12664_v11  ;;  %v9064_v7 = vadd.f32 %v9063_v15, %v9062_v40 }
 0x6cb   : > { %v6953_v24 = vld [vmem:[#allocation3 + $0x30] sm:$0xff] }
 0x6cc   : > { %v6491_v51 = vadd.f32 %v12581_v17, %v6330_v32  ;;  %v6333_v36 = vadd.f32 %v9064_v7, %v12664_v11  ;;  %v7001_v28 = vld [vmem:[#allocation3 + $0x31] sm:$0xff] }
 0x6cd   : > { %7163 = vrot.lane.b32.xlu1 %v6937_v1, %s9677_s17  ;;  %v6954_v59 = vld [vmem:[#allocation3 + $0x38] sm:$0xff] }
 0x6ce   : > { %v7049_v12 = vld [vmem:[#allocation3 + $0x32] sm:$0xff]  ;;  %v7050_v6 = vld [vmem:[#allocation3 + $0x3a] sm:$0xff]  ;;  %v6605_v52 = vmax.f32 %v6491_v51, 0.0  ;;  %v6494_v31 = vadd.f32 %v12593_v18, %v6333_v36  ;;  %v6985_v43 = vpack.c.bf16 %v6954_v59, %v6953_v24 }
 0x6cf   : > { %v7081_v45 = vpack.c.bf16 %v7050_v6, %v7049_v12  ;;  %v7002_v10 = vld [vmem:[#allocation3 + $0x39] sm:$0xff] }
 0x6d0   : > { %6637 = vst.msk [vmem:[#allocation3 + $0x49] sm:$0xff] %vm170_vm0, %v6605_v52  ;;  %v6606_v35 = vmax.f32 %v6494_v31, 0.0  ;;  %7305 = vrot.lane.b32.xlu0 %v6985_v43, %s9677_s17  ;;  %v12745_v17 = vpop.f32.mrb[176].mxu1  ;;  %v7033_v32 = vpack.c.bf16 %v7002_v10, %v7001_v28 }
 0x6d1   : > { %7211 = vrot.lane.b32.xlu1 %v6985_v43, %s9679_s20  ;;  %9439 = vmatprep.mubr.msk.bf16.mxu0 %vm170_vm0, %v7081_v45  ;;  %v12748_v40 = vpop.f32.mrb[177].mxu1 }
 0x6d2   : > { %v9065_v1 = vpop.f32.mrb[148].mxu0  ;;  %6638 = vst.msk [vmem:[#allocation3 + $0x51] sm:$0xff] %vm170_vm0, %v6606_v35  ;;  %v12751_v15 = vpop.f32.mrb[178].mxu1 }
 0x6d3   : > { %v9066_v18 = vpop.f32.mrb[149].mxu0  ;;  %v12753_v51 = vpop.f32.mrb[179].mxu1 }
 0x6d4   : > { %v9067_v7 = vadd.f32 %v9066_v18, %v9065_v1  ;;  %v9068_v36 = vpop.f32.mrb[150].mxu0  ;;  %7353 = vrot.lane.b32.xlu0 %v7033_v32, %s9679_s20 }
 0x6d5   : > { %7117 = vrot.lane.b32.xlu1 %v7033_v32, %s9678_s19  ;;  %v9069_v24 = vpop.f32.mrb[151].mxu0 }
 0x6d6   : > { %v6338_v59 = vadd.f32 %v9067_v7, %v12664_v11  ;;  %v9070_v12 = vadd.f32 %v9069_v24, %v9068_v36 }
 0x6d7   : > { %v6955_v31 = vld [vmem:[#allocation3 + $0x48] sm:$0xff] }
 0x6d8   : > { %v6499_v6 = vadd.f32 %v12579_v33, %v6338_v59  ;;  %v6341_v52 = vadd.f32 %v9070_v12, %v12664_v11  ;;  %7259 = vrot.lane.b32.xlu0 %v7081_v45, %s9678_s19 }
 0x6d9   : > { %7165 = vrot.lane.b32.xlu1 %v7081_v45, %s9677_s17  ;;  %v6956_v35 = vld [vmem:[#allocation3 + $0x50] sm:$0xff] }
 0x6da   : > { %v6607_v43 = vmax.f32 %v6499_v6, 0.0  ;;  %v6502_v10 = vadd.f32 %v12588_v54, %v6341_v52  ;;  %v7051_v1 = vld [vmem:[#allocation3 + $0x4a] sm:$0xff]  ;;  %v7052_v28 = vld [vmem:[#allocation3 + $0x52] sm:$0xff]  ;;  %v12763_v18 = vpop.f32.mrb[180].mxu1  ;;  %v6986_v32 = vpack.c.bf16 %v6956_v35, %v6955_v31 }
 0x6db   : > { %v7082_v7 = vpack.c.bf16 %v7052_v28, %v7051_v1  ;;  %v12765_v36 = vpop.f32.mrb[181].mxu1  ;;  %v7004_v24 = vld [vmem:[#allocation3 + $0x51] sm:$0xff]  ;;  %v7003_v45 = vld [vmem:[#allocation3 + $0x49] sm:$0xff] }
 0x6dc   : > { %6639 = vst.msk [vmem:[#allocation3 + $0x61] sm:$0xff] %vm170_vm0, %v6607_v43  ;;  %v6608_v33 = vmax.f32 %v6502_v10, 0.0  ;;  %7307 = vrot.lane.b32.xlu0 %v6986_v32, %s9677_s17  ;;  %v12772_v59 = vpop.f32.mrb[182].mxu1  ;;  %v7034_v6 = vpack.c.bf16 %v7004_v24, %v7003_v45 }
 0x6dd   : > { %7213 = vrot.lane.b32.xlu1 %v6986_v32, %s9679_s20  ;;  %9440 = vmatmul.mubr.msk.bf16.vlgmr.msra.gmra.mrb[200].mxu0 %vm170_vm0, %v7082_v7  ;;  %v12774_v52 = vpop.f32.mrb[183].mxu1 }
 0x6de   : > { %6640 = vst.msk [vmem:[#allocation3 + $0x69] sm:$0xff] %vm170_vm0, %v6608_v33  ;;  %v9071_v54 = vpop.f32.mrb[152].mxu0 }
 0x6df   : > { %v9072_v12 = vpop.f32.mrb[153].mxu0 }
 0x6e0   : > { %v9073_v31 = vadd.f32 %v9072_v12, %v9071_v54  ;;  %v9074_v43 = vpop.f32.mrb[154].mxu0  ;;  %7355 = vrot.lane.b32.xlu0 %v7034_v6, %s9679_s20 }
 0x6e1   : > { %7119 = vrot.lane.b32.xlu1 %v7034_v6, %s9678_s19  ;;  %v9075_v10 = vpop.f32.mrb[155].mxu0 }
 0x6e2   : > { %v6346_v35 = vadd.f32 %v9073_v31, %v12664_v11  ;;  %v9076_v1 = vadd.f32 %v9075_v10, %v9074_v43 }
 0x6e3   : > { %v6957_v33 = vld [vmem:[#allocation3 + $0x60] sm:$0xff] }
 0x6e4   : > { %v6507_v28 = vadd.f32 %v12608_v0, %v6346_v35  ;;  %v6349_v32 = vadd.f32 %v9076_v1, %v12664_v11  ;;  %7261 = vrot.lane.b32.xlu0 %v7082_v7, %s9678_s19  ;;  %v7005_v43 = vld [vmem:[#allocation3 + $0x61] sm:$0xff] }
 0x6e5   : > { %7167 = vrot.lane.b32.xlu1 %v7082_v7, %s9677_s17  ;;  %v6958_v24 = vld [vmem:[#allocation3 + $0x68] sm:$0xff] }
 0x6e6   : > { %v7053_v54 = vld [vmem:[#allocation3 + $0x62] sm:$0xff]  ;;  %v7054_v45 = vld [vmem:[#allocation3 + $0x6a] sm:$0xff]  ;;  %v6609_v12 = vmax.f32 %v6507_v28, 0.0  ;;  %v6510_v34 = vadd.f32 %v12612_v22, %v6349_v32  ;;  %v6987_v6 = vpack.c.bf16 %v6958_v24, %v6957_v33 }
 0x6e7   : > { %v7083_v5 = vpack.c.bf16 %v7054_v45, %v7053_v54  ;;  %v7006_v0 = vld [vmem:[#allocation3 + $0x69] sm:$0xff] }
 0x6e8   : > { %6641 = vst.msk [vmem:[#allocation3 + $0x79] sm:$0xff] %vm170_vm0, %v6609_v12  ;;  %v6610_v31 = vmax.f32 %v6510_v34, 0.0  ;;  %7309 = vrot.lane.b32.xlu0 %v6987_v6, %s9677_s17  ;;  %v7035_v35 = vpack.c.bf16 %v7006_v0, %v7005_v43 }
 0x6e9   : > { %9443 = vmatprep.mubr.msk.bf16.mxu0 %vm170_vm0, %v7083_v5  ;;  %7215 = vrot.lane.b32.xlu1 %v6987_v6, %s9679_s20 }
 0x6ea   : > { %6642 = vst.msk [vmem:[#allocation3 + $0x81] sm:$0xff] %vm170_vm0, %v6610_v31  ;;  %v9077_v7 = vpop.f32.mrb[156].mxu0 }
 0x6eb   : > { %v9078_v10 = vpop.f32.mrb[157].mxu0 }
 0x6ec   : > { %v9079_v1 = vadd.f32 %v9078_v10, %v9077_v7  ;;  %v9080_v22 = vpop.f32.mrb[158].mxu0  ;;  %7357 = vrot.lane.b32.xlu0 %v7035_v35, %s9679_s20 }
 0x6ed   : > { %7121 = vrot.lane.b32.xlu1 %v7035_v35, %s9678_s19  ;;  %v9081_v34 = vpop.f32.mrb[159].mxu0 }
 0x6ee   : > { %v6354_v28 = vadd.f32 %v9079_v1, %v12664_v11  ;;  %v9082_v32 = vadd.f32 %v9081_v34, %v9080_v22 }
 0x6ef   : > { %v6959_v54 = vld [vmem:[#allocation3 + $0x78] sm:$0xff] }
 0x6f0   : > { %v6515_v33 = vadd.f32 %v12606_v21, %v6354_v28  ;;  %v6357_v24 = vadd.f32 %v9082_v32, %v12664_v11  ;;  %7263 = vrot.lane.b32.xlu0 %v7083_v5, %s9678_s19  ;;  %v7007_v35 = vld [vmem:[#allocation3 + $0x79] sm:$0xff] }
 0x6f1   : > { %7169 = vrot.lane.b32.xlu1 %v7083_v5, %s9677_s17  ;;  %v7055_v45 = vld [vmem:[#allocation3 + $0x7a] sm:$0xff]  ;;  %v7056_v12 = vld [vmem:[#allocation3 + $0x82] sm:$0xff] }
 0x6f2   : > { %v6960_v6 = vld [vmem:[#allocation3 + $0x80] sm:$0xff]  ;;  %v6611_v31 = vmax.f32 %v6515_v33, 0.0  ;;  %v6518_v0 = vadd.f32 %v12610_v23, %v6357_v24  ;;  %v7084_v7 = vpack.c.bf16 %v7056_v12, %v7055_v45 }
 0x6f3   : > { %v6988_v43 = vpack.c.bf16 %v6960_v6, %v6959_v54  ;;  %v7008_v21 = vld [vmem:[#allocation3 + $0x81] sm:$0xff] }
 0x6f4   : > { %6643 = vst.msk [vmem:[#allocation3 + $0x91] sm:$0xff] %vm170_vm0, %v6611_v31  ;;  %v6612_v10 = vmax.f32 %v6518_v0, 0.0  ;;  %9444 = vmatmul.mubr.msk.bf16.gmra.mrb[204].mxu0 %vm170_vm0, %v7084_v7  ;;  %v7036_v22 = vpack.c.bf16 %v7008_v21, %v7007_v35 }
 0x6f5   : > { %7311 = vrot.lane.b32.xlu0 %v6988_v43, %s9677_s17  ;;  %7217 = vrot.lane.b32.xlu1 %v6988_v43, %s9679_s20 }
 0x6f6   : > { %6644 = vst.msk [vmem:[#allocation3 + $0x99] sm:$0xff] %vm170_vm0, %v6612_v10  ;;  %v9083_v5 = vpop.f32.mrb[160].mxu0 }
 0x6f7   : > { %v9084_v1 = vpop.f32.mrb[161].mxu0 }
 0x6f8   : > { %v9085_v34 = vadd.f32 %v9084_v1, %v9083_v5  ;;  %v9086_v23 = vpop.f32.mrb[162].mxu0 }
 0x6f9   : > { %7359 = vrot.lane.b32.xlu0 %v7036_v22, %s9679_s20  ;;  %7123 = vrot.lane.b32.xlu1 %v7036_v22, %s9678_s19  ;;  %v9087_v28 = vpop.f32.mrb[163].mxu0 }
 0x6fa   : > { %v6362_v32 = vadd.f32 %v9085_v34, %v12664_v11  ;;  %v9088_v33 = vadd.f32 %v9087_v28, %v9086_v23 }
 0x6fb   : > { %v6961_v45 = vld [vmem:[#allocation3 + $0x90] sm:$0xff] }
 0x6fc   : > { %v6523_v24 = vadd.f32 %v12638_v49, %v6362_v32  ;;  %v6365_v54 = vadd.f32 %v9088_v33, %v12664_v11  ;;  %v7009_v35 = vld [vmem:[#allocation3 + $0x91] sm:$0xff] }
 0x6fd   : > { %7265 = vrot.lane.b32.xlu0 %v7084_v7, %s9678_s19  ;;  %7171 = vrot.lane.b32.xlu1 %v7084_v7, %s9677_s17  ;;  %v7057_v12 = vld [vmem:[#allocation3 + $0x92] sm:$0xff]  ;;  %v7058_v6 = vld [vmem:[#allocation3 + $0x9a] sm:$0xff] }
 0x6fe   : > { %v6962_v31 = vld [vmem:[#allocation3 + $0x98] sm:$0xff]  ;;  %v6613_v0 = vmax.f32 %v6523_v24, 0.0  ;;  %v6526_v43 = vadd.f32 %v12645_v9, %v6365_v54  ;;  %v7085_v10 = vpack.c.bf16 %v7058_v6, %v7057_v12 }
 0x6ff   : > { %v6989_v21 = vpack.c.bf16 %v6962_v31, %v6961_v45  ;;  %v7010_v49 = vld [vmem:[#allocation3 + $0x99] sm:$0xff] }
 0x700   : > { %6645 = vst.msk [vmem:[#allocation3 + $0xa9] sm:$0xff] %vm170_vm0, %v6613_v0  ;;  %v6614_v5 = vmax.f32 %v6526_v43, 0.0  ;;  %9447 = vmatprep.mubr.msk.bf16.mxu0 %vm170_vm0, %v7085_v10  ;;  %v7037_v22 = vpack.c.bf16 %v7010_v49, %v7009_v35 }
 0x701   : > { %7313 = vrot.lane.b32.xlu0 %v6989_v21, %s9677_s17  ;;  %7219 = vrot.lane.b32.xlu1 %v6989_v21, %s9679_s20 }
 0x702   : > { %6646 = vst.msk [vmem:[#allocation3 + $0xb1] sm:$0xff] %vm170_vm0, %v6614_v5  ;;  %v9089_v7 = vpop.f32.mrb[164].mxu0 }
 0x703   : > { %v9090_v1 = vpop.f32.mrb[165].mxu0 }
 0x704   : > { %v9091_v34 = vadd.f32 %v9090_v1, %v9089_v7  ;;  %v9092_v9 = vpop.f32.mrb[166].mxu0 }
 0x705   : > { %7361 = vrot.lane.b32.xlu0 %v7037_v22, %s9679_s20  ;;  %7125 = vrot.lane.b32.xlu1 %v7037_v22, %s9678_s19  ;;  %v9093_v23 = vpop.f32.mrb[167].mxu0 }
 0x706   : > { %v6370_v28 = vadd.f32 %v9091_v34, %v12664_v11  ;;  %v9094_v32 = vadd.f32 %v9093_v23, %v9092_v9 }
 0x707   : > { %v6963_v54 = vld [vmem:[#allocation3 + $0xa8] sm:$0xff] }
 0x708   : > { %v6531_v33 = vadd.f32 %v12632_v55, %v6370_v28  ;;  %v6373_v24 = vadd.f32 %v9094_v32, %v12664_v11  ;;  %v7011_v49 = vld [vmem:[#allocation3 + $0xa9] sm:$0xff] }
 0x709   : > { %7267 = vrot.lane.b32.xlu0 %v7085_v10, %s9678_s19  ;;  %7173 = vrot.lane.b32.xlu1 %v7085_v10, %s9677_s17  ;;  %v7059_v45 = vld [vmem:[#allocation3 + $0xaa] sm:$0xff]  ;;  %v7060_v12 = vld [vmem:[#allocation3 + $0xb2] sm:$0xff] }
 0x70a   : > { %v6964_v6 = vld [vmem:[#allocation3 + $0xb0] sm:$0xff]  ;;  %v6615_v31 = vmax.f32 %v6531_v33, 0.0  ;;  %v6534_v0 = vadd.f32 %v12642_v53, %v6373_v24  ;;  %v7086_v43 = vpack.c.bf16 %v7060_v12, %v7059_v45 }
 0x70b   : > { %v6990_v21 = vpack.c.bf16 %v6964_v6, %v6963_v54  ;;  %v7012_v55 = vld [vmem:[#allocation3 + $0xb1] sm:$0xff] }
 0x70c   : > { %6647 = vst.msk [vmem:[#allocation3 + $0xc1] sm:$0xff] %vm170_vm0, %v6615_v31  ;;  %v6616_v5 = vmax.f32 %v6534_v0, 0.0  ;;  %9448 = vmatmul.mubr.msk.bf16.gmra.mrb[208].mxu0 %vm170_vm0, %v7086_v43  ;;  %v7038_v35 = vpack.c.bf16 %v7012_v55, %v7011_v49 }
 0x70d   : > { %7315 = vrot.lane.b32.xlu0 %v6990_v21, %s9677_s17  ;;  %7221 = vrot.lane.b32.xlu1 %v6990_v21, %s9679_s20 }
 0x70e   : > { %6648 = vst.msk [vmem:[#allocation3 + $0xc9] sm:$0xff] %vm170_vm0, %v6616_v5  ;;  %v9095_v10 = vpop.f32.mrb[168].mxu0 }
 0x70f   : > { %v9096_v7 = vpop.f32.mrb[169].mxu0 }
 0x710   : > { %v9097_v1 = vadd.f32 %v9096_v7, %v9095_v10  ;;  %v9098_v53 = vpop.f32.mrb[170].mxu0 }
 0x711   : > { %7363 = vrot.lane.b32.xlu0 %v7038_v35, %s9679_s20  ;;  %7127 = vrot.lane.b32.xlu1 %v7038_v35, %s9678_s19  ;;  %v9099_v22 = vpop.f32.mrb[171].mxu0 }
 0x712   : > { %v6378_v34 = vadd.f32 %v9097_v1, %v12664_v11  ;;  %v9100_v9 = vadd.f32 %v9099_v22, %v9098_v53 }
 0x713   : > { %v6965_v32 = vld [vmem:[#allocation3 + $0xc0] sm:$0xff] }
 0x714   : > { %v6539_v23 = vadd.f32 %v12649_v41, %v6378_v34  ;;  %v6381_v28 = vadd.f32 %v9100_v9, %v12664_v11  ;;  %v7013_v21 = vld [vmem:[#allocation3 + $0xc1] sm:$0xff] }
 0x715   : > { %7269 = vrot.lane.b32.xlu0 %v7086_v43, %s9678_s19  ;;  %7175 = vrot.lane.b32.xlu1 %v7086_v43, %s9677_s17  ;;  %v7061_v33 = vld [vmem:[#allocation3 + $0xc2] sm:$0xff]  ;;  %v7062_v24 = vld [vmem:[#allocation3 + $0xca] sm:$0xff] }
 0x716   : > { %v6966_v54 = vld [vmem:[#allocation3 + $0xc8] sm:$0xff]  ;;  %v6617_v45 = vmax.f32 %v6539_v23, 0.0  ;;  %v6542_v12 = vadd.f32 %v12653_v60, %v6381_v28  ;;  %v7087_v6 = vpack.c.bf16 %v7062_v24, %v7061_v33 }
 0x717   : > { %v6991_v31 = vpack.c.bf16 %v6966_v54, %v6965_v32  ;;  %v7014_v41 = vld [vmem:[#allocation3 + $0xc9] sm:$0xff] }
 0x718   : > { %6649 = vst.msk [vmem:[#allocation3 + $0xd9] sm:$0xff] %vm170_vm0, %v6617_v45  ;;  %v6618_v0 = vmax.f32 %v6542_v12, 0.0  ;;  %9451 = vmatprep.mubr.msk.bf16.mxu0 %vm170_vm0, %v7087_v6  ;;  %v7039_v55 = vpack.c.bf16 %v7014_v41, %v7013_v21 }
 0x719   : > { %7317 = vrot.lane.b32.xlu0 %v6991_v31, %s9677_s17  ;;  %7223 = vrot.lane.b32.xlu1 %v6991_v31, %s9679_s20 }
 0x71a   : > { %6650 = vst.msk [vmem:[#allocation3 + $0xe1] sm:$0xff] %vm170_vm0, %v6618_v0  ;;  %v9101_v43 = vpop.f32.mrb[172].mxu0 }
 0x71b   : > { %v9102_v5 = vpop.f32.mrb[173].mxu0 }
 0x71c   : > { %v9103_v10 = vadd.f32 %v9102_v5, %v9101_v43  ;;  %v9104_v60 = vpop.f32.mrb[174].mxu0  ;;  %v12857_v5 = vpop.permute.xlu1 %7113 }
 0x71d   : > { %7365 = vrot.lane.b32.xlu0 %v7039_v55, %s9679_s20  ;;  %7129 = vrot.lane.b32.xlu1 %v7039_v55, %s9678_s19  ;;  %v9105_v49 = vpop.f32.mrb[175].mxu0 }
 0x71e   : > { %v6386_v7 = vadd.f32 %v9103_v10, %v12664_v11  ;;  %v9106_v35 = vadd.f32 %v9105_v49, %v9104_v60 }
 0x71f   : > { %v6967_v22 = vld [vmem:[#allocation3 + $0xd8] sm:$0xff] }
 0x720   : > { %v6547_v1 = vadd.f32 %v12647_v56, %v6386_v7  ;;  %v6389_v53 = vadd.f32 %v9106_v35, %v12664_v11  ;;  %v7015_v45 = vld [vmem:[#allocation3 + $0xd9] sm:$0xff] }
 0x721   : > { %7271 = vrot.lane.b32.xlu0 %v7087_v6, %s9678_s19  ;;  %7177 = vrot.lane.b32.xlu1 %v7087_v6, %s9677_s17  ;;  %v7063_v34 = vld [vmem:[#allocation3 + $0xda] sm:$0xff]  ;;  %v7064_v9 = vld [vmem:[#allocation3 + $0xe2] sm:$0xff] }
 0x722   : > { %v6968_v23 = vld [vmem:[#allocation3 + $0xe0] sm:$0xff]  ;;  %v6619_v28 = vmax.f32 %v6547_v1, 0.0  ;;  %v6550_v32 = vadd.f32 %v12651_v39, %v6389_v53  ;;  %v7088_v33 = vpack.c.bf16 %v7064_v9, %v7063_v34 }
 0x723   : > { %v6992_v24 = vpack.c.bf16 %v6968_v23, %v6967_v22  ;;  %v7016_v56 = vld [vmem:[#allocation3 + $0xe1] sm:$0xff]  ;;  %v7162_v23 = vpop.permute.xlu1 %7161 }
 0x724   : > { %6651 = vst.msk [vmem:[#allocation3 + $0xf1] sm:$0xff] %vm170_vm0, %v6619_v28  ;;  %v6620_v54 = vmax.f32 %v6550_v32, 0.0  ;;  %9452 = vmatmul.mubr.msk.bf16.gmra.mrb[212].mxu0 %vm170_vm0, %v7088_v33  ;;  %v7040_v6 = vpack.c.bf16 %v7016_v56, %v7015_v45 }
 0x725   : > { %7319 = vrot.lane.b32.xlu0 %v6992_v24, %s9677_s17  ;;  %7225 = vrot.lane.b32.xlu1 %v6992_v24, %s9679_s20 }
 0x726   : > { %6652 = vst.msk [vmem:[#allocation3 + $0xf9] sm:$0xff] %vm170_vm0, %v6620_v54  ;;  %v9107_v12 = vpop.f32.mrb[176].mxu0 }
 0x727   : > { %v9108_v31 = vpop.f32.mrb[177].mxu0 }
 0x728   : > { %v9109_v0 = vadd.f32 %v9108_v31, %v9107_v12  ;;  %v9110_v39 = vpop.f32.mrb[178].mxu0  ;;  %v12882_v31 = vpop.permute.xlu0 %7335 }
 0x729   : > { %7367 = vrot.lane.b32.xlu0 %v7040_v6, %s9679_s20  ;;  %7131 = vrot.lane.b32.xlu1 %v7040_v6, %s9678_s19  ;;  %v9111_v41 = vpop.f32.mrb[179].mxu0 }
 0x72a   : > { %v6394_v43 = vadd.f32 %v9109_v0, %v12664_v11  ;;  %v9112_v21 = vadd.f32 %v9111_v41, %v9110_v39 }
 0x72b   : > { %v6969_v55 = vld [vmem:[#allocation3 + $0xf0] sm:$0xff] }
 0x72c   : > { %v6555_v10 = vadd.f32 %v12691_v57, %v6394_v43  ;;  %v6397_v60 = vadd.f32 %v9112_v21, %v12664_v11  ;;  %v7017_v28 = vld [vmem:[#allocation3 + $0xf1] sm:$0xff] }
 0x72d   : > { %7273 = vrot.lane.b32.xlu0 %v7088_v33, %s9678_s19  ;;  %7179 = vrot.lane.b32.xlu1 %v7088_v33, %s9677_s17  ;;  %v7065_v49 = vld [vmem:[#allocation3 + $0xf2] sm:$0xff]  ;;  %v7066_v7 = vld [vmem:[#allocation3 + $0xfa] sm:$0xff] }
 0x72e   : > { %v6970_v35 = vld [vmem:[#allocation3 + $0xf8] sm:$0xff]  ;;  %v7089_v1 = vpack.c.bf16 %v7066_v7, %v7065_v49  ;;  %v6621_v22 = vmax.f32 %v6555_v10, 0.0  ;;  %v6558_v34 = vadd.f32 %v12696_v20, %v6397_v60 }
 0x72f   : > { %v12863_v53 = vpack.c.bf16 %v6970_v35, %v6969_v55  ;;  %v7018_v9 = vld [vmem:[#allocation3 + $0xf9] sm:$0xff] }
 0x730   : > { %9455 = vmatprep.mubr.msk.bf16.mxu0 %vm170_vm0, %v7089_v1  ;;  %6653 = vst.msk [vmem:[#allocation3 + $0x109] sm:$0xff] %vm170_vm0, %v6621_v22  ;;  %v6622_v57 = vmax.f32 %v6558_v34, 0.0  ;;  %v12873_v33 = vpack.c.bf16 %v7018_v9, %v7017_v28  ;;  %v6665_v22 = vld [vmem:[#allocation3] sm:$0xff] }
 0x731   : > { %7321 = vrot.lane.b32.xlu0 %v12863_v53, %s9677_s17  ;;  %7227 = vrot.lane.b32.xlu1 %v12863_v53, %s9679_s20 }
 0x732   : > { %6654 = vst.msk [vmem:[#allocation3 + $0x111] sm:$0xff] %vm170_vm0, %v6622_v57  ;;  %v9113_v32 = vpop.f32.mrb[180].mxu0 }
 0x733   : > { %v9114_v20 = vpop.f32.mrb[181].mxu0 }
 0x734   : > { %v9115_v24 = vadd.f32 %v9114_v20, %v9113_v32  ;;  %v9116_v54 = vpop.f32.mrb[182].mxu0 }
 0x735   : > { %7369 = vrot.lane.b32.xlu0 %v12873_v33, %s9679_s20  ;;  %7133 = vrot.lane.b32.xlu1 %v12873_v33, %s9678_s19  ;;  %v9117_v56 = vpop.f32.mrb[183].mxu0 }
 0x736   : > { %v6402_v45 = vadd.f32 %v9115_v24, %v12664_v11  ;;  %v9118_v12 = vadd.f32 %v9117_v56, %v9116_v54 }
 0x737   : > { %v12880_v6 = vpop.permute.xlu1 %7209  ;;  %v6971_v41 = vld [vmem:[#allocation3 + $0x108] sm:$0xff] }
 0x738   : > { %v6563_v0 = vadd.f32 %v12686_v63, %v6402_v45  ;;  %v6405_v39 = vadd.f32 %v9118_v12, %v12664_v11  ;;  %v6666_v63 = vld [vmem:[#allocation3 + $0x8] sm:$0xff] }
 0x739   : > { %7275 = vrot.lane.b32.xlu0 %v7089_v1, %s9678_s19  ;;  %7181 = vrot.lane.b32.xlu1 %v7089_v1, %s9677_s17  ;;  %v7067_v43 = vld [vmem:[#allocation3 + $0x10a] sm:$0xff]  ;;  %v7068_v21 = vld [vmem:[#allocation3 + $0x112] sm:$0xff]  ;;  %v7258_v1 = vpop.permute.xlu0 %7257  ;;  %v6697_v57 = vpack.c.bf16 %v6666_v63, %v6665_v22 }
 0x73a   : > { %v6972_v55 = vld [vmem:[#allocation3 + $0x110] sm:$0xff]  ;;  %v6623_v10 = vmax.f32 %v6563_v0, 0.0  ;;  %v6566_v60 = vadd.f32 %v12694_v13, %v6405_v39  ;;  %v7090_v7 = vpack.c.bf16 %v7068_v21, %v7067_v43  ;;  %v7515_v21 = vsel %vm170_vm0, %v12727_v2, %v7258_v1 }
 0x73b   : > { %v12889_v49 = vpop.permute.xlu1 %7115  ;;  %v12891_v35 = vpack.c.bf16 %v6972_v55, %v6971_v41  ;;  %v7020_v34 = vld [vmem:[#allocation3 + $0x111] sm:$0xff]  ;;  %v7019_v13 = vld [vmem:[#allocation3 + $0x109] sm:$0xff]  ;;  %v7387_v12 = vsel %vm170_vm0, %v6697_v57, %v12857_v5 }
 0x73c   : > { %6655 = vst.msk [vmem:[#allocation3 + $0x121] sm:$0xff] %vm170_vm0, %v6623_v10  ;;  %v6624_v9 = vmax.f32 %v6566_v60, 0.0  ;;  %9456 = vmatmul.mubr.msk.bf16.gmra.mrb[216].mxu0 %vm170_vm0, %v7090_v7  ;;  %v12902_v20 = vpack.c.bf16 %v7020_v34, %v7019_v13  ;;  %v7434_v22 = vsel %vm1115_vm3, %v7387_v12, %v7162_v23 }
 0x73d   : > { %7323 = vrot.lane.b32.xlu0 %v12891_v35, %s9677_s17  ;;  %7229 = vrot.lane.b32.xlu1 %v12891_v35, %s9679_s20 }
 0x73e   : > { %6656 = vst.msk [vmem:[#allocation3 + $0x129] sm:$0xff] %vm170_vm0, %v6624_v9  ;;  %v9119_v32 = vpop.f32.mrb[184].mxu0 }
 0x73f   : > { %v12900_v28 = vpop.permute.xlu1 %7163  ;;  %v9120_v24 = vpop.f32.mrb[185].mxu0 }
 0x740   : > { %v9121_v54 = vadd.f32 %v9120_v24, %v9119_v32  ;;  %v9122_v56 = vpop.f32.mrb[186].mxu0 }
 0x741   : > { %7371 = vrot.lane.b32.xlu0 %v12902_v20, %s9679_s20  ;;  %7135 = vrot.lane.b32.xlu1 %v12902_v20, %s9678_s19  ;;  %v9123_v45 = vpop.f32.mrb[187].mxu0 }
 0x742   : > { %v6410_v0 = vadd.f32 %v9121_v54, %v12664_v11  ;;  %v9124_v39 = vadd.f32 %v9123_v45, %v9122_v56  ;;  %v7306_v41 = vpop.permute.xlu0 %7305  ;;  %v7466_v54 = vsel %vm1148_vm4, %v7434_v22, %v12880_v6 }
 0x743   : > { %v12911_v43 = vpop.permute.xlu1 %7211  ;;  %v6973_v60 = vld [vmem:[#allocation3 + $0x120] sm:$0xff]  ;;  %v7562_v5 = vsel %vm1115_vm3, %v7515_v21, %v7306_v41 }
 0x744   : > { %v6571_v55 = vadd.f32 %v12748_v40, %v6410_v0  ;;  %v6413_v10 = vadd.f32 %v9124_v39, %v12664_v11  ;;  %v7021_v45 = vld [vmem:[#allocation3 + $0x121] sm:$0xff]  ;;  %v6860_v39 = vld [vmem:[#allocation3 + $0x39] sm:$0xff] }
 0x745   : > { %7277 = vrot.lane.b32.xlu0 %v7090_v7, %s9678_s19  ;;  %7183 = vrot.lane.b32.xlu1 %v7090_v7, %s9677_s17  ;;  %v7069_v63 = vld [vmem:[#allocation3 + $0x122] sm:$0xff]  ;;  %v7070_v34 = vld [vmem:[#allocation3 + $0x12a] sm:$0xff] }
 0x746   : > { %v6974_v9 = vld [vmem:[#allocation3 + $0x128] sm:$0xff]  ;;  %v6625_v13 = vmax.f32 %v6571_v55, 0.0  ;;  %v6574_v57 = vadd.f32 %v12753_v51, %v6413_v10  ;;  %v7354_v2 = vpop.permute.xlu0 %7353  ;;  %v7091_v40 = vpack.c.bf16 %v7070_v34, %v7069_v63  ;;  %v6859_v55 = vld [vmem:[#allocation3 + $0x31] sm:$0xff] }
 0x747   : > { %v12922_v1 = vpop.permute.xlu1 %7117  ;;  %v12924_v32 = vpack.c.bf16 %v6974_v9, %v6973_v60  ;;  %v7594_v24 = vsel %vm1148_vm4, %v7562_v5, %v7354_v2  ;;  %v7022_v7 = vld [vmem:[#allocation3 + $0x129] sm:$0xff]  ;;  %v6890_v22 = vpack.c.bf16 %v6860_v39, %v6859_v55 }
 0x748   : > { %6657 = vst.msk [vmem:[#allocation3 + $0x139] sm:$0xff] %vm170_vm0, %v6625_v13  ;;  %v6626_v23 = vmax.f32 %v6574_v57, 0.0  ;;  %7874 = vmatprep.mubr.bf16.mxu1 %v7594_v24  ;;  %9459 = vmatprep.mubr.msk.bf16.mxu0 %vm170_vm0, %v7091_v40  ;;  %v12938_v0 = vpack.c.bf16 %v7022_v7, %v7021_v45 }
 0x749   : > { %7325 = vrot.lane.b32.xlu0 %v12924_v32, %s9677_s17  ;;  %7231 = vrot.lane.b32.xlu1 %v12924_v32, %s9679_s20 }
 0x74a   : > { %6658 = vst.msk [vmem:[#allocation3 + $0x141] sm:$0xff] %vm170_vm0, %v6626_v23  ;;  %7875 = vmatmul.mubr.bf16.vlgmr.msra.gmra.mrb[184].mxu1 %v7466_v54  ;;  %v7260_v51 = vpop.permute.xlu0 %7259  ;;  %v9125_v12 = vpop.f32.mrb[188].mxu0 }
 0x74b   : > { %v12936_v56 = vpop.permute.xlu1 %7165  ;;  %v9126_v41 = vpop.f32.mrb[189].mxu0  ;;  %v7518_v13 = vsel %vm170_vm0, %v6890_v22, %v7260_v51  ;;  %v7390_v51 = vsel %vm170_vm0, %v12714_v48, %v12889_v49 }
 0x74c   : > { %v9127_v21 = vadd.f32 %v9126_v41, %v9125_v12  ;;  %v9128_v6 = vpop.f32.mrb[190].mxu0 }
 0x74d   : > { %7373 = vrot.lane.b32.xlu0 %v12938_v0, %s9679_s20  ;;  %7137 = vrot.lane.b32.xlu1 %v12938_v0, %s9678_s19  ;;  %v9129_v10 = vpop.f32.mrb[191].mxu0 }
 0x74e   : > { %v7308_v60 = vpop.permute.xlu0 %7307  ;;  %v6418_v5 = vadd.f32 %v9127_v21, %v12664_v11  ;;  %v9130_v63 = vadd.f32 %v9129_v10, %v9128_v6  ;;  %v7436_v6 = vsel %vm1115_vm3, %v7390_v51, %v12900_v28  ;;  %v6669_v51 = vld [vmem:[#allocation3 + $0x30] sm:$0xff] }
 0x74f   : > { %v12945_v34 = vpop.permute.xlu1 %7213  ;;  %v6975_v9 = vld [vmem:[#allocation3 + $0x138] sm:$0xff]  ;;  %v7564_v54 = vsel %vm1115_vm3, %v7518_v13, %v7308_v60  ;;  %v7469_v48 = vsel %vm1148_vm4, %v7436_v6, %v12911_v43 }
 0x750   : > { %v6579_v57 = vadd.f32 %v12745_v17, %v6418_v5  ;;  %v6421_v2 = vadd.f32 %v9130_v63, %v12664_v11  ;;  %v7023_v28 = vld [vmem:[#allocation3 + $0x139] sm:$0xff]  ;;  %v6862_v63 = vld [vmem:[#allocation3 + $0x51] sm:$0xff] }
 0x751   : > { %7279 = vrot.lane.b32.xlu0 %v7091_v40, %s9678_s19  ;;  %7185 = vrot.lane.b32.xlu1 %v7091_v40, %s9677_s17  ;;  %v7071_v24 = vld [vmem:[#allocation3 + $0x13a] sm:$0xff]  ;;  %v7072_v23 = vld [vmem:[#allocation3 + $0x142] sm:$0xff] }
 0x752   : > { %v6976_v7 = vld [vmem:[#allocation3 + $0x140] sm:$0xff]  ;;  %v7356_v45 = vpop.permute.xlu0 %7355  ;;  %v7092_v12 = vpack.c.bf16 %v7072_v23, %v7071_v24  ;;  %v6627_v17 = vmax.f32 %v6579_v57, 0.0  ;;  %v6582_v41 = vadd.f32 %v12751_v15, %v6421_v2  ;;  %v6670_v57 = vld [vmem:[#allocation3 + $0x38] sm:$0xff]  ;;  %v6861_v2 = vld [vmem:[#allocation3 + $0x49] sm:$0xff] }
 0x753   : > { %v12953_v39 = vpack.c.bf16 %v6976_v7, %v6975_v9  ;;  %v12959_v21 = vpop.permute.xlu1 %7119  ;;  %v7597_v40 = vsel %vm1148_vm4, %v7564_v54, %v7356_v45  ;;  %v7024_v55 = vld [vmem:[#allocation3 + $0x141] sm:$0xff]  ;;  %v6891_v54 = vpack.c.bf16 %v6862_v63, %v6861_v2 }
 0x754   : > { %7882 = vmatprep.mubr.bf16.mxu1 %v7597_v40  ;;  %9460 = vmatmul.mubr.msk.bf16.gmra.mrb[220].mxu0 %vm170_vm0, %v7092_v12  ;;  %6659 = vst.msk [vmem:[#allocation3 + $0x151] sm:$0xff] %vm170_vm0, %v6627_v17  ;;  %v6628_v10 = vmax.f32 %v6582_v41, 0.0  ;;  %v12975_v5 = vpack.c.bf16 %v7024_v55, %v7023_v28  ;;  %v6699_v40 = vpack.c.bf16 %v6670_v57, %v6669_v51 }
 0x755   : > { %7327 = vrot.lane.b32.xlu0 %v12953_v39, %s9677_s17  ;;  %7233 = vrot.lane.b32.xlu1 %v12953_v39, %s9679_s20 }
 0x756   : > { %7883 = vmatmul.mubr.bf16.gmra.mrb[188].mxu1 %v7469_v48  ;;  %v7262_v15 = vpop.permute.xlu0 %7261  ;;  %v9131_v49 = vpop.f32.mrb[192].mxu0  ;;  %6660 = vst.msk [vmem:[#allocation3 + $0x159] sm:$0xff] %vm170_vm0, %v6628_v10 }
 0x757   : > { %v12973_v60 = vpop.permute.xlu1 %7167  ;;  %v9132_v22 = vpop.f32.mrb[193].mxu0  ;;  %v7521_v6 = vsel %vm170_vm0, %v6891_v54, %v7262_v15 }
 0x758   : > { %v9133_v9 = vadd.f32 %v9132_v22, %v9131_v49  ;;  %v9134_v13 = vpop.f32.mrb[194].mxu0 }
 0x759   : > { %7375 = vrot.lane.b32.xlu0 %v12975_v5, %s9679_s20  ;;  %7139 = vrot.lane.b32.xlu1 %v12975_v5, %s9678_s19  ;;  %v9135_v43 = vpop.f32.mrb[195].mxu0 }
 0x75a   : > { %v6426_v24 = vadd.f32 %v9133_v9, %v12664_v11  ;;  %v9136_v23 = vadd.f32 %v9135_v43, %v9134_v13  ;;  %v7310_v7 = vpop.permute.xlu0 %7309 }
 0x75b   : > { %v12982_v45 = vpop.permute.xlu1 %7215  ;;  %v6977_v55 = vld [vmem:[#allocation3 + $0x150] sm:$0xff]  ;;  %v7566_v49 = vsel %vm1115_vm3, %v7521_v6, %v7310_v7 }
 0x75c   : > { %v6587_v17 = vadd.f32 %v12765_v36, %v6426_v24  ;;  %v6429_v41 = vadd.f32 %v9136_v23, %v12664_v11  ;;  %v7393_v11 = vsel %vm170_vm0, %v6699_v40, %v12922_v1  ;;  %v7025_v40 = vld [vmem:[#allocation3 + $0x151] sm:$0xff] }
 0x75d   : > { %7281 = vrot.lane.b32.xlu0 %v7092_v12, %s9678_s19  ;;  %7187 = vrot.lane.b32.xlu1 %v7092_v12, %s9677_s17  ;;  %v7073_v63 = vld [vmem:[#allocation3 + $0x152] sm:$0xff]  ;;  %v7074_v9 = vld [vmem:[#allocation3 + $0x15a] sm:$0xff] }
 0x75e   : > { %v6629_v10 = vmax.f32 %v6587_v17, 0.0  ;;  %v6590_v48 = vadd.f32 %v12774_v52, %v6429_v41  ;;  %v7358_v28 = vpop.permute.xlu0 %7357  ;;  %v9137_v22 = vpop.f32.mrb[196].mxu0  ;;  %v6978_v36 = vld [vmem:[#allocation3 + $0x158] sm:$0xff]  ;;  %v7093_v12 = vpack.c.bf16 %v7074_v9, %v7073_v63  ;;  %v7438_v52 = vsel %vm1115_vm3, %v7393_v11, %v12936_v56  ;;  %v9611_v56 = vld [vmem:[%s13442_s2 + $0x3] ss:$0 sm:$0xff]  ;;  %v6863_v63 = vld [vmem:[#allocation3 + $0x61] sm:$0xff] }
 0x75f   : > { %v12993_v13 = vpop.permute.xlu1 %7121  ;;  %v9138_v15 = vpop.f32.mrb[197].mxu0  ;;  %v7600_v43 = vsel %vm1148_vm4, %v7566_v49, %v7358_v28  ;;  %v12996_v57 = vpack.c.bf16 %v6978_v36, %v6977_v55  ;;  %v7026_v7 = vld [vmem:[#allocation3 + $0x159] sm:$0xff]  ;;  %v7472_v54 = vsel %vm1148_vm4, %v7438_v52, %v12945_v34  ;;  %v6672_v49 = vld [vmem:[#allocation3 + $0x50] sm:$0xff]  ;;  %v6671_v36 = vld [vmem:[#allocation3 + $0x48] sm:$0xff] }
 0x760   : > { %6661 = vst.msk [vmem:[#allocation3 + $0x169] sm:$0xff] %vm170_vm0, %v6629_v10  ;;  %v6630_v2 = vmax.f32 %v6590_v48, 0.0  ;;  %v9139_v24 = vadd.f32 %v9138_v15, %v9137_v22  ;;  %v9140_v23 = vpop.f32.mrb[198].mxu0  ;;  %7890 = vmatprep.mubr.bf16.mxu1 %v7600_v43  ;;  %9463 = vmatprep.mubr.msk.bf16.mxu0 %vm170_vm0, %v7093_v12  ;;  %v13014_v55 = vpack.c.bf16 %v7026_v7, %v7025_v40  ;;  %v6864_v48 = vld [vmem:[#allocation3 + $0x69] sm:$0xff] }
 0x761   : > { %7329 = vrot.lane.b32.xlu0 %v12996_v57, %s9677_s17  ;;  %v9141_v1 = vpop.f32.mrb[199].mxu0  ;;  %7235 = vrot.lane.b32.xlu1 %v12996_v57, %s9679_s20  ;;  %v6892_v11 = vpack.c.bf16 %v6864_v48, %v6863_v63  ;;  %v6700_v43 = vpack.c.bf16 %v6672_v49, %v6671_v36  ;;  %v6866_v49 = vld [vmem:[#allocation3 + $0x81] sm:$0xff]  ;;  %v6865_v63 = vld [vmem:[#allocation3 + $0x79] sm:$0xff] }
 0x762   : > { %6662 = vst.msk [vmem:[#allocation3 + $0x171] sm:$0xff] %vm170_vm0, %v6630_v2  ;;  %v6434_v51 = vadd.f32 %v9611_v56, %v9139_v24  ;;  %v9142_v17 = vadd.f32 %v9141_v1, %v9140_v23  ;;  %7891 = vmatmul.mubr.bf16.gmra.mrb[192].mxu1 %v7472_v54  ;;  %v7264_v41 = vpop.permute.xlu0 %7263 }
 0x763   : > { %v13012_v6 = vpop.permute.xlu1 %7169  ;;  %v7524_v2 = vsel %vm170_vm0, %v6892_v11, %v7264_v41  ;;  %v7396_v7 = vsel %vm170_vm0, %v6700_v43, %v12959_v21  ;;  %v6673_v11 = vld [vmem:[#allocation3 + $0x60] sm:$0xff]  ;;  %v6893_v43 = vpack.c.bf16 %v6866_v49, %v6865_v63 }
 0x764   : > { %v6595_v34 = vadd.f32 %v12763_v18, %v6434_v51  ;;  %v6437_v10 = vadd.f32 %v9611_v56, %v9142_v17  ;;  %v7440_v17 = vsel %vm1115_vm3, %v7396_v7, %v12973_v60  ;;  %v6676_v63 = vld [vmem:[#allocation3 + $0x80] sm:$0xff] }
 0x765   : > { %7377 = vrot.lane.b32.xlu0 %v13014_v55, %s9679_s20  ;;  %7141 = vrot.lane.b32.xlu1 %v13014_v55, %s9678_s19  ;;  %v7475_v21 = vsel %vm1148_vm4, %v7440_v17, %v12982_v45 }
 0x766   : > { %v6631_v28 = vmax.f32 %v6595_v34, 0.0  ;;  %v6598_v22 = vadd.f32 %v12772_v59, %v6437_v10 }
 0x767   : > { %v7312_v9 = vpop.permute.xlu0 %7311  ;;  %v13022_v15 = vpop.permute.xlu1 %7217  ;;  %v6979_v52 = vld [vmem:[#allocation3 + $0x168] sm:$0xff] }
 0x768   : > { %6663 = vst.msk [vmem:[#allocation3 + $0x181] sm:$0xff] %vm170_vm0, %v6631_v28  ;;  %v6632_v18 = vmax.f32 %v6598_v22, 0.0  ;;  %v7568_v1 = vsel %vm1115_vm3, %v7524_v2, %v7312_v9  ;;  %v7027_v60 = vld [vmem:[#allocation3 + $0x169] sm:$0xff] }
 0x769   : > { %7283 = vrot.lane.b32.xlu0 %v7093_v12, %s9678_s19  ;;  %v7075_v24 = vld [vmem:[#allocation3 + $0x16a] sm:$0xff]  ;;  %v7076_v59 = vld [vmem:[#allocation3 + $0x172] sm:$0xff]  ;;  %7189 = vrot.lane.b32.xlu1 %v7093_v12, %s9677_s17 }
 0x76a   : > { %v6980_v23 = vld [vmem:[#allocation3 + $0x170] sm:$0xff]  ;;  %6664 = vst.msk [vmem:[#allocation3 + $0x189] sm:$0xff] %vm170_vm0, %v6632_v18  ;;  %v7094_v56 = vpack.c.bf16 %v7076_v59, %v7075_v24  ;;  %v6674_v28 = vld [vmem:[#allocation3 + $0x68] sm:$0xff]  ;;  %v7079_v24 = vld [vmem:[#allocation3 + $0x19a] sm:$0xff] }
 0x76b   : > { %v7360_v54 = vpop.permute.xlu0 %7359  ;;  %v13032_v51 = vpack.c.bf16 %v6980_v23, %v6979_v52  ;;  %v13036_v41 = vpop.permute.xlu1 %7123  ;;  %v7028_v34 = vld [vmem:[#allocation3 + $0x171] sm:$0xff]  ;;  %v6701_v52 = vpack.c.bf16 %v6674_v28, %v6673_v11  ;;  %v7080_v59 = vld [vmem:[#allocation3 + $0x1a2] sm:$0xff] }
 0x76c   : > { %v7603_v40 = vsel %vm1148_vm4, %v7568_v1, %v7360_v54  ;;  %9464 = vmatmul.mubr.msk.bf16.gmra.mrb[224].mxu0 %vm170_vm0, %v7094_v56  ;;  %v13046_v48 = vpack.c.bf16 %v7028_v34, %v7027_v60  ;;  %v7096_v7 = vpack.c.bf16 %v7080_v59, %v7079_v24 }
 0x76d   : > { %7898 = vmatprep.mubr.bf16.mxu1 %v7603_v40  ;;  %7331 = vrot.lane.b32.xlu0 %v13032_v51, %s9677_s17  ;;  %v7399_v1 = vsel %vm170_vm0, %v6701_v52, %v12993_v13  ;;  %v6675_v52 = vld [vmem:[#allocation3 + $0x78] sm:$0xff] }
 0x76e   : > { %7899 = vmatmul.mubr.bf16.gmra.mrb[196].mxu1 %v7475_v21  ;;  %7237 = vrot.lane.b32.xlu1 %v13032_v51, %s9679_s20  ;;  %v7442_v21 = vsel %vm1115_vm3, %v7399_v1, %v13012_v6  ;;  %v6702_v59 = vpack.c.bf16 %v6676_v63, %v6675_v52 }
 0x76f   : > { %v7266_v12 = vpop.permute.xlu0 %7265  ;;  %v7172_v10 = vpop.permute.xlu1 %7171  ;;  %v6981_v40 = vld [vmem:[#allocation3 + $0x180] sm:$0xff] }
 0x770   : > { %v7527_v23 = vsel %vm170_vm0, %v6893_v43, %v7266_v12  ;;  %v7478_v12 = vsel %vm1148_vm4, %v7442_v21, %v13022_v15  ;;  %v7029_v28 = vld [vmem:[#allocation3 + $0x181] sm:$0xff]  ;;  %v7031_v43 = vld [vmem:[#allocation3 + $0x199] sm:$0xff]  ;;  %v7402_v1 = vsel %vm170_vm0, %v6702_v59, %v13036_v41 }
 0x771   : > { %7379 = vrot.lane.b32.xlu0 %v13046_v48, %s9679_s20  ;;  %v7077_v22 = vld [vmem:[#allocation3 + $0x182] sm:$0xff]  ;;  %v7078_v45 = vld [vmem:[#allocation3 + $0x18a] sm:$0xff] }
 0x772   : > { %7143 = vrot.lane.b32.xlu1 %v13046_v48, %s9678_s19  ;;  %v7095_v36 = vpack.c.bf16 %v7078_v45, %v7077_v22  ;;  %v6982_v2 = vld [vmem:[#allocation3 + $0x188] sm:$0xff]  ;;  %v6868_v45 = vld [vmem:[#allocation3 + $0x99] sm:$0xff] }
 0x773   : > { %v7314_v9 = vpop.permute.xlu0 %7313  ;;  %v7220_v18 = vpop.permute.xlu1 %7219  ;;  %v6999_v60 = vpack.c.bf16 %v6982_v2, %v6981_v40  ;;  %v7030_v13 = vld [vmem:[#allocation3 + $0x189] sm:$0xff]  ;;  %v7032_v15 = vld [vmem:[#allocation3 + $0x1a1] sm:$0xff]  ;;  %v7444_v40 = vsel %vm1115_vm3, %v7402_v1, %v7172_v10 }
 0x774   : > { %9467 = vmatprep.mubr.msk.bf16.mxu0 %vm170_vm0, %v7095_v36  ;;  %v7570_v54 = vsel %vm1115_vm3, %v7527_v23, %v7314_v9  ;;  %v13067_v6 = vpack.c.bf16 %v7030_v13, %v7029_v28  ;;  %v6867_v9 = vld [vmem:[#allocation3 + $0x91] sm:$0xff]  ;;  %v6869_v28 = vld [vmem:[#allocation3 + $0xa9] sm:$0xff] }
 0x775   : > { %7285 = vrot.lane.b32.xlu0 %v7094_v56, %s9678_s19  ;;  %9468 = vmatmul.mubr.msk.bf16.gmra.mrb[228].mxu0 %vm170_vm0, %v7096_v7  ;;  %v6894_v2 = vpack.c.bf16 %v6868_v45, %v6867_v9  ;;  %v7048_v7 = vpack.c.bf16 %v7032_v15, %v7031_v43  ;;  %v6870_v13 = vld [vmem:[#allocation3 + $0xb1] sm:$0xff] }
 0x776   : > { %7191 = vrot.lane.b32.xlu1 %v7094_v56, %s9677_s17  ;;  %v6677_v45 = vld [vmem:[#allocation3 + $0x90] sm:$0xff]  ;;  %v6895_v63 = vpack.c.bf16 %v6870_v13, %v6869_v28 }
 0x777   : > { %v7362_v17 = vpop.permute.xlu0 %7361  ;;  %v7126_v34 = vpop.permute.xlu1 %7125 }
 0x778   : > { %v7606_v49 = vsel %vm1148_vm4, %v7570_v54, %v7362_v17 }
 0x779   : > { %7906 = vmatprep.mubr.bf16.mxu1 %v7606_v49  ;;  %7333 = vrot.lane.b32.xlu0 %v6999_v60, %s9677_s17  ;;  %v7481_v49 = vsel %vm1148_vm4, %v7444_v40, %v7220_v18  ;;  %v6871_v40 = vld [vmem:[#allocation3 + $0xc1] sm:$0xff]  ;;  %s161_s17 = sand.u32 1, %s9666_s13  }
 0x77a   : > { %7907 = vmatmul.mubr.bf16.gmra.mrb[200].mxu1 %v7478_v12  ;;  %7239 = vrot.lane.b32.xlu1 %v6999_v60, %s9679_s20  ;;  %s8308_s27 = sshll.u32 %s161_s17, 8  ;;  %s13399_s16 = scalar_lea.sflag [#allocation5], %s161_s17 }
 0x77b   : > { %v7268_v56 = vpop.permute.xlu0 %7267  ;;  %v7174_v22 = vpop.permute.xlu1 %7173  ;;  %s13207_s28 = scalar_lea.vmem [#allocation4], %s8308_s27 }
 0x77c   : > { %v7530_v23 = vsel %vm170_vm0, %v6894_v2, %v7268_v56  ;;  %v6678_v56 = vld [vmem:[#allocation3 + $0x98] sm:$0xff]  ;;  %s8242_s30 = sshll.u32 %s13207_s28, 4  ;;  %s13390_s30 = int_to_ptr.vmem [resolvable:$true] %s8242_s30 }
 0x77d   : > { %7381 = vrot.lane.b32.xlu0 %v13067_v6, %s9679_s20  ;;  %s9612_s9 = scalar_lea.vmem %s13390_s30, 4096  ;;  %p9619_p0 = scmp.lt.s32.totalorder %s13390_s30, %s9617_s8 }
 0x77e   : > { %p9613_p11 = scmp.ne.s32.totalorder %s13390_s30, %s9612_s9  ;;  %p9620_p1 = scmp.lt.s32.totalorder %s9618_s10, %s9612_s9 }
 0x77f   : > { %v7316_v11 = vpop.permute.xlu0 %7315  ;;  %v7222_v24 = vpop.permute.xlu1 %7221 }
 0x780   : > { %v7572_v54 = vsel %vm1115_vm3, %v7530_v23, %v7316_v11  ;;  %v6703_v11 = vpack.c.bf16 %v6678_v56, %v6677_v45  ;;  %p9614_p12 = pnand %p9613_p11, %p9741_p5  ;;  %p9621_p2 = por %p9620_p1, %p9619_p0 }
 0x781   : > { %7287 = vrot.lane.b32.xlu0 %v7095_v36, %s9678_s19 }
 0x782   : > { %v7405_v43 = vsel %vm170_vm0, %v6703_v11, %v7126_v34  ;;  %p9615_p13 = pneg %p9614_p12 }
 0x783   : > { %v7364_v17 = vpop.permute.xlu0 %7363  ;;  %v7128_v21 = vpop.permute.xlu1 %7127  ;;  %v7446_v52 = vsel %vm1115_vm3, %v7405_v43, %v7174_v22 }
 0x784   : > { %v7609_v60 = vsel %vm1148_vm4, %v7572_v54, %v7364_v17  ;;  %v7484_v23 = vsel %vm1148_vm4, %v7446_v52, %v7222_v24  ;;  %v6872_v54 = vld [vmem:[#allocation3 + $0xc9] sm:$0xff]  ;;  %v6873_v52 = vld [vmem:[#allocation3 + $0xd9] sm:$0xff]  ;;  %p9622_p3 = pnand %p9621_p2, %p9615_p13 }
 0x785   : > { %7914 = vmatprep.mubr.bf16.mxu1 %v7609_v60  ;;  %7383 = vrot.lane.b32.xlu0 %v7048_v7, %s9679_s20  ;;  %v6680_v17 = vld [vmem:[#allocation3 + $0xb0] sm:$0xff]  ;;  %v6896_v34 = vpack.c.bf16 %v6872_v54, %v6871_v40 }
 0x786   : > { %7915 = vmatmul.mubr.bf16.gmra.mrb[204].mxu1 %v7481_v49  ;;  %v6679_v49 = vld [vmem:[#allocation3 + $0xa8] sm:$0xff] }
 0x787   : > { %v7270_v12 = vpop.permute.xlu0 %7269  ;;  %v7176_v36 = vpop.permute.xlu1 %7175  ;;  %v6704_v13 = vpack.c.bf16 %v6680_v17, %v6679_v49 }
 0x788   : > { %v7533_v10 = vsel %vm170_vm0, %v6895_v63, %v7270_v12 }
 0x789   : > { %v7408_v22 = vsel %vm170_vm0, %v6704_v13, %v7128_v21 }
 0x78a   : > { %v7448_v24 = vsel %vm1115_vm3, %v7408_v22, %v7176_v36 }
 0x78b   : > { %v7318_v41 = vpop.permute.xlu0 %7317  ;;  %v7224_v9 = vpop.permute.xlu1 %7223 }
 0x78c   : > { %v7574_v15 = vsel %vm1115_vm3, %v7533_v10, %v7318_v41  ;;  %v7487_v11 = vsel %vm1148_vm4, %v7448_v24, %v7224_v9  ;;  %v6683_v24 = vld [vmem:[#allocation3 + $0xd8] sm:$0xff] }
 0x78f   : > { %v7366_v18 = vpop.permute.xlu0 %7365  ;;  %v7130_v2 = vpop.permute.xlu1 %7129 }
 0x790   : > { %v7612_v59 = vsel %vm1148_vm4, %v7574_v15, %v7366_v18  ;;  %v6874_v15 = vld [vmem:[#allocation3 + $0xe1] sm:$0xff] }
 0x791   : > { %7922 = vmatprep.mubr.bf16.mxu1 %v7612_v59  ;;  %v6682_v18 = vld [vmem:[#allocation3 + $0xc8] sm:$0xff]  ;;  %v6897_v21 = vpack.c.bf16 %v6874_v15, %v6873_v52 }
 0x792   : > { %7923 = vmatmul.mubr.bf16.gmra.mrb[208].mxu1 %v7484_v23  ;;  %v6681_v23 = vld [vmem:[#allocation3 + $0xc0] sm:$0xff] }
 0x793   : > { %v7272_v7 = vpop.permute.xlu0 %7271  ;;  %v7178_v1 = vpop.permute.xlu1 %7177  ;;  %v6705_v54 = vpack.c.bf16 %v6682_v18, %v6681_v23 }
 0x794   : > { %v7536_v56 = vsel %vm170_vm0, %v6896_v34, %v7272_v7 }
 0x795   : > { %v7411_v36 = vsel %vm170_vm0, %v6705_v54, %v7130_v2 }
 0x796   : > { %v7450_v9 = vsel %vm1115_vm3, %v7411_v36, %v7178_v1 }
 0x797   : > { %v7320_v60 = vpop.permute.xlu0 %7319  ;;  %v7226_v12 = vpop.permute.xlu1 %7225 }
 0x798   : > { %v7576_v28 = vsel %vm1115_vm3, %v7536_v56, %v7320_v60  ;;  %v7490_v13 = vsel %vm1148_vm4, %v7450_v9, %v7226_v12 }
 0x79b   : > { %v7368_v41 = vpop.permute.xlu0 %7367  ;;  %v7132_v45 = vpop.permute.xlu1 %7131 }
 0x79c   : > { %v7615_v63 = vsel %vm1148_vm4, %v7576_v28, %v7368_v41  ;;  %v6684_v28 = vld [vmem:[#allocation3 + $0xe0] sm:$0xff] }
 0x79d   : > { %7930 = vmatprep.mubr.bf16.mxu1 %v7615_v63 }
 0x79e   : > { %7931 = vmatmul.mubr.bf16.gmra.mrb[212].mxu1 %v7487_v11  ;;  %v6706_v11 = vpack.c.bf16 %v6684_v28, %v6683_v24 }
 0x79f   : > { %v7274_v10 = vpop.permute.xlu0 %7273  ;;  %v7180_v43 = vpop.permute.xlu1 %7179 }
 0x7a0   : > { %v7539_v17 = vsel %vm170_vm0, %v6897_v21, %v7274_v10  ;;  %v7414_v15 = vsel %vm170_vm0, %v6706_v11, %v7132_v45 }
 0x7a3   : > { %v7322_v59 = vpop.permute.xlu0 %7321  ;;  %v7228_v7 = vpop.permute.xlu1 %7227 }
 0x7a4   : > { %v7578_v40 = vsel %vm1115_vm3, %v7539_v17, %v7322_v59  ;;  %v7452_v59 = vsel %vm1115_vm3, %v7414_v15, %v7180_v43 }
 0x7a5   : > { %v7493_v17 = vsel %vm1148_vm4, %v7452_v59, %v7228_v7 }
 0x7a7   : > { %v7370_v60 = vpop.permute.xlu0 %7369  ;;  %v7134_v49 = vpop.permute.xlu1 %7133 }
 0x7a8   : > { %v7618_v34 = vsel %vm1148_vm4, %v7578_v40, %v7370_v60  ;;  %v7417_v9 = vsel %vm170_vm0, %v12863_v53, %v7134_v49 }
 0x7a9   : > { %7938 = vmatprep.mubr.bf16.mxu1 %v7618_v34 }
 0x7aa   : > { %7939 = vmatmul.mubr.bf16.gmra.mrb[216].mxu1 %v7490_v13 }
 0x7ab   : > { %v7276_v56 = vpop.permute.xlu0 %7275  ;;  %v7182_v22 = vpop.permute.xlu1 %7181 }
 0x7ac   : > { %v7542_v10 = vsel %vm170_vm0, %v12873_v33, %v7276_v56  ;;  %v7454_v56 = vsel %vm1115_vm3, %v7417_v9, %v7182_v22 }
 0x7af   : > { %v7324_v41 = vpop.permute.xlu0 %7323  ;;  %v7230_v63 = vpop.permute.xlu1 %7229 }
 0x7b0   : > { %v13098_v2 = vpop.f32.mrb[200].mxu0  ;;  %v7580_v18 = vsel %vm1115_vm3, %v7542_v10, %v7324_v41  ;;  %v7496_v7 = vsel %vm1148_vm4, %v7454_v56, %v7230_v63 }
 0x7b1   : > { %v13102_v1 = vpop.f32.mrb[201].mxu0 }
 0x7b2   : > { %v13106_v12 = vpop.f32.mrb[202].mxu0 }
 0x7b3   : > { %v7372_v52 = vpop.permute.xlu0 %7371  ;;  %v13109_v23 = vpop.f32.mrb[203].mxu0 }
 0x7b4   : > { %v7136_v21 = vpop.permute.xlu1 %7135  ;;  %v7621_v54 = vsel %vm1148_vm4, %v7580_v18, %v7372_v52 }
 0x7b5   : > { %7946 = vmatprep.mubr.bf16.mxu1 %v7621_v54  ;;  %v7420_v18 = vsel %vm170_vm0, %v12891_v35, %v7136_v21 }
 0x7b6   : > { %7947 = vmatmul.mubr.bf16.gmra.mrb[220].mxu1 %v7493_v17 }
 0x7b7   : > { %v7278_v33 = vpop.permute.xlu0 %7277 }
 0x7b8   : > { %v7184_v36 = vpop.permute.xlu1 %7183  ;;  %v7545_v60 = vsel %vm170_vm0, %v12902_v20, %v7278_v33 }
 0x7b9   : > { %v7456_v54 = vsel %vm1115_vm3, %v7420_v18, %v7184_v36 }
 0x7bb   : > { %v7326_v40 = vpop.permute.xlu0 %7325 }
 0x7bc   : > { %v7232_v45 = vpop.permute.xlu1 %7231  ;;  %v7582_v43 = vsel %vm1115_vm3, %v7545_v60, %v7326_v40 }
 0x7bd   : > { %v7499_v33 = vsel %vm1148_vm4, %v7456_v54, %v7232_v45 }
 0x7bf   : > { %v7374_v34 = vpop.permute.xlu0 %7373 }
 0x7c0   : > { %v7138_v13 = vpop.permute.xlu1 %7137  ;;  %v7624_v28 = vsel %vm1148_vm4, %v7582_v43, %v7374_v34 }
 0x7c1   : > { %7954 = vmatprep.mubr.bf16.mxu1 %v7624_v28  ;;  %v7423_v35 = vsel %vm170_vm0, %v12924_v32, %v7138_v13 }
 0x7c2   : > { %7955 = vmatmul.mubr.bf16.gmra.mrb[224].mxu1 %v7496_v7 }
 0x7c3   : > { %v7280_v41 = vpop.permute.xlu0 %7279 }
 0x7c4   : > { %v7186_v24 = vpop.permute.xlu1 %7185  ;;  %v7548_v49 = vsel %vm170_vm0, %v12938_v0, %v7280_v41 }
 0x7c5   : > { %v7458_v36 = vsel %vm1115_vm3, %v7423_v35, %v7186_v24 }
 0x7c7   : > { %v13121_v11 = vpop.f32.mrb[204].mxu0  ;;  %v7328_v20 = vpop.permute.xlu0 %7327 }
 0x7c8   : > { %v7234_v10 = vpop.permute.xlu1 %7233  ;;  %v13123_v15 = vpop.f32.mrb[205].mxu0  ;;  %v7584_v63 = vsel %vm1115_vm3, %v7548_v49, %v7328_v20 }
 0x7c9   : > { %v13125_v53 = vpop.f32.mrb[206].mxu0  ;;  %v7502_v45 = vsel %vm1148_vm4, %v7458_v36, %v7234_v10 }
 0x7ca   : > { %v13129_v22 = vpop.f32.mrb[207].mxu0 }
 0x7cb   : > { %v7376_v52 = vpop.permute.xlu0 %7375 }
 0x7cc   : > { %v7140_v59 = vpop.permute.xlu1 %7139  ;;  %v7627_v17 = vsel %vm1148_vm4, %v7584_v63, %v7376_v52 }
 0x7cd   : > { %7962 = vmatprep.mubr.bf16.mxu1 %v7627_v17  ;;  %v7426_v18 = vsel %vm170_vm0, %v12953_v39, %v7140_v59 }
 0x7ce   : > { %7963 = vmatmul.mubr.bf16.gmra.mrb[228].mxu1 %v7499_v33 }
 0x7cf   : > { %v7282_v40 = vpop.permute.xlu0 %7281 }
 0x7d0   : > { %v7188_v60 = vpop.permute.xlu1 %7187  ;;  %v7551_v43 = vsel %vm170_vm0, %v12975_v5, %v7282_v40 }
 0x7d1   : > { %v7460_v52 = vsel %vm1115_vm3, %v7426_v18, %v7188_v60 }
 0x7d3   : > { %v7330_v0 = vpop.permute.xlu0 %7329 }
 0x7d4   : > { %v7236_v9 = vpop.permute.xlu1 %7235  ;;  %v7586_v21 = vsel %vm1115_vm3, %v7551_v43, %v7330_v0 }
 0x7d5   : > { %v7505_v33 = vsel %vm1148_vm4, %v7460_v52, %v7236_v9 }
 0x7d7   : > { %v7378_v34 = vpop.permute.xlu0 %7377 }
 0x7d8   : > { %v7142_v56 = vpop.permute.xlu1 %7141  ;;  %v7630_v28 = vsel %vm1148_vm4, %v7586_v21, %v7378_v34 }
 0x7d9   : > { %7970 = vmatprep.mubr.bf16.mxu1 %v7630_v28  ;;  %v7429_v39 = vsel %vm170_vm0, %v12996_v57, %v7142_v56 }
 0x7da   : > { %7971 = vmatmul.mubr.bf16.gmra.mrb[232].mxu1 %v7502_v45 }
 0x7db   : > { %v7284_v7 = vpop.permute.xlu0 %7283 }
 0x7dc   : > { %v7190_v41 = vpop.permute.xlu1 %7189  ;;  %v7554_v24 = vsel %vm170_vm0, %v13014_v55, %v7284_v7 }
 0x7dd   : > { %v7462_v60 = vsel %vm1115_vm3, %v7429_v39, %v7190_v41 }
 0x7df   : > { %v13145_v20 = vpop.f32.mrb[208].mxu0  ;;  %v7332_v5 = vpop.permute.xlu0 %7331 }
 0x7e0   : > { %v13147_v49 = vpop.f32.mrb[209].mxu0  ;;  %v7588_v10 = vsel %vm1115_vm3, %v7554_v24, %v7332_v5  ;;  %v7238_v54 = vpop.permute.xlu1 %7237 }
 0x7e1   : > { %v13149_v32 = vpop.f32.mrb[210].mxu0  ;;  %v7508_v9 = vsel %vm1148_vm4, %v7462_v60, %v7238_v54 }
 0x7e2   : > { %v13151_v13 = vpop.f32.mrb[211].mxu0 }
 0x7e3   : > { %v7380_v63 = vpop.permute.xlu0 %7379 }
 0x7e4   : > { %v7633_v17 = vsel %vm1148_vm4, %v7588_v10, %v7380_v63  ;;  %v7144_v0 = vpop.permute.xlu1 %7143 }
 0x7e5   : > { %7978 = vmatprep.mubr.bf16.mxu1 %v7633_v17  ;;  %v7432_v57 = vsel %vm170_vm0, %v13032_v51, %v7144_v0  ;;  %v13198_v17 = vld [vmem:[%s13442_s2 + $0x4] ss:$0 sm:$0xff] }
 0x7e6   : > { %7979 = vmatmul.mubr.bf16.gmra.mrb[236].mxu1 %v7505_v33 }
 0x7e7   : > { %v7286_v40 = vpop.permute.xlu0 %7285 }
 0x7e8   : > { %v7557_v55 = vsel %vm170_vm0, %v13046_v48, %v7286_v40  ;;  %v7192_v21 = vpop.permute.xlu1 %7191 }
 0x7e9   : > { %v7464_v5 = vsel %vm1115_vm3, %v7432_v57, %v7192_v21 }
 0x7eb   : > { %v7334_v43 = vpop.permute.xlu0 %7333 }
 0x7ec   : > { %v7590_v59 = vsel %vm1115_vm3, %v7557_v55, %v7334_v43  ;;  %v7240_v48 = vpop.permute.xlu1 %7239 }
 0x7ef   : > { %v7382_v35 = vpop.permute.xlu0 %7381 }
 0x7f0   : > { %v7636_v34 = vsel %vm1148_vm4, %v7590_v59, %v7382_v35 }
 0x7f1   : > { %7986 = vmatprep.mubr.bf16.mxu1 %v7636_v34 }
 0x7f2   : > { %7987 = vmatmul.mubr.bf16.gmra.mrb[240].mxu1 %v7508_v9 }
 0x7f3   : > { %v7288_v36 = vpop.permute.xlu0 %7287 }
 0x7f4   : > { %v7560_v28 = vsel %vm170_vm0, %v13067_v6, %v7288_v36  ;;  %v7511_v6 = vsel %vm1148_vm4, %v7464_v5, %v7240_v48 }
 0x7f5   : > { %v7592_v7 = vsel %vm1115_vm3, %v7560_v28, %v12882_v31 }
 0x7f7   : > { %v13171_v45 = vpop.f32.mrb[212].mxu0  ;;  %v7384_v56 = vpop.permute.xlu0 %7383 }
 0x7f8   : > { %v13177_v41 = vpop.f32.mrb[213].mxu0  ;;  %v7639_v24 = vsel %vm1148_vm4, %v7592_v7, %v7384_v56 }
 0x7f9   : > { %v13181_v18 = vpop.f32.mrb[214].mxu0  ;;  %7994 = vmatprep.mubr.bf16.mxu1 %v7639_v24 }
 0x7fa   : > { %v13184_v10 = vpop.f32.mrb[215].mxu0  ;;  %7995 = vmatmul.mubr.bf16.gmra.mrb[244].mxu1 %v7511_v6 }
 0x80f   : > { %v13186_v51 = vpop.f32.mrb[216].mxu0 }
 0x810   : > { %v13188_v63 = vpop.f32.mrb[217].mxu0 }
 0x811   : > { %v13190_v31 = vpop.f32.mrb[218].mxu0 }
 0x812   : > { %v13192_v52 = vpop.f32.mrb[219].mxu0 }
 0x81d   : > { %v9177_v54 = vpop.f32.mrb[184].mxu1 }
 0x81e   : > { %v9178_v33 = vpop.f32.mrb[185].mxu1 }
 0x81f   : > { %v9179_v40 = vadd.f32 %v9178_v33, %v9177_v54  ;;  %v9180_v0 = vpop.f32.mrb[186].mxu1 }
 0x820   : > { %v9181_v43 = vpop.f32.mrb[187].mxu1 }
 0x821   : > { %v7877_v55 = vadd.f32 %v9179_v40, %v13198_v17  ;;  %v9182_v39 = vadd.f32 %v9181_v43, %v9180_v0 }
 0x823   : > { %v8038_v59 = vadd.f32 %v13102_v1, %v7877_v55  ;;  %v7880_v35 = vadd.f32 %v9182_v39, %v13198_v17 }
 0x825   : > { %v8164_v60 = vadd.f32 %v8038_v59, %v12023_v62  ;;  %v8041_v21 = vadd.f32 %v13109_v23, %v7880_v35 }
 0x827   : > { %8196 = vst.msk [vmem:[%s13207_s28] sm:$0xff] %vm170_vm0, %v8164_v60  ;;  %v8165_v34 = vadd.f32 %v8041_v21, %v12029_v47  ;;  %v13212_v9 = vpop.f32.mrb[220].mxu0 }
 0x828   : > { %v13214_v36 = vpop.f32.mrb[221].mxu0 }
 0x829   : > { %8197 = vst.msk [vmem:[%s13207_s28 + $0x8] sm:$0xff] %vm170_vm0, %v8165_v34  ;;  %v9183_v1 = vpop.f32.mrb[188].mxu1  ;;  %v13218_v62 = vpop.f32.mrb[222].mxu0 }
 0x82a   : > { %v9184_v23 = vpop.f32.mrb[189].mxu1  ;;  %v13220_v28 = vpop.f32.mrb[223].mxu0 }
 0x82b   : > { %v9185_v48 = vadd.f32 %v9184_v23, %v9183_v1  ;;  %v9186_v57 = vpop.f32.mrb[190].mxu1 }
 0x82c   : > { %v9187_v56 = vpop.f32.mrb[191].mxu1 }
 0x82d   : > { %v7885_v7 = vadd.f32 %v9185_v48, %v13198_v17  ;;  %v9188_v47 = vadd.f32 %v9187_v56, %v9186_v57 }
 0x82f   : > { %v8046_v5 = vadd.f32 %v13098_v2, %v7885_v7  ;;  %v7888_v24 = vadd.f32 %v9188_v47, %v13198_v17 }
 0x831   : > { %v8166_v6 = vadd.f32 %v8046_v5, %v12049_v50  ;;  %v8049_v54 = vadd.f32 %v13106_v12, %v7888_v24 }
 0x833   : > { %8198 = vst.msk [vmem:[%s13207_s28 + $0x10] sm:$0xff] %vm170_vm0, %v8166_v6  ;;  %v8167_v33 = vadd.f32 %v8049_v54, %v12057_v44 }
 0x835   : > { %8199 = vst.msk [vmem:[%s13207_s28 + $0x18] sm:$0xff] %vm170_vm0, %v8167_v33  ;;  %v9189_v40 = vpop.f32.mrb[192].mxu1 }
 0x836   : > { %v9190_v0 = vpop.f32.mrb[193].mxu1 }
 0x837   : > { %v9191_v43 = vadd.f32 %v9190_v0, %v9189_v40  ;;  %v9192_v55 = vpop.f32.mrb[194].mxu1 }
 0x838   : > { %v9193_v39 = vpop.f32.mrb[195].mxu1 }
 0x839   : > { %v7893_v2 = vadd.f32 %v9191_v43, %v13198_v17  ;;  %v9194_v59 = vadd.f32 %v9193_v39, %v9192_v55 }
 0x83b   : > { %v8054_v50 = vadd.f32 %v13123_v15, %v7893_v2  ;;  %v7896_v35 = vadd.f32 %v9194_v59, %v13198_v17 }
 0x83d   : > { %v8168_v12 = vadd.f32 %v8054_v50, %v12079_v61  ;;  %v8057_v60 = vadd.f32 %v13129_v22, %v7896_v35 }
 0x83f   : > { %8200 = vst.msk [vmem:[%s13207_s28 + $0x20] sm:$0xff] %vm170_vm0, %v8168_v12  ;;  %v8169_v44 = vadd.f32 %v8057_v60, %v12085_v4  ;;  %v13240_v21 = vpop.f32.mrb[224].mxu0 }
 0x840   : > { %v13242_v1 = vpop.f32.mrb[225].mxu0 }
 0x841   : > { %v9195_v34 = vpop.f32.mrb[196].mxu1  ;;  %8201 = vst.msk [vmem:[%s13207_s28 + $0x28] sm:$0xff] %vm170_vm0, %v8169_v44  ;;  %v13246_v15 = vpop.f32.mrb[226].mxu0 }
 0x842   : > { %v9196_v23 = vpop.f32.mrb[197].mxu1  ;;  %v13248_v57 = vpop.f32.mrb[227].mxu0 }
 0x843   : > { %v9197_v48 = vadd.f32 %v9196_v23, %v9195_v34  ;;  %v9198_v61 = vpop.f32.mrb[198].mxu1 }
 0x844   : > { %v9199_v22 = vpop.f32.mrb[199].mxu1 }
 0x845   : > { %v7901_v56 = vadd.f32 %v9197_v48, %v13198_v17  ;;  %v9200_v4 = vadd.f32 %v9199_v22, %v9198_v61 }
 0x847   : > { %v8062_v7 = vadd.f32 %v13121_v11, %v7901_v56  ;;  %v7904_v47 = vadd.f32 %v9200_v4, %v13198_v17 }
 0x848   : > { %v13258_v54 = vpop.f32.mrb[228].mxu0 }
 0x849   : > { %v8170_v5 = vadd.f32 %v8062_v7, %v12100_v8  ;;  %v8065_v24 = vadd.f32 %v13125_v53, %v7904_v47  ;;  %v13260_v33 = vpop.f32.mrb[229].mxu0 }
 0x84a   : > { %v13264_v55 = vpop.f32.mrb[230].mxu0 }
 0x84b   : > { %8202 = vst.msk [vmem:[%s13207_s28 + $0x30] sm:$0xff] %vm170_vm0, %v8170_v5  ;;  %v8171_v6 = vadd.f32 %v8065_v24, %v12110_v26  ;;  %v13266_v53 = vpop.f32.mrb[231].mxu0 }
 0x84d   : > { %8203 = vst.msk [vmem:[%s13207_s28 + $0x38] sm:$0xff] %vm170_vm0, %v8171_v6  ;;  %v9201_v40 = vpop.f32.mrb[200].mxu1 }
 0x84e   : > { %v9202_v11 = vpop.f32.mrb[201].mxu1 }
 0x84f   : > { %v9203_v0 = vadd.f32 %v9202_v11, %v9201_v40  ;;  %v9204_v43 = vpop.f32.mrb[202].mxu1 }
 0x850   : > { %v9205_v8 = vpop.f32.mrb[203].mxu1 }
 0x851   : > { %v7909_v39 = vadd.f32 %v9203_v0, %v13198_v17  ;;  %v9206_v26 = vadd.f32 %v9205_v8, %v9204_v43 }
 0x853   : > { %v8070_v2 = vadd.f32 %v13147_v49, %v7909_v39  ;;  %v7912_v59 = vadd.f32 %v9206_v26, %v13198_v17 }
 0x855   : > { %v8172_v50 = vadd.f32 %v8070_v2, %v12129_v25  ;;  %v8073_v35 = vadd.f32 %v13151_v13, %v7912_v59 }
 0x857   : > { %8204 = vst.msk [vmem:[%s13207_s28 + $0x40] sm:$0xff] %vm170_vm0, %v8172_v50  ;;  %v8173_v12 = vadd.f32 %v8073_v35, %v12135_v37 }
 0x859   : > { %8205 = vst.msk [vmem:[%s13207_s28 + $0x48] sm:$0xff] %vm170_vm0, %v8173_v12  ;;  %v9207_v60 = vpop.f32.mrb[204].mxu1 }
 0x85a   : > { %v9208_v44 = vpop.f32.mrb[205].mxu1 }
 0x85b   : > { %v9209_v34 = vadd.f32 %v9208_v44, %v9207_v60  ;;  %v9210_v23 = vpop.f32.mrb[206].mxu1 }
 0x85c   : > { %v9211_v48 = vpop.f32.mrb[207].mxu1 }
 0x85d   : > { %v7917_v49 = vadd.f32 %v9209_v34, %v13198_v17  ;;  %v9212_v61 = vadd.f32 %v9211_v48, %v9210_v23 }
 0x85f   : > { %v8078_v25 = vadd.f32 %v13145_v20, %v7917_v49  ;;  %v7920_v22 = vadd.f32 %v9212_v61, %v13198_v17 }
 0x861   : > { %v8174_v13 = vadd.f32 %v8078_v25, %v12149_v27  ;;  %v8081_v56 = vadd.f32 %v13149_v32, %v7920_v22 }
 0x863   : > { %8206 = vst.msk [vmem:[%s13207_s28 + $0x50] sm:$0xff] %vm170_vm0, %v8174_v13  ;;  %v8175_v37 = vadd.f32 %v8081_v56, %v12156_v14 }
 0x865   : > { %8207 = vst.msk [vmem:[%s13207_s28 + $0x58] sm:$0xff] %vm170_vm0, %v8175_v37  ;;  %v9213_v4 = vpop.f32.mrb[208].mxu1 }
 0x866   : > { %v9214_v7 = vpop.f32.mrb[209].mxu1 }
 0x867   : > { %v9215_v47 = vadd.f32 %v9214_v7, %v9213_v4  ;;  %v9216_v5 = vpop.f32.mrb[210].mxu1 }
 0x868   : > { %v9217_v24 = vpop.f32.mrb[211].mxu1 }
 0x869   : > { %v7925_v20 = vadd.f32 %v9215_v47, %v13198_v17  ;;  %v9218_v6 = vadd.f32 %v9217_v24, %v9216_v5 }
 0x86b   : > { %v8086_v27 = vadd.f32 %v13177_v41, %v7925_v20  ;;  %v7928_v40 = vadd.f32 %v9218_v6, %v13198_v17 }
 0x86d   : > { %v8176_v32 = vadd.f32 %v8086_v27, %v12170_v19  ;;  %v8089_v11 = vadd.f32 %v13184_v10, %v7928_v40 }
 0x86f   : > { %8208 = vst.msk [vmem:[%s13207_s28 + $0x60] sm:$0xff] %vm170_vm0, %v8176_v32  ;;  %v8177_v14 = vadd.f32 %v8089_v11, %v12177_v16 }
 0x871   : > { %8209 = vst.msk [vmem:[%s13207_s28 + $0x68] sm:$0xff] %vm170_vm0, %v8177_v14  ;;  %v9219_v0 = vpop.f32.mrb[212].mxu1 }
 0x872   : > { %v9220_v43 = vpop.f32.mrb[213].mxu1 }
 0x873   : > { %v9221_v8 = vadd.f32 %v9220_v43, %v9219_v0  ;;  %v9222_v39 = vpop.f32.mrb[214].mxu1 }
 0x874   : > { %v9223_v26 = vpop.f32.mrb[215].mxu1 }
 0x875   : > { %v7933_v41 = vadd.f32 %v9221_v8, %v13198_v17  ;;  %v9224_v2 = vadd.f32 %v9223_v26, %v9222_v39 }
 0x877   : > { %v8094_v19 = vadd.f32 %v13171_v45, %v7933_v41  ;;  %v7936_v59 = vadd.f32 %v9224_v2, %v13198_v17 }
 0x879   : > { %v8178_v10 = vadd.f32 %v8094_v19, %v12191_v58  ;;  %v8097_v50 = vadd.f32 %v13181_v18, %v7936_v59  ;;  %v13578_v59 = vld [vmem:[#allocation40_spill] sm:$0xff] }
 0x87b   : > { %8210 = vst.msk [vmem:[%s13207_s28 + $0x70] sm:$0xff] %vm170_vm0, %v8178_v10  ;;  %v8179_v16 = vadd.f32 %v8097_v50, %v12198_v3 }
 0x87d   : > { %8211 = vst.msk [vmem:[%s13207_s28 + $0x78] sm:$0xff] %vm170_vm0, %v8179_v16  ;;  %v9225_v35 = vpop.f32.mrb[216].mxu1 }
 0x87e   : > { %v9226_v12 = vpop.f32.mrb[217].mxu1 }
 0x87f   : > { %v9227_v60 = vadd.f32 %v9226_v12, %v9225_v35  ;;  %v9228_v44 = vpop.f32.mrb[218].mxu1 }
 0x880   : > { %v9229_v34 = vpop.f32.mrb[219].mxu1 }
 0x881   : > { %v7941_v45 = vadd.f32 %v9227_v60, %v13198_v17  ;;  %v9230_v23 = vadd.f32 %v9229_v34, %v9228_v44 }
 0x883   : > { %v8102_v58 = vadd.f32 %v13188_v63, %v7941_v45  ;;  %v7944_v48 = vadd.f32 %v9230_v23, %v13198_v17 }
 0x885   : > { %v8180_v18 = vadd.f32 %v8102_v58, %v12212_v30  ;;  %v8105_v49 = vadd.f32 %v13192_v52, %v7944_v48  ;;  %v13580_v48 = vld [vmem:[#allocation32_spill] sm:$0xff] }
 0x887   : > { %8212 = vst.msk [vmem:[%s13207_s28 + $0x80] sm:$0xff] %vm170_vm0, %v8180_v18  ;;  %v8181_v3 = vadd.f32 %v8105_v49, %v12219_v42 }
 0x889   : > { %8213 = vst.msk [vmem:[%s13207_s28 + $0x88] sm:$0xff] %vm170_vm0, %v8181_v3  ;;  %v9231_v61 = vpop.f32.mrb[220].mxu1 }
 0x88a   : > { %v9232_v25 = vpop.f32.mrb[221].mxu1 }
 0x88b   : > { %v9233_v22 = vadd.f32 %v9232_v25, %v9231_v61  ;;  %v9234_v13 = vpop.f32.mrb[222].mxu1 }
 0x88c   : > { %v9235_v56 = vpop.f32.mrb[223].mxu1 }
 0x88d   : > { %v7949_v63 = vadd.f32 %v9233_v22, %v13198_v17  ;;  %v9236_v37 = vadd.f32 %v9235_v56, %v9234_v13 }
 0x88f   : > { %v8110_v30 = vadd.f32 %v13186_v51, %v7949_v63  ;;  %v7952_v4 = vadd.f32 %v9236_v37, %v13198_v17 }
 0x891   : > { %v8182_v52 = vadd.f32 %v8110_v30, %v12233_v46  ;;  %v8113_v7 = vadd.f32 %v13190_v31, %v7952_v4  ;;  %v13582_v4 = vld [vmem:[#allocation31_spill] sm:$0xff] }
 0x893   : > { %8214 = vst.msk [vmem:[%s13207_s28 + $0x90] sm:$0xff] %vm170_vm0, %v8182_v52  ;;  %v8183_v42 = vadd.f32 %v8113_v7, %v12242_v29  ;;  %v13576_v29 = vld [vmem:[#allocation39_spill] sm:$0xff] }
 0x895   : > { %8215 = vst.msk [vmem:[%s13207_s28 + $0x98] sm:$0xff] %vm170_vm0, %v8183_v42  ;;  %v9237_v47 = vpop.f32.mrb[224].mxu1 }
 0x896   : > { %v9238_v5 = vpop.f32.mrb[225].mxu1 }
 0x897   : > { %v9239_v24 = vadd.f32 %v9238_v5, %v9237_v47  ;;  %v9240_v20 = vpop.f32.mrb[226].mxu1 }
 0x898   : > { %v9241_v6 = vpop.f32.mrb[227].mxu1 }
 0x899   : > { %v7957_v51 = vadd.f32 %v9239_v24, %v13198_v17  ;;  %v9242_v27 = vadd.f32 %v9241_v6, %v9240_v20 }
 0x89b   : > { %v8118_v46 = vadd.f32 %v13214_v36, %v7957_v51  ;;  %v7960_v40 = vadd.f32 %v9242_v27, %v13198_v17  ;;  %v13583_v51 = vld [vmem:[#allocation33_spill] sm:$0xff] }
 0x89d   : > { %v8184_v31 = vadd.f32 %v8118_v46, %v12267_v38  ;;  %v8121_v32 = vadd.f32 %v13220_v28, %v7960_v40  ;;  %v13577_v28 = vld [vmem:[#allocation42_spill] sm:$0xff] }
 0x89f   : > { %8216 = vst.msk [vmem:[%s13207_s28 + $0xa0] sm:$0xff] %vm170_vm0, %v8184_v31  ;;  %v8185_v11 = vadd.f32 %v8121_v32, %v13576_v29  ;;  %v13584_v32 = vld [vmem:[#allocation36_spill] sm:$0xff] }
 0x8a1   : > { %8217 = vst.msk [vmem:[%s13207_s28 + $0xa8] sm:$0xff] %vm170_vm0, %v8185_v11  ;;  %v9243_v14 = vpop.f32.mrb[228].mxu1 }
 0x8a2   : > { %v9244_v0 = vpop.f32.mrb[229].mxu1 }
 0x8a3   : > { %v9245_v43 = vadd.f32 %v9244_v0, %v9243_v14  ;;  %v9246_v8 = vpop.f32.mrb[230].mxu1 }
 0x8a4   : > { %v9247_v39 = vpop.f32.mrb[231].mxu1 }
 0x8a5   : > { %v7965_v36 = vadd.f32 %v9245_v43, %v13198_v17  ;;  %v9248_v26 = vadd.f32 %v9247_v39, %v9246_v8  ;;  %v13585_v39 = vld [vmem:[#allocation38_spill] sm:$0xff] }
 0x8a7   : > { %v8126_v38 = vadd.f32 %v13212_v9, %v7965_v36  ;;  %v7968_v41 = vadd.f32 %v9248_v26, %v13198_v17 }
 0x8a9   : > { %v8186_v2 = vadd.f32 %v8126_v38, %v13577_v28  ;;  %v8129_v19 = vadd.f32 %v13218_v62, %v7968_v41  ;;  %v13579_v62 = vld [vmem:[#allocation41_spill] sm:$0xff] }
 0x8ab   : > { %8218 = vst.msk [vmem:[%s13207_s28 + $0xb0] sm:$0xff] %vm170_vm0, %v8186_v2  ;;  %v8187_v10 = vadd.f32 %v8129_v19, %v13578_v59 }
 0x8ad   : > { %8219 = vst.msk [vmem:[%s13207_s28 + $0xb8] sm:$0xff] %vm170_vm0, %v8187_v10  ;;  %v9249_v50 = vpop.f32.mrb[232].mxu1 }
 0x8ae   : > { %v9250_v16 = vpop.f32.mrb[233].mxu1 }
 0x8af   : > { %v9251_v35 = vadd.f32 %v9250_v16, %v9249_v50  ;;  %v9252_v12 = vpop.f32.mrb[234].mxu1 }
 0x8b0   : > { %v9253_v60 = vpop.f32.mrb[235].mxu1 }
 0x8b1   : > { %v7973_v9 = vadd.f32 %v9251_v35, %v13198_v17  ;;  %v9254_v44 = vadd.f32 %v9253_v60, %v9252_v12 }
 0x8b3   : > { %v8134_v34 = vadd.f32 %v13242_v1, %v7973_v9  ;;  %v7976_v45 = vadd.f32 %v9254_v44, %v13198_v17 }
 0x8b5   : > { %v8188_v23 = vadd.f32 %v8134_v34, %v13579_v62  ;;  %v8137_v58 = vadd.f32 %v13248_v57, %v7976_v45  ;;  %v13581_v57 = vld [vmem:[#allocation34_spill] sm:$0xff] }
 0x8b7   : > { %8220 = vst.msk [vmem:[%s13207_s28 + $0xc0] sm:$0xff] %vm170_vm0, %v8188_v23  ;;  %v8189_v18 = vadd.f32 %v8137_v58, %v13580_v48 }
 0x8b9   : > { %8221 = vst.msk [vmem:[%s13207_s28 + $0xc8] sm:$0xff] %vm170_vm0, %v8189_v18  ;;  %v9255_v49 = vpop.f32.mrb[236].mxu1 }
 0x8ba   : > { %v9256_v3 = vpop.f32.mrb[237].mxu1 }
 0x8bb   : > { %v9257_v61 = vadd.f32 %v9256_v3, %v9255_v49  ;;  %v9258_v25 = vpop.f32.mrb[238].mxu1 }
 0x8bc   : > { %v9259_v22 = vpop.f32.mrb[239].mxu1 }
 0x8bd   : > { %v7981_v1 = vadd.f32 %v9257_v61, %v13198_v17  ;;  %v9260_v13 = vadd.f32 %v9259_v22, %v9258_v25 }
 0x8bf   : > { %v8142_v56 = vadd.f32 %v13240_v21, %v7981_v1  ;;  %v7984_v63 = vadd.f32 %v9260_v13, %v13198_v17 }
 0x8c1   : > { %v8190_v37 = vadd.f32 %v8142_v56, %v13581_v57  ;;  %v8145_v30 = vadd.f32 %v13246_v15, %v7984_v63 }
 0x8c3   : > { %8222 = vst.msk [vmem:[%s13207_s28 + $0xd0] sm:$0xff] %vm170_vm0, %v8190_v37  ;;  %v8191_v52 = vadd.f32 %v8145_v30, %v13582_v4 }
 0x8c5   : > { %8223 = vst.msk [vmem:[%s13207_s28 + $0xd8] sm:$0xff] %vm170_vm0, %v8191_v52  ;;  %v9261_v7 = vpop.f32.mrb[240].mxu1 }
 0x8c6   : > { %v9262_v42 = vpop.f32.mrb[241].mxu1 }
 0x8c7   : > { %v9263_v47 = vadd.f32 %v9262_v42, %v9261_v7  ;;  %v9264_v5 = vpop.f32.mrb[242].mxu1 }
 0x8c8   : > { %v9265_v24 = vpop.f32.mrb[243].mxu1 }
 0x8c9   : > { %v9266_v21 = vadd.f32 %v9265_v24, %v9264_v5  ;;  %v7989_v20 = vadd.f32 %v9263_v47, %v13198_v17 }
 0x8cb   : > { %v8150_v6 = vadd.f32 %v13260_v33, %v7989_v20  ;;  %v7992_v15 = vadd.f32 %v9266_v21, %v13198_v17 }
 0x8cd   : > { %v8192_v27 = vadd.f32 %v8150_v6, %v13583_v51  ;;  %v8153_v46 = vadd.f32 %v13266_v53, %v7992_v15  ;;  %v9267_v40 = vpop.f32.mrb[244].mxu1 }
 0x8ce   : > { %v9268_v31 = vpop.f32.mrb[245].mxu1 }
 0x8cf   : > { %8224 = vst.msk [vmem:[%s13207_s28 + $0xe0] sm:$0xff] %vm170_vm0, %v8192_v27  ;;  %v8193_v29 = vadd.f32 %v8153_v46, %v13584_v32  ;;  %v9269_v11 = vadd.f32 %v9268_v31, %v9267_v40  ;;  %v9270_v14 = vpop.f32.mrb[246].mxu1 }
 0x8d0   : > { %v9271_v33 = vpop.f32.mrb[247].mxu1 }
 0x8d1   : > { %8225 = vst.msk [vmem:[%s13207_s28 + $0xe8] sm:$0xff] %vm170_vm0, %v8193_v29  ;;  %v7997_v0 = vadd.f32 %v9269_v11, %v13198_v17  ;;  %v9272_v43 = vadd.f32 %v9271_v33, %v9270_v14 }
 0x8d3   : > { %v8158_v53 = vadd.f32 %v13258_v54, %v7997_v0  ;;  %v8000_v8 = vadd.f32 %v9272_v43, %v13198_v17  ;;  %v13586_v54 = vld [vmem:[#allocation35_spill] sm:$0xff] }
 0x8d5   : > { %v8194_v36 = vadd.f32 %v8158_v53, %v13585_v39  ;;  %v8161_v26 = vadd.f32 %v13264_v55, %v8000_v8 }
 0x8d7   : > { %8226 = vst.msk [vmem:[%s13207_s28 + $0xf0] sm:$0xff] %vm170_vm0, %v8194_v36  ;;  %v8195_v17 = vadd.f32 %v8161_v26, %v13586_v54 }
 0x8d9   : > { %8227 = vst.msk [vmem:[%s13207_s28 + $0xf8] sm:$0xff] %vm170_vm0, %v8195_v17 }
 0x8da   : > { %9625 = shalt.err (!%p9622_p3)
}
 0x8db   : > { %s9626_s11 = scalar_lea.hbm %s13388_s6, 4096  ;;  %s9630_s26 = scalar_lea.hbm %s13443_s3, 8192 }
 0x8dc   : > { %p9627_p4 = scmp.ne.s32.totalorder %s13388_s6, %s9626_s11  ;;  %p9631_p9 = scmp.lt.u32.totalorder %s13388_s6, %s13443_s3 }
 0x8dd   : > { %p9632_p10 = scmp.lt.u32.totalorder %s9630_s26, %s9626_s11  ;;  %p9634_p12 = scmp.lt.u32.totalorder %s9626_s11, %s13388_s6 }
 0x8de   : > { %p9628_p7 = pnand %p9627_p4, %p9741_p5 }
 0x8df   : > { %p9633_p11 = por %p9632_p10, %p9631_p9 }
 0x8e0   : > { %p9629_p8 = pneg %p9628_p7 }
 0x8e1   : > { %p9635_p13 = por %p9634_p12, %p9633_p11 }
 0x8e3   : > { %p9636_p0 = pnand %p9635_p13, %p9629_p8 }
 0x8e5   : > { %9639 = shalt.err (!%p9636_p0)
}
 0x8e6   : > { %s9681_s20 = smov 128   ;;  %s9682_s27 = smov 8  }
 0x8e7   : > { %9475 = dma.vmem_to_hbm [thread:$0]  (%p9741_p5), %s13390_s30, 4096, %s13388_s6, %s13399_s16, %s9681_s20, %s9681_s20, %s9682_s27  }
 0x8e8 PF: > { %p9481_p1 = scmp.ge.s32.totalorder %s9674_s15, 2  ;;  %s8257_s28 = sand.u32 1, %s9662_s12  }
 0x8e9   : > { %s8258_s29 = scalar_lea.sflag [#allocation5], %s8257_s28 }
 0x8ea   : > { %p9478_p2 = pnand %p9481_p1, %p9745_p6 }
 0x8ec   : > { %9657 = dma.done.wait (!%p9478_p2), %s8258_s29, 4096  }
 0x8ed   : > { %9659 = vsyncadd (!%p9478_p2), %s8258_s29, 4294963200  ;;  %p13_p3 = scmp.ge.s32.totalorder %s9728_s18, 4   ;;  %s13587_s12 = smov %s9666_s13 }
 0x8ee   : > { %s13588_s13 = smov %s9670_s14  ;;  %s13589_s14 = smov %s9739_s21 }
 0x8ef   : > { %s13590_s15 = smov %s9728_s18  ;;  %15 = sbr.rel (!%p13_p3) target bundleno = 3 (0x3), region = 79 }
 0x8f6   :  { %8263 = vsyncpa [#allocation5], 1 }
 0x8f7   :  { %8265 = vsyncpa [#allocation5 + $0x1], 1 }

</bundles_post_ra>
